<compile_context>
chip_gen: v5e
topology: v5e:2x2
jax: 0.10.0
libtpu: 0.0.40
codegen_flags: <defaults>
</compile_context>

<pallas_src>
import math
import functools

import numpy as np
import jax
import jax.numpy as jnp
from jax.experimental import pallas as pl
from jax.experimental.pallas import tpu as pltpu

_VMEM_LIMIT = 48 * 1024 * 1024   # fits v7x's 64 MiB physical VMEM with headroom


def _tile(dim, pref, align):
    """Largest block size <= pref that is either the full dim or an aligned divisor."""
    if dim <= pref:
        return dim
    t = (pref // align) * align
    while t >= align:
        if dim % t == 0:
            return t
        t -= align
    return dim


# ----------------------------------------------------------------------------
# In-kernel helpers (traced inside Pallas kernel bodies)
# ----------------------------------------------------------------------------

def _ln_f32(x, g, b):
    mu = jnp.mean(x, axis=-1, keepdims=True)
    var = jnp.mean(jnp.square(x - mu), axis=-1, keepdims=True)
    return (x - mu) * jax.lax.rsqrt(var + 1e-5) * g + b


def _bf16_dot(x_f32, w_bf16, b_f32):
    return jnp.dot(x_f32.astype(jnp.bfloat16), w_bf16,
                   preferred_element_type=jnp.float32) + b_f32


def _attn_heads(q, k, v, key_mask_row, n_heads, dim_head):
    """q:(Lq, nh*dh) f32, k/v:(Lk, nh*dh) f32, key_mask_row:(1, Lk) f32."""
    scale = 1.0 / math.sqrt(dim_head)
    bias = jnp.where(key_mask_row > 0.5, 0.0, -1e9)       # built in-kernel, f32
    outs = []
    for h in range(n_heads):                              # static, unrolled
        s0, s1 = h * dim_head, (h + 1) * dim_head
        qh = q[:, s0:s1].astype(jnp.bfloat16)
        kh = k[:, s0:s1].astype(jnp.bfloat16)
        vh = v[:, s0:s1].astype(jnp.bfloat16)
        s = jnp.einsum("qd,kd->qk", qh, kh,
                       preferred_element_type=jnp.float32) * scale + bias
        s = s - jnp.max(s, axis=-1, keepdims=True)
        p = jnp.exp(s)
        p = p * pl.reciprocal(jnp.sum(p, axis=-1, keepdims=True), approx=True)
        outs.append(jnp.dot(p.astype(jnp.bfloat16), vh,
                            preferred_element_type=jnp.float32))
    return jnp.concatenate(outs, axis=-1)                  # (Lq, nh*dh) f32


# ----------------------------------------------------------------------------
# Pallas kernels
# ----------------------------------------------------------------------------

def _linear_kernel(x_ref, w_ref, b_ref, o_ref, acc_ref):
    k = pl.program_id(2)

    @pl.when(k == 0)
    def _():
        acc_ref[...] = jnp.zeros_like(acc_ref)

    acc_ref[...] += jnp.dot(x_ref[...].astype(jnp.bfloat16), w_ref[...],
                            preferred_element_type=jnp.float32)

    @pl.when(k == pl.num_programs(2) - 1)
    def _():
        o_ref[...] = (acc_ref[...] + b_ref[...]).astype(o_ref.dtype)


def linear(x, w, b):
    """y = x @ w + b.  w is bf16, accumulation is f32; tiled with a K grid axis."""
    *lead, K = x.shape
    N = w.shape[1]
    M = int(np.prod(lead)) if lead else 1
    x2 = x.reshape(M, K)
    tm = _tile(M, 256, 8)
    tn = _tile(N, 512, 128)
    tk = _tile(K, 1024, 128)
    out = pl.pallas_call(
        _linear_kernel,
        out_shape=jax.ShapeDtypeStruct((M, N), x.dtype),
        grid=(M // tm, N // tn, K // tk),
        in_specs=[
            pl.BlockSpec((tm, tk), lambda i, j, k: (i, k)),
            pl.BlockSpec((tk, tn), lambda i, j, k: (k, j)),
            pl.BlockSpec((1, tn), lambda i, j, k: (0, j)),
        ],
        out_specs=pl.BlockSpec((tm, tn), lambda i, j, k: (i, j)),
        scratch_shapes=[pltpu.VMEM((tm, tn), jnp.float32)],
        compiler_params=pltpu.CompilerParams(
            dimension_semantics=("parallel", "parallel", "arbitrary"),
            vmem_limit_bytes=_VMEM_LIMIT),
    )(x2, w, b.reshape(1, N))
    return out.reshape(*lead, N)


def _conv_pre_kernel(c_ref, pitch_ref, wc_ref, bc_ref, wp_ref, bp_ref, m_ref,
                     o_ref, *, ksize):
    """Fused 'same' conv1d (k-tap accumulate) + pitch projection + time mask."""
    T, H = o_ref.shape[1], o_ref.shape[2]
    xc = c_ref[0].astype(jnp.bfloat16)                      # (T + 2*pad, Cin)
    acc = jnp.zeros((T, H), jnp.float32)
    for t in range(ksize):                                  # static taps, unrolled
        acc = acc + jnp.dot(xc[t:t + T, :], wc_ref[t],
                            preferred_element_type=jnp.float32)
    acc = acc + bc_ref[0]
    acc = acc + jnp.dot(pitch_ref[0].astype(jnp.bfloat16), wp_ref[...],
                        preferred_element_type=jnp.float32) + bp_ref[...]
    o_ref[0] = (acc * m_ref[0]).astype(o_ref.dtype)


def conv_pre(p, c_t, pitch, m, ksize):
    """c_t: (B, T, Cin); pitch: (B, T, 2); m: (B, T) -> (B, T, H)."""
    B, T, Cin = c_t.shape
    H = p["w_conv"].shape[-1]
    pad = ksize // 2
    cpad = jnp.pad(c_t, ((0, 0), (pad, pad), (0, 0)))
    Tp = T + 2 * pad
    kern = functools.partial(_conv_pre_kernel, ksize=ksize)
    return pl.pallas_call(
        kern,
        out_shape=jax.ShapeDtypeStruct((B, T, H), jnp.float32),
        grid=(B,),
        in_specs=[
            pl.BlockSpec((1, Tp, Cin), lambda b: (b, 0, 0)),
            pl.BlockSpec((1, T, 2), lambda b: (b, 0, 0)),
            pl.BlockSpec((ksize, Cin, H), lambda b: (0, 0, 0)),
            pl.BlockSpec((1, 1, H), lambda b: (0, 0, 0)),
            pl.BlockSpec((2, H), lambda b: (0, 0)),
            pl.BlockSpec((1, H), lambda b: (0, 0)),
            pl.BlockSpec((1, T, 1), lambda b: (b, 0, 0)),
        ],
        out_specs=pl.BlockSpec((1, T, H), lambda b: (b, 0, 0)),
        compiler_params=pltpu.CompilerParams(
            dimension_semantics=("parallel",),
            vmem_limit_bytes=_VMEM_LIMIT),
    )(cpad, pitch, p["w_conv"], p["b_conv"], p["w_pitch"], p["b_pitch"],
      m[:, :, None])


def _block_stack_kernel(x_in_ref, cond_ref, qm_ref, km_ref, cm_ref,
                        ln1_g, ln1_b, w_qkv, b_qkv, w_os, b_os,
                        lnc_g, lnc_b, w_qc, b_qc, w_kvc, b_kvc, w_oc, b_oc,
                        ln2_g, ln2_b, w1, b1, w2, b2,
                        o_ref, x_sc, *, n_heads, dim_head):
    """Full transformer block (self-attn + cross-attn + FFN), layers on grid axis 1."""
    l = pl.program_id(1)

    @pl.when(l == 0)
    def _():
        x_sc[...] = x_in_ref[0]

    inner = n_heads * dim_head
    x = x_sc[...]
    cond = cond_ref[0]
    qm = qm_ref[0]          # (T, 1)  query/time mask
    km = km_ref[0]          # (1, T)  self-attn key mask
    cm = cm_ref[0]          # (1, Lc) cross-attn key mask

    # --- self attention (fused QKV projection) ---
    h = _ln_f32(x, ln1_g[0], ln1_b[0])
    qkv = _bf16_dot(h, w_qkv[0], b_qkv[0])
    att = _attn_heads(qkv[:, :inner], qkv[:, inner:2 * inner], qkv[:, 2 * inner:],
                      km, n_heads, dim_head)
    x = x + _bf16_dot(att, w_os[0], b_os[0]) * qm

    # --- cross attention (fused KV projection) ---
    h = _ln_f32(x, lnc_g[0], lnc_b[0])
    q = _bf16_dot(h, w_qc[0], b_qc[0])
    kv = _bf16_dot(cond, w_kvc[0], b_kvc[0])
    att = _attn_heads(q, kv[:, :inner], kv[:, inner:], cm, n_heads, dim_head)
    x = x + _bf16_dot(att, w_oc[0], b_oc[0]) * qm

    # --- feed-forward ---
    h = _ln_f32(x, ln2_g[0], ln2_b[0])
    h = jax.nn.gelu(_bf16_dot(h, w1[0], b1[0]))
    x = x + _bf16_dot(h, w2[0], b2[0]) * qm

    x = x * qm
    x_sc[...] = x

    @pl.when(l == pl.num_programs(1) - 1)
    def _():
        o_ref[0] = x.astype(o_ref.dtype)


_BLOCK_LAYER_KEYS = ["ln1_g", "ln1_b", "w_qkv", "b_qkv", "w_os", "b_os",
                     "lnc_g", "lnc_b", "w_qc", "b_qc", "w_kvc", "b_kvc",
                     "w_oc", "b_oc", "ln2_g", "ln2_b", "w1", "b1", "w2", "b2"]


def transformer_stack(p, x, x_mask, cond, cond_mask, n_heads, dim_head):
    """x: (B, T, H); x_mask: (B, T); cond: (B, Lc, H); cond_mask: (B, Lc)."""
    B, T, H = x.shape
    L = p["ln1_g"].shape[0]
    qm = x_mask[:, :, None]
    km = x_mask[:, None, :]
    cm = cond_mask[:, None, :]

    def pb(arr):   # per-batch block, resident across the layer axis
        return pl.BlockSpec((1,) + tuple(arr.shape[1:]), lambda b, l: (b, 0, 0))

    def pL(arr):   # per-layer block (stacked weights)
        return pl.BlockSpec((1,) + tuple(arr.shape[1:]), lambda b, l: (l, 0, 0))

    layer_args = [p[k] for k in _BLOCK_LAYER_KEYS]
    kern = functools.partial(_block_stack_kernel, n_heads=n_heads, dim_head=dim_head)
    return pl.pallas_call(
        kern,
        out_shape=jax.ShapeDtypeStruct((B, T, H), jnp.float32),
        grid=(B, L),
        in_specs=[pb(x), pb(cond), pb(qm), pb(km), pb(cm)]
                 + [pL(a) for a in layer_args],
        out_specs=pl.BlockSpec((1, T, H), lambda b, l: (b, 0, 0)),
        scratch_shapes=[pltpu.VMEM((T, H), jnp.float32)],
        compiler_params=pltpu.CompilerParams(
            dimension_semantics=("parallel", "arbitrary"),
            vmem_limit_bytes=_VMEM_LIMIT),
    )(x, cond, qm, km, cm, *layer_args)


def _perceiver_stack_kernel(lat_ref, ctx_ref, cm_ref,
                            ln1_g, ln1_b, w_q, b_q, w_kv, b_kv, w_o, b_o,
                            ln2_g, ln2_b, w1, b1, w2, b2,
                            lno_g, lno_b,
                            o_ref, x_sc, *, n_heads, dim_head):
    """Perceiver block (cross-attn + FFN), final LayerNorm fused at the last layer."""
    l = pl.program_id(1)

    @pl.when(l == 0)
    def _():
        x_sc[...] = lat_ref[0]

    inner = n_heads * dim_head
    x = x_sc[...]
    ctx = ctx_ref[0]
    cm = cm_ref[0]

    h = _ln_f32(x, ln1_g[0], ln1_b[0])
    q = _bf16_dot(h, w_q[0], b_q[0])
    kv = _bf16_dot(ctx, w_kv[0], b_kv[0])
    att = _attn_heads(q, kv[:, :inner], kv[:, inner:], cm, n_heads, dim_head)
    x = x + _bf16_dot(att, w_o[0], b_o[0])

    h = _ln_f32(x, ln2_g[0], ln2_b[0])
    h = jax.nn.gelu(_bf16_dot(h, w1[0], b1[0]))
    x = x + _bf16_dot(h, w2[0], b2[0])

    x_sc[...] = x

    @pl.when(l == pl.num_programs(1) - 1)
    def _():
        o_ref[0] = _ln_f32(x, lno_g[0], lno_b[0]).astype(o_ref.dtype)


_PERC_LAYER_KEYS = ["ln1_g", "ln1_b", "w_q", "b_q", "w_kv", "b_kv", "w_o", "b_o",
                    "ln2_g", "ln2_b", "w1", "b1", "w2", "b2"]


def perceiver_stack(p, lat, ctx, ctx_mask, n_heads, dim_head):
    """lat: (B, Ln, H); ctx: (B, T, H); ctx_mask: (B, T)."""
    B, Ln, H = lat.shape
    L = p["ln1_g"].shape[0]
    cm = ctx_mask[:, None, :]

    def pb(arr):
        return pl.BlockSpec((1,) + tuple(arr.shape[1:]), lambda b, l: (b, 0, 0))

    def pL(arr):
        return pl.BlockSpec((1,) + tuple(arr.shape[1:]), lambda b, l: (l, 0, 0))

    def sh(arr):
        return pl.BlockSpec(tuple(arr.shape), lambda b, l: (0, 0, 0))

    layer_args = [p[k] for k in _PERC_LAYER_KEYS]
    kern = functools.partial(_perceiver_stack_kernel,
                             n_heads=n_heads, dim_head=dim_head)
    return pl.pallas_call(
        kern,
        out_shape=jax.ShapeDtypeStruct((B, Ln, H), jnp.float32),
        grid=(B, L),
        in_specs=[pb(lat), pb(ctx), pb(cm)]
                 + [pL(a) for a in layer_args]
                 + [sh(p["lno_g"]), sh(p["lno_b"])],
        out_specs=pl.BlockSpec((1, Ln, H), lambda b, l: (b, 0, 0)),
        scratch_shapes=[pltpu.VMEM((Ln, H), jnp.float32)],
        compiler_params=pltpu.CompilerParams(
            dimension_semantics=("parallel", "arbitrary"),
            vmem_limit_bytes=_VMEM_LIMIT),
    )(lat, ctx, cm, *layer_args, p["lno_g"], p["lno_b"])


def _masked_sse_kernel(p_ref, t_ref, m_ref, o_ref):
    @pl.when(pl.program_id(0) == 0)
    def _():
        o_ref[0] = 0.0
    d = (p_ref[...] - t_ref[...]) * m_ref[...]
    o_ref[0] += jnp.sum(d * d)


def masked_sse(pred2d, target2d, mask2d):
    M, C = pred2d.shape
    tm = _tile(M, 1024, 8)
    out = pl.pallas_call(
        _masked_sse_kernel,
        out_shape=jax.ShapeDtypeStruct((1,), jnp.float32),
        grid=(M // tm,),
        in_specs=[pl.BlockSpec((tm, C), lambda i: (i, 0))] * 3,
        out_specs=pl.BlockSpec((1,), lambda i: (0,),
                               memory_space=pltpu.MemorySpace.SMEM),
        compiler_params=pltpu.CompilerParams(
            dimension_semantics=("arbitrary",),
            vmem_limit_bytes=_VMEM_LIMIT),
    )(pred2d, target2d, mask2d)
    return out[0]


# ----------------------------------------------------------------------------
# Model glue (channels-last everywhere; hot paths go through the fused kernels)
# ----------------------------------------------------------------------------

def sequence_mask(lengths, max_len):
    return (jnp.arange(max_len)[None, :] < lengths[:, None]).astype(jnp.float32)


def perceiver_resampler(p, spec_t, spec_mask, cfg):
    """spec_t: (B, T, spec_ch); spec_mask: (B, T) -> cond (B, Ln, H), mask (B, Ln)."""
    B = spec_t.shape[0]
    H = cfg["hidden_channels"]
    ctx = linear(spec_t, p["proj"]["w"], p["proj"]["b"])            # (B, T, H)
    Ln = p["latents"].shape[0]
    lat = jnp.broadcast_to(p["latents"][None], (B, Ln, H))
    lat = perceiver_stack(p["stack"], lat, ctx, spec_mask,
                          cfg["n_heads"], cfg["dim_head"])
    cond_mask = jnp.ones((B, Ln), jnp.float32)
    return lat, cond_mask


def content_encoder(p, c_t, m, cond, cond_mask, f0, uv, cfg):
    """c_t: (B, T, ssl); m: (B, T)."""
    lf0 = 2595.0 * jnp.log10(1.0 + f0 / 700.0) / 500.0               # (B, T)
    pitch = jnp.stack([lf0, uv.astype(lf0.dtype)], axis=-1)          # (B, T, 2)
    x = conv_pre(p["pre"], c_t, pitch, m, cfg["kernel_size"])        # (B, T, H)
    x = transformer_stack(p["stack"], x, m, cond, cond_mask,
                          cfg["n_heads"], cfg["dim_head"])
    f0_pred = jnp.transpose(linear(x, p["f0_proj"]["w"], p["f0_proj"]["b"]),
                            (0, 2, 1)) * m[:, None, :]               # (B, 1, T)
    pooled = (jnp.sum(x * m[:, :, None], axis=1)
              / jnp.maximum(jnp.sum(m, axis=1, keepdims=True), 1.0))
    x_spk = linear(pooled, p["spk_cls"]["w"], p["spk_cls"]["b"])
    mu_y = linear(x, p["mu_proj"]["w"], p["mu_proj"]["b"]) * m[:, :, None]  # (B,T,H)
    lf0_out = lf0[:, None, :] * m[:, None, :]
    return x_spk, mu_y, f0_pred, lf0_out


def timestep_embedding(t, dim):
    half = dim // 2
    freqs = jnp.exp(-math.log(10000.0) * jnp.arange(half, dtype=jnp.float32) / half)
    args = t[:, None].astype(jnp.float32) * freqs[None, :] * 1000.0
    return jnp.concatenate([jnp.cos(args), jnp.sin(args)], axis=-1)


def estimator(p, y, m, mu, t, cond, cond_mask, cfg):
    """y: (B, T, spec); mu: (B, T, H); m: (B, T) -> (B, T, spec)."""
    h = linear(jnp.concatenate([y, mu], axis=-1), p["in_proj"]["w"], p["in_proj"]["b"])
    temb = timestep_embedding(t, cfg["hidden_channels"])
    temb = linear(jax.nn.silu(linear(temb, p["t1"]["w"], p["t1"]["b"])),
                  p["t2"]["w"], p["t2"]["b"])
    h = (h + temb[:, None, :]) * m[:, :, None]
    h = transformer_stack(p["stack"], h, m, cond, cond_mask,
                          cfg["n_heads"], cfg["dim_head"])
    out = linear(h, p["out_proj"]["w"], p["out_proj"]["b"]) * m[:, :, None]
    return out


def cfm_forward(p, spec_t, m, mu, cond, cond_mask, rng, cfg):
    """OT-CFM training loss: y_t = (1-(1-s)t) z + t x1, target u = x1 - (1-s) z."""
    B, T, C = spec_t.shape
    k_t, k_z = jax.random.split(rng)
    t = jax.random.uniform(k_t, (B,), spec_t.dtype)
    z = jax.random.normal(k_z, spec_t.shape, spec_t.dtype)
    sigma_min = 1e-4
    t3 = t[:, None, None]
    mm = m[:, :, None]
    y = ((1.0 - (1.0 - sigma_min) * t3) * z + t3 * spec_t) * mm
    u = (spec_t - (1.0 - sigma_min) * z) * mm
    pred = estimator(p["estimator"], y, m, mu, t, cond, cond_mask, cfg)
    mask3 = jnp.broadcast_to(mm, (B, T, C))
    sse = masked_sse(pred.reshape(B * T, C), u.reshape(B * T, C),
                     mask3.reshape(B * T, C))
    diff_loss = sse / (jnp.sum(m) * C)
    return diff_loss, pred


def synthesizer_forward(params, c, f0, uv, spec, c_lengths, rng, cfg):
    B, _, T = c.shape
    m = sequence_mask(c_lengths, T).astype(c.dtype)                  # (B, T)
    c_t = jnp.transpose(c, (0, 2, 1))                                # (B, T, ssl)
    spec_t = jnp.transpose(spec, (0, 2, 1))                          # (B, T, spec)
    cond, cond_mask = perceiver_resampler(params["speaker_encoder"], spec_t, m, cfg)
    _, mu_y, f0_pred, lf0 = content_encoder(
        params["content_encoder"], c_t, m, cond, cond_mask, f0, uv, cfg)
    diff_loss, _ = cfm_forward(
        params["decoder"], spec_t, m, mu_y, cond, cond_mask, rng, cfg)
    return diff_loss, f0_pred, lf0


# ------------------------------- parameter init --------------------------------

def init_params(key, cfg):
    cnt = [0]

    def nk():
        cnt[0] += 1
        return jax.random.fold_in(key, cnt[0])

    H = cfg["hidden_channels"]
    F = cfg["filter_channels"]
    nh, dh = cfg["n_heads"], cfg["dim_head"]
    inner = nh * dh

    def w(shape):
        return (0.02 * jax.random.normal(nk(), shape, jnp.float32)).astype(jnp.bfloat16)

    def lin(k_in, k_out):
        return {"w": w((k_in, k_out)), "b": jnp.zeros((k_out,), jnp.float32)}

    def block_stack(L, ff):
        return {
            "ln1_g": jnp.ones((L, 1, H), jnp.float32),
            "ln1_b": jnp.zeros((L, 1, H), jnp.float32),
            "w_qkv": w((L, H, 3 * inner)),
            "b_qkv": jnp.zeros((L, 1, 3 * inner), jnp.float32),
            "w_os": w((L, inner, H)),
            "b_os": jnp.zeros((L, 1, H), jnp.float32),
            "lnc_g": jnp.ones((L, 1, H), jnp.float32),
            "lnc_b": jnp.zeros((L, 1, H), jnp.float32),
            "w_qc": w((L, H, inner)),
            "b_qc": jnp.zeros((L, 1, inner), jnp.float32),
            "w_kvc": w((L, H, 2 * inner)),
            "b_kvc": jnp.zeros((L, 1, 2 * inner), jnp.float32),
            "w_oc": w((L, inner, H)),
            "b_oc": jnp.zeros((L, 1, H), jnp.float32),
            "ln2_g": jnp.ones((L, 1, H), jnp.float32),
            "ln2_b": jnp.zeros((L, 1, H), jnp.float32),
            "w1": w((L, H, ff)),
            "b1": jnp.zeros((L, 1, ff), jnp.float32),
            "w2": w((L, ff, H)),
            "b2": jnp.zeros((L, 1, H), jnp.float32),
        }

    def perceiver_blocks(L, ff):
        return {
            "ln1_g": jnp.ones((L, 1, H), jnp.float32),
            "ln1_b": jnp.zeros((L, 1, H), jnp.float32),
            "w_q": w((L, H, inner)),
            "b_q": jnp.zeros((L, 1, inner), jnp.float32),
            "w_kv": w((L, H, 2 * inner)),
            "b_kv": jnp.zeros((L, 1, 2 * inner), jnp.float32),
            "w_o": w((L, inner, H)),
            "b_o": jnp.zeros((L, 1, H), jnp.float32),
            "ln2_g": jnp.ones((L, 1, H), jnp.float32),
            "ln2_b": jnp.zeros((L, 1, H), jnp.float32),
            "w1": w((L, H, ff)),
            "b1": jnp.zeros((L, 1, ff), jnp.float32),
            "w2": w((L, ff, H)),
            "b2": jnp.zeros((L, 1, H), jnp.float32),
            "lno_g": jnp.ones((1, 1, H), jnp.float32),
            "lno_b": jnp.zeros((1, 1, H), jnp.float32),
        }

    speaker_encoder = {
        "proj": lin(cfg["spec_channels"], H),
        "latents": 0.02 * jax.random.normal(nk(), (cfg["num_latents"], H), jnp.float32),
        "stack": perceiver_blocks(2, 4 * H),
    }
    content_enc = {
        "pre": {
            "w_conv": w((cfg["kernel_size"], cfg["ssl_dim"], H)),
            "b_conv": jnp.zeros((1, 1, H), jnp.float32),
            "w_pitch": w((2, H)),
            "b_pitch": jnp.zeros((1, H), jnp.float32),
        },
        "stack": block_stack(cfg["n_layers"], F),
        "f0_proj": lin(H, 1),
        "spk_cls": lin(H, H),
        "mu_proj": lin(H, H),
    }
    decoder = {"estimator": {
        "in_proj": lin(cfg["spec_channels"] + H, H),
        "t1": lin(H, H),
        "t2": lin(H, H),
        "stack": block_stack(cfg["est_n_layers"], F),
        "out_proj": lin(H, cfg["spec_channels"]),
    }}
    return {"speaker_encoder": speaker_encoder,
            "content_encoder": content_enc,
            "decoder": decoder}


# ------------------------------------ main --------------------------------------

if __name__ == "__main__":
    cfg = dict(
        spec_channels=16,
        hidden_channels=32,
        filter_channels=64,
        n_heads=2,
        dim_head=16,
        n_layers=2,
        kernel_size=3,
        p_dropout=0.0,
        ssl_dim=24,
        num_latents=32,
        est_n_layers=8,
    )

    key = jax.random.PRNGKey(0)
    kp, kc, kf, ku, ks, kn = jax.random.split(key, 6)

    params = init_params(kp, cfg)

    B, T = 2, 16
    c = jax.random.normal(kc, (B, cfg["ssl_dim"], T), jnp.float32)
    f0 = jax.random.uniform(kf, (B, T), jnp.float32, 100.0, 400.0)
    uv = (jax.random.uniform(ku, (B, T)) > 0.3).astype(jnp.float32)
    spec = jax.random.normal(ks, (B, cfg["spec_channels"], T), jnp.float32)
    c_lengths = jnp.array([T, T - 4], jnp.float32)

    fwd = jax.jit(functools.partial(synthesizer_forward, cfg=cfg))
    diff_loss, f0_pred, lf0 = fwd(params, c, f0, uv, spec, c_lengths, kn)
    jax.block_until_ready((diff_loss, f0_pred, lf0))

    assert diff_loss.shape == ()
    assert f0_pred.shape == (B, 1, T)
    assert lf0.shape == (B, 1, T)
    assert jnp.isfinite(diff_loss)
    print("KERNEL_OK")
</pallas_src>

<mosaic_0001>
module attributes {stable_mosaic.version = 11 : i64} {
  func.func @_linear_kernel(%arg0: i32, %arg1: i32, %arg2: i32, %arg3: memref<32x16xf32, #tpu.memory_space<vmem>>, %arg4: memref<16x32xbf16, #tpu.memory_space<vmem>>, %arg5: memref<1x32xf32, #tpu.memory_space<vmem>>, %arg6: memref<32x32xf32, #tpu.memory_space<vmem>>, %arg7: memref<32x32xf32, #tpu.memory_space<vmem>>) attributes {dimension_semantics = [#tpu.dimension_semantics<parallel>, #tpu.dimension_semantics<parallel>, #tpu.dimension_semantics<arbitrary>], iteration_bounds = array<i64: 1, 1, 1>, scalar_prefetch = 0 : i64, scratch_operands = 1 : i64, tpu.core_type = #tpu.core_type<tc>, window_params = [{transform_indices = @transform_0, window_bounds = array<i64: 32, 16>}, {transform_indices = @transform_1, window_bounds = array<i64: 16, 32>}, {transform_indices = @transform_2, window_bounds = array<i64: 1, 32>}, {transform_indices = @transform_3, window_bounds = array<i64: 32, 32>}]} {
    %c0_i32 = arith.constant 0 : i32
    %0 = arith.cmpi eq, %arg2, %c0_i32 : i32
    %1 = arith.extui %0 : i1 to i32
    %c0_i32_0 = arith.constant 0 : i32
    %2 = arith.cmpi ne, %1, %c0_i32_0 : i32
    scf.if %2 {
      %cst_10 = arith.constant 0.000000e+00 : f32
      %13 = vector.broadcast %cst_10 : f32 to vector<32x32xf32>
      %c0_11 = arith.constant 0 : index
      %c0_12 = arith.constant 0 : index
      %14 = vector.load %arg7[%c0_11, %c0_12] : memref<32x32xf32, #tpu.memory_space<vmem>>, vector<32x32xf32>
      tpu.vector_store %arg7[%c0_11, %c0_12], %13 {strides = array<i32>} : memref<32x32xf32, #tpu.memory_space<vmem>>, vector<32x32xf32>,
    } else {
    }
    %c0 = arith.constant 0 : index
    %c0_1 = arith.constant 0 : index
    %3 = vector.load %arg7[%c0, %c0_1] : memref<32x32xf32, #tpu.memory_space<vmem>>, vector<32x32xf32>
    %c0_2 = arith.constant 0 : index
    %c0_3 = arith.constant 0 : index
    %4 = vector.load %arg3[%c0_2, %c0_3] : memref<32x16xf32, #tpu.memory_space<vmem>>, vector<32x16xf32>
    %5 = arith.truncf %4 : vector<32x16xf32> to vector<32x16xbf16>
    %c0_4 = arith.constant 0 : index
    %c0_5 = arith.constant 0 : index
    %6 = vector.load %arg4[%c0_4, %c0_5] : memref<16x32xbf16, #tpu.memory_space<vmem>>, vector<16x32xbf16>
    %cst = arith.constant dense<0.000000e+00> : vector<32x32xf32>
    %7 = tpu.matmul %5, %6, %cst {dimension_numbers = #tpu.dot_dimension_numbers<[1], [0], [0], [1], [0, 0, 1, 1], [], []>} : vector<32x16xbf16>, vector<16x32xbf16>, vector<32x32xf32> -> vector<32x32xf32>
    %8 = arith.addf %3, %7 : vector<32x32xf32>
    %c0_6 = arith.constant 0 : index
    %c0_7 = arith.constant 0 : index
    %9 = vector.load %arg7[%c0_6, %c0_7] : memref<32x32xf32, #tpu.memory_space<vmem>>, vector<32x32xf32>
    tpu.vector_store %arg7[%c0_6, %c0_7], %8 {strides = array<i32>} : memref<32x32xf32, #tpu.memory_space<vmem>>, vector<32x32xf32>,
    %c0_i32_8 = arith.constant 0 : i32
    %10 = arith.cmpi eq, %arg2, %c0_i32_8 : i32
    %11 = arith.extui %10 : i1 to i32
    %c0_i32_9 = arith.constant 0 : i32
    %12 = arith.cmpi ne, %11, %c0_i32_9 : i32
    scf.if %12 {
      %c0_10 = arith.constant 0 : index
      %c0_11 = arith.constant 0 : index
      %13 = vector.load %arg7[%c0_10, %c0_11] : memref<32x32xf32, #tpu.memory_space<vmem>>, vector<32x32xf32>
      %c0_12 = arith.constant 0 : index
      %c0_13 = arith.constant 0 : index
      %14 = vector.load %arg5[%c0_12, %c0_13] : memref<1x32xf32, #tpu.memory_space<vmem>>, vector<1x32xf32>
      %15 = vector.broadcast %14 : vector<1x32xf32> to vector<32x32xf32>
      %16 = arith.addf %13, %15 : vector<32x32xf32>
      %c0_14 = arith.constant 0 : index
      %c0_15 = arith.constant 0 : index
      %17 = vector.load %arg6[%c0_14, %c0_15] : memref<32x32xf32, #tpu.memory_space<vmem>>, vector<32x32xf32>
      tpu.vector_store %arg6[%c0_14, %c0_15], %16 {strides = array<i32>} : memref<32x32xf32, #tpu.memory_space<vmem>>, vector<32x32xf32>,
    } else {
    }
    return
  }
  func.func @transform_0(%arg0: i32, %arg1: i32, %arg2: i32) -> (i32, i32) {
    %c0_i32 = arith.constant 0 : i32
    return %arg0, %arg2 : i32, i32
  }
  func.func @transform_1(%arg0: i32, %arg1: i32, %arg2: i32) -> (i32, i32) {
    %c0_i32 = arith.constant 0 : i32
    return %arg2, %arg1 : i32, i32
  }
  func.func @transform_2(%arg0: i32, %arg1: i32, %arg2: i32) -> (i32, i32) {
    %c0_i32 = arith.constant 0 : i32
    %c0_i32_0 = arith.constant 0 : i32
    return %c0_i32, %arg1 : i32, i32
  }
  func.func @transform_3(%arg0: i32, %arg1: i32, %arg2: i32) -> (i32, i32) {
    %c0_i32 = arith.constant 0 : i32
    return %arg0, %arg1 : i32, i32
  }
}

module attributes {stable_mosaic.version = 11 : i64} {
  func.func @_perceiver_stack_kernel(%arg0: i32, %arg1: i32, %arg2: memref<1x32x32xf32, #tpu.memory_space<vmem>>, %arg3: memref<1x16x32xf32, #tpu.memory_space<vmem>>, %arg4: memref<1x1x16xf32, #tpu.memory_space<vmem>>, %arg5: memref<1x1x32xf32, #tpu.memory_space<vmem>>, %arg6: memref<1x1x32xf32, #tpu.memory_space<vmem>>, %arg7: memref<1x32x32xbf16, #tpu.memory_space<vmem>>, %arg8: memref<1x1x32xf32, #tpu.memory_space<vmem>>, %arg9: memref<1x32x64xbf16, #tpu.memory_space<vmem>>, %arg10: memref<1x1x64xf32, #tpu.memory_space<vmem>>, %arg11: memref<1x32x32xbf16, #tpu.memory_space<vmem>>, %arg12: memref<1x1x32xf32, #tpu.memory_space<vmem>>, %arg13: memref<1x1x32xf32, #tpu.memory_space<vmem>>, %arg14: memref<1x1x32xf32, #tpu.memory_space<vmem>>, %arg15: memref<1x32x128xbf16, #tpu.memory_space<vmem>>, %arg16: memref<1x1x128xf32, #tpu.memory_space<vmem>>, %arg17: memref<1x128x32xbf16, #tpu.memory_space<vmem>>, %arg18: memref<1x1x32xf32, #tpu.memory_space<vmem>>, %arg19: memref<1x1x32xf32, #tpu.memory_space<vmem>>, %arg20: memref<1x1x32xf32, #tpu.memory_space<vmem>>, %arg21: memref<1x32x32xf32, #tpu.memory_space<vmem>>, %arg22: memref<32x32xf32, #tpu.memory_space<vmem>>) attributes {dimension_semantics = [#tpu.dimension_semantics<parallel>, #tpu.dimension_semantics<arbitrary>], iteration_bounds = array<i64: 2, 2>, scalar_prefetch = 0 : i64, scratch_operands = 1 : i64, tpu.core_type = #tpu.core_type<tc>, window_params = [{transform_indices = @transform_0, window_bounds = array<i64: 1, 32, 32>}, {transform_indices = @transform_1, window_bounds = array<i64: 1, 16, 32>}, {transform_indices = @transform_2, window_bounds = array<i64: 1, 1, 16>}, {transform_indices = @transform_3, window_bounds = array<i64: 1, 1, 32>}, {transform_indices = @transform_4, window_bounds = array<i64: 1, 1, 32>}, {transform_indices = @transform_5, window_bounds = array<i64: 1, 32, 32>}, {transform_indices = @transform_6, window_bounds = array<i64: 1, 1, 32>}, {transform_indices = @transform_7, window_bounds = array<i64: 1, 32, 64>}, {transform_indices = @transform_8, window_bounds = array<i64: 1, 1, 64>}, {transform_indices = @transform_9, window_bounds = array<i64: 1, 32, 32>}, {transform_indices = @transform_10, window_bounds = array<i64: 1, 1, 32>}, {transform_indices = @transform_11, window_bounds = array<i64: 1, 1, 32>}, {transform_indices = @transform_12, window_bounds = array<i64: 1, 1, 32>}, {transform_indices = @transform_13, window_bounds = array<i64: 1, 32, 128>}, {transform_indices = @transform_14, window_bounds = array<i64: 1, 1, 128>}, {transform_indices = @transform_15, window_bounds = array<i64: 1, 128, 32>}, {transform_indices = @transform_16, window_bounds = array<i64: 1, 1, 32>}, {pipeline_mode = #tpu.pipeline_mode<synchronous>, transform_indices = @transform_17, window_bounds = array<i64: 1, 1, 32>}, {pipeline_mode = #tpu.pipeline_mode<synchronous>, transform_indices = @transform_18, window_bounds = array<i64: 1, 1, 32>}, {transform_indices = @transform_19, window_bounds = array<i64: 1, 32, 32>}]} {
    %c0_i32 = arith.constant 0 : i32
    %0 = arith.cmpi eq, %arg1, %c0_i32 : i32
    %1 = arith.extui %0 : i1 to i32
    %c0_i32_0 = arith.constant 0 : i32
    %2 = arith.cmpi ne, %1, %c0_i32_0 : i32
    scf.if %2 {
      %c0_84 = arith.constant 0 : index
      %c0_85 = arith.constant 0 : index
      %c0_86 = arith.constant 0 : index
      %173 = vector.load %arg2[%c0_84, %c0_85, %c0_86] : memref<1x32x32xf32, #tpu.memory_space<vmem>>, vector<1x32x32xf32>
      %174 = vector.shape_cast %173 : vector<1x32x32xf32> to vector<32x32xf32>
      %c0_87 = arith.constant 0 : index
      %c0_88 = arith.constant 0 : index
      %175 = vector.load %arg22[%c0_87, %c0_88] : memref<32x32xf32, #tpu.memory_space<vmem>>, vector<32x32xf32>
      tpu.vector_store %arg22[%c0_87, %c0_88], %174 {strides = array<i32>} : memref<32x32xf32, #tpu.memory_space<vmem>>, vector<32x32xf32>,
    } else {
    }
    %c0 = arith.constant 0 : index
    %c0_1 = arith.constant 0 : index
    %3 = vector.load %arg22[%c0, %c0_1] : memref<32x32xf32, #tpu.memory_space<vmem>>, vector<32x32xf32>
    %c0_2 = arith.constant 0 : index
    %c0_3 = arith.constant 0 : index
    %c0_4 = arith.constant 0 : index
    %4 = vector.load %arg3[%c0_2, %c0_3, %c0_4] : memref<1x16x32xf32, #tpu.memory_space<vmem>>, vector<1x16x32xf32>
    %5 = vector.shape_cast %4 : vector<1x16x32xf32> to vector<16x32xf32>
    %c0_5 = arith.constant 0 : index
    %c0_6 = arith.constant 0 : index
    %c0_7 = arith.constant 0 : index
    %6 = vector.load %arg4[%c0_5, %c0_6, %c0_7] : memref<1x1x16xf32, #tpu.memory_space<vmem>>, vector<1x1x16xf32>
    %7 = vector.shape_cast %6 : vector<1x1x16xf32> to vector<1x16xf32>
    %c0_8 = arith.constant 0 : index
    %c0_9 = arith.constant 0 : index
    %c0_10 = arith.constant 0 : index
    %8 = vector.load %arg5[%c0_8, %c0_9, %c0_10] : memref<1x1x32xf32, #tpu.memory_space<vmem>>, vector<1x1x32xf32>
    %9 = vector.shape_cast %8 : vector<1x1x32xf32> to vector<1x32xf32>
    %c0_11 = arith.constant 0 : index
    %c0_12 = arith.constant 0 : index
    %c0_13 = arith.constant 0 : index
    %10 = vector.load %arg6[%c0_11, %c0_12, %c0_13] : memref<1x1x32xf32, #tpu.memory_space<vmem>>, vector<1x1x32xf32>
    %11 = vector.shape_cast %10 : vector<1x1x32xf32> to vector<1x32xf32>
    %cst = arith.constant dense<0.000000e+00> : vector<32xf32>
    %12 = vector.multi_reduction <add>, %3, %cst [1] : vector<32x32xf32> to vector<32xf32>
    %13 = vector.shape_cast %12 : vector<32xf32> to vector<32x1xf32>
    %cst_14 = arith.constant 3.200000e+01 : f32
    %14 = vector.broadcast %cst_14 : f32 to vector<32x1xf32>
    %15 = arith.divf %13, %14 : vector<32x1xf32>
    %16 = vector.broadcast %15 : vector<32x1xf32> to vector<32x32xf32>
    %17 = arith.subf %3, %16 : vector<32x32xf32>
    %18 = arith.mulf %17, %17 : vector<32x32xf32>
    %cst_15 = arith.constant dense<0.000000e+00> : vector<32xf32>
    %19 = vector.multi_reduction <add>, %18, %cst_15 [1] : vector<32x32xf32> to vector<32xf32>
    %20 = vector.shape_cast %19 : vector<32xf32> to vector<32x1xf32>
    %cst_16 = arith.constant 3.200000e+01 : f32
    %21 = vector.broadcast %cst_16 : f32 to vector<32x1xf32>
    %22 = arith.divf %20, %21 : vector<32x1xf32>
    %23 = vector.broadcast %15 : vector<32x1xf32> to vector<32x32xf32>
    %24 = arith.subf %3, %23 : vector<32x32xf32>
    %cst_17 = arith.constant 9.99999974E-6 : f32
    %25 = vector.broadcast %cst_17 : f32 to vector<32x1xf32>
    %26 = arith.addf %22, %25 : vector<32x1xf32>
    %27 = math.rsqrt %26 : vector<32x1xf32>
    %28 = vector.broadcast %27 : vector<32x1xf32> to vector<32x32xf32>
    %29 = arith.mulf %24, %28 : vector<32x32xf32>
    %30 = vector.broadcast %9 : vector<1x32xf32> to vector<32x32xf32>
    %31 = arith.mulf %29, %30 : vector<32x32xf32>
    %32 = vector.broadcast %11 : vector<1x32xf32> to vector<32x32xf32>
    %33 = arith.addf %31, %32 : vector<32x32xf32>
    %c0_18 = arith.constant 0 : index
    %c0_19 = arith.constant 0 : index
    %c0_20 = arith.constant 0 : index
    %34 = vector.load %arg7[%c0_18, %c0_19, %c0_20] : memref<1x32x32xbf16, #tpu.memory_space<vmem>>, vector<1x32x32xbf16>
    %35 = vector.shape_cast %34 : vector<1x32x32xbf16> to vector<32x32xbf16>
    %c0_21 = arith.constant 0 : index
    %c0_22 = arith.constant 0 : index
    %c0_23 = arith.constant 0 : index
    %36 = vector.load %arg8[%c0_21, %c0_22, %c0_23] : memref<1x1x32xf32, #tpu.memory_space<vmem>>, vector<1x1x32xf32>
    %37 = vector.shape_cast %36 : vector<1x1x32xf32> to vector<1x32xf32>
    %38 = arith.truncf %33 : vector<32x32xf32> to vector<32x32xbf16>
    %cst_24 = arith.constant dense<0.000000e+00> : vector<32x32xf32>
    %39 = tpu.matmul %38, %35, %cst_24 {dimension_numbers = #tpu.dot_dimension_numbers<[1], [0], [0], [1], [0, 0, 1, 1], [], []>} : vector<32x32xbf16>, vector<32x32xbf16>, vector<32x32xf32> -> vector<32x32xf32>
    %40 = vector.broadcast %37 : vector<1x32xf32> to vector<32x32xf32>
    %41 = arith.addf %39, %40 : vector<32x32xf32>
    %c0_25 = arith.constant 0 : index
    %c0_26 = arith.constant 0 : index
    %c0_27 = arith.constant 0 : index
    %42 = vector.load %arg9[%c0_25, %c0_26, %c0_27] : memref<1x32x64xbf16, #tpu.memory_space<vmem>>, vector<1x32x64xbf16>
    %43 = vector.shape_cast %42 : vector<1x32x64xbf16> to vector<32x64xbf16>
    %c0_28 = arith.constant 0 : index
    %c0_29 = arith.constant 0 : index
    %c0_30 = arith.constant 0 : index
    %44 = vector.load %arg10[%c0_28, %c0_29, %c0_30] : memref<1x1x64xf32, #tpu.memory_space<vmem>>, vector<1x1x64xf32>
    %45 = vector.shape_cast %44 : vector<1x1x64xf32> to vector<1x64xf32>
    %46 = arith.truncf %5 : vector<16x32xf32> to vector<16x32xbf16>
    %cst_31 = arith.constant dense<0.000000e+00> : vector<16x64xf32>
    %47 = tpu.matmul %46, %43, %cst_31 {dimension_numbers = #tpu.dot_dimension_numbers<[1], [0], [0], [1], [0, 0, 1, 1], [], []>} : vector<16x32xbf16>, vector<32x64xbf16>, vector<16x64xf32> -> vector<16x64xf32>
    %48 = vector.broadcast %45 : vector<1x64xf32> to vector<16x64xf32>
    %49 = arith.addf %47, %48 : vector<16x64xf32>
    %50 = vector.extract_strided_slice %49 {offsets = [0, 0], sizes = [16, 32], strides = [1, 1]} : vector<16x64xf32> to vector<16x32xf32>
    %51 = vector.extract_strided_slice %49 {offsets = [0, 32], sizes = [16, 32], strides = [1, 1]} : vector<16x64xf32> to vector<16x32xf32>
    %cst_32 = arith.constant 5.000000e-01 : f32
    %52 = vector.broadcast %cst_32 : f32 to vector<1x16xf32>
    %53 = arith.cmpf ogt, %7, %52 : vector<1x16xf32>
    %cst_33 = arith.constant 0.000000e+00 : f32
    %cst_34 = arith.constant -1.000000e+09 : f32
    %54 = vector.broadcast %cst_33 : f32 to vector<1x16xf32>
    %55 = vector.broadcast %cst_34 : f32 to vector<1x16xf32>
    %56 = arith.select %53, %54, %55 : vector<1x16xi1>, vector<1x16xf32>
    %57 = vector.extract_strided_slice %41 {offsets = [0, 0], sizes = [32, 16], strides = [1, 1]} : vector<32x32xf32> to vector<32x16xf32>
    %58 = arith.truncf %57 : vector<32x16xf32> to vector<32x16xbf16>
    %59 = vector.extract_strided_slice %50 {offsets = [0, 0], sizes = [16, 16], strides = [1, 1]} : vector<16x32xf32> to vector<16x16xf32>
    %60 = arith.truncf %59 : vector<16x16xf32> to vector<16x16xbf16>
    %61 = vector.extract_strided_slice %51 {offsets = [0, 0], sizes = [16, 16], strides = [1, 1]} : vector<16x32xf32> to vector<16x16xf32>
    %62 = arith.truncf %61 : vector<16x16xf32> to vector<16x16xbf16>
    "tpu.trace_start"() <{level = 10 : i32, message = "qd,kd->qk"}> : () -> ()
    %cst_35 = arith.constant dense<0.000000e+00> : vector<32x16xf32>
    %63 = tpu.matmul %58, %60, %cst_35 {dimension_numbers = #tpu.dot_dimension_numbers<[1], [1], [0], [0], [0, 0, 1, 0], [], []>} : vector<32x16xbf16>, vector<16x16xbf16>, vector<32x16xf32> -> vector<32x16xf32>
    "tpu.trace_stop"() : () -> ()
    %cst_36 = arith.constant 2.500000e-01 : f32
    %64 = vector.broadcast %cst_36 : f32 to vector<32x16xf32>
    %65 = arith.mulf %63, %64 : vector<32x16xf32>
    %66 = vector.broadcast %56 : vector<1x16xf32> to vector<32x16xf32>
    %67 = arith.addf %65, %66 : vector<32x16xf32>
    %cst_37 = arith.constant dense<0xFF800000> : vector<32xf32>
    %68 = vector.multi_reduction <maximumf>, %67, %cst_37 [1] : vector<32x16xf32> to vector<32xf32>
    %69 = vector.shape_cast %68 : vector<32xf32> to vector<32x1xf32>
    %70 = vector.broadcast %69 : vector<32x1xf32> to vector<32x16xf32>
    %71 = arith.subf %67, %70 : vector<32x16xf32>
    %72 = math.exp %71 : vector<32x16xf32>
    %cst_38 = arith.constant dense<0.000000e+00> : vector<32xf32>
    %73 = vector.multi_reduction <add>, %72, %cst_38 [1] : vector<32x16xf32> to vector<32xf32>
    %74 = vector.shape_cast %73 : vector<32xf32> to vector<32x1xf32>
    %75 = tpu.reciprocal %74 {approx = true} : vector<32x1xf32> -> vector<32x1xf32>
    %76 = vector.broadcast %75 : vector<32x1xf32> to vector<32x16xf32>
    %77 = arith.mulf %72, %76 : vector<32x16xf32>
    %78 = arith.truncf %77 : vector<32x16xf32> to vector<32x16xbf16>
    %cst_39 = arith.constant dense<0.000000e+00> : vector<32x16xf32>
    %79 = tpu.matmul %78, %62, %cst_39 {dimension_numbers = #tpu.dot_dimension_numbers<[1], [0], [0], [1], [0, 0, 1, 1], [], []>} : vector<32x16xbf16>, vector<16x16xbf16>, vector<32x16xf32> -> vector<32x16xf32>
    %80 = vector.extract_strided_slice %41 {offsets = [0, 16], sizes = [32, 16], strides = [1, 1]} : vector<32x32xf32> to vector<32x16xf32>
    %81 = arith.truncf %80 : vector<32x16xf32> to vector<32x16xbf16>
    %82 = vector.extract_strided_slice %50 {offsets = [0, 16], sizes = [16, 16], strides = [1, 1]} : vector<16x32xf32> to vector<16x16xf32>
    %83 = arith.truncf %82 : vector<16x16xf32> to vector<16x16xbf16>
    %84 = vector.extract_strided_slice %51 {offsets = [0, 16], sizes = [16, 16], strides = [1, 1]} : vector<16x32xf32> to vector<16x16xf32>
    %85 = arith.truncf %84 : vector<16x16xf32> to vector<16x16xbf16>
    "tpu.trace_start"() <{level = 10 : i32, message = "qd,kd->qk"}> : () -> ()
    %cst_40 = arith.constant dense<0.000000e+00> : vector<32x16xf32>
    %86 = tpu.matmul %81, %83, %cst_40 {dimension_numbers = #tpu.dot_dimension_numbers<[1], [1], [0], [0], [0, 0, 1, 0], [], []>} : vector<32x16xbf16>, vector<16x16xbf16>, vector<32x16xf32> -> vector<32x16xf32>
    "tpu.trace_stop"() : () -> ()
    %cst_41 = arith.constant 2.500000e-01 : f32
    %87 = vector.broadcast %cst_41 : f32 to vector<32x16xf32>
    %88 = arith.mulf %86, %87 : vector<32x16xf32>
    %89 = vector.broadcast %56 : vector<1x16xf32> to vector<32x16xf32>
    %90 = arith.addf %88, %89 : vector<32x16xf32>
    %cst_42 = arith.constant dense<0xFF800000> : vector<32xf32>
    %91 = vector.multi_reduction <maximumf>, %90, %cst_42 [1] : vector<32x16xf32> to vector<32xf32>
    %92 = vector.shape_cast %91 : vector<32xf32> to vector<32x1xf32>
    %93 = vector.broadcast %92 : vector<32x1xf32> to vector<32x16xf32>
    %94 = arith.subf %90, %93 : vector<32x16xf32>
    %95 = math.exp %94 : vector<32x16xf32>
    %cst_43 = arith.constant dense<0.000000e+00> : vector<32xf32>
    %96 = vector.multi_reduction <add>, %95, %cst_43 [1] : vector<32x16xf32> to vector<32xf32>
    %97 = vector.shape_cast %96 : vector<32xf32> to vector<32x1xf32>
    %98 = tpu.reciprocal %97 {approx = true} : vector<32x1xf32> -> vector<32x1xf32>
    %99 = vector.broadcast %98 : vector<32x1xf32> to vector<32x16xf32>
    %100 = arith.mulf %95, %99 : vector<32x16xf32>
    %101 = arith.truncf %100 : vector<32x16xf32> to vector<32x16xbf16>
    %cst_44 = arith.constant dense<0.000000e+00> : vector<32x16xf32>
    %102 = tpu.matmul %101, %85, %cst_44 {dimension_numbers = #tpu.dot_dimension_numbers<[1], [0], [0], [1], [0, 0, 1, 1], [], []>} : vector<32x16xbf16>, vector<16x16xbf16>, vector<32x16xf32> -> vector<32x16xf32>
    %103 = tpu.concatenate %79, %102 in 1 : vector<32x16xf32>, vector<32x16xf32> -> vector<32x32xf32>
    %c0_45 = arith.constant 0 : index
    %c0_46 = arith.constant 0 : index
    %c0_47 = arith.constant 0 : index
    %104 = vector.load %arg11[%c0_45, %c0_46, %c0_47] : memref<1x32x32xbf16, #tpu.memory_space<vmem>>, vector<1x32x32xbf16>
    %105 = vector.shape_cast %104 : vector<1x32x32xbf16> to vector<32x32xbf16>
    %c0_48 = arith.constant 0 : index
    %c0_49 = arith.constant 0 : index
    %c0_50 = arith.constant 0 : index
    %106 = vector.load %arg12[%c0_48, %c0_49, %c0_50] : memref<1x1x32xf32, #tpu.memory_space<vmem>>, vector<1x1x32xf32>
    %107 = vector.shape_cast %106 : vector<1x1x32xf32> to vector<1x32xf32>
    %108 = arith.truncf %103 : vector<32x32xf32> to vector<32x32xbf16>
    %cst_51 = arith.constant dense<0.000000e+00> : vector<32x32xf32>
    %109 = tpu.matmul %108, %105, %cst_51 {dimension_numbers = #tpu.dot_dimension_numbers<[1], [0], [0], [1], [0, 0, 1, 1], [], []>} : vector<32x32xbf16>, vector<32x32xbf16>, vector<32x32xf32> -> vector<32x32xf32>
    %110 = vector.broadcast %107 : vector<1x32xf32> to vector<32x32xf32>
    %111 = arith.addf %109, %110 : vector<32x32xf32>
    %112 = arith.addf %3, %111 : vector<32x32xf32>
    %c0_52 = arith.constant 0 : index
    %c0_53 = arith.constant 0 : index
    %c0_54 = arith.constant 0 : index
    %113 = vector.load %arg13[%c0_52, %c0_53, %c0_54] : memref<1x1x32xf32, #tpu.memory_space<vmem>>, vector<1x1x32xf32>
    %114 = vector.shape_cast %113 : vector<1x1x32xf32> to vector<1x32xf32>
    %c0_55 = arith.constant 0 : index
    %c0_56 = arith.constant 0 : index
    %c0_57 = arith.constant 0 : index
    %115 = vector.load %arg14[%c0_55, %c0_56, %c0_57] : memref<1x1x32xf32, #tpu.memory_space<vmem>>, vector<1x1x32xf32>
    %116 = vector.shape_cast %115 : vector<1x1x32xf32> to vector<1x32xf32>
    %cst_58 = arith.constant dense<0.000000e+00> : vector<32xf32>
    %117 = vector.multi_reduction <add>, %112, %cst_58 [1] : vector<32x32xf32> to vector<32xf32>
    %118 = vector.shape_cast %117 : vector<32xf32> to vector<32x1xf32>
    %cst_59 = arith.constant 3.200000e+01 : f32
    %119 = vector.broadcast %cst_59 : f32 to vector<32x1xf32>
    %120 = arith.divf %118, %119 : vector<32x1xf32>
    %121 = vector.broadcast %120 : vector<32x1xf32> to vector<32x32xf32>
    %122 = arith.subf %112, %121 : vector<32x32xf32>
    %123 = arith.mulf %122, %122 : vector<32x32xf32>
    %cst_60 = arith.constant dense<0.000000e+00> : vector<32xf32>
    %124 = vector.multi_reduction <add>, %123, %cst_60 [1] : vector<32x32xf32> to vector<32xf32>
    %125 = vector.shape_cast %124 : vector<32xf32> to vector<32x1xf32>
    %cst_61 = arith.constant 3.200000e+01 : f32
    %126 = vector.broadcast %cst_61 : f32 to vector<32x1xf32>
    %127 = arith.divf %125, %126 : vector<32x1xf32>
    %128 = vector.broadcast %120 : vector<32x1xf32> to vector<32x32xf32>
    %129 = arith.subf %112, %128 : vector<32x32xf32>
    %cst_62 = arith.constant 9.99999974E-6 : f32
    %130 = vector.broadcast %cst_62 : f32 to vector<32x1xf32>
    %131 = arith.addf %127, %130 : vector<32x1xf32>
    %132 = math.rsqrt %131 : vector<32x1xf32>
    %133 = vector.broadcast %132 : vector<32x1xf32> to vector<32x32xf32>
    %134 = arith.mulf %129, %133 : vector<32x32xf32>
    %135 = vector.broadcast %114 : vector<1x32xf32> to vector<32x32xf32>
    %136 = arith.mulf %134, %135 : vector<32x32xf32>
    %137 = vector.broadcast %116 : vector<1x32xf32> to vector<32x32xf32>
    %138 = arith.addf %136, %137 : vector<32x32xf32>
    %c0_63 = arith.constant 0 : index
    %c0_64 = arith.constant 0 : index
    %c0_65 = arith.constant 0 : index
    %139 = vector.load %arg15[%c0_63, %c0_64, %c0_65] : memref<1x32x128xbf16, #tpu.memory_space<vmem>>, vector<1x32x128xbf16>
    %140 = vector.shape_cast %139 : vector<1x32x128xbf16> to vector<32x128xbf16>
    %c0_66 = arith.constant 0 : index
    %c0_67 = arith.constant 0 : index
    %c0_68 = arith.constant 0 : index
    %141 = vector.load %arg16[%c0_66, %c0_67, %c0_68] : memref<1x1x128xf32, #tpu.memory_space<vmem>>, vector<1x1x128xf32>
    %142 = vector.shape_cast %141 : vector<1x1x128xf32> to vector<1x128xf32>
    %143 = arith.truncf %138 : vector<32x32xf32> to vector<32x32xbf16>
    %cst_69 = arith.constant dense<0.000000e+00> : vector<32x128xf32>
    %144 = tpu.matmul %143, %140, %cst_69 {dimension_numbers = #tpu.dot_dimension_numbers<[1], [0], [0], [1], [0, 0, 1, 1], [], []>} : vector<32x32xbf16>, vector<32x128xbf16>, vector<32x128xf32> -> vector<32x128xf32>
    %145 = vector.broadcast %142 : vector<1x128xf32> to vector<32x128xf32>
    %146 = arith.addf %144, %145 : vector<32x128xf32>
    %147 = arith.mulf %146, %146 : vector<32x128xf32>
    %148 = arith.mulf %146, %147 : vector<32x128xf32>
    %cst_70 = arith.constant 4.471500e-02 : f32
    %149 = vector.broadcast %cst_70 : f32 to vector<32x128xf32>
    %150 = arith.mulf %149, %148 : vector<32x128xf32>
    %151 = arith.addf %146, %150 : vector<32x128xf32>
    %cst_71 = arith.constant 0.797884583 : f32
    %152 = vector.broadcast %cst_71 : f32 to vector<32x128xf32>
    %153 = arith.mulf %152, %151 : vector<32x128xf32>
    %154 = math.tanh %153 : vector<32x128xf32>
    %cst_72 = arith.constant 1.000000e+00 : f32
    %155 = vector.broadcast %cst_72 : f32 to vector<32x128xf32>
    %156 = arith.addf %155, %154 : vector<32x128xf32>
    %cst_73 = arith.constant 5.000000e-01 : f32
    %157 = vector.broadcast %cst_73 : f32 to vector<32x128xf32>
    %158 = arith.mulf %157, %156 : vector<32x128xf32>
    %159 = arith.mulf %146, %158 : vector<32x128xf32>
    %c0_74 = arith.constant 0 : index
    %c0_75 = arith.constant 0 : index
    %c0_76 = arith.constant 0 : index
    %160 = vector.load %arg17[%c0_74, %c0_75, %c0_76] : memref<1x128x32xbf16, #tpu.memory_space<vmem>>, vector<1x128x32xbf16>
    %161 = vector.shape_cast %160 : vector<1x128x32xbf16> to vector<128x32xbf16>
    %c0_77 = arith.constant 0 : index
    %c0_78 = arith.constant 0 : index
    %c0_79 = arith.constant 0 : index
    %162 = vector.load %arg18[%c0_77, %c0_78, %c0_79] : memref<1x1x32xf32, #tpu.memory_space<vmem>>, vector<1x1x32xf32>
    %163 = vector.shape_cast %162 : vector<1x1x32xf32> to vector<1x32xf32>
    %164 = arith.truncf %159 : vector<32x128xf32> to vector<32x128xbf16>
    %cst_80 = arith.constant dense<0.000000e+00> : vector<32x32xf32>
    %165 = tpu.matmul %164, %161, %cst_80 {dimension_numbers = #tpu.dot_dimension_numbers<[1], [0], [0], [1], [0, 0, 1, 1], [], []>} : vector<32x128xbf16>, vector<128x32xbf16>, vector<32x32xf32> -> vector<32x32xf32>
    %166 = vector.broadcast %163 : vector<1x32xf32> to vector<32x32xf32>
    %167 = arith.addf %165, %166 : vector<32x32xf32>
    %168 = arith.addf %112, %167 : vector<32x32xf32>
    %c0_81 = arith.constant 0 : index
    %c0_82 = arith.constant 0 : index
    %169 = vector.load %arg22[%c0_81, %c0_82] : memref<32x32xf32, #tpu.memory_space<vmem>>, vector<32x32xf32>
    tpu.vector_store %arg22[%c0_81, %c0_82], %168 {strides = array<i32>} : memref<32x32xf32, #tpu.memory_space<vmem>>, vector<32x32xf32>,
    %c1_i32 = arith.constant 1 : i32
    %170 = arith.cmpi eq, %arg1, %c1_i32 : i32
    %171 = arith.extui %170 : i1 to i32
    %c0_i32_83 = arith.constant 0 : i32
    %172 = arith.cmpi ne, %171, %c0_i32_83 : i32
    scf.if %172 {
      %c0_84 = arith.constant 0 : index
      %c0_85 = arith.constant 0 : index
      %c0_86 = arith.constant 0 : index
      %173 = vector.load %arg19[%c0_84, %c0_85, %c0_86] : memref<1x1x32xf32, #tpu.memory_space<vmem>>, vector<1x1x32xf32>
      %174 = vector.shape_cast %173 : vector<1x1x32xf32> to vector<1x32xf32>
      %c0_87 = arith.constant 0 : index
      %c0_88 = arith.constant 0 : index
      %c0_89 = arith.constant 0 : index
      %175 = vector.load %arg20[%c0_87, %c0_88, %c0_89] : memref<1x1x32xf32, #tpu.memory_space<vmem>>, vector<1x1x32xf32>
      %176 = vector.shape_cast %175 : vector<1x1x32xf32> to vector<1x32xf32>
      %cst_90 = arith.constant dense<0.000000e+00> : vector<32xf32>
      %177 = vector.multi_reduction <add>, %168, %cst_90 [1] : vector<32x32xf32> to vector<32xf32>
      %178 = vector.shape_cast %177 : vector<32xf32> to vector<32x1xf32>
      %cst_91 = arith.constant 3.200000e+01 : f32
      %179 = vector.broadcast %cst_91 : f32 to vector<32x1xf32>
      %180 = arith.divf %178, %179 : vector<32x1xf32>
      %181 = vector.broadcast %180 : vector<32x1xf32> to vector<32x32xf32>
      %182 = arith.subf %168, %181 : vector<32x32xf32>
      %183 = arith.mulf %182, %182 : vector<32x32xf32>
      %cst_92 = arith.constant dense<0.000000e+00> : vector<32xf32>
      %184 = vector.multi_reduction <add>, %183, %cst_92 [1] : vector<32x32xf32> to vector<32xf32>
      %185 = vector.shape_cast %184 : vector<32xf32> to vector<32x1xf32>
      %cst_93 = arith.constant 3.200000e+01 : f32
      %186 = vector.broadcast %cst_93 : f32 to vector<32x1xf32>
      %187 = arith.divf %185, %186 : vector<32x1xf32>
      %188 = vector.broadcast %180 : vector<32x1xf32> to vector<32x32xf32>
      %189 = arith.subf %168, %188 : vector<32x32xf32>
      %cst_94 = arith.constant 9.99999974E-6 : f32
      %190 = vector.broadcast %cst_94 : f32 to vector<32x1xf32>
      %191 = arith.addf %187, %190 : vector<32x1xf32>
      %192 = math.rsqrt %191 : vector<32x1xf32>
      %193 = vector.broadcast %192 : vector<32x1xf32> to vector<32x32xf32>
      %194 = arith.mulf %189, %193 : vector<32x32xf32>
      %195 = vector.broadcast %174 : vector<1x32xf32> to vector<32x32xf32>
      %196 = arith.mulf %194, %195 : vector<32x32xf32>
      %197 = vector.broadcast %176 : vector<1x32xf32> to vector<32x32xf32>
      %198 = arith.addf %196, %197 : vector<32x32xf32>
      %c0_95 = arith.constant 0 : index
      %c0_96 = arith.constant 0 : index
      %c0_97 = arith.constant 0 : index
      %199 = vector.load %arg21[%c0_95, %c0_96, %c0_97] : memref<1x32x32xf32, #tpu.memory_space<vmem>>, vector<1x32x32xf32>
      %200 = vector.shape_cast %199 : vector<1x32x32xf32> to vector<32x32xf32>
      %201 = vector.shape_cast %198 : vector<32x32xf32> to vector<1x32x32xf32>
      tpu.vector_store %arg21[%c0_95, %c0_96, %c0_97], %201 {strides = array<i32>} : memref<1x32x32xf32, #tpu.memory_space<vmem>>, vector<1x32x32xf32>,
    } else {
    }
    return
  }
  func.func @transform_0(%arg0: i32, %arg1: i32) -> (i32, i32, i32) {
    %c0_i32 = arith.constant 0 : i32
    %c0_i32_0 = arith.constant 0 : i32
    %c0_i32_1 = arith.constant 0 : i32
    return %arg0, %c0_i32, %c0_i32_0 : i32, i32, i32
  }
  func.func @transform_1(%arg0: i32, %arg1: i32) -> (i32, i32, i32) {
    %c0_i32 = arith.constant 0 : i32
    %c0_i32_0 = arith.constant 0 : i32
    %c0_i32_1 = arith.constant 0 : i32
    return %arg0, %c0_i32, %c0_i32_0 : i32, i32, i32
  }
  func.func @transform_2(%arg0: i32, %arg1: i32) -> (i32, i32, i32) {
    %c0_i32 = arith.constant 0 : i32
    %c0_i32_0 = arith.constant 0 : i32
    %c0_i32_1 = arith.constant 0 : i32
    return %arg0, %c0_i32, %c0_i32_0 : i32, i32, i32
  }
  func.func @transform_3(%arg0: i32, %arg1: i32) -> (i32, i32, i32) {
    %c0_i32 = arith.constant 0 : i32
    %c0_i32_0 = arith.constant 0 : i32
    %c0_i32_1 = arith.constant 0 : i32
    return %arg1, %c0_i32, %c0_i32_0 : i32, i32, i32
  }
  func.func @transform_4(%arg0: i32, %arg1: i32) -> (i32, i32, i32) {
    %c0_i32 = arith.constant 0 : i32
    %c0_i32_0 = arith.constant 0 : i32
    %c0_i32_1 = arith.constant 0 : i32
    return %arg1, %c0_i32, %c0_i32_0 : i32, i32, i32
  }
  func.func @transform_5(%arg0: i32, %arg1: i32) -> (i32, i32, i32) {
    %c0_i32 = arith.constant 0 : i32
    %c0_i32_0 = arith.constant 0 : i32
    %c0_i32_1 = arith.constant 0 : i32
    return %arg1, %c0_i32, %c0_i32_0 : i32, i32, i32
  }
  func.func @transform_6(%arg0: i32, %arg1: i32) -> (i32, i32, i32) {
    %c0_i32 = arith.constant 0 : i32
    %c0_i32_0 = arith.constant 0 : i32
    %c0_i32_1 = arith.constant 0 : i32
    return %arg1, %c0_i32, %c0_i32_0 : i32, i32, i32
  }
  func.func @transform_7(%arg0: i32, %arg1: i32) -> (i32, i32, i32) {
    %c0_i32 = arith.constant 0 : i32
    %c0_i32_0 = arith.constant 0 : i32
    %c0_i32_1 = arith.constant 0 : i32
    return %arg1, %c0_i32, %c0_i32_0 : i32, i32, i32
  }
  func.func @transform_8(%arg0: i32, %arg1: i32) -> (i32, i32, i32) {
    %c0_i32 = arith.constant 0 : i32
    %c0_i32_0 = arith.constant 0 : i32
    %c0_i32_1 = arith.constant 0 : i32
    return %arg1, %c0_i32, %c0_i32_0 : i32, i32, i32
  }
  func.func @transform_9(%arg0: i32, %arg1: i32) -> (i32, i32, i32) {
    %c0_i32 = arith.constant 0 : i32
    %c0_i32_0 = arith.constant 0 : i32
    %c0_i32_1 = arith.constant 0 : i32
    return %arg1, %c0_i32, %c0_i32_0 : i32, i32, i32
  }
  func.func @transform_10(%arg0: i32, %arg1: i32) -> (i32, i32, i32) {
    %c0_i32 = arith.constant 0 : i32
    %c0_i32_0 = arith.constant 0 : i32
    %c0_i32_1 = arith.constant 0 : i32
    return %arg1, %c0_i32, %c0_i32_0 : i32, i32, i32
  }
  func.func @transform_11(%arg0: i32, %arg1: i32) -> (i32, i32, i32) {
    %c0_i32 = arith.constant 0 : i32
    %c0_i32_0 = arith.constant 0 : i32
    %c0_i32_1 = arith.constant 0 : i32
    return %arg1, %c0_i32, %c0_i32_0 : i32, i32, i32
  }
  func.func @transform_12(%arg0: i32, %arg1: i32) -> (i32, i32, i32) {
    %c0_i32 = arith.constant 0 : i32
    %c0_i32_0 = arith.constant 0 : i32
    %c0_i32_1 = arith.constant 0 : i32
    return %arg1, %c0_i32, %c0_i32_0 : i32, i32, i32
  }
  func.func @transform_13(%arg0: i32, %arg1: i32) -> (i32, i32, i32) {
    %c0_i32 = arith.constant 0 : i32
    %c0_i32_0 = arith.constant 0 : i32
    %c0_i32_1 = arith.constant 0 : i32
    return %arg1, %c0_i32, %c0_i32_0 : i32, i32, i32
  }
  func.func @transform_14(%arg0: i32, %arg1: i32) -> (i32, i32, i32) {
    %c0_i32 = arith.constant 0 : i32
    %c0_i32_0 = arith.constant 0 : i32
    %c0_i32_1 = arith.constant 0 : i32
    return %arg1, %c0_i32, %c0_i32_0 : i32, i32, i32
  }
  func.func @transform_15(%arg0: i32, %arg1: i32) -> (i32, i32, i32) {
    %c0_i32 = arith.constant 0 : i32
    %c0_i32_0 = arith.constant 0 : i32
    %c0_i32_1 = arith.constant 0 : i32
    return %arg1, %c0_i32, %c0_i32_0 : i32, i32, i32
  }
  func.func @transform_16(%arg0: i32, %arg1: i32) -> (i32, i32, i32) {
    %c0_i32 = arith.constant 0 : i32
    %c0_i32_0 = arith.constant 0 : i32
    %c0_i32_1 = arith.constant 0 : i32
    return %arg1, %c0_i32, %c0_i32_0 : i32, i32, i32
  }
  func.func @transform_17(%arg0: i32, %arg1: i32) -> (i32, i32, i32) {
    %c0_i32 = arith.constant 0 : i32
    %c0_i32_0 = arith.constant 0 : i32
    %c0_i32_1 = arith.constant 0 : i32
    %c0_i32_2 = arith.constant 0 : i32
    return %c0_i32, %c0_i32_0, %c0_i32_1 : i32, i32, i32
  }
  func.func @transform_18(%arg0: i32, %arg1: i32) -> (i32, i32, i32) {
    %c0_i32 = arith.constant 0 : i32
    %c0_i32_0 = arith.constant 0 : i32
    %c0_i32_1 = arith.constant 0 : i32
    %c0_i32_2 = arith.constant 0 : i32
    return %c0_i32, %c0_i32_0, %c0_i32_1 : i32, i32, i32
  }
  func.func @transform_19(%arg0: i32, %arg1: i32) -> (i32, i32, i32) {
    %c0_i32 = arith.constant 0 : i32
    %c0_i32_0 = arith.constant 0 : i32
    %c0_i32_1 = arith.constant 0 : i32
    return %arg0, %c0_i32, %c0_i32_0 : i32, i32, i32
  }
}

module attributes {stable_mosaic.version = 11 : i64} {
  func.func @_conv_pre_kernel(%arg0: i32, %arg1: memref<1x18x24xf32, #tpu.memory_space<vmem>>, %arg2: memref<1x16x2xf32, #tpu.memory_space<vmem>>, %arg3: memref<3x24x32xbf16, #tpu.memory_space<vmem>>, %arg4: memref<1x1x32xf32, #tpu.memory_space<vmem>>, %arg5: memref<2x32xbf16, #tpu.memory_space<vmem>>, %arg6: memref<1x32xf32, #tpu.memory_space<vmem>>, %arg7: memref<1x16x1xf32, #tpu.memory_space<vmem>>, %arg8: memref<1x16x32xf32, #tpu.memory_space<vmem>>) attributes {dimension_semantics = [#tpu.dimension_semantics<parallel>], iteration_bounds = array<i64: 2>, scalar_prefetch = 0 : i64, scratch_operands = 0 : i64, tpu.core_type = #tpu.core_type<tc>, window_params = [{transform_indices = @transform_0, window_bounds = array<i64: 1, 18, 24>}, {transform_indices = @transform_1, window_bounds = array<i64: 1, 16, 2>}, {pipeline_mode = #tpu.pipeline_mode<synchronous>, transform_indices = @transform_2, window_bounds = array<i64: 3, 24, 32>}, {pipeline_mode = #tpu.pipeline_mode<synchronous>, transform_indices = @transform_3, window_bounds = array<i64: 1, 1, 32>}, {pipeline_mode = #tpu.pipeline_mode<synchronous>, transform_indices = @transform_4, window_bounds = array<i64: 2, 32>}, {pipeline_mode = #tpu.pipeline_mode<synchronous>, transform_indices = @transform_5, window_bounds = array<i64: 1, 32>}, {transform_indices = @transform_6, window_bounds = array<i64: 1, 16, 1>}, {transform_indices = @transform_7, window_bounds = array<i64: 1, 16, 32>}]} {
    %c0 = arith.constant 0 : index
    %c0_0 = arith.constant 0 : index
    %c0_1 = arith.constant 0 : index
    %0 = vector.load %arg1[%c0, %c0_0, %c0_1] : memref<1x18x24xf32, #tpu.memory_space<vmem>>, vector<1x18x24xf32>
    %1 = vector.shape_cast %0 : vector<1x18x24xf32> to vector<18x24xf32>
    %2 = arith.truncf %1 : vector<18x24xf32> to vector<18x24xbf16>
    %cst = arith.constant 0.000000e+00 : f32
    %3 = vector.broadcast %cst : f32 to vector<16x32xf32>
    %4 = vector.extract_strided_slice %2 {offsets = [0, 0], sizes = [16, 24], strides = [1, 1]} : vector<18x24xbf16> to vector<16x24xbf16>
    %c0_2 = arith.constant 0 : index
    %c0_3 = arith.constant 0 : index
    %c0_4 = arith.constant 0 : index
    %5 = vector.load %arg3[%c0_2, %c0_3, %c0_4] : memref<3x24x32xbf16, #tpu.memory_space<vmem>>, vector<1x24x32xbf16>
    %6 = vector.shape_cast %5 : vector<1x24x32xbf16> to vector<24x32xbf16>
    %cst_5 = arith.constant dense<0.000000e+00> : vector<16x32xf32>
    %7 = tpu.matmul %4, %6, %cst_5 {dimension_numbers = #tpu.dot_dimension_numbers<[1], [0], [0], [1], [0, 0, 1, 1], [], []>} : vector<16x24xbf16>, vector<24x32xbf16>, vector<16x32xf32> -> vector<16x32xf32>
    %8 = arith.addf %3, %7 : vector<16x32xf32>
    %9 = vector.extract_strided_slice %2 {offsets = [1, 0], sizes = [16, 24], strides = [1, 1]} : vector<18x24xbf16> to vector<16x24xbf16>
    %c1 = arith.constant 1 : index
    %c0_6 = arith.constant 0 : index
    %c0_7 = arith.constant 0 : index
    %10 = vector.load %arg3[%c1, %c0_6, %c0_7] : memref<3x24x32xbf16, #tpu.memory_space<vmem>>, vector<1x24x32xbf16>
    %11 = vector.shape_cast %10 : vector<1x24x32xbf16> to vector<24x32xbf16>
    %cst_8 = arith.constant dense<0.000000e+00> : vector<16x32xf32>
    %12 = tpu.matmul %9, %11, %cst_8 {dimension_numbers = #tpu.dot_dimension_numbers<[1], [0], [0], [1], [0, 0, 1, 1], [], []>} : vector<16x24xbf16>, vector<24x32xbf16>, vector<16x32xf32> -> vector<16x32xf32>
    %13 = arith.addf %8, %12 : vector<16x32xf32>
    %14 = vector.extract_strided_slice %2 {offsets = [2, 0], sizes = [16, 24], strides = [1, 1]} : vector<18x24xbf16> to vector<16x24xbf16>
    %c2 = arith.constant 2 : index
    %c0_9 = arith.constant 0 : index
    %c0_10 = arith.constant 0 : index
    %15 = vector.load %arg3[%c2, %c0_9, %c0_10] : memref<3x24x32xbf16, #tpu.memory_space<vmem>>, vector<1x24x32xbf16>
    %16 = vector.shape_cast %15 : vector<1x24x32xbf16> to vector<24x32xbf16>
    %cst_11 = arith.constant dense<0.000000e+00> : vector<16x32xf32>
    %17 = tpu.matmul %14, %16, %cst_11 {dimension_numbers = #tpu.dot_dimension_numbers<[1], [0], [0], [1], [0, 0, 1, 1], [], []>} : vector<16x24xbf16>, vector<24x32xbf16>, vector<16x32xf32> -> vector<16x32xf32>
    %18 = arith.addf %13, %17 : vector<16x32xf32>
    %c0_12 = arith.constant 0 : index
    %c0_13 = arith.constant 0 : index
    %c0_14 = arith.constant 0 : index
    %19 = vector.load %arg4[%c0_12, %c0_13, %c0_14] : memref<1x1x32xf32, #tpu.memory_space<vmem>>, vector<1x1x32xf32>
    %20 = vector.shape_cast %19 : vector<1x1x32xf32> to vector<1x32xf32>
    %21 = vector.broadcast %20 : vector<1x32xf32> to vector<16x32xf32>
    %22 = arith.addf %18, %21 : vector<16x32xf32>
    %c0_15 = arith.constant 0 : index
    %c0_16 = arith.constant 0 : index
    %c0_17 = arith.constant 0 : index
    %23 = vector.load %arg2[%c0_15, %c0_16, %c0_17] : memref<1x16x2xf32, #tpu.memory_space<vmem>>, vector<1x16x2xf32>
    %24 = vector.shape_cast %23 : vector<1x16x2xf32> to vector<16x2xf32>
    %25 = arith.truncf %24 : vector<16x2xf32> to vector<16x2xbf16>
    %c0_18 = arith.constant 0 : index
    %c0_19 = arith.constant 0 : index
    %26 = vector.load %arg5[%c0_18, %c0_19] : memref<2x32xbf16, #tpu.memory_space<vmem>>, vector<2x32xbf16>
    %cst_20 = arith.constant dense<0.000000e+00> : vector<16x32xf32>
    %27 = tpu.matmul %25, %26, %cst_20 {dimension_numbers = #tpu.dot_dimension_numbers<[1], [0], [0], [1], [0, 0, 1, 1], [], []>} : vector<16x2xbf16>, vector<2x32xbf16>, vector<16x32xf32> -> vector<16x32xf32>
    %28 = arith.addf %22, %27 : vector<16x32xf32>
    %c0_21 = arith.constant 0 : index
    %c0_22 = arith.constant 0 : index
    %29 = vector.load %arg6[%c0_21, %c0_22] : memref<1x32xf32, #tpu.memory_space<vmem>>, vector<1x32xf32>
    %30 = vector.broadcast %29 : vector<1x32xf32> to vector<16x32xf32>
    %31 = arith.addf %28, %30 : vector<16x32xf32>
    %c0_23 = arith.constant 0 : index
    %c0_24 = arith.constant 0 : index
    %c0_25 = arith.constant 0 : index
    %32 = vector.load %arg7[%c0_23, %c0_24, %c0_25] : memref<1x16x1xf32, #tpu.memory_space<vmem>>, vector<1x16x1xf32>
    %33 = vector.shape_cast %32 : vector<1x16x1xf32> to vector<16x1xf32>
    %34 = vector.broadcast %33 : vector<16x1xf32> to vector<16x32xf32>
    %35 = arith.mulf %31, %34 : vector<16x32xf32>
    %c0_26 = arith.constant 0 : index
    %c0_27 = arith.constant 0 : index
    %c0_28 = arith.constant 0 : index
    %36 = vector.load %arg8[%c0_26, %c0_27, %c0_28] : memref<1x16x32xf32, #tpu.memory_space<vmem>>, vector<1x16x32xf32>
    %37 = vector.shape_cast %36 : vector<1x16x32xf32> to vector<16x32xf32>
    %38 = vector.shape_cast %35 : vector<16x32xf32> to vector<1x16x32xf32>
    tpu.vector_store %arg8[%c0_26, %c0_27, %c0_28], %38 {strides = array<i32>} : memref<1x16x32xf32, #tpu.memory_space<vmem>>, vector<1x16x32xf32>,
    return
  }
  func.func @transform_0(%arg0: i32) -> (i32, i32, i32) {
    %c0_i32 = arith.constant 0 : i32
    %c0_i32_0 = arith.constant 0 : i32
    %c0_i32_1 = arith.constant 0 : i32
    return %arg0, %c0_i32, %c0_i32_0 : i32, i32, i32
  }
  func.func @transform_1(%arg0: i32) -> (i32, i32, i32) {
    %c0_i32 = arith.constant 0 : i32
    %c0_i32_0 = arith.constant 0 : i32
    %c0_i32_1 = arith.constant 0 : i32
    return %arg0, %c0_i32, %c0_i32_0 : i32, i32, i32
  }
  func.func @transform_2(%arg0: i32) -> (i32, i32, i32) {
    %c0_i32 = arith.constant 0 : i32
    %c0_i32_0 = arith.constant 0 : i32
    %c0_i32_1 = arith.constant 0 : i32
    %c0_i32_2 = arith.constant 0 : i32
    return %c0_i32, %c0_i32_0, %c0_i32_1 : i32, i32, i32
  }
  func.func @transform_3(%arg0: i32) -> (i32, i32, i32) {
    %c0_i32 = arith.constant 0 : i32
    %c0_i32_0 = arith.constant 0 : i32
    %c0_i32_1 = arith.constant 0 : i32
    %c0_i32_2 = arith.constant 0 : i32
    return %c0_i32, %c0_i32_0, %c0_i32_1 : i32, i32, i32
  }
  func.func @transform_4(%arg0: i32) -> (i32, i32) {
    %c0_i32 = arith.constant 0 : i32
    %c0_i32_0 = arith.constant 0 : i32
    %c0_i32_1 = arith.constant 0 : i32
    return %c0_i32, %c0_i32_0 : i32, i32
  }
  func.func @transform_5(%arg0: i32) -> (i32, i32) {
    %c0_i32 = arith.constant 0 : i32
    %c0_i32_0 = arith.constant 0 : i32
    %c0_i32_1 = arith.constant 0 : i32
    return %c0_i32, %c0_i32_0 : i32, i32
  }
  func.func @transform_6(%arg0: i32) -> (i32, i32, i32) {
    %c0_i32 = arith.constant 0 : i32
    %c0_i32_0 = arith.constant 0 : i32
    %c0_i32_1 = arith.constant 0 : i32
    return %arg0, %c0_i32, %c0_i32_0 : i32, i32, i32
  }
  func.func @transform_7(%arg0: i32) -> (i32, i32, i32) {
    %c0_i32 = arith.constant 0 : i32
    %c0_i32_0 = arith.constant 0 : i32
    %c0_i32_1 = arith.constant 0 : i32
    return %arg0, %c0_i32, %c0_i32_0 : i32, i32, i32
  }
}

module attributes {stable_mosaic.version = 11 : i64} {
  func.func @_block_stack_kernel(%arg0: i32, %arg1: i32, %arg2: memref<1x16x32xf32, #tpu.memory_space<vmem>>, %arg3: memref<1x32x32xf32, #tpu.memory_space<vmem>>, %arg4: memref<1x16x1xf32, #tpu.memory_space<vmem>>, %arg5: memref<1x1x16xf32, #tpu.memory_space<vmem>>, %arg6: memref<1x1x32xf32, #tpu.memory_space<vmem>>, %arg7: memref<1x1x32xf32, #tpu.memory_space<vmem>>, %arg8: memref<1x1x32xf32, #tpu.memory_space<vmem>>, %arg9: memref<1x32x96xbf16, #tpu.memory_space<vmem>>, %arg10: memref<1x1x96xf32, #tpu.memory_space<vmem>>, %arg11: memref<1x32x32xbf16, #tpu.memory_space<vmem>>, %arg12: memref<1x1x32xf32, #tpu.memory_space<vmem>>, %arg13: memref<1x1x32xf32, #tpu.memory_space<vmem>>, %arg14: memref<1x1x32xf32, #tpu.memory_space<vmem>>, %arg15: memref<1x32x32xbf16, #tpu.memory_space<vmem>>, %arg16: memref<1x1x32xf32, #tpu.memory_space<vmem>>, %arg17: memref<1x32x64xbf16, #tpu.memory_space<vmem>>, %arg18: memref<1x1x64xf32, #tpu.memory_space<vmem>>, %arg19: memref<1x32x32xbf16, #tpu.memory_space<vmem>>, %arg20: memref<1x1x32xf32, #tpu.memory_space<vmem>>, %arg21: memref<1x1x32xf32, #tpu.memory_space<vmem>>, %arg22: memref<1x1x32xf32, #tpu.memory_space<vmem>>, %arg23: memref<1x32x64xbf16, #tpu.memory_space<vmem>>, %arg24: memref<1x1x64xf32, #tpu.memory_space<vmem>>, %arg25: memref<1x64x32xbf16, #tpu.memory_space<vmem>>, %arg26: memref<1x1x32xf32, #tpu.memory_space<vmem>>, %arg27: memref<1x16x32xf32, #tpu.memory_space<vmem>>, %arg28: memref<16x32xf32, #tpu.memory_space<vmem>>) attributes {dimension_semantics = [#tpu.dimension_semantics<parallel>, #tpu.dimension_semantics<arbitrary>], iteration_bounds = array<i64: 2, 2>, scalar_prefetch = 0 : i64, scratch_operands = 1 : i64, tpu.core_type = #tpu.core_type<tc>, window_params = [{transform_indices = @transform_0, window_bounds = array<i64: 1, 16, 32>}, {transform_indices = @transform_1, window_bounds = array<i64: 1, 32, 32>}, {transform_indices = @transform_2, window_bounds = array<i64: 1, 16, 1>}, {transform_indices = @transform_3, window_bounds = array<i64: 1, 1, 16>}, {transform_indices = @transform_4, window_bounds = array<i64: 1, 1, 32>}, {transform_indices = @transform_5, window_bounds = array<i64: 1, 1, 32>}, {transform_indices = @transform_6, window_bounds = array<i64: 1, 1, 32>}, {transform_indices = @transform_7, window_bounds = array<i64: 1, 32, 96>}, {transform_indices = @transform_8, window_bounds = array<i64: 1, 1, 96>}, {transform_indices = @transform_9, window_bounds = array<i64: 1, 32, 32>}, {transform_indices = @transform_10, window_bounds = array<i64: 1, 1, 32>}, {transform_indices = @transform_11, window_bounds = array<i64: 1, 1, 32>}, {transform_indices = @transform_12, window_bounds = array<i64: 1, 1, 32>}, {transform_indices = @transform_13, window_bounds = array<i64: 1, 32, 32>}, {transform_indices = @transform_14, window_bounds = array<i64: 1, 1, 32>}, {transform_indices = @transform_15, window_bounds = array<i64: 1, 32, 64>}, {transform_indices = @transform_16, window_bounds = array<i64: 1, 1, 64>}, {transform_indices = @transform_17, window_bounds = array<i64: 1, 32, 32>}, {transform_indices = @transform_18, window_bounds = array<i64: 1, 1, 32>}, {transform_indices = @transform_19, window_bounds = array<i64: 1, 1, 32>}, {transform_indices = @transform_20, window_bounds = array<i64: 1, 1, 32>}, {transform_indices = @transform_21, window_bounds = array<i64: 1, 32, 64>}, {transform_indices = @transform_22, window_bounds = array<i64: 1, 1, 64>}, {transform_indices = @transform_23, window_bounds = array<i64: 1, 64, 32>}, {transform_indices = @transform_24, window_bounds = array<i64: 1, 1, 32>}, {transform_indices = @transform_25, window_bounds = array<i64: 1, 16, 32>}]} {
    %c0_i32 = arith.constant 0 : i32
    %0 = arith.cmpi eq, %arg1, %c0_i32 : i32
    %1 = arith.extui %0 : i1 to i32
    %c0_i32_0 = arith.constant 0 : i32
    %2 = arith.cmpi ne, %1, %c0_i32_0 : i32
    scf.if %2 {
      %c0_128 = arith.constant 0 : index
      %c0_129 = arith.constant 0 : index
      %c0_130 = arith.constant 0 : index
      %283 = vector.load %arg2[%c0_128, %c0_129, %c0_130] : memref<1x16x32xf32, #tpu.memory_space<vmem>>, vector<1x16x32xf32>
      %284 = vector.shape_cast %283 : vector<1x16x32xf32> to vector<16x32xf32>
      %c0_131 = arith.constant 0 : index
      %c0_132 = arith.constant 0 : index
      %285 = vector.load %arg28[%c0_131, %c0_132] : memref<16x32xf32, #tpu.memory_space<vmem>>, vector<16x32xf32>
      tpu.vector_store %arg28[%c0_131, %c0_132], %284 {strides = array<i32>} : memref<16x32xf32, #tpu.memory_space<vmem>>, vector<16x32xf32>,
    } else {
    }
    %c0 = arith.constant 0 : index
    %c0_1 = arith.constant 0 : index
    %3 = vector.load %arg28[%c0, %c0_1] : memref<16x32xf32, #tpu.memory_space<vmem>>, vector<16x32xf32>
    %c0_2 = arith.constant 0 : index
    %c0_3 = arith.constant 0 : index
    %c0_4 = arith.constant 0 : index
    %4 = vector.load %arg3[%c0_2, %c0_3, %c0_4] : memref<1x32x32xf32, #tpu.memory_space<vmem>>, vector<1x32x32xf32>
    %5 = vector.shape_cast %4 : vector<1x32x32xf32> to vector<32x32xf32>
    %c0_5 = arith.constant 0 : index
    %c0_6 = arith.constant 0 : index
    %c0_7 = arith.constant 0 : index
    %6 = vector.load %arg4[%c0_5, %c0_6, %c0_7] : memref<1x16x1xf32, #tpu.memory_space<vmem>>, vector<1x16x1xf32>
    %7 = vector.shape_cast %6 : vector<1x16x1xf32> to vector<16x1xf32>
    %c0_8 = arith.constant 0 : index
    %c0_9 = arith.constant 0 : index
    %c0_10 = arith.constant 0 : index
    %8 = vector.load %arg5[%c0_8, %c0_9, %c0_10] : memref<1x1x16xf32, #tpu.memory_space<vmem>>, vector<1x1x16xf32>
    %9 = vector.shape_cast %8 : vector<1x1x16xf32> to vector<1x16xf32>
    %c0_11 = arith.constant 0 : index
    %c0_12 = arith.constant 0 : index
    %c0_13 = arith.constant 0 : index
    %10 = vector.load %arg6[%c0_11, %c0_12, %c0_13] : memref<1x1x32xf32, #tpu.memory_space<vmem>>, vector<1x1x32xf32>
    %11 = vector.shape_cast %10 : vector<1x1x32xf32> to vector<1x32xf32>
    %c0_14 = arith.constant 0 : index
    %c0_15 = arith.constant 0 : index
    %c0_16 = arith.constant 0 : index
    %12 = vector.load %arg7[%c0_14, %c0_15, %c0_16] : memref<1x1x32xf32, #tpu.memory_space<vmem>>, vector<1x1x32xf32>
    %13 = vector.shape_cast %12 : vector<1x1x32xf32> to vector<1x32xf32>
    %c0_17 = arith.constant 0 : index
    %c0_18 = arith.constant 0 : index
    %c0_19 = arith.constant 0 : index
    %14 = vector.load %arg8[%c0_17, %c0_18, %c0_19] : memref<1x1x32xf32, #tpu.memory_space<vmem>>, vector<1x1x32xf32>
    %15 = vector.shape_cast %14 : vector<1x1x32xf32> to vector<1x32xf32>
    %cst = arith.constant dense<0.000000e+00> : vector<16xf32>
    %16 = vector.multi_reduction <add>, %3, %cst [1] : vector<16x32xf32> to vector<16xf32>
    %17 = vector.shape_cast %16 : vector<16xf32> to vector<16x1xf32>
    %cst_20 = arith.constant 3.200000e+01 : f32
    %18 = vector.broadcast %cst_20 : f32 to vector<16x1xf32>
    %19 = arith.divf %17, %18 : vector<16x1xf32>
    %20 = vector.broadcast %19 : vector<16x1xf32> to vector<16x32xf32>
    %21 = arith.subf %3, %20 : vector<16x32xf32>
    %22 = arith.mulf %21, %21 : vector<16x32xf32>
    %cst_21 = arith.constant dense<0.000000e+00> : vector<16xf32>
    %23 = vector.multi_reduction <add>, %22, %cst_21 [1] : vector<16x32xf32> to vector<16xf32>
    %24 = vector.shape_cast %23 : vector<16xf32> to vector<16x1xf32>
    %cst_22 = arith.constant 3.200000e+01 : f32
    %25 = vector.broadcast %cst_22 : f32 to vector<16x1xf32>
    %26 = arith.divf %24, %25 : vector<16x1xf32>
    %27 = vector.broadcast %19 : vector<16x1xf32> to vector<16x32xf32>
    %28 = arith.subf %3, %27 : vector<16x32xf32>
    %cst_23 = arith.constant 9.99999974E-6 : f32
    %29 = vector.broadcast %cst_23 : f32 to vector<16x1xf32>
    %30 = arith.addf %26, %29 : vector<16x1xf32>
    %31 = math.rsqrt %30 : vector<16x1xf32>
    %32 = vector.broadcast %31 : vector<16x1xf32> to vector<16x32xf32>
    %33 = arith.mulf %28, %32 : vector<16x32xf32>
    %34 = vector.broadcast %13 : vector<1x32xf32> to vector<16x32xf32>
    %35 = arith.mulf %33, %34 : vector<16x32xf32>
    %36 = vector.broadcast %15 : vector<1x32xf32> to vector<16x32xf32>
    %37 = arith.addf %35, %36 : vector<16x32xf32>
    %c0_24 = arith.constant 0 : index
    %c0_25 = arith.constant 0 : index
    %c0_26 = arith.constant 0 : index
    %38 = vector.load %arg9[%c0_24, %c0_25, %c0_26] : memref<1x32x96xbf16, #tpu.memory_space<vmem>>, vector<1x32x96xbf16>
    %39 = vector.shape_cast %38 : vector<1x32x96xbf16> to vector<32x96xbf16>
    %c0_27 = arith.constant 0 : index
    %c0_28 = arith.constant 0 : index
    %c0_29 = arith.constant 0 : index
    %40 = vector.load %arg10[%c0_27, %c0_28, %c0_29] : memref<1x1x96xf32, #tpu.memory_space<vmem>>, vector<1x1x96xf32>
    %41 = vector.shape_cast %40 : vector<1x1x96xf32> to vector<1x96xf32>
    %42 = arith.truncf %37 : vector<16x32xf32> to vector<16x32xbf16>
    %cst_30 = arith.constant dense<0.000000e+00> : vector<16x96xf32>
    %43 = tpu.matmul %42, %39, %cst_30 {dimension_numbers = #tpu.dot_dimension_numbers<[1], [0], [0], [1], [0, 0, 1, 1], [], []>} : vector<16x32xbf16>, vector<32x96xbf16>, vector<16x96xf32> -> vector<16x96xf32>
    %44 = vector.broadcast %41 : vector<1x96xf32> to vector<16x96xf32>
    %45 = arith.addf %43, %44 : vector<16x96xf32>
    %46 = vector.extract_strided_slice %45 {offsets = [0, 0], sizes = [16, 32], strides = [1, 1]} : vector<16x96xf32> to vector<16x32xf32>
    %47 = vector.extract_strided_slice %45 {offsets = [0, 32], sizes = [16, 32], strides = [1, 1]} : vector<16x96xf32> to vector<16x32xf32>
    %48 = vector.extract_strided_slice %45 {offsets = [0, 64], sizes = [16, 32], strides = [1, 1]} : vector<16x96xf32> to vector<16x32xf32>
    %cst_31 = arith.constant 5.000000e-01 : f32
    %49 = vector.broadcast %cst_31 : f32 to vector<1x16xf32>
    %50 = arith.cmpf ogt, %9, %49 : vector<1x16xf32>
    %cst_32 = arith.constant 0.000000e+00 : f32
    %cst_33 = arith.constant -1.000000e+09 : f32
    %51 = vector.broadcast %cst_32 : f32 to vector<1x16xf32>
    %52 = vector.broadcast %cst_33 : f32 to vector<1x16xf32>
    %53 = arith.select %50, %51, %52 : vector<1x16xi1>, vector<1x16xf32>
    %54 = vector.extract_strided_slice %46 {offsets = [0, 0], sizes = [16, 16], strides = [1, 1]} : vector<16x32xf32> to vector<16x16xf32>
    %55 = arith.truncf %54 : vector<16x16xf32> to vector<16x16xbf16>
    %56 = vector.extract_strided_slice %47 {offsets = [0, 0], sizes = [16, 16], strides = [1, 1]} : vector<16x32xf32> to vector<16x16xf32>
    %57 = arith.truncf %56 : vector<16x16xf32> to vector<16x16xbf16>
    %58 = vector.extract_strided_slice %48 {offsets = [0, 0], sizes = [16, 16], strides = [1, 1]} : vector<16x32xf32> to vector<16x16xf32>
    %59 = arith.truncf %58 : vector<16x16xf32> to vector<16x16xbf16>
    "tpu.trace_start"() <{level = 10 : i32, message = "qd,kd->qk"}> : () -> ()
    %cst_34 = arith.constant dense<0.000000e+00> : vector<16x16xf32>
    %60 = tpu.matmul %55, %57, %cst_34 {dimension_numbers = #tpu.dot_dimension_numbers<[1], [1], [0], [0], [0, 0, 1, 0], [], []>} : vector<16x16xbf16>, vector<16x16xbf16>, vector<16x16xf32> -> vector<16x16xf32>
    "tpu.trace_stop"() : () -> ()
    %cst_35 = arith.constant 2.500000e-01 : f32
    %61 = vector.broadcast %cst_35 : f32 to vector<16x16xf32>
    %62 = arith.mulf %60, %61 : vector<16x16xf32>
    %63 = vector.broadcast %53 : vector<1x16xf32> to vector<16x16xf32>
    %64 = arith.addf %62, %63 : vector<16x16xf32>
    %cst_36 = arith.constant dense<0xFF800000> : vector<16xf32>
    %65 = vector.multi_reduction <maximumf>, %64, %cst_36 [1] : vector<16x16xf32> to vector<16xf32>
    %66 = vector.shape_cast %65 : vector<16xf32> to vector<16x1xf32>
    %67 = vector.broadcast %66 : vector<16x1xf32> to vector<16x16xf32>
    %68 = arith.subf %64, %67 : vector<16x16xf32>
    %69 = math.exp %68 : vector<16x16xf32>
    %cst_37 = arith.constant dense<0.000000e+00> : vector<16xf32>
    %70 = vector.multi_reduction <add>, %69, %cst_37 [1] : vector<16x16xf32> to vector<16xf32>
    %71 = vector.shape_cast %70 : vector<16xf32> to vector<16x1xf32>
    %72 = tpu.reciprocal %71 {approx = true} : vector<16x1xf32> -> vector<16x1xf32>
    %73 = vector.broadcast %72 : vector<16x1xf32> to vector<16x16xf32>
    %74 = arith.mulf %69, %73 : vector<16x16xf32>
    %75 = arith.truncf %74 : vector<16x16xf32> to vector<16x16xbf16>
    %cst_38 = arith.constant dense<0.000000e+00> : vector<16x16xf32>
    %76 = tpu.matmul %75, %59, %cst_38 {dimension_numbers = #tpu.dot_dimension_numbers<[1], [0], [0], [1], [0, 0, 1, 1], [], []>} : vector<16x16xbf16>, vector<16x16xbf16>, vector<16x16xf32> -> vector<16x16xf32>
    %77 = vector.extract_strided_slice %46 {offsets = [0, 16], sizes = [16, 16], strides = [1, 1]} : vector<16x32xf32> to vector<16x16xf32>
    %78 = arith.truncf %77 : vector<16x16xf32> to vector<16x16xbf16>
    %79 = vector.extract_strided_slice %47 {offsets = [0, 16], sizes = [16, 16], strides = [1, 1]} : vector<16x32xf32> to vector<16x16xf32>
    %80 = arith.truncf %79 : vector<16x16xf32> to vector<16x16xbf16>
    %81 = vector.extract_strided_slice %48 {offsets = [0, 16], sizes = [16, 16], strides = [1, 1]} : vector<16x32xf32> to vector<16x16xf32>
    %82 = arith.truncf %81 : vector<16x16xf32> to vector<16x16xbf16>
    "tpu.trace_start"() <{level = 10 : i32, message = "qd,kd->qk"}> : () -> ()
    %cst_39 = arith.constant dense<0.000000e+00> : vector<16x16xf32>
    %83 = tpu.matmul %78, %80, %cst_39 {dimension_numbers = #tpu.dot_dimension_numbers<[1], [1], [0], [0], [0, 0, 1, 0], [], []>} : vector<16x16xbf16>, vector<16x16xbf16>, vector<16x16xf32> -> vector<16x16xf32>
    "tpu.trace_stop"() : () -> ()
    %cst_40 = arith.constant 2.500000e-01 : f32
    %84 = vector.broadcast %cst_40 : f32 to vector<16x16xf32>
    %85 = arith.mulf %83, %84 : vector<16x16xf32>
    %86 = vector.broadcast %53 : vector<1x16xf32> to vector<16x16xf32>
    %87 = arith.addf %85, %86 : vector<16x16xf32>
    %cst_41 = arith.constant dense<0xFF800000> : vector<16xf32>
    %88 = vector.multi_reduction <maximumf>, %87, %cst_41 [1] : vector<16x16xf32> to vector<16xf32>
    %89 = vector.shape_cast %88 : vector<16xf32> to vector<16x1xf32>
    %90 = vector.broadcast %89 : vector<16x1xf32> to vector<16x16xf32>
    %91 = arith.subf %87, %90 : vector<16x16xf32>
    %92 = math.exp %91 : vector<16x16xf32>
    %cst_42 = arith.constant dense<0.000000e+00> : vector<16xf32>
    %93 = vector.multi_reduction <add>, %92, %cst_42 [1] : vector<16x16xf32> to vector<16xf32>
    %94 = vector.shape_cast %93 : vector<16xf32> to vector<16x1xf32>
    %95 = tpu.reciprocal %94 {approx = true} : vector<16x1xf32> -> vector<16x1xf32>
    %96 = vector.broadcast %95 : vector<16x1xf32> to vector<16x16xf32>
    %97 = arith.mulf %92, %96 : vector<16x16xf32>
    %98 = arith.truncf %97 : vector<16x16xf32> to vector<16x16xbf16>
    %cst_43 = arith.constant dense<0.000000e+00> : vector<16x16xf32>
    %99 = tpu.matmul %98, %82, %cst_43 {dimension_numbers = #tpu.dot_dimension_numbers<[1], [0], [0], [1], [0, 0, 1, 1], [], []>} : vector<16x16xbf16>, vector<16x16xbf16>, vector<16x16xf32> -> vector<16x16xf32>
    %100 = tpu.concatenate %76, %99 in 1 : vector<16x16xf32>, vector<16x16xf32> -> vector<16x32xf32>
    %c0_44 = arith.constant 0 : index
    %c0_45 = arith.constant 0 : index
    %c0_46 = arith.constant 0 : index
    %101 = vector.load %arg11[%c0_44, %c0_45, %c0_46] : memref<1x32x32xbf16, #tpu.memory_space<vmem>>, vector<1x32x32xbf16>
    %102 = vector.shape_cast %101 : vector<1x32x32xbf16> to vector<32x32xbf16>
    %c0_47 = arith.constant 0 : index
    %c0_48 = arith.constant 0 : index
    %c0_49 = arith.constant 0 : index
    %103 = vector.load %arg12[%c0_47, %c0_48, %c0_49] : memref<1x1x32xf32, #tpu.memory_space<vmem>>, vector<1x1x32xf32>
    %104 = vector.shape_cast %103 : vector<1x1x32xf32> to vector<1x32xf32>
    %105 = arith.truncf %100 : vector<16x32xf32> to vector<16x32xbf16>
    %cst_50 = arith.constant dense<0.000000e+00> : vector<16x32xf32>
    %106 = tpu.matmul %105, %102, %cst_50 {dimension_numbers = #tpu.dot_dimension_numbers<[1], [0], [0], [1], [0, 0, 1, 1], [], []>} : vector<16x32xbf16>, vector<32x32xbf16>, vector<16x32xf32> -> vector<16x32xf32>
    %107 = vector.broadcast %104 : vector<1x32xf32> to vector<16x32xf32>
    %108 = arith.addf %106, %107 : vector<16x32xf32>
    %109 = vector.broadcast %7 : vector<16x1xf32> to vector<16x32xf32>
    %110 = arith.mulf %108, %109 : vector<16x32xf32>
    %111 = arith.addf %3, %110 : vector<16x32xf32>
    %c0_51 = arith.constant 0 : index
    %c0_52 = arith.constant 0 : index
    %c0_53 = arith.constant 0 : index
    %112 = vector.load %arg13[%c0_51, %c0_52, %c0_53] : memref<1x1x32xf32, #tpu.memory_space<vmem>>, vector<1x1x32xf32>
    %113 = vector.shape_cast %112 : vector<1x1x32xf32> to vector<1x32xf32>
    %c0_54 = arith.constant 0 : index
    %c0_55 = arith.constant 0 : index
    %c0_56 = arith.constant 0 : index
    %114 = vector.load %arg14[%c0_54, %c0_55, %c0_56] : memref<1x1x32xf32, #tpu.memory_space<vmem>>, vector<1x1x32xf32>
    %115 = vector.shape_cast %114 : vector<1x1x32xf32> to vector<1x32xf32>
    %cst_57 = arith.constant dense<0.000000e+00> : vector<16xf32>
    %116 = vector.multi_reduction <add>, %111, %cst_57 [1] : vector<16x32xf32> to vector<16xf32>
    %117 = vector.shape_cast %116 : vector<16xf32> to vector<16x1xf32>
    %cst_58 = arith.constant 3.200000e+01 : f32
    %118 = vector.broadcast %cst_58 : f32 to vector<16x1xf32>
    %119 = arith.divf %117, %118 : vector<16x1xf32>
    %120 = vector.broadcast %119 : vector<16x1xf32> to vector<16x32xf32>
    %121 = arith.subf %111, %120 : vector<16x32xf32>
    %122 = arith.mulf %121, %121 : vector<16x32xf32>
    %cst_59 = arith.constant dense<0.000000e+00> : vector<16xf32>
    %123 = vector.multi_reduction <add>, %122, %cst_59 [1] : vector<16x32xf32> to vector<16xf32>
    %124 = vector.shape_cast %123 : vector<16xf32> to vector<16x1xf32>
    %cst_60 = arith.constant 3.200000e+01 : f32
    %125 = vector.broadcast %cst_60 : f32 to vector<16x1xf32>
    %126 = arith.divf %124, %125 : vector<16x1xf32>
    %127 = vector.broadcast %119 : vector<16x1xf32> to vector<16x32xf32>
    %128 = arith.subf %111, %127 : vector<16x32xf32>
    %cst_61 = arith.constant 9.99999974E-6 : f32
    %129 = vector.broadcast %cst_61 : f32 to vector<16x1xf32>
    %130 = arith.addf %126, %129 : vector<16x1xf32>
    %131 = math.rsqrt %130 : vector<16x1xf32>
    %132 = vector.broadcast %131 : vector<16x1xf32> to vector<16x32xf32>
    %133 = arith.mulf %128, %132 : vector<16x32xf32>
    %134 = vector.broadcast %113 : vector<1x32xf32> to vector<16x32xf32>
    %135 = arith.mulf %133, %134 : vector<16x32xf32>
    %136 = vector.broadcast %115 : vector<1x32xf32> to vector<16x32xf32>
    %137 = arith.addf %135, %136 : vector<16x32xf32>
    %c0_62 = arith.constant 0 : index
    %c0_63 = arith.constant 0 : index
    %c0_64 = arith.constant 0 : index
    %138 = vector.load %arg15[%c0_62, %c0_63, %c0_64] : memref<1x32x32xbf16, #tpu.memory_space<vmem>>, vector<1x32x32xbf16>
    %139 = vector.shape_cast %138 : vector<1x32x32xbf16> to vector<32x32xbf16>
    %c0_65 = arith.constant 0 : index
    %c0_66 = arith.constant 0 : index
    %c0_67 = arith.constant 0 : index
    %140 = vector.load %arg16[%c0_65, %c0_66, %c0_67] : memref<1x1x32xf32, #tpu.memory_space<vmem>>, vector<1x1x32xf32>
    %141 = vector.shape_cast %140 : vector<1x1x32xf32> to vector<1x32xf32>
    %142 = arith.truncf %137 : vector<16x32xf32> to vector<16x32xbf16>
    %cst_68 = arith.constant dense<0.000000e+00> : vector<16x32xf32>
    %143 = tpu.matmul %142, %139, %cst_68 {dimension_numbers = #tpu.dot_dimension_numbers<[1], [0], [0], [1], [0, 0, 1, 1], [], []>} : vector<16x32xbf16>, vector<32x32xbf16>, vector<16x32xf32> -> vector<16x32xf32>
    %144 = vector.broadcast %141 : vector<1x32xf32> to vector<16x32xf32>
    %145 = arith.addf %143, %144 : vector<16x32xf32>
    %c0_69 = arith.constant 0 : index
    %c0_70 = arith.constant 0 : index
    %c0_71 = arith.constant 0 : index
    %146 = vector.load %arg17[%c0_69, %c0_70, %c0_71] : memref<1x32x64xbf16, #tpu.memory_space<vmem>>, vector<1x32x64xbf16>
    %147 = vector.shape_cast %146 : vector<1x32x64xbf16> to vector<32x64xbf16>
    %c0_72 = arith.constant 0 : index
    %c0_73 = arith.constant 0 : index
    %c0_74 = arith.constant 0 : index
    %148 = vector.load %arg18[%c0_72, %c0_73, %c0_74] : memref<1x1x64xf32, #tpu.memory_space<vmem>>, vector<1x1x64xf32>
    %149 = vector.shape_cast %148 : vector<1x1x64xf32> to vector<1x64xf32>
    %150 = arith.truncf %5 : vector<32x32xf32> to vector<32x32xbf16>
    %cst_75 = arith.constant dense<0.000000e+00> : vector<32x64xf32>
    %151 = tpu.matmul %150, %147, %cst_75 {dimension_numbers = #tpu.dot_dimension_numbers<[1], [0], [0], [1], [0, 0, 1, 1], [], []>} : vector<32x32xbf16>, vector<32x64xbf16>, vector<32x64xf32> -> vector<32x64xf32>
    %152 = vector.broadcast %149 : vector<1x64xf32> to vector<32x64xf32>
    %153 = arith.addf %151, %152 : vector<32x64xf32>
    %154 = vector.extract_strided_slice %153 {offsets = [0, 0], sizes = [32, 32], strides = [1, 1]} : vector<32x64xf32> to vector<32x32xf32>
    %155 = vector.extract_strided_slice %153 {offsets = [0, 32], sizes = [32, 32], strides = [1, 1]} : vector<32x64xf32> to vector<32x32xf32>
    %cst_76 = arith.constant 5.000000e-01 : f32
    %156 = vector.broadcast %cst_76 : f32 to vector<1x32xf32>
    %157 = arith.cmpf ogt, %11, %156 : vector<1x32xf32>
    %cst_77 = arith.constant 0.000000e+00 : f32
    %cst_78 = arith.constant -1.000000e+09 : f32
    %158 = vector.broadcast %cst_77 : f32 to vector<1x32xf32>
    %159 = vector.broadcast %cst_78 : f32 to vector<1x32xf32>
    %160 = arith.select %157, %158, %159 : vector<1x32xi1>, vector<1x32xf32>
    %161 = vector.extract_strided_slice %145 {offsets = [0, 0], sizes = [16, 16], strides = [1, 1]} : vector<16x32xf32> to vector<16x16xf32>
    %162 = arith.truncf %161 : vector<16x16xf32> to vector<16x16xbf16>
    %163 = vector.extract_strided_slice %154 {offsets = [0, 0], sizes = [32, 16], strides = [1, 1]} : vector<32x32xf32> to vector<32x16xf32>
    %164 = arith.truncf %163 : vector<32x16xf32> to vector<32x16xbf16>
    %165 = vector.extract_strided_slice %155 {offsets = [0, 0], sizes = [32, 16], strides = [1, 1]} : vector<32x32xf32> to vector<32x16xf32>
    %166 = arith.truncf %165 : vector<32x16xf32> to vector<32x16xbf16>
    "tpu.trace_start"() <{level = 10 : i32, message = "qd,kd->qk"}> : () -> ()
    %cst_79 = arith.constant dense<0.000000e+00> : vector<16x32xf32>
    %167 = tpu.matmul %162, %164, %cst_79 {dimension_numbers = #tpu.dot_dimension_numbers<[1], [1], [0], [0], [0, 0, 1, 0], [], []>} : vector<16x16xbf16>, vector<32x16xbf16>, vector<16x32xf32> -> vector<16x32xf32>
    "tpu.trace_stop"() : () -> ()
    %cst_80 = arith.constant 2.500000e-01 : f32
    %168 = vector.broadcast %cst_80 : f32 to vector<16x32xf32>
    %169 = arith.mulf %167, %168 : vector<16x32xf32>
    %170 = vector.broadcast %160 : vector<1x32xf32> to vector<16x32xf32>
    %171 = arith.addf %169, %170 : vector<16x32xf32>
    %cst_81 = arith.constant dense<0xFF800000> : vector<16xf32>
    %172 = vector.multi_reduction <maximumf>, %171, %cst_81 [1] : vector<16x32xf32> to vector<16xf32>
    %173 = vector.shape_cast %172 : vector<16xf32> to vector<16x1xf32>
    %174 = vector.broadcast %173 : vector<16x1xf32> to vector<16x32xf32>
    %175 = arith.subf %171, %174 : vector<16x32xf32>
    %176 = math.exp %175 : vector<16x32xf32>
    %cst_82 = arith.constant dense<0.000000e+00> : vector<16xf32>
    %177 = vector.multi_reduction <add>, %176, %cst_82 [1] : vector<16x32xf32> to vector<16xf32>
    %178 = vector.shape_cast %177 : vector<16xf32> to vector<16x1xf32>
    %179 = tpu.reciprocal %178 {approx = true} : vector<16x1xf32> -> vector<16x1xf32>
    %180 = vector.broadcast %179 : vector<16x1xf32> to vector<16x32xf32>
    %181 = arith.mulf %176, %180 : vector<16x32xf32>
    %182 = arith.truncf %181 : vector<16x32xf32> to vector<16x32xbf16>
    %cst_83 = arith.constant dense<0.000000e+00> : vector<16x16xf32>
    %183 = tpu.matmul %182, %166, %cst_83 {dimension_numbers = #tpu.dot_dimension_numbers<[1], [0], [0], [1], [0, 0, 1, 1], [], []>} : vector<16x32xbf16>, vector<32x16xbf16>, vector<16x16xf32> -> vector<16x16xf32>
    %184 = vector.extract_strided_slice %145 {offsets = [0, 16], sizes = [16, 16], strides = [1, 1]} : vector<16x32xf32> to vector<16x16xf32>
    %185 = arith.truncf %184 : vector<16x16xf32> to vector<16x16xbf16>
    %186 = vector.extract_strided_slice %154 {offsets = [0, 16], sizes = [32, 16], strides = [1, 1]} : vector<32x32xf32> to vector<32x16xf32>
    %187 = arith.truncf %186 : vector<32x16xf32> to vector<32x16xbf16>
    %188 = vector.extract_strided_slice %155 {offsets = [0, 16], sizes = [32, 16], strides = [1, 1]} : vector<32x32xf32> to vector<32x16xf32>
    %189 = arith.truncf %188 : vector<32x16xf32> to vector<32x16xbf16>
    "tpu.trace_start"() <{level = 10 : i32, message = "qd,kd->qk"}> : () -> ()
    %cst_84 = arith.constant dense<0.000000e+00> : vector<16x32xf32>
    %190 = tpu.matmul %185, %187, %cst_84 {dimension_numbers = #tpu.dot_dimension_numbers<[1], [1], [0], [0], [0, 0, 1, 0], [], []>} : vector<16x16xbf16>, vector<32x16xbf16>, vector<16x32xf32> -> vector<16x32xf32>
    "tpu.trace_stop"() : () -> ()
    %cst_85 = arith.constant 2.500000e-01 : f32
    %191 = vector.broadcast %cst_85 : f32 to vector<16x32xf32>
    %192 = arith.mulf %190, %191 : vector<16x32xf32>
    %193 = vector.broadcast %160 : vector<1x32xf32> to vector<16x32xf32>
    %194 = arith.addf %192, %193 : vector<16x32xf32>
    %cst_86 = arith.constant dense<0xFF800000> : vector<16xf32>
    %195 = vector.multi_reduction <maximumf>, %194, %cst_86 [1] : vector<16x32xf32> to vector<16xf32>
    %196 = vector.shape_cast %195 : vector<16xf32> to vector<16x1xf32>
    %197 = vector.broadcast %196 : vector<16x1xf32> to vector<16x32xf32>
    %198 = arith.subf %194, %197 : vector<16x32xf32>
    %199 = math.exp %198 : vector<16x32xf32>
    %cst_87 = arith.constant dense<0.000000e+00> : vector<16xf32>
    %200 = vector.multi_reduction <add>, %199, %cst_87 [1] : vector<16x32xf32> to vector<16xf32>
    %201 = vector.shape_cast %200 : vector<16xf32> to vector<16x1xf32>
    %202 = tpu.reciprocal %201 {approx = true} : vector<16x1xf32> -> vector<16x1xf32>
    %203 = vector.broadcast %202 : vector<16x1xf32> to vector<16x32xf32>
    %204 = arith.mulf %199, %203 : vector<16x32xf32>
    %205 = arith.truncf %204 : vector<16x32xf32> to vector<16x32xbf16>
    %cst_88 = arith.constant dense<0.000000e+00> : vector<16x16xf32>
    %206 = tpu.matmul %205, %189, %cst_88 {dimension_numbers = #tpu.dot_dimension_numbers<[1], [0], [0], [1], [0, 0, 1, 1], [], []>} : vector<16x32xbf16>, vector<32x16xbf16>, vector<16x16xf32> -> vector<16x16xf32>
    %207 = tpu.concatenate %183, %206 in 1 : vector<16x16xf32>, vector<16x16xf32> -> vector<16x32xf32>
    %c0_89 = arith.constant 0 : index
    %c0_90 = arith.constant 0 : index
    %c0_91 = arith.constant 0 : index
    %208 = vector.load %arg19[%c0_89, %c0_90, %c0_91] : memref<1x32x32xbf16, #tpu.memory_space<vmem>>, vector<1x32x32xbf16>
    %209 = vector.shape_cast %208 : vector<1x32x32xbf16> to vector<32x32xbf16>
    %c0_92 = arith.constant 0 : index
    %c0_93 = arith.constant 0 : index
    %c0_94 = arith.constant 0 : index
    %210 = vector.load %arg20[%c0_92, %c0_93, %c0_94] : memref<1x1x32xf32, #tpu.memory_space<vmem>>, vector<1x1x32xf32>
    %211 = vector.shape_cast %210 : vector<1x1x32xf32> to vector<1x32xf32>
    %212 = arith.truncf %207 : vector<16x32xf32> to vector<16x32xbf16>
    %cst_95 = arith.constant dense<0.000000e+00> : vector<16x32xf32>
    %213 = tpu.matmul %212, %209, %cst_95 {dimension_numbers = #tpu.dot_dimension_numbers<[1], [0], [0], [1], [0, 0, 1, 1], [], []>} : vector<16x32xbf16>, vector<32x32xbf16>, vector<16x32xf32> -> vector<16x32xf32>
    %214 = vector.broadcast %211 : vector<1x32xf32> to vector<16x32xf32>
    %215 = arith.addf %213, %214 : vector<16x32xf32>
    %216 = vector.broadcast %7 : vector<16x1xf32> to vector<16x32xf32>
    %217 = arith.mulf %215, %216 : vector<16x32xf32>
    %218 = arith.addf %111, %217 : vector<16x32xf32>
    %c0_96 = arith.constant 0 : index
    %c0_97 = arith.constant 0 : index
    %c0_98 = arith.constant 0 : index
    %219 = vector.load %arg21[%c0_96, %c0_97, %c0_98] : memref<1x1x32xf32, #tpu.memory_space<vmem>>, vector<1x1x32xf32>
    %220 = vector.shape_cast %219 : vector<1x1x32xf32> to vector<1x32xf32>
    %c0_99 = arith.constant 0 : index
    %c0_100 = arith.constant 0 : index
    %c0_101 = arith.constant 0 : index
    %221 = vector.load %arg22[%c0_99, %c0_100, %c0_101] : memref<1x1x32xf32, #tpu.memory_space<vmem>>, vector<1x1x32xf32>
    %222 = vector.shape_cast %221 : vector<1x1x32xf32> to vector<1x32xf32>
    %cst_102 = arith.constant dense<0.000000e+00> : vector<16xf32>
    %223 = vector.multi_reduction <add>, %218, %cst_102 [1] : vector<16x32xf32> to vector<16xf32>
    %224 = vector.shape_cast %223 : vector<16xf32> to vector<16x1xf32>
    %cst_103 = arith.constant 3.200000e+01 : f32
    %225 = vector.broadcast %cst_103 : f32 to vector<16x1xf32>
    %226 = arith.divf %224, %225 : vector<16x1xf32>
    %227 = vector.broadcast %226 : vector<16x1xf32> to vector<16x32xf32>
    %228 = arith.subf %218, %227 : vector<16x32xf32>
    %229 = arith.mulf %228, %228 : vector<16x32xf32>
    %cst_104 = arith.constant dense<0.000000e+00> : vector<16xf32>
    %230 = vector.multi_reduction <add>, %229, %cst_104 [1] : vector<16x32xf32> to vector<16xf32>
    %231 = vector.shape_cast %230 : vector<16xf32> to vector<16x1xf32>
    %cst_105 = arith.constant 3.200000e+01 : f32
    %232 = vector.broadcast %cst_105 : f32 to vector<16x1xf32>
    %233 = arith.divf %231, %232 : vector<16x1xf32>
    %234 = vector.broadcast %226 : vector<16x1xf32> to vector<16x32xf32>
    %235 = arith.subf %218, %234 : vector<16x32xf32>
    %cst_106 = arith.constant 9.99999974E-6 : f32
    %236 = vector.broadcast %cst_106 : f32 to vector<16x1xf32>
    %237 = arith.addf %233, %236 : vector<16x1xf32>
    %238 = math.rsqrt %237 : vector<16x1xf32>
    %239 = vector.broadcast %238 : vector<16x1xf32> to vector<16x32xf32>
    %240 = arith.mulf %235, %239 : vector<16x32xf32>
    %241 = vector.broadcast %220 : vector<1x32xf32> to vector<16x32xf32>
    %242 = arith.mulf %240, %241 : vector<16x32xf32>
    %243 = vector.broadcast %222 : vector<1x32xf32> to vector<16x32xf32>
    %244 = arith.addf %242, %243 : vector<16x32xf32>
    %c0_107 = arith.constant 0 : index
    %c0_108 = arith.constant 0 : index
    %c0_109 = arith.constant 0 : index
    %245 = vector.load %arg23[%c0_107, %c0_108, %c0_109] : memref<1x32x64xbf16, #tpu.memory_space<vmem>>, vector<1x32x64xbf16>
    %246 = vector.shape_cast %245 : vector<1x32x64xbf16> to vector<32x64xbf16>
    %c0_110 = arith.constant 0 : index
    %c0_111 = arith.constant 0 : index
    %c0_112 = arith.constant 0 : index
    %247 = vector.load %arg24[%c0_110, %c0_111, %c0_112] : memref<1x1x64xf32, #tpu.memory_space<vmem>>, vector<1x1x64xf32>
    %248 = vector.shape_cast %247 : vector<1x1x64xf32> to vector<1x64xf32>
    %249 = arith.truncf %244 : vector<16x32xf32> to vector<16x32xbf16>
    %cst_113 = arith.constant dense<0.000000e+00> : vector<16x64xf32>
    %250 = tpu.matmul %249, %246, %cst_113 {dimension_numbers = #tpu.dot_dimension_numbers<[1], [0], [0], [1], [0, 0, 1, 1], [], []>} : vector<16x32xbf16>, vector<32x64xbf16>, vector<16x64xf32> -> vector<16x64xf32>
    %251 = vector.broadcast %248 : vector<1x64xf32> to vector<16x64xf32>
    %252 = arith.addf %250, %251 : vector<16x64xf32>
    %253 = arith.mulf %252, %252 : vector<16x64xf32>
    %254 = arith.mulf %252, %253 : vector<16x64xf32>
    %cst_114 = arith.constant 4.471500e-02 : f32
    %255 = vector.broadcast %cst_114 : f32 to vector<16x64xf32>
    %256 = arith.mulf %255, %254 : vector<16x64xf32>
    %257 = arith.addf %252, %256 : vector<16x64xf32>
    %cst_115 = arith.constant 0.797884583 : f32
    %258 = vector.broadcast %cst_115 : f32 to vector<16x64xf32>
    %259 = arith.mulf %258, %257 : vector<16x64xf32>
    %260 = math.tanh %259 : vector<16x64xf32>
    %cst_116 = arith.constant 1.000000e+00 : f32
    %261 = vector.broadcast %cst_116 : f32 to vector<16x64xf32>
    %262 = arith.addf %261, %260 : vector<16x64xf32>
    %cst_117 = arith.constant 5.000000e-01 : f32
    %263 = vector.broadcast %cst_117 : f32 to vector<16x64xf32>
    %264 = arith.mulf %263, %262 : vector<16x64xf32>
    %265 = arith.mulf %252, %264 : vector<16x64xf32>
    %c0_118 = arith.constant 0 : index
    %c0_119 = arith.constant 0 : index
    %c0_120 = arith.constant 0 : index
    %266 = vector.load %arg25[%c0_118, %c0_119, %c0_120] : memref<1x64x32xbf16, #tpu.memory_space<vmem>>, vector<1x64x32xbf16>
    %267 = vector.shape_cast %266 : vector<1x64x32xbf16> to vector<64x32xbf16>
    %c0_121 = arith.constant 0 : index
    %c0_122 = arith.constant 0 : index
    %c0_123 = arith.constant 0 : index
    %268 = vector.load %arg26[%c0_121, %c0_122, %c0_123] : memref<1x1x32xf32, #tpu.memory_space<vmem>>, vector<1x1x32xf32>
    %269 = vector.shape_cast %268 : vector<1x1x32xf32> to vector<1x32xf32>
    %270 = arith.truncf %265 : vector<16x64xf32> to vector<16x64xbf16>
    %cst_124 = arith.constant dense<0.000000e+00> : vector<16x32xf32>
    %271 = tpu.matmul %270, %267, %cst_124 {dimension_numbers = #tpu.dot_dimension_numbers<[1], [0], [0], [1], [0, 0, 1, 1], [], []>} : vector<16x64xbf16>, vector<64x32xbf16>, vector<16x32xf32> -> vector<16x32xf32>
    %272 = vector.broadcast %269 : vector<1x32xf32> to vector<16x32xf32>
    %273 = arith.addf %271, %272 : vector<16x32xf32>
    %274 = vector.broadcast %7 : vector<16x1xf32> to vector<16x32xf32>
    %275 = arith.mulf %273, %274 : vector<16x32xf32>
    %276 = arith.addf %218, %275 : vector<16x32xf32>
    %277 = vector.broadcast %7 : vector<16x1xf32> to vector<16x32xf32>
    %278 = arith.mulf %276, %277 : vector<16x32xf32>
    %c0_125 = arith.constant 0 : index
    %c0_126 = arith.constant 0 : index
    %279 = vector.load %arg28[%c0_125, %c0_126] : memref<16x32xf32, #tpu.memory_space<vmem>>, vector<16x32xf32>
    tpu.vector_store %arg28[%c0_125, %c0_126], %278 {strides = array<i32>} : memref<16x32xf32, #tpu.memory_space<vmem>>, vector<16x32xf32>,
    %c1_i32 = arith.constant 1 : i32
    %280 = arith.cmpi eq, %arg1, %c1_i32 : i32
    %281 = arith.extui %280 : i1 to i32
    %c0_i32_127 = arith.constant 0 : i32
    %282 = arith.cmpi ne, %281, %c0_i32_127 : i32
    scf.if %282 {
      %c0_128 = arith.constant 0 : index
      %c0_129 = arith.constant 0 : index
      %c0_130 = arith.constant 0 : index
      %283 = vector.load %arg27[%c0_128, %c0_129, %c0_130] : memref<1x16x32xf32, #tpu.memory_space<vmem>>, vector<1x16x32xf32>
      %284 = vector.shape_cast %283 : vector<1x16x32xf32> to vector<16x32xf32>
      %285 = vector.shape_cast %278 : vector<16x32xf32> to vector<1x16x32xf32>
      tpu.vector_store %arg27[%c0_128, %c0_129, %c0_130], %285 {strides = array<i32>} : memref<1x16x32xf32, #tpu.memory_space<vmem>>, vector<1x16x32xf32>,
    } else {
    }
    return
  }
  func.func @transform_0(%arg0: i32, %arg1: i32) -> (i32, i32, i32) {
    %c0_i32 = arith.constant 0 : i32
    %c0_i32_0 = arith.constant 0 : i32
    %c0_i32_1 = arith.constant 0 : i32
    return %arg0, %c0_i32, %c0_i32_0 : i32, i32, i32
  }
  func.func @transform_1(%arg0: i32, %arg1: i32) -> (i32, i32, i32) {
    %c0_i32 = arith.constant 0 : i32
    %c0_i32_0 = arith.constant 0 : i32
    %c0_i32_1 = arith.constant 0 : i32
    return %arg0, %c0_i32, %c0_i32_0 : i32, i32, i32
  }
  func.func @transform_2(%arg0: i32, %arg1: i32) -> (i32, i32, i32) {
    %c0_i32 = arith.constant 0 : i32
    %c0_i32_0 = arith.constant 0 : i32
    %c0_i32_1 = arith.constant 0 : i32
    return %arg0, %c0_i32, %c0_i32_0 : i32, i32, i32
  }
  func.func @transform_3(%arg0: i32, %arg1: i32) -> (i32, i32, i32) {
    %c0_i32 = arith.constant 0 : i32
    %c0_i32_0 = arith.constant 0 : i32
    %c0_i32_1 = arith.constant 0 : i32
    return %arg0, %c0_i32, %c0_i32_0 : i32, i32, i32
  }
  func.func @transform_4(%arg0: i32, %arg1: i32) -> (i32, i32, i32) {
    %c0_i32 = arith.constant 0 : i32
    %c0_i32_0 = arith.constant 0 : i32
    %c0_i32_1 = arith.constant 0 : i32
    return %arg0, %c0_i32, %c0_i32_0 : i32, i32, i32
  }
  func.func @transform_5(%arg0: i32, %arg1: i32) -> (i32, i32, i32) {
    %c0_i32 = arith.constant 0 : i32
    %c0_i32_0 = arith.constant 0 : i32
    %c0_i32_1 = arith.constant 0 : i32
    return %arg1, %c0_i32, %c0_i32_0 : i32, i32, i32
  }
  func.func @transform_6(%arg0: i32, %arg1: i32) -> (i32, i32, i32) {
    %c0_i32 = arith.constant 0 : i32
    %c0_i32_0 = arith.constant 0 : i32
    %c0_i32_1 = arith.constant 0 : i32
    return %arg1, %c0_i32, %c0_i32_0 : i32, i32, i32
  }
  func.func @transform_7(%arg0: i32, %arg1: i32) -> (i32, i32, i32) {
    %c0_i32 = arith.constant 0 : i32
    %c0_i32_0 = arith.constant 0 : i32
    %c0_i32_1 = arith.constant 0 : i32
    return %arg1, %c0_i32, %c0_i32_0 : i32, i32, i32
  }
  func.func @transform_8(%arg0: i32, %arg1: i32) -> (i32, i32, i32) {
    %c0_i32 = arith.constant 0 : i32
    %c0_i32_0 = arith.constant 0 : i32
    %c0_i32_1 = arith.constant 0 : i32
    return %arg1, %c0_i32, %c0_i32_0 : i32, i32, i32
  }
  func.func @transform_9(%arg0: i32, %arg1: i32) -> (i32, i32, i32) {
    %c0_i32 = arith.constant 0 : i32
    %c0_i32_0 = arith.constant 0 : i32
    %c0_i32_1 = arith.constant 0 : i32
    return %arg1, %c0_i32, %c0_i32_0 : i32, i32, i32
  }
  func.func @transform_10(%arg0: i32, %arg1: i32) -> (i32, i32, i32) {
    %c0_i32 = arith.constant 0 : i32
    %c0_i32_0 = arith.constant 0 : i32
    %c0_i32_1 = arith.constant 0 : i32
    return %arg1, %c0_i32, %c0_i32_0 : i32, i32, i32
  }
  func.func @transform_11(%arg0: i32, %arg1: i32) -> (i32, i32, i32) {
    %c0_i32 = arith.constant 0 : i32
    %c0_i32_0 = arith.constant 0 : i32
    %c0_i32_1 = arith.constant 0 : i32
    return %arg1, %c0_i32, %c0_i32_0 : i32, i32, i32
  }
  func.func @transform_12(%arg0: i32, %arg1: i32) -> (i32, i32, i32) {
    %c0_i32 = arith.constant 0 : i32
    %c0_i32_0 = arith.constant 0 : i32
    %c0_i32_1 = arith.constant 0 : i32
    return %arg1, %c0_i32, %c0_i32_0 : i32, i32, i32
  }
  func.func @transform_13(%arg0: i32, %arg1: i32) -> (i32, i32, i32) {
    %c0_i32 = arith.constant 0 : i32
    %c0_i32_0 = arith.constant 0 : i32
    %c0_i32_1 = arith.constant 0 : i32
    return %arg1, %c0_i32, %c0_i32_0 : i32, i32, i32
  }
  func.func @transform_14(%arg0: i32, %arg1: i32) -> (i32, i32, i32) {
    %c0_i32 = arith.constant 0 : i32
    %c0_i32_0 = arith.constant 0 : i32
    %c0_i32_1 = arith.constant 0 : i32
    return %arg1, %c0_i32, %c0_i32_0 : i32, i32, i32
  }
  func.func @transform_15(%arg0: i32, %arg1: i32) -> (i32, i32, i32) {
    %c0_i32 = arith.constant 0 : i32
    %c0_i32_0 = arith.constant 0 : i32
    %c0_i32_1 = arith.constant 0 : i32
    return %arg1, %c0_i32, %c0_i32_0 : i32, i32, i32
  }
  func.func @transform_16(%arg0: i32, %arg1: i32) -> (i32, i32, i32) {
    %c0_i32 = arith.constant 0 : i32
    %c0_i32_0 = arith.constant 0 : i32
    %c0_i32_1 = arith.constant 0 : i32
    return %arg1, %c0_i32, %c0_i32_0 : i32, i32, i32
  }
  func.func @transform_17(%arg0: i32, %arg1: i32) -> (i32, i32, i32) {
    %c0_i32 = arith.constant 0 : i32
    %c0_i32_0 = arith.constant 0 : i32
    %c0_i32_1 = arith.constant 0 : i32
    return %arg1, %c0_i32, %c0_i32_0 : i32, i32, i32
  }
  func.func @transform_18(%arg0: i32, %arg1: i32) -> (i32, i32, i32) {
    %c0_i32 = arith.constant 0 : i32
    %c0_i32_0 = arith.constant 0 : i32
    %c0_i32_1 = arith.constant 0 : i32
    return %arg1, %c0_i32, %c0_i32_0 : i32, i32, i32
  }
  func.func @transform_19(%arg0: i32, %arg1: i32) -> (i32, i32, i32) {
    %c0_i32 = arith.constant 0 : i32
    %c0_i32_0 = arith.constant 0 : i32
    %c0_i32_1 = arith.constant 0 : i32
    return %arg1, %c0_i32, %c0_i32_0 : i32, i32, i32
  }
  func.func @transform_20(%arg0: i32, %arg1: i32) -> (i32, i32, i32) {
    %c0_i32 = arith.constant 0 : i32
    %c0_i32_0 = arith.constant 0 : i32
    %c0_i32_1 = arith.constant 0 : i32
    return %arg1, %c0_i32, %c0_i32_0 : i32, i32, i32
  }
  func.func @transform_21(%arg0: i32, %arg1: i32) -> (i32, i32, i32) {
    %c0_i32 = arith.constant 0 : i32
    %c0_i32_0 = arith.constant 0 : i32
    %c0_i32_1 = arith.constant 0 : i32
    return %arg1, %c0_i32, %c0_i32_0 : i32, i32, i32
  }
  func.func @transform_22(%arg0: i32, %arg1: i32) -> (i32, i32, i32) {
    %c0_i32 = arith.constant 0 : i32
    %c0_i32_0 = arith.constant 0 : i32
    %c0_i32_1 = arith.constant 0 : i32
    return %arg1, %c0_i32, %c0_i32_0 : i32, i32, i32
  }
  func.func @transform_23(%arg0: i32, %arg1: i32) -> (i32, i32, i32) {
    %c0_i32 = arith.constant 0 : i32
    %c0_i32_0 = arith.constant 0 : i32
    %c0_i32_1 = arith.constant 0 : i32
    return %arg1, %c0_i32, %c0_i32_0 : i32, i32, i32
  }
  func.func @transform_24(%arg0: i32, %arg1: i32) -> (i32, i32, i32) {
    %c0_i32 = arith.constant 0 : i32
    %c0_i32_0 = arith.constant 0 : i32
    %c0_i32_1 = arith.constant 0 : i32
    return %arg1, %c0_i32, %c0_i32_0 : i32, i32, i32
  }
  func.func @transform_25(%arg0: i32, %arg1: i32) -> (i32, i32, i32) {
    %c0_i32 = arith.constant 0 : i32
    %c0_i32_0 = arith.constant 0 : i32
    %c0_i32_1 = arith.constant 0 : i32
    return %arg0, %c0_i32, %c0_i32_0 : i32, i32, i32
  }
}

module attributes {stable_mosaic.version = 11 : i64} {
  func.func @_linear_kernel(%arg0: i32, %arg1: i32, %arg2: i32, %arg3: memref<32x32xf32, #tpu.memory_space<vmem>>, %arg4: memref<32x32xbf16, #tpu.memory_space<vmem>>, %arg5: memref<1x32xf32, #tpu.memory_space<vmem>>, %arg6: memref<32x32xf32, #tpu.memory_space<vmem>>, %arg7: memref<32x32xf32, #tpu.memory_space<vmem>>) attributes {dimension_semantics = [#tpu.dimension_semantics<parallel>, #tpu.dimension_semantics<parallel>, #tpu.dimension_semantics<arbitrary>], iteration_bounds = array<i64: 1, 1, 1>, scalar_prefetch = 0 : i64, scratch_operands = 1 : i64, tpu.core_type = #tpu.core_type<tc>, window_params = [{transform_indices = @transform_0, window_bounds = array<i64: 32, 32>}, {transform_indices = @transform_1, window_bounds = array<i64: 32, 32>}, {transform_indices = @transform_2, window_bounds = array<i64: 1, 32>}, {transform_indices = @transform_3, window_bounds = array<i64: 32, 32>}]} {
    %c0_i32 = arith.constant 0 : i32
    %0 = arith.cmpi eq, %arg2, %c0_i32 : i32
    %1 = arith.extui %0 : i1 to i32
    %c0_i32_0 = arith.constant 0 : i32
    %2 = arith.cmpi ne, %1, %c0_i32_0 : i32
    scf.if %2 {
      %cst_10 = arith.constant 0.000000e+00 : f32
      %13 = vector.broadcast %cst_10 : f32 to vector<32x32xf32>
      %c0_11 = arith.constant 0 : index
      %c0_12 = arith.constant 0 : index
      %14 = vector.load %arg7[%c0_11, %c0_12] : memref<32x32xf32, #tpu.memory_space<vmem>>, vector<32x32xf32>
      tpu.vector_store %arg7[%c0_11, %c0_12], %13 {strides = array<i32>} : memref<32x32xf32, #tpu.memory_space<vmem>>, vector<32x32xf32>,
    } else {
    }
    %c0 = arith.constant 0 : index
    %c0_1 = arith.constant 0 : index
    %3 = vector.load %arg7[%c0, %c0_1] : memref<32x32xf32, #tpu.memory_space<vmem>>, vector<32x32xf32>
    %c0_2 = arith.constant 0 : index
    %c0_3 = arith.constant 0 : index
    %4 = vector.load %arg3[%c0_2, %c0_3] : memref<32x32xf32, #tpu.memory_space<vmem>>, vector<32x32xf32>
    %5 = arith.truncf %4 : vector<32x32xf32> to vector<32x32xbf16>
    %c0_4 = arith.constant 0 : index
    %c0_5 = arith.constant 0 : index
    %6 = vector.load %arg4[%c0_4, %c0_5] : memref<32x32xbf16, #tpu.memory_space<vmem>>, vector<32x32xbf16>
    %cst = arith.constant dense<0.000000e+00> : vector<32x32xf32>
    %7 = tpu.matmul %5, %6, %cst {dimension_numbers = #tpu.dot_dimension_numbers<[1], [0], [0], [1], [0, 0, 1, 1], [], []>} : vector<32x32xbf16>, vector<32x32xbf16>, vector<32x32xf32> -> vector<32x32xf32>
    %8 = arith.addf %3, %7 : vector<32x32xf32>
    %c0_6 = arith.constant 0 : index
    %c0_7 = arith.constant 0 : index
    %9 = vector.load %arg7[%c0_6, %c0_7] : memref<32x32xf32, #tpu.memory_space<vmem>>, vector<32x32xf32>
    tpu.vector_store %arg7[%c0_6, %c0_7], %8 {strides = array<i32>} : memref<32x32xf32, #tpu.memory_space<vmem>>, vector<32x32xf32>,
    %c0_i32_8 = arith.constant 0 : i32
    %10 = arith.cmpi eq, %arg2, %c0_i32_8 : i32
    %11 = arith.extui %10 : i1 to i32
    %c0_i32_9 = arith.constant 0 : i32
    %12 = arith.cmpi ne, %11, %c0_i32_9 : i32
    scf.if %12 {
      %c0_10 = arith.constant 0 : index
      %c0_11 = arith.constant 0 : index
      %13 = vector.load %arg7[%c0_10, %c0_11] : memref<32x32xf32, #tpu.memory_space<vmem>>, vector<32x32xf32>
      %c0_12 = arith.constant 0 : index
      %c0_13 = arith.constant 0 : index
      %14 = vector.load %arg5[%c0_12, %c0_13] : memref<1x32xf32, #tpu.memory_space<vmem>>, vector<1x32xf32>
      %15 = vector.broadcast %14 : vector<1x32xf32> to vector<32x32xf32>
      %16 = arith.addf %13, %15 : vector<32x32xf32>
      %c0_14 = arith.constant 0 : index
      %c0_15 = arith.constant 0 : index
      %17 = vector.load %arg6[%c0_14, %c0_15] : memref<32x32xf32, #tpu.memory_space<vmem>>, vector<32x32xf32>
      tpu.vector_store %arg6[%c0_14, %c0_15], %16 {strides = array<i32>} : memref<32x32xf32, #tpu.memory_space<vmem>>, vector<32x32xf32>,
    } else {
    }
    return
  }
  func.func @transform_0(%arg0: i32, %arg1: i32, %arg2: i32) -> (i32, i32) {
    %c0_i32 = arith.constant 0 : i32
    return %arg0, %arg2 : i32, i32
  }
  func.func @transform_1(%arg0: i32, %arg1: i32, %arg2: i32) -> (i32, i32) {
    %c0_i32 = arith.constant 0 : i32
    return %arg2, %arg1 : i32, i32
  }
  func.func @transform_2(%arg0: i32, %arg1: i32, %arg2: i32) -> (i32, i32) {
    %c0_i32 = arith.constant 0 : i32
    %c0_i32_0 = arith.constant 0 : i32
    return %c0_i32, %arg1 : i32, i32
  }
  func.func @transform_3(%arg0: i32, %arg1: i32, %arg2: i32) -> (i32, i32) {
    %c0_i32 = arith.constant 0 : i32
    return %arg0, %arg1 : i32, i32
  }
}

module attributes {stable_mosaic.version = 11 : i64} {
  func.func @_linear_kernel(%arg0: i32, %arg1: i32, %arg2: i32, %arg3: memref<32x48xf32, #tpu.memory_space<vmem>>, %arg4: memref<48x32xbf16, #tpu.memory_space<vmem>>, %arg5: memref<1x32xf32, #tpu.memory_space<vmem>>, %arg6: memref<32x32xf32, #tpu.memory_space<vmem>>, %arg7: memref<32x32xf32, #tpu.memory_space<vmem>>) attributes {dimension_semantics = [#tpu.dimension_semantics<parallel>, #tpu.dimension_semantics<parallel>, #tpu.dimension_semantics<arbitrary>], iteration_bounds = array<i64: 1, 1, 1>, scalar_prefetch = 0 : i64, scratch_operands = 1 : i64, tpu.core_type = #tpu.core_type<tc>, window_params = [{transform_indices = @transform_0, window_bounds = array<i64: 32, 48>}, {transform_indices = @transform_1, window_bounds = array<i64: 48, 32>}, {transform_indices = @transform_2, window_bounds = array<i64: 1, 32>}, {transform_indices = @transform_3, window_bounds = array<i64: 32, 32>}]} {
    %c0_i32 = arith.constant 0 : i32
    %0 = arith.cmpi eq, %arg2, %c0_i32 : i32
    %1 = arith.extui %0 : i1 to i32
    %c0_i32_0 = arith.constant 0 : i32
    %2 = arith.cmpi ne, %1, %c0_i32_0 : i32
    scf.if %2 {
      %cst_10 = arith.constant 0.000000e+00 : f32
      %13 = vector.broadcast %cst_10 : f32 to vector<32x32xf32>
      %c0_11 = arith.constant 0 : index
      %c0_12 = arith.constant 0 : index
      %14 = vector.load %arg7[%c0_11, %c0_12] : memref<32x32xf32, #tpu.memory_space<vmem>>, vector<32x32xf32>
      tpu.vector_store %arg7[%c0_11, %c0_12], %13 {strides = array<i32>} : memref<32x32xf32, #tpu.memory_space<vmem>>, vector<32x32xf32>,
    } else {
    }
    %c0 = arith.constant 0 : index
    %c0_1 = arith.constant 0 : index
    %3 = vector.load %arg7[%c0, %c0_1] : memref<32x32xf32, #tpu.memory_space<vmem>>, vector<32x32xf32>
    %c0_2 = arith.constant 0 : index
    %c0_3 = arith.constant 0 : index
    %4 = vector.load %arg3[%c0_2, %c0_3] : memref<32x48xf32, #tpu.memory_space<vmem>>, vector<32x48xf32>
    %5 = arith.truncf %4 : vector<32x48xf32> to vector<32x48xbf16>
    %c0_4 = arith.constant 0 : index
    %c0_5 = arith.constant 0 : index
    %6 = vector.load %arg4[%c0_4, %c0_5] : memref<48x32xbf16, #tpu.memory_space<vmem>>, vector<48x32xbf16>
    %cst = arith.constant dense<0.000000e+00> : vector<32x32xf32>
    %7 = tpu.matmul %5, %6, %cst {dimension_numbers = #tpu.dot_dimension_numbers<[1], [0], [0], [1], [0, 0, 1, 1], [], []>} : vector<32x48xbf16>, vector<48x32xbf16>, vector<32x32xf32> -> vector<32x32xf32>
    %8 = arith.addf %3, %7 : vector<32x32xf32>
    %c0_6 = arith.constant 0 : index
    %c0_7 = arith.constant 0 : index
    %9 = vector.load %arg7[%c0_6, %c0_7] : memref<32x32xf32, #tpu.memory_space<vmem>>, vector<32x32xf32>
    tpu.vector_store %arg7[%c0_6, %c0_7], %8 {strides = array<i32>} : memref<32x32xf32, #tpu.memory_space<vmem>>, vector<32x32xf32>,
    %c0_i32_8 = arith.constant 0 : i32
    %10 = arith.cmpi eq, %arg2, %c0_i32_8 : i32
    %11 = arith.extui %10 : i1 to i32
    %c0_i32_9 = arith.constant 0 : i32
    %12 = arith.cmpi ne, %11, %c0_i32_9 : i32
    scf.if %12 {
      %c0_10 = arith.constant 0 : index
      %c0_11 = arith.constant 0 : index
      %13 = vector.load %arg7[%c0_10, %c0_11] : memref<32x32xf32, #tpu.memory_space<vmem>>, vector<32x32xf32>
      %c0_12 = arith.constant 0 : index
      %c0_13 = arith.constant 0 : index
      %14 = vector.load %arg5[%c0_12, %c0_13] : memref<1x32xf32, #tpu.memory_space<vmem>>, vector<1x32xf32>
      %15 = vector.broadcast %14 : vector<1x32xf32> to vector<32x32xf32>
      %16 = arith.addf %13, %15 : vector<32x32xf32>
      %c0_14 = arith.constant 0 : index
      %c0_15 = arith.constant 0 : index
      %17 = vector.load %arg6[%c0_14, %c0_15] : memref<32x32xf32, #tpu.memory_space<vmem>>, vector<32x32xf32>
      tpu.vector_store %arg6[%c0_14, %c0_15], %16 {strides = array<i32>} : memref<32x32xf32, #tpu.memory_space<vmem>>, vector<32x32xf32>,
    } else {
    }
    return
  }
  func.func @transform_0(%arg0: i32, %arg1: i32, %arg2: i32) -> (i32, i32) {
    %c0_i32 = arith.constant 0 : i32
    return %arg0, %arg2 : i32, i32
  }
  func.func @transform_1(%arg0: i32, %arg1: i32, %arg2: i32) -> (i32, i32) {
    %c0_i32 = arith.constant 0 : i32
    return %arg2, %arg1 : i32, i32
  }
  func.func @transform_2(%arg0: i32, %arg1: i32, %arg2: i32) -> (i32, i32) {
    %c0_i32 = arith.constant 0 : i32
    %c0_i32_0 = arith.constant 0 : i32
    return %c0_i32, %arg1 : i32, i32
  }
  func.func @transform_3(%arg0: i32, %arg1: i32, %arg2: i32) -> (i32, i32) {
    %c0_i32 = arith.constant 0 : i32
    return %arg0, %arg1 : i32, i32
  }
}

module attributes {stable_mosaic.version = 11 : i64} {
  func.func @_linear_kernel(%arg0: i32, %arg1: i32, %arg2: i32, %arg3: memref<2x32xf32, #tpu.memory_space<vmem>>, %arg4: memref<32x32xbf16, #tpu.memory_space<vmem>>, %arg5: memref<1x32xf32, #tpu.memory_space<vmem>>, %arg6: memref<2x32xf32, #tpu.memory_space<vmem>>, %arg7: memref<2x32xf32, #tpu.memory_space<vmem>>) attributes {dimension_semantics = [#tpu.dimension_semantics<parallel>, #tpu.dimension_semantics<parallel>, #tpu.dimension_semantics<arbitrary>], iteration_bounds = array<i64: 1, 1, 1>, scalar_prefetch = 0 : i64, scratch_operands = 1 : i64, tpu.core_type = #tpu.core_type<tc>, window_params = [{transform_indices = @transform_0, window_bounds = array<i64: 2, 32>}, {transform_indices = @transform_1, window_bounds = array<i64: 32, 32>}, {transform_indices = @transform_2, window_bounds = array<i64: 1, 32>}, {transform_indices = @transform_3, window_bounds = array<i64: 2, 32>}]} {
    %c0_i32 = arith.constant 0 : i32
    %0 = arith.cmpi eq, %arg2, %c0_i32 : i32
    %1 = arith.extui %0 : i1 to i32
    %c0_i32_0 = arith.constant 0 : i32
    %2 = arith.cmpi ne, %1, %c0_i32_0 : i32
    scf.if %2 {
      %cst_10 = arith.constant 0.000000e+00 : f32
      %13 = vector.broadcast %cst_10 : f32 to vector<2x32xf32>
      %c0_11 = arith.constant 0 : index
      %c0_12 = arith.constant 0 : index
      %14 = vector.load %arg7[%c0_11, %c0_12] : memref<2x32xf32, #tpu.memory_space<vmem>>, vector<2x32xf32>
      tpu.vector_store %arg7[%c0_11, %c0_12], %13 {strides = array<i32>} : memref<2x32xf32, #tpu.memory_space<vmem>>, vector<2x32xf32>,
    } else {
    }
    %c0 = arith.constant 0 : index
    %c0_1 = arith.constant 0 : index
    %3 = vector.load %arg7[%c0, %c0_1] : memref<2x32xf32, #tpu.memory_space<vmem>>, vector<2x32xf32>
    %c0_2 = arith.constant 0 : index
    %c0_3 = arith.constant 0 : index
    %4 = vector.load %arg3[%c0_2, %c0_3] : memref<2x32xf32, #tpu.memory_space<vmem>>, vector<2x32xf32>
    %5 = arith.truncf %4 : vector<2x32xf32> to vector<2x32xbf16>
    %c0_4 = arith.constant 0 : index
    %c0_5 = arith.constant 0 : index
    %6 = vector.load %arg4[%c0_4, %c0_5] : memref<32x32xbf16, #tpu.memory_space<vmem>>, vector<32x32xbf16>
    %cst = arith.constant dense<0.000000e+00> : vector<2x32xf32>
    %7 = tpu.matmul %5, %6, %cst {dimension_numbers = #tpu.dot_dimension_numbers<[1], [0], [0], [1], [0, 0, 1, 1], [], []>} : vector<2x32xbf16>, vector<32x32xbf16>, vector<2x32xf32> -> vector<2x32xf32>
    %8 = arith.addf %3, %7 : vector<2x32xf32>
    %c0_6 = arith.constant 0 : index
    %c0_7 = arith.constant 0 : index
    %9 = vector.load %arg7[%c0_6, %c0_7] : memref<2x32xf32, #tpu.memory_space<vmem>>, vector<2x32xf32>
    tpu.vector_store %arg7[%c0_6, %c0_7], %8 {strides = array<i32>} : memref<2x32xf32, #tpu.memory_space<vmem>>, vector<2x32xf32>,
    %c0_i32_8 = arith.constant 0 : i32
    %10 = arith.cmpi eq, %arg2, %c0_i32_8 : i32
    %11 = arith.extui %10 : i1 to i32
    %c0_i32_9 = arith.constant 0 : i32
    %12 = arith.cmpi ne, %11, %c0_i32_9 : i32
    scf.if %12 {
      %c0_10 = arith.constant 0 : index
      %c0_11 = arith.constant 0 : index
      %13 = vector.load %arg7[%c0_10, %c0_11] : memref<2x32xf32, #tpu.memory_space<vmem>>, vector<2x32xf32>
      %c0_12 = arith.constant 0 : index
      %c0_13 = arith.constant 0 : index
      %14 = vector.load %arg5[%c0_12, %c0_13] : memref<1x32xf32, #tpu.memory_space<vmem>>, vector<1x32xf32>
      %15 = vector.broadcast %14 : vector<1x32xf32> to vector<2x32xf32>
      %16 = arith.addf %13, %15 : vector<2x32xf32>
      %c0_14 = arith.constant 0 : index
      %c0_15 = arith.constant 0 : index
      %17 = vector.load %arg6[%c0_14, %c0_15] : memref<2x32xf32, #tpu.memory_space<vmem>>, vector<2x32xf32>
      tpu.vector_store %arg6[%c0_14, %c0_15], %16 {strides = array<i32>} : memref<2x32xf32, #tpu.memory_space<vmem>>, vector<2x32xf32>,
    } else {
    }
    return
  }
  func.func @transform_0(%arg0: i32, %arg1: i32, %arg2: i32) -> (i32, i32) {
    %c0_i32 = arith.constant 0 : i32
    return %arg0, %arg2 : i32, i32
  }
  func.func @transform_1(%arg0: i32, %arg1: i32, %arg2: i32) -> (i32, i32) {
    %c0_i32 = arith.constant 0 : i32
    return %arg2, %arg1 : i32, i32
  }
  func.func @transform_2(%arg0: i32, %arg1: i32, %arg2: i32) -> (i32, i32) {
    %c0_i32 = arith.constant 0 : i32
    %c0_i32_0 = arith.constant 0 : i32
    return %c0_i32, %arg1 : i32, i32
  }
  func.func @transform_3(%arg0: i32, %arg1: i32, %arg2: i32) -> (i32, i32) {
    %c0_i32 = arith.constant 0 : i32
    return %arg0, %arg1 : i32, i32
  }
}

module attributes {stable_mosaic.version = 11 : i64} {
  func.func @_block_stack_kernel(%arg0: i32, %arg1: i32, %arg2: memref<1x16x32xf32, #tpu.memory_space<vmem>>, %arg3: memref<1x32x32xf32, #tpu.memory_space<vmem>>, %arg4: memref<1x16x1xf32, #tpu.memory_space<vmem>>, %arg5: memref<1x1x16xf32, #tpu.memory_space<vmem>>, %arg6: memref<1x1x32xf32, #tpu.memory_space<vmem>>, %arg7: memref<1x1x32xf32, #tpu.memory_space<vmem>>, %arg8: memref<1x1x32xf32, #tpu.memory_space<vmem>>, %arg9: memref<1x32x96xbf16, #tpu.memory_space<vmem>>, %arg10: memref<1x1x96xf32, #tpu.memory_space<vmem>>, %arg11: memref<1x32x32xbf16, #tpu.memory_space<vmem>>, %arg12: memref<1x1x32xf32, #tpu.memory_space<vmem>>, %arg13: memref<1x1x32xf32, #tpu.memory_space<vmem>>, %arg14: memref<1x1x32xf32, #tpu.memory_space<vmem>>, %arg15: memref<1x32x32xbf16, #tpu.memory_space<vmem>>, %arg16: memref<1x1x32xf32, #tpu.memory_space<vmem>>, %arg17: memref<1x32x64xbf16, #tpu.memory_space<vmem>>, %arg18: memref<1x1x64xf32, #tpu.memory_space<vmem>>, %arg19: memref<1x32x32xbf16, #tpu.memory_space<vmem>>, %arg20: memref<1x1x32xf32, #tpu.memory_space<vmem>>, %arg21: memref<1x1x32xf32, #tpu.memory_space<vmem>>, %arg22: memref<1x1x32xf32, #tpu.memory_space<vmem>>, %arg23: memref<1x32x64xbf16, #tpu.memory_space<vmem>>, %arg24: memref<1x1x64xf32, #tpu.memory_space<vmem>>, %arg25: memref<1x64x32xbf16, #tpu.memory_space<vmem>>, %arg26: memref<1x1x32xf32, #tpu.memory_space<vmem>>, %arg27: memref<1x16x32xf32, #tpu.memory_space<vmem>>, %arg28: memref<16x32xf32, #tpu.memory_space<vmem>>) attributes {dimension_semantics = [#tpu.dimension_semantics<parallel>, #tpu.dimension_semantics<arbitrary>], iteration_bounds = array<i64: 2, 8>, scalar_prefetch = 0 : i64, scratch_operands = 1 : i64, tpu.core_type = #tpu.core_type<tc>, window_params = [{transform_indices = @transform_0, window_bounds = array<i64: 1, 16, 32>}, {transform_indices = @transform_1, window_bounds = array<i64: 1, 32, 32>}, {transform_indices = @transform_2, window_bounds = array<i64: 1, 16, 1>}, {transform_indices = @transform_3, window_bounds = array<i64: 1, 1, 16>}, {transform_indices = @transform_4, window_bounds = array<i64: 1, 1, 32>}, {transform_indices = @transform_5, window_bounds = array<i64: 1, 1, 32>}, {transform_indices = @transform_6, window_bounds = array<i64: 1, 1, 32>}, {transform_indices = @transform_7, window_bounds = array<i64: 1, 32, 96>}, {transform_indices = @transform_8, window_bounds = array<i64: 1, 1, 96>}, {transform_indices = @transform_9, window_bounds = array<i64: 1, 32, 32>}, {transform_indices = @transform_10, window_bounds = array<i64: 1, 1, 32>}, {transform_indices = @transform_11, window_bounds = array<i64: 1, 1, 32>}, {transform_indices = @transform_12, window_bounds = array<i64: 1, 1, 32>}, {transform_indices = @transform_13, window_bounds = array<i64: 1, 32, 32>}, {transform_indices = @transform_14, window_bounds = array<i64: 1, 1, 32>}, {transform_indices = @transform_15, window_bounds = array<i64: 1, 32, 64>}, {transform_indices = @transform_16, window_bounds = array<i64: 1, 1, 64>}, {transform_indices = @transform_17, window_bounds = array<i64: 1, 32, 32>}, {transform_indices = @transform_18, window_bounds = array<i64: 1, 1, 32>}, {transform_indices = @transform_19, window_bounds = array<i64: 1, 1, 32>}, {transform_indices = @transform_20, window_bounds = array<i64: 1, 1, 32>}, {transform_indices = @transform_21, window_bounds = array<i64: 1, 32, 64>}, {transform_indices = @transform_22, window_bounds = array<i64: 1, 1, 64>}, {transform_indices = @transform_23, window_bounds = array<i64: 1, 64, 32>}, {transform_indices = @transform_24, window_bounds = array<i64: 1, 1, 32>}, {transform_indices = @transform_25, window_bounds = array<i64: 1, 16, 32>}]} {
    %c0_i32 = arith.constant 0 : i32
    %0 = arith.cmpi eq, %arg1, %c0_i32 : i32
    %1 = arith.extui %0 : i1 to i32
    %c0_i32_0 = arith.constant 0 : i32
    %2 = arith.cmpi ne, %1, %c0_i32_0 : i32
    scf.if %2 {
      %c0_128 = arith.constant 0 : index
      %c0_129 = arith.constant 0 : index
      %c0_130 = arith.constant 0 : index
      %283 = vector.load %arg2[%c0_128, %c0_129, %c0_130] : memref<1x16x32xf32, #tpu.memory_space<vmem>>, vector<1x16x32xf32>
      %284 = vector.shape_cast %283 : vector<1x16x32xf32> to vector<16x32xf32>
      %c0_131 = arith.constant 0 : index
      %c0_132 = arith.constant 0 : index
      %285 = vector.load %arg28[%c0_131, %c0_132] : memref<16x32xf32, #tpu.memory_space<vmem>>, vector<16x32xf32>
      tpu.vector_store %arg28[%c0_131, %c0_132], %284 {strides = array<i32>} : memref<16x32xf32, #tpu.memory_space<vmem>>, vector<16x32xf32>,
    } else {
    }
    %c0 = arith.constant 0 : index
    %c0_1 = arith.constant 0 : index
    %3 = vector.load %arg28[%c0, %c0_1] : memref<16x32xf32, #tpu.memory_space<vmem>>, vector<16x32xf32>
    %c0_2 = arith.constant 0 : index
    %c0_3 = arith.constant 0 : index
    %c0_4 = arith.constant 0 : index
    %4 = vector.load %arg3[%c0_2, %c0_3, %c0_4] : memref<1x32x32xf32, #tpu.memory_space<vmem>>, vector<1x32x32xf32>
    %5 = vector.shape_cast %4 : vector<1x32x32xf32> to vector<32x32xf32>
    %c0_5 = arith.constant 0 : index
    %c0_6 = arith.constant 0 : index
    %c0_7 = arith.constant 0 : index
    %6 = vector.load %arg4[%c0_5, %c0_6, %c0_7] : memref<1x16x1xf32, #tpu.memory_space<vmem>>, vector<1x16x1xf32>
    %7 = vector.shape_cast %6 : vector<1x16x1xf32> to vector<16x1xf32>
    %c0_8 = arith.constant 0 : index
    %c0_9 = arith.constant 0 : index
    %c0_10 = arith.constant 0 : index
    %8 = vector.load %arg5[%c0_8, %c0_9, %c0_10] : memref<1x1x16xf32, #tpu.memory_space<vmem>>, vector<1x1x16xf32>
    %9 = vector.shape_cast %8 : vector<1x1x16xf32> to vector<1x16xf32>
    %c0_11 = arith.constant 0 : index
    %c0_12 = arith.constant 0 : index
    %c0_13 = arith.constant 0 : index
    %10 = vector.load %arg6[%c0_11, %c0_12, %c0_13] : memref<1x1x32xf32, #tpu.memory_space<vmem>>, vector<1x1x32xf32>
    %11 = vector.shape_cast %10 : vector<1x1x32xf32> to vector<1x32xf32>
    %c0_14 = arith.constant 0 : index
    %c0_15 = arith.constant 0 : index
    %c0_16 = arith.constant 0 : index
    %12 = vector.load %arg7[%c0_14, %c0_15, %c0_16] : memref<1x1x32xf32, #tpu.memory_space<vmem>>, vector<1x1x32xf32>
    %13 = vector.shape_cast %12 : vector<1x1x32xf32> to vector<1x32xf32>
    %c0_17 = arith.constant 0 : index
    %c0_18 = arith.constant 0 : index
    %c0_19 = arith.constant 0 : index
    %14 = vector.load %arg8[%c0_17, %c0_18, %c0_19] : memref<1x1x32xf32, #tpu.memory_space<vmem>>, vector<1x1x32xf32>
    %15 = vector.shape_cast %14 : vector<1x1x32xf32> to vector<1x32xf32>
    %cst = arith.constant dense<0.000000e+00> : vector<16xf32>
    %16 = vector.multi_reduction <add>, %3, %cst [1] : vector<16x32xf32> to vector<16xf32>
    %17 = vector.shape_cast %16 : vector<16xf32> to vector<16x1xf32>
    %cst_20 = arith.constant 3.200000e+01 : f32
    %18 = vector.broadcast %cst_20 : f32 to vector<16x1xf32>
    %19 = arith.divf %17, %18 : vector<16x1xf32>
    %20 = vector.broadcast %19 : vector<16x1xf32> to vector<16x32xf32>
    %21 = arith.subf %3, %20 : vector<16x32xf32>
    %22 = arith.mulf %21, %21 : vector<16x32xf32>
    %cst_21 = arith.constant dense<0.000000e+00> : vector<16xf32>
    %23 = vector.multi_reduction <add>, %22, %cst_21 [1] : vector<16x32xf32> to vector<16xf32>
    %24 = vector.shape_cast %23 : vector<16xf32> to vector<16x1xf32>
    %cst_22 = arith.constant 3.200000e+01 : f32
    %25 = vector.broadcast %cst_22 : f32 to vector<16x1xf32>
    %26 = arith.divf %24, %25 : vector<16x1xf32>
    %27 = vector.broadcast %19 : vector<16x1xf32> to vector<16x32xf32>
    %28 = arith.subf %3, %27 : vector<16x32xf32>
    %cst_23 = arith.constant 9.99999974E-6 : f32
    %29 = vector.broadcast %cst_23 : f32 to vector<16x1xf32>
    %30 = arith.addf %26, %29 : vector<16x1xf32>
    %31 = math.rsqrt %30 : vector<16x1xf32>
    %32 = vector.broadcast %31 : vector<16x1xf32> to vector<16x32xf32>
    %33 = arith.mulf %28, %32 : vector<16x32xf32>
    %34 = vector.broadcast %13 : vector<1x32xf32> to vector<16x32xf32>
    %35 = arith.mulf %33, %34 : vector<16x32xf32>
    %36 = vector.broadcast %15 : vector<1x32xf32> to vector<16x32xf32>
    %37 = arith.addf %35, %36 : vector<16x32xf32>
    %c0_24 = arith.constant 0 : index
    %c0_25 = arith.constant 0 : index
    %c0_26 = arith.constant 0 : index
    %38 = vector.load %arg9[%c0_24, %c0_25, %c0_26] : memref<1x32x96xbf16, #tpu.memory_space<vmem>>, vector<1x32x96xbf16>
    %39 = vector.shape_cast %38 : vector<1x32x96xbf16> to vector<32x96xbf16>
    %c0_27 = arith.constant 0 : index
    %c0_28 = arith.constant 0 : index
    %c0_29 = arith.constant 0 : index
    %40 = vector.load %arg10[%c0_27, %c0_28, %c0_29] : memref<1x1x96xf32, #tpu.memory_space<vmem>>, vector<1x1x96xf32>
    %41 = vector.shape_cast %40 : vector<1x1x96xf32> to vector<1x96xf32>
    %42 = arith.truncf %37 : vector<16x32xf32> to vector<16x32xbf16>
    %cst_30 = arith.constant dense<0.000000e+00> : vector<16x96xf32>
    %43 = tpu.matmul %42, %39, %cst_30 {dimension_numbers = #tpu.dot_dimension_numbers<[1], [0], [0], [1], [0, 0, 1, 1], [], []>} : vector<16x32xbf16>, vector<32x96xbf16>, vector<16x96xf32> -> vector<16x96xf32>
    %44 = vector.broadcast %41 : vector<1x96xf32> to vector<16x96xf32>
    %45 = arith.addf %43, %44 : vector<16x96xf32>
    %46 = vector.extract_strided_slice %45 {offsets = [0, 0], sizes = [16, 32], strides = [1, 1]} : vector<16x96xf32> to vector<16x32xf32>
    %47 = vector.extract_strided_slice %45 {offsets = [0, 32], sizes = [16, 32], strides = [1, 1]} : vector<16x96xf32> to vector<16x32xf32>
    %48 = vector.extract_strided_slice %45 {offsets = [0, 64], sizes = [16, 32], strides = [1, 1]} : vector<16x96xf32> to vector<16x32xf32>
    %cst_31 = arith.constant 5.000000e-01 : f32
    %49 = vector.broadcast %cst_31 : f32 to vector<1x16xf32>
    %50 = arith.cmpf ogt, %9, %49 : vector<1x16xf32>
    %cst_32 = arith.constant 0.000000e+00 : f32
    %cst_33 = arith.constant -1.000000e+09 : f32
    %51 = vector.broadcast %cst_32 : f32 to vector<1x16xf32>
    %52 = vector.broadcast %cst_33 : f32 to vector<1x16xf32>
    %53 = arith.select %50, %51, %52 : vector<1x16xi1>, vector<1x16xf32>
    %54 = vector.extract_strided_slice %46 {offsets = [0, 0], sizes = [16, 16], strides = [1, 1]} : vector<16x32xf32> to vector<16x16xf32>
    %55 = arith.truncf %54 : vector<16x16xf32> to vector<16x16xbf16>
    %56 = vector.extract_strided_slice %47 {offsets = [0, 0], sizes = [16, 16], strides = [1, 1]} : vector<16x32xf32> to vector<16x16xf32>
    %57 = arith.truncf %56 : vector<16x16xf32> to vector<16x16xbf16>
    %58 = vector.extract_strided_slice %48 {offsets = [0, 0], sizes = [16, 16], strides = [1, 1]} : vector<16x32xf32> to vector<16x16xf32>
    %59 = arith.truncf %58 : vector<16x16xf32> to vector<16x16xbf16>
    "tpu.trace_start"() <{level = 10 : i32, message = "qd,kd->qk"}> : () -> ()
    %cst_34 = arith.constant dense<0.000000e+00> : vector<16x16xf32>
    %60 = tpu.matmul %55, %57, %cst_34 {dimension_numbers = #tpu.dot_dimension_numbers<[1], [1], [0], [0], [0, 0, 1, 0], [], []>} : vector<16x16xbf16>, vector<16x16xbf16>, vector<16x16xf32> -> vector<16x16xf32>
    "tpu.trace_stop"() : () -> ()
    %cst_35 = arith.constant 2.500000e-01 : f32
    %61 = vector.broadcast %cst_35 : f32 to vector<16x16xf32>
    %62 = arith.mulf %60, %61 : vector<16x16xf32>
    %63 = vector.broadcast %53 : vector<1x16xf32> to vector<16x16xf32>
    %64 = arith.addf %62, %63 : vector<16x16xf32>
    %cst_36 = arith.constant dense<0xFF800000> : vector<16xf32>
    %65 = vector.multi_reduction <maximumf>, %64, %cst_36 [1] : vector<16x16xf32> to vector<16xf32>
    %66 = vector.shape_cast %65 : vector<16xf32> to vector<16x1xf32>
    %67 = vector.broadcast %66 : vector<16x1xf32> to vector<16x16xf32>
    %68 = arith.subf %64, %67 : vector<16x16xf32>
    %69 = math.exp %68 : vector<16x16xf32>
    %cst_37 = arith.constant dense<0.000000e+00> : vector<16xf32>
    %70 = vector.multi_reduction <add>, %69, %cst_37 [1] : vector<16x16xf32> to vector<16xf32>
    %71 = vector.shape_cast %70 : vector<16xf32> to vector<16x1xf32>
    %72 = tpu.reciprocal %71 {approx = true} : vector<16x1xf32> -> vector<16x1xf32>
    %73 = vector.broadcast %72 : vector<16x1xf32> to vector<16x16xf32>
    %74 = arith.mulf %69, %73 : vector<16x16xf32>
    %75 = arith.truncf %74 : vector<16x16xf32> to vector<16x16xbf16>
    %cst_38 = arith.constant dense<0.000000e+00> : vector<16x16xf32>
    %76 = tpu.matmul %75, %59, %cst_38 {dimension_numbers = #tpu.dot_dimension_numbers<[1], [0], [0], [1], [0, 0, 1, 1], [], []>} : vector<16x16xbf16>, vector<16x16xbf16>, vector<16x16xf32> -> vector<16x16xf32>
    %77 = vector.extract_strided_slice %46 {offsets = [0, 16], sizes = [16, 16], strides = [1, 1]} : vector<16x32xf32> to vector<16x16xf32>
    %78 = arith.truncf %77 : vector<16x16xf32> to vector<16x16xbf16>
    %79 = vector.extract_strided_slice %47 {offsets = [0, 16], sizes = [16, 16], strides = [1, 1]} : vector<16x32xf32> to vector<16x16xf32>
    %80 = arith.truncf %79 : vector<16x16xf32> to vector<16x16xbf16>
    %81 = vector.extract_strided_slice %48 {offsets = [0, 16], sizes = [16, 16], strides = [1, 1]} : vector<16x32xf32> to vector<16x16xf32>
    %82 = arith.truncf %81 : vector<16x16xf32> to vector<16x16xbf16>
    "tpu.trace_start"() <{level = 10 : i32, message = "qd,kd->qk"}> : () -> ()
    %cst_39 = arith.constant dense<0.000000e+00> : vector<16x16xf32>
    %83 = tpu.matmul %78, %80, %cst_39 {dimension_numbers = #tpu.dot_dimension_numbers<[1], [1], [0], [0], [0, 0, 1, 0], [], []>} : vector<16x16xbf16>, vector<16x16xbf16>, vector<16x16xf32> -> vector<16x16xf32>
    "tpu.trace_stop"() : () -> ()
    %cst_40 = arith.constant 2.500000e-01 : f32
    %84 = vector.broadcast %cst_40 : f32 to vector<16x16xf32>
    %85 = arith.mulf %83, %84 : vector<16x16xf32>
    %86 = vector.broadcast %53 : vector<1x16xf32> to vector<16x16xf32>
    %87 = arith.addf %85, %86 : vector<16x16xf32>
    %cst_41 = arith.constant dense<0xFF800000> : vector<16xf32>
    %88 = vector.multi_reduction <maximumf>, %87, %cst_41 [1] : vector<16x16xf32> to vector<16xf32>
    %89 = vector.shape_cast %88 : vector<16xf32> to vector<16x1xf32>
    %90 = vector.broadcast %89 : vector<16x1xf32> to vector<16x16xf32>
    %91 = arith.subf %87, %90 : vector<16x16xf32>
    %92 = math.exp %91 : vector<16x16xf32>
    %cst_42 = arith.constant dense<0.000000e+00> : vector<16xf32>
    %93 = vector.multi_reduction <add>, %92, %cst_42 [1] : vector<16x16xf32> to vector<16xf32>
    %94 = vector.shape_cast %93 : vector<16xf32> to vector<16x1xf32>
    %95 = tpu.reciprocal %94 {approx = true} : vector<16x1xf32> -> vector<16x1xf32>
    %96 = vector.broadcast %95 : vector<16x1xf32> to vector<16x16xf32>
    %97 = arith.mulf %92, %96 : vector<16x16xf32>
    %98 = arith.truncf %97 : vector<16x16xf32> to vector<16x16xbf16>
    %cst_43 = arith.constant dense<0.000000e+00> : vector<16x16xf32>
    %99 = tpu.matmul %98, %82, %cst_43 {dimension_numbers = #tpu.dot_dimension_numbers<[1], [0], [0], [1], [0, 0, 1, 1], [], []>} : vector<16x16xbf16>, vector<16x16xbf16>, vector<16x16xf32> -> vector<16x16xf32>
    %100 = tpu.concatenate %76, %99 in 1 : vector<16x16xf32>, vector<16x16xf32> -> vector<16x32xf32>
    %c0_44 = arith.constant 0 : index
    %c0_45 = arith.constant 0 : index
    %c0_46 = arith.constant 0 : index
    %101 = vector.load %arg11[%c0_44, %c0_45, %c0_46] : memref<1x32x32xbf16, #tpu.memory_space<vmem>>, vector<1x32x32xbf16>
    %102 = vector.shape_cast %101 : vector<1x32x32xbf16> to vector<32x32xbf16>
    %c0_47 = arith.constant 0 : index
    %c0_48 = arith.constant 0 : index
    %c0_49 = arith.constant 0 : index
    %103 = vector.load %arg12[%c0_47, %c0_48, %c0_49] : memref<1x1x32xf32, #tpu.memory_space<vmem>>, vector<1x1x32xf32>
    %104 = vector.shape_cast %103 : vector<1x1x32xf32> to vector<1x32xf32>
    %105 = arith.truncf %100 : vector<16x32xf32> to vector<16x32xbf16>
    %cst_50 = arith.constant dense<0.000000e+00> : vector<16x32xf32>
    %106 = tpu.matmul %105, %102, %cst_50 {dimension_numbers = #tpu.dot_dimension_numbers<[1], [0], [0], [1], [0, 0, 1, 1], [], []>} : vector<16x32xbf16>, vector<32x32xbf16>, vector<16x32xf32> -> vector<16x32xf32>
    %107 = vector.broadcast %104 : vector<1x32xf32> to vector<16x32xf32>
    %108 = arith.addf %106, %107 : vector<16x32xf32>
    %109 = vector.broadcast %7 : vector<16x1xf32> to vector<16x32xf32>
    %110 = arith.mulf %108, %109 : vector<16x32xf32>
    %111 = arith.addf %3, %110 : vector<16x32xf32>
    %c0_51 = arith.constant 0 : index
    %c0_52 = arith.constant 0 : index
    %c0_53 = arith.constant 0 : index
    %112 = vector.load %arg13[%c0_51, %c0_52, %c0_53] : memref<1x1x32xf32, #tpu.memory_space<vmem>>, vector<1x1x32xf32>
    %113 = vector.shape_cast %112 : vector<1x1x32xf32> to vector<1x32xf32>
    %c0_54 = arith.constant 0 : index
    %c0_55 = arith.constant 0 : index
    %c0_56 = arith.constant 0 : index
    %114 = vector.load %arg14[%c0_54, %c0_55, %c0_56] : memref<1x1x32xf32, #tpu.memory_space<vmem>>, vector<1x1x32xf32>
    %115 = vector.shape_cast %114 : vector<1x1x32xf32> to vector<1x32xf32>
    %cst_57 = arith.constant dense<0.000000e+00> : vector<16xf32>
    %116 = vector.multi_reduction <add>, %111, %cst_57 [1] : vector<16x32xf32> to vector<16xf32>
    %117 = vector.shape_cast %116 : vector<16xf32> to vector<16x1xf32>
    %cst_58 = arith.constant 3.200000e+01 : f32
    %118 = vector.broadcast %cst_58 : f32 to vector<16x1xf32>
    %119 = arith.divf %117, %118 : vector<16x1xf32>
    %120 = vector.broadcast %119 : vector<16x1xf32> to vector<16x32xf32>
    %121 = arith.subf %111, %120 : vector<16x32xf32>
    %122 = arith.mulf %121, %121 : vector<16x32xf32>
    %cst_59 = arith.constant dense<0.000000e+00> : vector<16xf32>
    %123 = vector.multi_reduction <add>, %122, %cst_59 [1] : vector<16x32xf32> to vector<16xf32>
    %124 = vector.shape_cast %123 : vector<16xf32> to vector<16x1xf32>
    %cst_60 = arith.constant 3.200000e+01 : f32
    %125 = vector.broadcast %cst_60 : f32 to vector<16x1xf32>
    %126 = arith.divf %124, %125 : vector<16x1xf32>
    %127 = vector.broadcast %119 : vector<16x1xf32> to vector<16x32xf32>
    %128 = arith.subf %111, %127 : vector<16x32xf32>
    %cst_61 = arith.constant 9.99999974E-6 : f32
    %129 = vector.broadcast %cst_61 : f32 to vector<16x1xf32>
    %130 = arith.addf %126, %129 : vector<16x1xf32>
    %131 = math.rsqrt %130 : vector<16x1xf32>
    %132 = vector.broadcast %131 : vector<16x1xf32> to vector<16x32xf32>
    %133 = arith.mulf %128, %132 : vector<16x32xf32>
    %134 = vector.broadcast %113 : vector<1x32xf32> to vector<16x32xf32>
    %135 = arith.mulf %133, %134 : vector<16x32xf32>
    %136 = vector.broadcast %115 : vector<1x32xf32> to vector<16x32xf32>
    %137 = arith.addf %135, %136 : vector<16x32xf32>
    %c0_62 = arith.constant 0 : index
    %c0_63 = arith.constant 0 : index
    %c0_64 = arith.constant 0 : index
    %138 = vector.load %arg15[%c0_62, %c0_63, %c0_64] : memref<1x32x32xbf16, #tpu.memory_space<vmem>>, vector<1x32x32xbf16>
    %139 = vector.shape_cast %138 : vector<1x32x32xbf16> to vector<32x32xbf16>
    %c0_65 = arith.constant 0 : index
    %c0_66 = arith.constant 0 : index
    %c0_67 = arith.constant 0 : index
    %140 = vector.load %arg16[%c0_65, %c0_66, %c0_67] : memref<1x1x32xf32, #tpu.memory_space<vmem>>, vector<1x1x32xf32>
    %141 = vector.shape_cast %140 : vector<1x1x32xf32> to vector<1x32xf32>
    %142 = arith.truncf %137 : vector<16x32xf32> to vector<16x32xbf16>
    %cst_68 = arith.constant dense<0.000000e+00> : vector<16x32xf32>
    %143 = tpu.matmul %142, %139, %cst_68 {dimension_numbers = #tpu.dot_dimension_numbers<[1], [0], [0], [1], [0, 0, 1, 1], [], []>} : vector<16x32xbf16>, vector<32x32xbf16>, vector<16x32xf32> -> vector<16x32xf32>
    %144 = vector.broadcast %141 : vector<1x32xf32> to vector<16x32xf32>
    %145 = arith.addf %143, %144 : vector<16x32xf32>
    %c0_69 = arith.constant 0 : index
    %c0_70 = arith.constant 0 : index
    %c0_71 = arith.constant 0 : index
    %146 = vector.load %arg17[%c0_69, %c0_70, %c0_71] : memref<1x32x64xbf16, #tpu.memory_space<vmem>>, vector<1x32x64xbf16>
    %147 = vector.shape_cast %146 : vector<1x32x64xbf16> to vector<32x64xbf16>
    %c0_72 = arith.constant 0 : index
    %c0_73 = arith.constant 0 : index
    %c0_74 = arith.constant 0 : index
    %148 = vector.load %arg18[%c0_72, %c0_73, %c0_74] : memref<1x1x64xf32, #tpu.memory_space<vmem>>, vector<1x1x64xf32>
    %149 = vector.shape_cast %148 : vector<1x1x64xf32> to vector<1x64xf32>
    %150 = arith.truncf %5 : vector<32x32xf32> to vector<32x32xbf16>
    %cst_75 = arith.constant dense<0.000000e+00> : vector<32x64xf32>
    %151 = tpu.matmul %150, %147, %cst_75 {dimension_numbers = #tpu.dot_dimension_numbers<[1], [0], [0], [1], [0, 0, 1, 1], [], []>} : vector<32x32xbf16>, vector<32x64xbf16>, vector<32x64xf32> -> vector<32x64xf32>
    %152 = vector.broadcast %149 : vector<1x64xf32> to vector<32x64xf32>
    %153 = arith.addf %151, %152 : vector<32x64xf32>
    %154 = vector.extract_strided_slice %153 {offsets = [0, 0], sizes = [32, 32], strides = [1, 1]} : vector<32x64xf32> to vector<32x32xf32>
    %155 = vector.extract_strided_slice %153 {offsets = [0, 32], sizes = [32, 32], strides = [1, 1]} : vector<32x64xf32> to vector<32x32xf32>
    %cst_76 = arith.constant 5.000000e-01 : f32
    %156 = vector.broadcast %cst_76 : f32 to vector<1x32xf32>
    %157 = arith.cmpf ogt, %11, %156 : vector<1x32xf32>
    %cst_77 = arith.constant 0.000000e+00 : f32
    %cst_78 = arith.constant -1.000000e+09 : f32
    %158 = vector.broadcast %cst_77 : f32 to vector<1x32xf32>
    %159 = vector.broadcast %cst_78 : f32 to vector<1x32xf32>
    %160 = arith.select %157, %158, %159 : vector<1x32xi1>, vector<1x32xf32>
    %161 = vector.extract_strided_slice %145 {offsets = [0, 0], sizes = [16, 16], strides = [1, 1]} : vector<16x32xf32> to vector<16x16xf32>
    %162 = arith.truncf %161 : vector<16x16xf32> to vector<16x16xbf16>
    %163 = vector.extract_strided_slice %154 {offsets = [0, 0], sizes = [32, 16], strides = [1, 1]} : vector<32x32xf32> to vector<32x16xf32>
    %164 = arith.truncf %163 : vector<32x16xf32> to vector<32x16xbf16>
    %165 = vector.extract_strided_slice %155 {offsets = [0, 0], sizes = [32, 16], strides = [1, 1]} : vector<32x32xf32> to vector<32x16xf32>
    %166 = arith.truncf %165 : vector<32x16xf32> to vector<32x16xbf16>
    "tpu.trace_start"() <{level = 10 : i32, message = "qd,kd->qk"}> : () -> ()
    %cst_79 = arith.constant dense<0.000000e+00> : vector<16x32xf32>
    %167 = tpu.matmul %162, %164, %cst_79 {dimension_numbers = #tpu.dot_dimension_numbers<[1], [1], [0], [0], [0, 0, 1, 0], [], []>} : vector<16x16xbf16>, vector<32x16xbf16>, vector<16x32xf32> -> vector<16x32xf32>
    "tpu.trace_stop"() : () -> ()
    %cst_80 = arith.constant 2.500000e-01 : f32
    %168 = vector.broadcast %cst_80 : f32 to vector<16x32xf32>
    %169 = arith.mulf %167, %168 : vector<16x32xf32>
    %170 = vector.broadcast %160 : vector<1x32xf32> to vector<16x32xf32>
    %171 = arith.addf %169, %170 : vector<16x32xf32>
    %cst_81 = arith.constant dense<0xFF800000> : vector<16xf32>
    %172 = vector.multi_reduction <maximumf>, %171, %cst_81 [1] : vector<16x32xf32> to vector<16xf32>
    %173 = vector.shape_cast %172 : vector<16xf32> to vector<16x1xf32>
    %174 = vector.broadcast %173 : vector<16x1xf32> to vector<16x32xf32>
    %175 = arith.subf %171, %174 : vector<16x32xf32>
    %176 = math.exp %175 : vector<16x32xf32>
    %cst_82 = arith.constant dense<0.000000e+00> : vector<16xf32>
    %177 = vector.multi_reduction <add>, %176, %cst_82 [1] : vector<16x32xf32> to vector<16xf32>
    %178 = vector.shape_cast %177 : vector<16xf32> to vector<16x1xf32>
    %179 = tpu.reciprocal %178 {approx = true} : vector<16x1xf32> -> vector<16x1xf32>
    %180 = vector.broadcast %179 : vector<16x1xf32> to vector<16x32xf32>
    %181 = arith.mulf %176, %180 : vector<16x32xf32>
    %182 = arith.truncf %181 : vector<16x32xf32> to vector<16x32xbf16>
    %cst_83 = arith.constant dense<0.000000e+00> : vector<16x16xf32>
    %183 = tpu.matmul %182, %166, %cst_83 {dimension_numbers = #tpu.dot_dimension_numbers<[1], [0], [0], [1], [0, 0, 1, 1], [], []>} : vector<16x32xbf16>, vector<32x16xbf16>, vector<16x16xf32> -> vector<16x16xf32>
    %184 = vector.extract_strided_slice %145 {offsets = [0, 16], sizes = [16, 16], strides = [1, 1]} : vector<16x32xf32> to vector<16x16xf32>
    %185 = arith.truncf %184 : vector<16x16xf32> to vector<16x16xbf16>
    %186 = vector.extract_strided_slice %154 {offsets = [0, 16], sizes = [32, 16], strides = [1, 1]} : vector<32x32xf32> to vector<32x16xf32>
    %187 = arith.truncf %186 : vector<32x16xf32> to vector<32x16xbf16>
    %188 = vector.extract_strided_slice %155 {offsets = [0, 16], sizes = [32, 16], strides = [1, 1]} : vector<32x32xf32> to vector<32x16xf32>
    %189 = arith.truncf %188 : vector<32x16xf32> to vector<32x16xbf16>
    "tpu.trace_start"() <{level = 10 : i32, message = "qd,kd->qk"}> : () -> ()
    %cst_84 = arith.constant dense<0.000000e+00> : vector<16x32xf32>
    %190 = tpu.matmul %185, %187, %cst_84 {dimension_numbers = #tpu.dot_dimension_numbers<[1], [1], [0], [0], [0, 0, 1, 0], [], []>} : vector<16x16xbf16>, vector<32x16xbf16>, vector<16x32xf32> -> vector<16x32xf32>
    "tpu.trace_stop"() : () -> ()
    %cst_85 = arith.constant 2.500000e-01 : f32
    %191 = vector.broadcast %cst_85 : f32 to vector<16x32xf32>
    %192 = arith.mulf %190, %191 : vector<16x32xf32>
    %193 = vector.broadcast %160 : vector<1x32xf32> to vector<16x32xf32>
    %194 = arith.addf %192, %193 : vector<16x32xf32>
    %cst_86 = arith.constant dense<0xFF800000> : vector<16xf32>
    %195 = vector.multi_reduction <maximumf>, %194, %cst_86 [1] : vector<16x32xf32> to vector<16xf32>
    %196 = vector.shape_cast %195 : vector<16xf32> to vector<16x1xf32>
    %197 = vector.broadcast %196 : vector<16x1xf32> to vector<16x32xf32>
    %198 = arith.subf %194, %197 : vector<16x32xf32>
    %199 = math.exp %198 : vector<16x32xf32>
    %cst_87 = arith.constant dense<0.000000e+00> : vector<16xf32>
    %200 = vector.multi_reduction <add>, %199, %cst_87 [1] : vector<16x32xf32> to vector<16xf32>
    %201 = vector.shape_cast %200 : vector<16xf32> to vector<16x1xf32>
    %202 = tpu.reciprocal %201 {approx = true} : vector<16x1xf32> -> vector<16x1xf32>
    %203 = vector.broadcast %202 : vector<16x1xf32> to vector<16x32xf32>
    %204 = arith.mulf %199, %203 : vector<16x32xf32>
    %205 = arith.truncf %204 : vector<16x32xf32> to vector<16x32xbf16>
    %cst_88 = arith.constant dense<0.000000e+00> : vector<16x16xf32>
    %206 = tpu.matmul %205, %189, %cst_88 {dimension_numbers = #tpu.dot_dimension_numbers<[1], [0], [0], [1], [0, 0, 1, 1], [], []>} : vector<16x32xbf16>, vector<32x16xbf16>, vector<16x16xf32> -> vector<16x16xf32>
    %207 = tpu.concatenate %183, %206 in 1 : vector<16x16xf32>, vector<16x16xf32> -> vector<16x32xf32>
    %c0_89 = arith.constant 0 : index
    %c0_90 = arith.constant 0 : index
    %c0_91 = arith.constant 0 : index
    %208 = vector.load %arg19[%c0_89, %c0_90, %c0_91] : memref<1x32x32xbf16, #tpu.memory_space<vmem>>, vector<1x32x32xbf16>
    %209 = vector.shape_cast %208 : vector<1x32x32xbf16> to vector<32x32xbf16>
    %c0_92 = arith.constant 0 : index
    %c0_93 = arith.constant 0 : index
    %c0_94 = arith.constant 0 : index
    %210 = vector.load %arg20[%c0_92, %c0_93, %c0_94] : memref<1x1x32xf32, #tpu.memory_space<vmem>>, vector<1x1x32xf32>
    %211 = vector.shape_cast %210 : vector<1x1x32xf32> to vector<1x32xf32>
    %212 = arith.truncf %207 : vector<16x32xf32> to vector<16x32xbf16>
    %cst_95 = arith.constant dense<0.000000e+00> : vector<16x32xf32>
    %213 = tpu.matmul %212, %209, %cst_95 {dimension_numbers = #tpu.dot_dimension_numbers<[1], [0], [0], [1], [0, 0, 1, 1], [], []>} : vector<16x32xbf16>, vector<32x32xbf16>, vector<16x32xf32> -> vector<16x32xf32>
    %214 = vector.broadcast %211 : vector<1x32xf32> to vector<16x32xf32>
    %215 = arith.addf %213, %214 : vector<16x32xf32>
    %216 = vector.broadcast %7 : vector<16x1xf32> to vector<16x32xf32>
    %217 = arith.mulf %215, %216 : vector<16x32xf32>
    %218 = arith.addf %111, %217 : vector<16x32xf32>
    %c0_96 = arith.constant 0 : index
    %c0_97 = arith.constant 0 : index
    %c0_98 = arith.constant 0 : index
    %219 = vector.load %arg21[%c0_96, %c0_97, %c0_98] : memref<1x1x32xf32, #tpu.memory_space<vmem>>, vector<1x1x32xf32>
    %220 = vector.shape_cast %219 : vector<1x1x32xf32> to vector<1x32xf32>
    %c0_99 = arith.constant 0 : index
    %c0_100 = arith.constant 0 : index
    %c0_101 = arith.constant 0 : index
    %221 = vector.load %arg22[%c0_99, %c0_100, %c0_101] : memref<1x1x32xf32, #tpu.memory_space<vmem>>, vector<1x1x32xf32>
    %222 = vector.shape_cast %221 : vector<1x1x32xf32> to vector<1x32xf32>
    %cst_102 = arith.constant dense<0.000000e+00> : vector<16xf32>
    %223 = vector.multi_reduction <add>, %218, %cst_102 [1] : vector<16x32xf32> to vector<16xf32>
    %224 = vector.shape_cast %223 : vector<16xf32> to vector<16x1xf32>
    %cst_103 = arith.constant 3.200000e+01 : f32
    %225 = vector.broadcast %cst_103 : f32 to vector<16x1xf32>
    %226 = arith.divf %224, %225 : vector<16x1xf32>
    %227 = vector.broadcast %226 : vector<16x1xf32> to vector<16x32xf32>
    %228 = arith.subf %218, %227 : vector<16x32xf32>
    %229 = arith.mulf %228, %228 : vector<16x32xf32>
    %cst_104 = arith.constant dense<0.000000e+00> : vector<16xf32>
    %230 = vector.multi_reduction <add>, %229, %cst_104 [1] : vector<16x32xf32> to vector<16xf32>
    %231 = vector.shape_cast %230 : vector<16xf32> to vector<16x1xf32>
    %cst_105 = arith.constant 3.200000e+01 : f32
    %232 = vector.broadcast %cst_105 : f32 to vector<16x1xf32>
    %233 = arith.divf %231, %232 : vector<16x1xf32>
    %234 = vector.broadcast %226 : vector<16x1xf32> to vector<16x32xf32>
    %235 = arith.subf %218, %234 : vector<16x32xf32>
    %cst_106 = arith.constant 9.99999974E-6 : f32
    %236 = vector.broadcast %cst_106 : f32 to vector<16x1xf32>
    %237 = arith.addf %233, %236 : vector<16x1xf32>
    %238 = math.rsqrt %237 : vector<16x1xf32>
    %239 = vector.broadcast %238 : vector<16x1xf32> to vector<16x32xf32>
    %240 = arith.mulf %235, %239 : vector<16x32xf32>
    %241 = vector.broadcast %220 : vector<1x32xf32> to vector<16x32xf32>
    %242 = arith.mulf %240, %241 : vector<16x32xf32>
    %243 = vector.broadcast %222 : vector<1x32xf32> to vector<16x32xf32>
    %244 = arith.addf %242, %243 : vector<16x32xf32>
    %c0_107 = arith.constant 0 : index
    %c0_108 = arith.constant 0 : index
    %c0_109 = arith.constant 0 : index
    %245 = vector.load %arg23[%c0_107, %c0_108, %c0_109] : memref<1x32x64xbf16, #tpu.memory_space<vmem>>, vector<1x32x64xbf16>
    %246 = vector.shape_cast %245 : vector<1x32x64xbf16> to vector<32x64xbf16>
    %c0_110 = arith.constant 0 : index
    %c0_111 = arith.constant 0 : index
    %c0_112 = arith.constant 0 : index
    %247 = vector.load %arg24[%c0_110, %c0_111, %c0_112] : memref<1x1x64xf32, #tpu.memory_space<vmem>>, vector<1x1x64xf32>
    %248 = vector.shape_cast %247 : vector<1x1x64xf32> to vector<1x64xf32>
    %249 = arith.truncf %244 : vector<16x32xf32> to vector<16x32xbf16>
    %cst_113 = arith.constant dense<0.000000e+00> : vector<16x64xf32>
    %250 = tpu.matmul %249, %246, %cst_113 {dimension_numbers = #tpu.dot_dimension_numbers<[1], [0], [0], [1], [0, 0, 1, 1], [], []>} : vector<16x32xbf16>, vector<32x64xbf16>, vector<16x64xf32> -> vector<16x64xf32>
    %251 = vector.broadcast %248 : vector<1x64xf32> to vector<16x64xf32>
    %252 = arith.addf %250, %251 : vector<16x64xf32>
    %253 = arith.mulf %252, %252 : vector<16x64xf32>
    %254 = arith.mulf %252, %253 : vector<16x64xf32>
    %cst_114 = arith.constant 4.471500e-02 : f32
    %255 = vector.broadcast %cst_114 : f32 to vector<16x64xf32>
    %256 = arith.mulf %255, %254 : vector<16x64xf32>
    %257 = arith.addf %252, %256 : vector<16x64xf32>
    %cst_115 = arith.constant 0.797884583 : f32
    %258 = vector.broadcast %cst_115 : f32 to vector<16x64xf32>
    %259 = arith.mulf %258, %257 : vector<16x64xf32>
    %260 = math.tanh %259 : vector<16x64xf32>
    %cst_116 = arith.constant 1.000000e+00 : f32
    %261 = vector.broadcast %cst_116 : f32 to vector<16x64xf32>
    %262 = arith.addf %261, %260 : vector<16x64xf32>
    %cst_117 = arith.constant 5.000000e-01 : f32
    %263 = vector.broadcast %cst_117 : f32 to vector<16x64xf32>
    %264 = arith.mulf %263, %262 : vector<16x64xf32>
    %265 = arith.mulf %252, %264 : vector<16x64xf32>
    %c0_118 = arith.constant 0 : index
    %c0_119 = arith.constant 0 : index
    %c0_120 = arith.constant 0 : index
    %266 = vector.load %arg25[%c0_118, %c0_119, %c0_120] : memref<1x64x32xbf16, #tpu.memory_space<vmem>>, vector<1x64x32xbf16>
    %267 = vector.shape_cast %266 : vector<1x64x32xbf16> to vector<64x32xbf16>
    %c0_121 = arith.constant 0 : index
    %c0_122 = arith.constant 0 : index
    %c0_123 = arith.constant 0 : index
    %268 = vector.load %arg26[%c0_121, %c0_122, %c0_123] : memref<1x1x32xf32, #tpu.memory_space<vmem>>, vector<1x1x32xf32>
    %269 = vector.shape_cast %268 : vector<1x1x32xf32> to vector<1x32xf32>
    %270 = arith.truncf %265 : vector<16x64xf32> to vector<16x64xbf16>
    %cst_124 = arith.constant dense<0.000000e+00> : vector<16x32xf32>
    %271 = tpu.matmul %270, %267, %cst_124 {dimension_numbers = #tpu.dot_dimension_numbers<[1], [0], [0], [1], [0, 0, 1, 1], [], []>} : vector<16x64xbf16>, vector<64x32xbf16>, vector<16x32xf32> -> vector<16x32xf32>
    %272 = vector.broadcast %269 : vector<1x32xf32> to vector<16x32xf32>
    %273 = arith.addf %271, %272 : vector<16x32xf32>
    %274 = vector.broadcast %7 : vector<16x1xf32> to vector<16x32xf32>
    %275 = arith.mulf %273, %274 : vector<16x32xf32>
    %276 = arith.addf %218, %275 : vector<16x32xf32>
    %277 = vector.broadcast %7 : vector<16x1xf32> to vector<16x32xf32>
    %278 = arith.mulf %276, %277 : vector<16x32xf32>
    %c0_125 = arith.constant 0 : index
    %c0_126 = arith.constant 0 : index
    %279 = vector.load %arg28[%c0_125, %c0_126] : memref<16x32xf32, #tpu.memory_space<vmem>>, vector<16x32xf32>
    tpu.vector_store %arg28[%c0_125, %c0_126], %278 {strides = array<i32>} : memref<16x32xf32, #tpu.memory_space<vmem>>, vector<16x32xf32>,
    %c7_i32 = arith.constant 7 : i32
    %280 = arith.cmpi eq, %arg1, %c7_i32 : i32
    %281 = arith.extui %280 : i1 to i32
    %c0_i32_127 = arith.constant 0 : i32
    %282 = arith.cmpi ne, %281, %c0_i32_127 : i32
    scf.if %282 {
      %c0_128 = arith.constant 0 : index
      %c0_129 = arith.constant 0 : index
      %c0_130 = arith.constant 0 : index
      %283 = vector.load %arg27[%c0_128, %c0_129, %c0_130] : memref<1x16x32xf32, #tpu.memory_space<vmem>>, vector<1x16x32xf32>
      %284 = vector.shape_cast %283 : vector<1x16x32xf32> to vector<16x32xf32>
      %285 = vector.shape_cast %278 : vector<16x32xf32> to vector<1x16x32xf32>
      tpu.vector_store %arg27[%c0_128, %c0_129, %c0_130], %285 {strides = array<i32>} : memref<1x16x32xf32, #tpu.memory_space<vmem>>, vector<1x16x32xf32>,
    } else {
    }
    return
  }
  func.func @transform_0(%arg0: i32, %arg1: i32) -> (i32, i32, i32) {
    %c0_i32 = arith.constant 0 : i32
    %c0_i32_0 = arith.constant 0 : i32
    %c0_i32_1 = arith.constant 0 : i32
    return %arg0, %c0_i32, %c0_i32_0 : i32, i32, i32
  }
  func.func @transform_1(%arg0: i32, %arg1: i32) -> (i32, i32, i32) {
    %c0_i32 = arith.constant 0 : i32
    %c0_i32_0 = arith.constant 0 : i32
    %c0_i32_1 = arith.constant 0 : i32
    return %arg0, %c0_i32, %c0_i32_0 : i32, i32, i32
  }
  func.func @transform_2(%arg0: i32, %arg1: i32) -> (i32, i32, i32) {
    %c0_i32 = arith.constant 0 : i32
    %c0_i32_0 = arith.constant 0 : i32
    %c0_i32_1 = arith.constant 0 : i32
    return %arg0, %c0_i32, %c0_i32_0 : i32, i32, i32
  }
  func.func @transform_3(%arg0: i32, %arg1: i32) -> (i32, i32, i32) {
    %c0_i32 = arith.constant 0 : i32
    %c0_i32_0 = arith.constant 0 : i32
    %c0_i32_1 = arith.constant 0 : i32
    return %arg0, %c0_i32, %c0_i32_0 : i32, i32, i32
  }
  func.func @transform_4(%arg0: i32, %arg1: i32) -> (i32, i32, i32) {
    %c0_i32 = arith.constant 0 : i32
    %c0_i32_0 = arith.constant 0 : i32
    %c0_i32_1 = arith.constant 0 : i32
    return %arg0, %c0_i32, %c0_i32_0 : i32, i32, i32
  }
  func.func @transform_5(%arg0: i32, %arg1: i32) -> (i32, i32, i32) {
    %c0_i32 = arith.constant 0 : i32
    %c0_i32_0 = arith.constant 0 : i32
    %c0_i32_1 = arith.constant 0 : i32
    return %arg1, %c0_i32, %c0_i32_0 : i32, i32, i32
  }
  func.func @transform_6(%arg0: i32, %arg1: i32) -> (i32, i32, i32) {
    %c0_i32 = arith.constant 0 : i32
    %c0_i32_0 = arith.constant 0 : i32
    %c0_i32_1 = arith.constant 0 : i32
    return %arg1, %c0_i32, %c0_i32_0 : i32, i32, i32
  }
  func.func @transform_7(%arg0: i32, %arg1: i32) -> (i32, i32, i32) {
    %c0_i32 = arith.constant 0 : i32
    %c0_i32_0 = arith.constant 0 : i32
    %c0_i32_1 = arith.constant 0 : i32
    return %arg1, %c0_i32, %c0_i32_0 : i32, i32, i32
  }
  func.func @transform_8(%arg0: i32, %arg1: i32) -> (i32, i32, i32) {
    %c0_i32 = arith.constant 0 : i32
    %c0_i32_0 = arith.constant 0 : i32
    %c0_i32_1 = arith.constant 0 : i32
    return %arg1, %c0_i32, %c0_i32_0 : i32, i32, i32
  }
  func.func @transform_9(%arg0: i32, %arg1: i32) -> (i32, i32, i32) {
    %c0_i32 = arith.constant 0 : i32
    %c0_i32_0 = arith.constant 0 : i32
    %c0_i32_1 = arith.constant 0 : i32
    return %arg1, %c0_i32, %c0_i32_0 : i32, i32, i32
  }
  func.func @transform_10(%arg0: i32, %arg1: i32) -> (i32, i32, i32) {
    %c0_i32 = arith.constant 0 : i32
    %c0_i32_0 = arith.constant 0 : i32
    %c0_i32_1 = arith.constant 0 : i32
    return %arg1, %c0_i32, %c0_i32_0 : i32, i32, i32
  }
  func.func @transform_11(%arg0: i32, %arg1: i32) -> (i32, i32, i32) {
    %c0_i32 = arith.constant 0 : i32
    %c0_i32_0 = arith.constant 0 : i32
    %c0_i32_1 = arith.constant 0 : i32
    return %arg1, %c0_i32, %c0_i32_0 : i32, i32, i32
  }
  func.func @transform_12(%arg0: i32, %arg1: i32) -> (i32, i32, i32) {
    %c0_i32 = arith.constant 0 : i32
    %c0_i32_0 = arith.constant 0 : i32
    %c0_i32_1 = arith.constant 0 : i32
    return %arg1, %c0_i32, %c0_i32_0 : i32, i32, i32
  }
  func.func @transform_13(%arg0: i32, %arg1: i32) -> (i32, i32, i32) {
    %c0_i32 = arith.constant 0 : i32
    %c0_i32_0 = arith.constant 0 : i32
    %c0_i32_1 = arith.constant 0 : i32
    return %arg1, %c0_i32, %c0_i32_0 : i32, i32, i32
  }
  func.func @transform_14(%arg0: i32, %arg1: i32) -> (i32, i32, i32) {
    %c0_i32 = arith.constant 0 : i32
    %c0_i32_0 = arith.constant 0 : i32
    %c0_i32_1 = arith.constant 0 : i32
    return %arg1, %c0_i32, %c0_i32_0 : i32, i32, i32
  }
  func.func @transform_15(%arg0: i32, %arg1: i32) -> (i32, i32, i32) {
    %c0_i32 = arith.constant 0 : i32
    %c0_i32_0 = arith.constant 0 : i32
    %c0_i32_1 = arith.constant 0 : i32
    return %arg1, %c0_i32, %c0_i32_0 : i32, i32, i32
  }
  func.func @transform_16(%arg0: i32, %arg1: i32) -> (i32, i32, i32) {
    %c0_i32 = arith.constant 0 : i32
    %c0_i32_0 = arith.constant 0 : i32
    %c0_i32_1 = arith.constant 0 : i32
    return %arg1, %c0_i32, %c0_i32_0 : i32, i32, i32
  }
  func.func @transform_17(%arg0: i32, %arg1: i32) -> (i32, i32, i32) {
    %c0_i32 = arith.constant 0 : i32
    %c0_i32_0 = arith.constant 0 : i32
    %c0_i32_1 = arith.constant 0 : i32
    return %arg1, %c0_i32, %c0_i32_0 : i32, i32, i32
  }
  func.func @transform_18(%arg0: i32, %arg1: i32) -> (i32, i32, i32) {
    %c0_i32 = arith.constant 0 : i32
    %c0_i32_0 = arith.constant 0 : i32
    %c0_i32_1 = arith.constant 0 : i32
    return %arg1, %c0_i32, %c0_i32_0 : i32, i32, i32
  }
  func.func @transform_19(%arg0: i32, %arg1: i32) -> (i32, i32, i32) {
    %c0_i32 = arith.constant 0 : i32
    %c0_i32_0 = arith.constant 0 : i32
    %c0_i32_1 = arith.constant 0 : i32
    return %arg1, %c0_i32, %c0_i32_0 : i32, i32, i32
  }
  func.func @transform_20(%arg0: i32, %arg1: i32) -> (i32, i32, i32) {
    %c0_i32 = arith.constant 0 : i32
    %c0_i32_0 = arith.constant 0 : i32
    %c0_i32_1 = arith.constant 0 : i32
    return %arg1, %c0_i32, %c0_i32_0 : i32, i32, i32
  }
  func.func @transform_21(%arg0: i32, %arg1: i32) -> (i32, i32, i32) {
    %c0_i32 = arith.constant 0 : i32
    %c0_i32_0 = arith.constant 0 : i32
    %c0_i32_1 = arith.constant 0 : i32
    return %arg1, %c0_i32, %c0_i32_0 : i32, i32, i32
  }
  func.func @transform_22(%arg0: i32, %arg1: i32) -> (i32, i32, i32) {
    %c0_i32 = arith.constant 0 : i32
    %c0_i32_0 = arith.constant 0 : i32
    %c0_i32_1 = arith.constant 0 : i32
    return %arg1, %c0_i32, %c0_i32_0 : i32, i32, i32
  }
  func.func @transform_23(%arg0: i32, %arg1: i32) -> (i32, i32, i32) {
    %c0_i32 = arith.constant 0 : i32
    %c0_i32_0 = arith.constant 0 : i32
    %c0_i32_1 = arith.constant 0 : i32
    return %arg1, %c0_i32, %c0_i32_0 : i32, i32, i32
  }
  func.func @transform_24(%arg0: i32, %arg1: i32) -> (i32, i32, i32) {
    %c0_i32 = arith.constant 0 : i32
    %c0_i32_0 = arith.constant 0 : i32
    %c0_i32_1 = arith.constant 0 : i32
    return %arg1, %c0_i32, %c0_i32_0 : i32, i32, i32
  }
  func.func @transform_25(%arg0: i32, %arg1: i32) -> (i32, i32, i32) {
    %c0_i32 = arith.constant 0 : i32
    %c0_i32_0 = arith.constant 0 : i32
    %c0_i32_1 = arith.constant 0 : i32
    return %arg0, %c0_i32, %c0_i32_0 : i32, i32, i32
  }
}

module attributes {stable_mosaic.version = 11 : i64} {
  func.func @_linear_kernel(%arg0: i32, %arg1: i32, %arg2: i32, %arg3: memref<32x32xf32, #tpu.memory_space<vmem>>, %arg4: memref<32x16xbf16, #tpu.memory_space<vmem>>, %arg5: memref<1x16xf32, #tpu.memory_space<vmem>>, %arg6: memref<32x16xf32, #tpu.memory_space<vmem>>, %arg7: memref<32x16xf32, #tpu.memory_space<vmem>>) attributes {dimension_semantics = [#tpu.dimension_semantics<parallel>, #tpu.dimension_semantics<parallel>, #tpu.dimension_semantics<arbitrary>], iteration_bounds = array<i64: 1, 1, 1>, scalar_prefetch = 0 : i64, scratch_operands = 1 : i64, tpu.core_type = #tpu.core_type<tc>, window_params = [{transform_indices = @transform_0, window_bounds = array<i64: 32, 32>}, {transform_indices = @transform_1, window_bounds = array<i64: 32, 16>}, {transform_indices = @transform_2, window_bounds = array<i64: 1, 16>}, {transform_indices = @transform_3, window_bounds = array<i64: 32, 16>}]} {
    %c0_i32 = arith.constant 0 : i32
    %0 = arith.cmpi eq, %arg2, %c0_i32 : i32
    %1 = arith.extui %0 : i1 to i32
    %c0_i32_0 = arith.constant 0 : i32
    %2 = arith.cmpi ne, %1, %c0_i32_0 : i32
    scf.if %2 {
      %cst_10 = arith.constant 0.000000e+00 : f32
      %13 = vector.broadcast %cst_10 : f32 to vector<32x16xf32>
      %c0_11 = arith.constant 0 : index
      %c0_12 = arith.constant 0 : index
      %14 = vector.load %arg7[%c0_11, %c0_12] : memref<32x16xf32, #tpu.memory_space<vmem>>, vector<32x16xf32>
      tpu.vector_store %arg7[%c0_11, %c0_12], %13 {strides = array<i32>} : memref<32x16xf32, #tpu.memory_space<vmem>>, vector<32x16xf32>,
    } else {
    }
    %c0 = arith.constant 0 : index
    %c0_1 = arith.constant 0 : index
    %3 = vector.load %arg7[%c0, %c0_1] : memref<32x16xf32, #tpu.memory_space<vmem>>, vector<32x16xf32>
    %c0_2 = arith.constant 0 : index
    %c0_3 = arith.constant 0 : index
    %4 = vector.load %arg3[%c0_2, %c0_3] : memref<32x32xf32, #tpu.memory_space<vmem>>, vector<32x32xf32>
    %5 = arith.truncf %4 : vector<32x32xf32> to vector<32x32xbf16>
    %c0_4 = arith.constant 0 : index
    %c0_5 = arith.constant 0 : index
    %6 = vector.load %arg4[%c0_4, %c0_5] : memref<32x16xbf16, #tpu.memory_space<vmem>>, vector<32x16xbf16>
    %cst = arith.constant dense<0.000000e+00> : vector<32x16xf32>
    %7 = tpu.matmul %5, %6, %cst {dimension_numbers = #tpu.dot_dimension_numbers<[1], [0], [0], [1], [0, 0, 1, 1], [], []>} : vector<32x32xbf16>, vector<32x16xbf16>, vector<32x16xf32> -> vector<32x16xf32>
    %8 = arith.addf %3, %7 : vector<32x16xf32>
    %c0_6 = arith.constant 0 : index
    %c0_7 = arith.constant 0 : index
    %9 = vector.load %arg7[%c0_6, %c0_7] : memref<32x16xf32, #tpu.memory_space<vmem>>, vector<32x16xf32>
    tpu.vector_store %arg7[%c0_6, %c0_7], %8 {strides = array<i32>} : memref<32x16xf32, #tpu.memory_space<vmem>>, vector<32x16xf32>,
    %c0_i32_8 = arith.constant 0 : i32
    %10 = arith.cmpi eq, %arg2, %c0_i32_8 : i32
    %11 = arith.extui %10 : i1 to i32
    %c0_i32_9 = arith.constant 0 : i32
    %12 = arith.cmpi ne, %11, %c0_i32_9 : i32
    scf.if %12 {
      %c0_10 = arith.constant 0 : index
      %c0_11 = arith.constant 0 : index
      %13 = vector.load %arg7[%c0_10, %c0_11] : memref<32x16xf32, #tpu.memory_space<vmem>>, vector<32x16xf32>
      %c0_12 = arith.constant 0 : index
      %c0_13 = arith.constant 0 : index
      %14 = vector.load %arg5[%c0_12, %c0_13] : memref<1x16xf32, #tpu.memory_space<vmem>>, vector<1x16xf32>
      %15 = vector.broadcast %14 : vector<1x16xf32> to vector<32x16xf32>
      %16 = arith.addf %13, %15 : vector<32x16xf32>
      %c0_14 = arith.constant 0 : index
      %c0_15 = arith.constant 0 : index
      %17 = vector.load %arg6[%c0_14, %c0_15] : memref<32x16xf32, #tpu.memory_space<vmem>>, vector<32x16xf32>
      tpu.vector_store %arg6[%c0_14, %c0_15], %16 {strides = array<i32>} : memref<32x16xf32, #tpu.memory_space<vmem>>, vector<32x16xf32>,
    } else {
    }
    return
  }
  func.func @transform_0(%arg0: i32, %arg1: i32, %arg2: i32) -> (i32, i32) {
    %c0_i32 = arith.constant 0 : i32
    return %arg0, %arg2 : i32, i32
  }
  func.func @transform_1(%arg0: i32, %arg1: i32, %arg2: i32) -> (i32, i32) {
    %c0_i32 = arith.constant 0 : i32
    return %arg2, %arg1 : i32, i32
  }
  func.func @transform_2(%arg0: i32, %arg1: i32, %arg2: i32) -> (i32, i32) {
    %c0_i32 = arith.constant 0 : i32
    %c0_i32_0 = arith.constant 0 : i32
    return %c0_i32, %arg1 : i32, i32
  }
  func.func @transform_3(%arg0: i32, %arg1: i32, %arg2: i32) -> (i32, i32) {
    %c0_i32 = arith.constant 0 : i32
    return %arg0, %arg1 : i32, i32
  }
}

module attributes {stable_mosaic.version = 11 : i64} {
  func.func @_masked_sse_kernel(%arg0: i32, %arg1: memref<32x16xf32, #tpu.memory_space<vmem>>, %arg2: memref<32x16xf32, #tpu.memory_space<vmem>>, %arg3: memref<32x16xf32, #tpu.memory_space<vmem>>, %arg4: memref<1xf32, #tpu.memory_space<smem>>) attributes {dimension_semantics = [#tpu.dimension_semantics<arbitrary>], iteration_bounds = array<i64: 1>, scalar_prefetch = 0 : i64, scratch_operands = 0 : i64, tpu.core_type = #tpu.core_type<tc>, window_params = [{transform_indices = @transform_0, window_bounds = array<i64: 32, 16>}, {transform_indices = @transform_1, window_bounds = array<i64: 32, 16>}, {transform_indices = @transform_2, window_bounds = array<i64: 32, 16>}, {transform_indices = @transform_3, window_bounds = array<i64: 1>}]} {
    %c0_i32 = arith.constant 0 : i32
    %0 = arith.cmpi eq, %arg0, %c0_i32 : i32
    %1 = arith.extui %0 : i1 to i32
    %c0_i32_0 = arith.constant 0 : i32
    %2 = arith.cmpi ne, %1, %c0_i32_0 : i32
    scf.if %2 {
      %cst_8 = arith.constant 0.000000e+00 : f32
      %c0_9 = arith.constant 0 : index
      %16 = memref.load %arg4[%c0_9] : memref<1xf32, #tpu.memory_space<smem>>
      memref.store %cst_8, %arg4[%c0_9] : memref<1xf32, #tpu.memory_space<smem>>
    } else {
    }
    %c0 = arith.constant 0 : index
    %c0_1 = arith.constant 0 : index
    %3 = vector.load %arg1[%c0, %c0_1] : memref<32x16xf32, #tpu.memory_space<vmem>>, vector<32x16xf32>
    %c0_2 = arith.constant 0 : index
    %c0_3 = arith.constant 0 : index
    %4 = vector.load %arg2[%c0_2, %c0_3] : memref<32x16xf32, #tpu.memory_space<vmem>>, vector<32x16xf32>
    %5 = arith.subf %3, %4 : vector<32x16xf32>
    %c0_4 = arith.constant 0 : index
    %c0_5 = arith.constant 0 : index
    %6 = vector.load %arg3[%c0_4, %c0_5] : memref<32x16xf32, #tpu.memory_space<vmem>>, vector<32x16xf32>
    %7 = arith.mulf %5, %6 : vector<32x16xf32>
    %c0_6 = arith.constant 0 : index
    %8 = memref.load %arg4[%c0_6] : memref<1xf32, #tpu.memory_space<smem>>
    %9 = arith.mulf %7, %7 : vector<32x16xf32>
    %10 = vector.shape_cast %9 : vector<32x16xf32> to vector<1x32x16xf32>
    %cst = arith.constant dense<0.000000e+00> : vector<1xf32>
    %11 = vector.multi_reduction <add>, %10, %cst [1, 2] : vector<1x32x16xf32> to vector<1xf32>
    %12 = vector.shape_cast %11 : vector<1xf32> to vector<1x1x1xf32>
    %13 = vector.extract %12[0, 0, 0] : f32 from vector<1x1x1xf32>
    %14 = arith.addf %8, %13 : f32
    %c0_7 = arith.constant 0 : index
    %15 = memref.load %arg4[%c0_7] : memref<1xf32, #tpu.memory_space<smem>>
    memref.store %14, %arg4[%c0_7] : memref<1xf32, #tpu.memory_space<smem>>
    return
  }
  func.func @transform_0(%arg0: i32) -> (i32, i32) {
    %c0_i32 = arith.constant 0 : i32
    %c0_i32_0 = arith.constant 0 : i32
    return %arg0, %c0_i32 : i32, i32
  }
  func.func @transform_1(%arg0: i32) -> (i32, i32) {
    %c0_i32 = arith.constant 0 : i32
    %c0_i32_0 = arith.constant 0 : i32
    return %arg0, %c0_i32 : i32, i32
  }
  func.func @transform_2(%arg0: i32) -> (i32, i32) {
    %c0_i32 = arith.constant 0 : i32
    %c0_i32_0 = arith.constant 0 : i32
    return %arg0, %c0_i32 : i32, i32
  }
  func.func @transform_3(%arg0: i32) -> i32 {
    %c0_i32 = arith.constant 0 : i32
    %c0_i32_0 = arith.constant 0 : i32
    return %c0_i32 : i32
  }
}

module attributes {stable_mosaic.version = 11 : i64} {
  func.func @_linear_kernel(%arg0: i32, %arg1: i32, %arg2: i32, %arg3: memref<32x32xf32, #tpu.memory_space<vmem>>, %arg4: memref<32x1xbf16, #tpu.memory_space<vmem>>, %arg5: memref<1x1xf32, #tpu.memory_space<vmem>>, %arg6: memref<32x1xf32, #tpu.memory_space<vmem>>, %arg7: memref<32x1xf32, #tpu.memory_space<vmem>>) attributes {dimension_semantics = [#tpu.dimension_semantics<parallel>, #tpu.dimension_semantics<parallel>, #tpu.dimension_semantics<arbitrary>], iteration_bounds = array<i64: 1, 1, 1>, scalar_prefetch = 0 : i64, scratch_operands = 1 : i64, tpu.core_type = #tpu.core_type<tc>, window_params = [{transform_indices = @transform_0, window_bounds = array<i64: 32, 32>}, {transform_indices = @transform_1, window_bounds = array<i64: 32, 1>}, {transform_indices = @transform_2, window_bounds = array<i64: 1, 1>}, {transform_indices = @transform_3, window_bounds = array<i64: 32, 1>}]} {
    %c0_i32 = arith.constant 0 : i32
    %0 = arith.cmpi eq, %arg2, %c0_i32 : i32
    %1 = arith.extui %0 : i1 to i32
    %c0_i32_0 = arith.constant 0 : i32
    %2 = arith.cmpi ne, %1, %c0_i32_0 : i32
    scf.if %2 {
      %cst_10 = arith.constant 0.000000e+00 : f32
      %13 = vector.broadcast %cst_10 : f32 to vector<32x1xf32>
      %c0_11 = arith.constant 0 : index
      %c0_12 = arith.constant 0 : index
      %14 = vector.load %arg7[%c0_11, %c0_12] : memref<32x1xf32, #tpu.memory_space<vmem>>, vector<32x1xf32>
      tpu.vector_store %arg7[%c0_11, %c0_12], %13 {strides = array<i32>} : memref<32x1xf32, #tpu.memory_space<vmem>>, vector<32x1xf32>,
    } else {
    }
    %c0 = arith.constant 0 : index
    %c0_1 = arith.constant 0 : index
    %3 = vector.load %arg7[%c0, %c0_1] : memref<32x1xf32, #tpu.memory_space<vmem>>, vector<32x1xf32>
    %c0_2 = arith.constant 0 : index
    %c0_3 = arith.constant 0 : index
    %4 = vector.load %arg3[%c0_2, %c0_3] : memref<32x32xf32, #tpu.memory_space<vmem>>, vector<32x32xf32>
    %5 = arith.truncf %4 : vector<32x32xf32> to vector<32x32xbf16>
    %c0_4 = arith.constant 0 : index
    %c0_5 = arith.constant 0 : index
    %6 = vector.load %arg4[%c0_4, %c0_5] : memref<32x1xbf16, #tpu.memory_space<vmem>>, vector<32x1xbf16>
    %cst = arith.constant dense<0.000000e+00> : vector<32x1xf32>
    %7 = tpu.matmul %5, %6, %cst {dimension_numbers = #tpu.dot_dimension_numbers<[1], [0], [0], [1], [0, 0, 1, 1], [], []>} : vector<32x32xbf16>, vector<32x1xbf16>, vector<32x1xf32> -> vector<32x1xf32>
    %8 = arith.addf %3, %7 : vector<32x1xf32>
    %c0_6 = arith.constant 0 : index
    %c0_7 = arith.constant 0 : index
    %9 = vector.load %arg7[%c0_6, %c0_7] : memref<32x1xf32, #tpu.memory_space<vmem>>, vector<32x1xf32>
    tpu.vector_store %arg7[%c0_6, %c0_7], %8 {strides = array<i32>} : memref<32x1xf32, #tpu.memory_space<vmem>>, vector<32x1xf32>,
    %c0_i32_8 = arith.constant 0 : i32
    %10 = arith.cmpi eq, %arg2, %c0_i32_8 : i32
    %11 = arith.extui %10 : i1 to i32
    %c0_i32_9 = arith.constant 0 : i32
    %12 = arith.cmpi ne, %11, %c0_i32_9 : i32
    scf.if %12 {
      %c0_10 = arith.constant 0 : index
      %c0_11 = arith.constant 0 : index
      %13 = vector.load %arg7[%c0_10, %c0_11] : memref<32x1xf32, #tpu.memory_space<vmem>>, vector<32x1xf32>
      %c0_12 = arith.constant 0 : index
      %c0_13 = arith.constant 0 : index
      %14 = vector.load %arg5[%c0_12, %c0_13] : memref<1x1xf32, #tpu.memory_space<vmem>>, vector<1x1xf32>
      %15 = vector.broadcast %14 : vector<1x1xf32> to vector<32x1xf32>
      %16 = arith.addf %13, %15 : vector<32x1xf32>
      %c0_14 = arith.constant 0 : index
      %c0_15 = arith.constant 0 : index
      %17 = vector.load %arg6[%c0_14, %c0_15] : memref<32x1xf32, #tpu.memory_space<vmem>>, vector<32x1xf32>
      tpu.vector_store %arg6[%c0_14, %c0_15], %16 {strides = array<i32>} : memref<32x1xf32, #tpu.memory_space<vmem>>, vector<32x1xf32>,
    } else {
    }
    return
  }
  func.func @transform_0(%arg0: i32, %arg1: i32, %arg2: i32) -> (i32, i32) {
    %c0_i32 = arith.constant 0 : i32
    return %arg0, %arg2 : i32, i32
  }
  func.func @transform_1(%arg0: i32, %arg1: i32, %arg2: i32) -> (i32, i32) {
    %c0_i32 = arith.constant 0 : i32
    return %arg2, %arg1 : i32, i32
  }
  func.func @transform_2(%arg0: i32, %arg1: i32, %arg2: i32) -> (i32, i32) {
    %c0_i32 = arith.constant 0 : i32
    %c0_i32_0 = arith.constant 0 : i32
    return %c0_i32, %arg1 : i32, i32
  }
  func.func @transform_3(%arg0: i32, %arg1: i32, %arg2: i32) -> (i32, i32) {
    %c0_i32 = arith.constant 0 : i32
    return %arg0, %arg1 : i32, i32
  }
}

</mosaic_0001>

<bundles_post_ra>
// kernel: synthesizer_forward.13
= control target key start
LH: loop header
LB: loop body
LE: loop exit
PB: predicated region body
PF: predicated region fallthrough
CT: control target
= control target key end

     0   :  { %vm19_vm0 = vcmask 261120   ;;  %v110_v3 = vmov 0.0   ;;  %vm42_vm1 = vcmask 130048   ;;  %s173_s1 = inlined_call_operand.vmem [shape: bf16[16,32], index: 1, kind: input, shape index: {}]   ;;  %s174_s0 = inlined_call_operand.vmem [shape: f32[32,16], index: 0, kind: input, shape index: {}]   ;;  %s175_s2 = inlined_call_operand.vmem [shape: f32[1,32], index: 2, kind: input, shape index: {}]   ;;  %s176_s3 = inlined_call_operand.vmem [shape: f32[32,32], index: 3, kind: output, shape index: {}]  }
   0x1   :  { %v106_v0 = vld [vmem:[%s173_s1] sm:$0xff]  ;;  %v29_v2 = vld [vmem:[%s174_s0 + $0x8] sm:$0xff]  ;;  %20 = vst.msk [vmem:[#allocation2] sm:$0xff] %vm19_vm0, %v110_v3  ;;  %v30_v5 = vld [vmem:[%s174_s0 + $0x10] sm:$0xff] }
   0x2   :  { %v28_v1 = vld [vmem:[%s174_s0] sm:$0xff]  ;;  %v31_v6 = vld [vmem:[%s174_s0 + $0x18] sm:$0xff]  ;;  %21 = vst.msk [vmem:[#allocation2 + $0x8] sm:$0xff] %vm19_vm0, %v110_v3  ;;  %56 = vmatpush.bf16.msra.mxu0 %v106_v0  ;;  %107 = vmatpush.bf16.msra.mxu1 %v106_v0 }
   0x3   :  { %v32_v4 = vpack.c.bf16 %v29_v2, %v28_v1  ;;  %v33_v7 = vpack.c.bf16 %v31_v6, %v30_v5  ;;  %22 = vst.msk [vmem:[#allocation2 + $0x10] sm:$0xff] %vm19_vm0, %v110_v3  ;;  %v109_v16 = vld [vmem:[%s175_s2] ss:$0 sm:$0xff] }
   0x4   :  { %23 = vst.msk [vmem:[#allocation2 + $0x18] sm:$0xff] %vm19_vm0, %v110_v3 }
   0x5   :  { %104 = vmatmul.msk.bf16.vlgmr.msra.gmra.mxu0 %vm42_vm1, %v32_v4  ;;  %105 = vmatmul.msk.bf16.vlgmr.msra.gmra.mxu1 %vm42_vm1, %v33_v7 }
   0x8   :  { %v24_v8 = vld [vmem:[#allocation2] sm:$0xff] }
   0x9   :  { %v25_v14 = vld [vmem:[#allocation2 + $0x8] sm:$0xff] }
   0xa   :  { %v26_v9 = vld [vmem:[#allocation2 + $0x10] sm:$0xff] }
   0xb   :  { %v27_v15 = vld [vmem:[#allocation2 + $0x18] sm:$0xff] }
  0x82   :  { %v58_v10 = vpop.f32.mrf.mxu0  ;;  %v63_v11 = vpop.f32.mrf.mxu1 }
  0x83   :  { %v68_v12 = vadd.f32 %v58_v10, %v24_v8  ;;  %v70_v13 = vadd.f32 %v63_v11, %v26_v9 }
  0x85   :  { %73 = vst.msk [vmem:[#allocation2] sm:$0xff] %vm19_vm0, %v68_v12 }
  0x86   :  { %75 = vst.msk [vmem:[#allocation2 + $0x10] sm:$0xff] %vm19_vm0, %v70_v13 }
  0x8a   :  { %v60_v17 = vpop.f32.mrf.mxu0  ;;  %v65_v18 = vpop.f32.mrf.mxu1 }
  0x8b   :  { %v69_v19 = vadd.f32 %v60_v17, %v25_v14  ;;  %v71_v20 = vadd.f32 %v65_v18, %v27_v15 }
  0x8c   :  { %v80_v21 = vld [vmem:[#allocation2] sm:$0xff] }
  0x8d   :  { %v88_v22 = vadd.f32 %v109_v16, %v80_v21  ;;  %v82_v23 = vld [vmem:[#allocation2 + $0x10] sm:$0xff]  ;;  %74 = vst.msk [vmem:[#allocation2 + $0x8] sm:$0xff] %vm19_vm0, %v69_v19 }
  0x8e   :  { %v90_v24 = vadd.f32 %v109_v16, %v82_v23  ;;  %76 = vst.msk [vmem:[#allocation2 + $0x18] sm:$0xff] %vm19_vm0, %v71_v20 }
  0x8f   :  { %92 = vst.msk [vmem:[%s176_s3] sm:$0xff] %vm19_vm0, %v88_v22 }
  0x90   :  { %94 = vst.msk [vmem:[%s176_s3 + $0x10] sm:$0xff] %vm19_vm0, %v90_v24 }
  0x94   :  { %v81_v25 = vld [vmem:[#allocation2 + $0x8] sm:$0xff] }
  0x95   :  { %v89_v26 = vadd.f32 %v109_v16, %v81_v25  ;;  %v83_v27 = vld [vmem:[#allocation2 + $0x18] sm:$0xff] }
  0x96   :  { %v91_v28 = vadd.f32 %v109_v16, %v83_v27 }
  0x97   :  { %93 = vst.msk [vmem:[%s176_s3 + $0x8] sm:$0xff] %vm19_vm0, %v89_v26 }
  0x98   :  { %95 = vst.msk [vmem:[%s176_s3 + $0x18] sm:$0xff] %vm19_vm0, %v91_v28 }

// kernel: synthesizer_forward.12
= control target key start
LH: loop header
LB: loop body
LE: loop exit
PB: predicated region body
PF: predicated region fallthrough
CT: control target
= control target key end

     0   :  { %12 = vsyncpa [#allocation3], 0  ;;  %s983_s0 = inlined_call_operand.vmem [shape: f32[2,18,24], index: 0, kind: input, shape index: {}]   ;;  %s984_s1 = inlined_call_operand.vmem [shape: f32[2,16,2], index: 1, kind: input, shape index: {}]   ;;  %s985_s2 = inlined_call_operand.vmem [shape: bf16[3,24,32], index: 2, kind: input, shape index: {}]   ;;  %s986_s3 = inlined_call_operand.hbm [shape: f32[1,1,32], index: 3, kind: input, shape index: {}]   ;;  %s987_s4 = inlined_call_operand.hbm [shape: bf16[2,32], index: 4, kind: input, shape index: {}]   ;;  %s988_s5 = inlined_call_operand.hbm [shape: f32[1,32], index: 5, kind: input, shape index: {}]   ;;  %s989_s6 = inlined_call_operand.vmem [shape: f32[2,16,1], index: 6, kind: input, shape index: {}]   ;;  %s990_s7 = inlined_call_operand.vmem [shape: f32[2,16,32], index: 7, kind: output, shape index: {}]  }
   0x1   :  { %13 = vsyncpa [#allocation5], 0  ;;  %s905_s24 = smov 0  }
   0x2 LB: > { %s239_s27 = sshll.u32 %s987_s4, 4  ;;  %s663_s28 = sadd.s32 4294967295, %s859_s24   ;;  %s859_s24 = sphi %s905_s24, %s19_s24   ;;  %s240_s27 = int_to_ptr.hbm [resolvable:$true] %s239_s27 }
   0x3   : > { %p665_p0 = scmp.ge.s32.totalorder %s859_s24, 1  ;;  %p212_p1 = scmp.lt.s32.totalorder %s859_s24, 3 }
   0x4   : > { %p734_p2 = scmp.eq.s32.totalorder %s663_s28, 0  ;;  %s861_s30 = smov [#allocation4]  }
   0x5   : > { %p916_p3 = pnand %p665_p0, %p212_p1  ;;  %s241_s8 = sshll.u32 %s861_s30, 4  ;;  %s242_s8 = int_to_ptr.vmem [resolvable:$true] %s241_s8 }
   0x6   : > { %s227_s11 = sshll.u32 %s986_s3, 4  ;;  %s251_s14 = sshll.u32 %s988_s5, 4  ;;  %s228_s11 = int_to_ptr.hbm [resolvable:$true] %s227_s11  ;;  %s252_s14 = int_to_ptr.hbm [resolvable:$true] %s251_s14 }
   0x7   : > { %p724_p4 = pneg %p916_p3  ;;  %s862_s15 = smov [#allocation2]  }
   0x8   : > { %s229_s16 = sshll.u32 %s862_s15, 4  ;;  %s863_s17 = smov [#allocation6]   ;;  %s230_s16 = int_to_ptr.vmem [resolvable:$true] %s229_s16 }
   0x9   : > { %p725_p5 = pnand %p734_p2, %p724_p4  ;;  %s253_s18 = sshll.u32 %s863_s17, 4  ;;  %s254_s18 = int_to_ptr.vmem [resolvable:$true] %s253_s18 }
   0xa   : > { %290 = sbr.rel (%p916_p3) target bundleno = 185 (0xb9), region = 48 }
   0xb   : > { %730 = dma.hbm_to_vmem [thread:$0]  (!%p725_p5), %s240_s27, 16, %s242_s8, [#allocation5]  }
   0xc   : > { %727 = dma.hbm_to_vmem [thread:$0]  (!%p725_p5), %s228_s11, 16, %s230_s16, [#allocation3]  }
   0xd   : > { %733 = dma.hbm_to_vmem [thread:$0]  (!%p725_p5), %s252_s14, 16, %s254_s18, [#allocation5]  }
   0xf   : > { %850 = dma.done.wait (%p734_p2), [#allocation3], 16  }
  0x10   : > { %852 = vsyncadd (%p734_p2), [#allocation3], 4294967280 }
  0x11   : > { %854 = dma.done.wait (%p734_p2), [#allocation5], 32  }
  0x12   : > { %856 = vsyncadd (%p734_p2), [#allocation5], 4294967264  ;;  %p343_p6 = scmp.lt.s32.totalorder %s663_s28, 1  ;;  %v864_v0 = vmov 0   ;;  %vm510_vm0 = vcmask 1040384   ;;  %vm411_vm1 = vcmask 1043456  }
  0x13   : > { %752 = vset.pattern.permute.xlu0 %v864_v0  ;;  %v372_v1 = vld [vmem:[%s985_s2 + $0x8] sm:$0xf]  ;;  %v696_v2 = vld [vmem:[%s985_s2 + $0x20] sm:$0xf]  ;;  %v683_v7 = vld [vmem:[%s985_s2 + $0x14] sm:$0xf] }
  0x14   : > { %s993_s28 = smov (!%p343_p6, %s663_s28), 1  ;;  %v505_v3 = vld [vmem:[#allocation4] sm:$0x1]  ;;  %v434_v4 = vunpack.c.l.b16 %v372_v1  ;;  %v470_v5 = vunpack.c.l.b16 %v696_v2  ;;  %v403_v10 = vunpack.c.l.b16 %v683_v7  ;;  %vm506_vm2 = vcmask 15360   ;;  %v710_v26 = vld [vmem:[%s985_s2 + $0x18] sm:$0xff]  ;;  %v709_v30 = vld [vmem:[%s985_s2 + $0xc] sm:$0xff] }
  0x15   : > { %s711_s19 = smul.u32 24, %s993_s28  ;;  %s935_s20 = sshll.u32 %s993_s28, 4  ;;  %v512_v6 = vsel %vm510_vm0, %v505_v3, 0  ;;  %v708_v25 = vld [vmem:[%s985_s2] sm:$0xff]  ;;  %vm407_vm3 = vcmask 195584   ;;  %vm461_vm4 = vcmask 1046528  }
  0x16   : > { %s352_s23 = scalar_lea.vmem %s984_s1, %s935_s20  ;;  %s957_s13 = scalar_lea.vmem %s989_s6, %s935_s20  ;;  %521 = vmatpush.bf16.msra.mxu3 %v512_v6  ;;  %v436_v12 = vpack.c.b16 %v434_v4, %v434_v4  ;;  %v472_v13 = vpack.c.b16 %v470_v5, %v470_v5  ;;  %v405_v17 = vpack.c.b16 %v403_v10, %v403_v10  ;;  %vm385_vm5 = vsmask.f32 7424  ;;  %v753_v47 = vld [vmem:[#allocation2] ss:$0 sm:$0xff]  ;;  %v754_v52 = vld [vmem:[#allocation6] ss:$0 sm:$0xff] }
  0x17   : > { %s347_s28 = scalar_lea.vmem %s983_s0, %s711_s19  ;;  %v502_v8 = vld [vmem:[%s352_s23] sm:$0xff]  ;;  %v503_v9 = vld [vmem:[%s352_s23 + $0x8] sm:$0xff]  ;;  %s362_s23 = scalar_lea.vmem %s990_s7, %s935_s20  ;;  %vm550_vm6 = vcmask 261120  }
  0x18   : > { %v504_v11 = vpack.c.bf16 %v503_v9, %v502_v8  ;;  %v364_v14 = vld [vmem:[%s347_s28] sm:$0xff]  ;;  %v365_v15 = vld [vmem:[%s347_s28 + $0x8] sm:$0xff]  ;;  %v366_v16 = vld [vmem:[%s347_s28 + $0x10] sm:$0x3]  ;;  %v441_v22 = vsel %vm411_vm1, %v436_v12, 0  ;;  %v478_v23 = vsel %vm411_vm1, %v472_v13, 0 }
  0x19   : > { %v367_v18 = vpack.c.bf16 %v364_v14, %v364_v14  ;;  %v368_v19 = vpack.c.bf16 %v365_v15, %v365_v15  ;;  %v369_v20 = vpack.c.bf16 %v366_v16, %v366_v16  ;;  %v536_v21 = vld [vmem:[%s957_s13] sm:$0xff]  ;;  %449 = vmatpush.bf16.msra.mxu1 %v441_v22  ;;  %486 = vmatpush.bf16.msra.mxu2 %v478_v23  ;;  %v413_v24 = vsel %vm411_vm1, %v405_v17, 0  ;;  %v537_v38 = vld [vmem:[%s957_s13 + $0x8] sm:$0xff] }
  0x1a   : > { %702 = vmatmul.msk.bf16.vlgmr.msra.gmra.mxu3 %vm506_vm2, %v504_v11  ;;  %540 = vperm.xlu0 %752, %v536_v21  }
  0x1b   : > { %v380_v27 = vunpack.c.l.b16 %v367_v18  ;;  %v381_v28 = vunpack.c.l.b16 %v368_v19  ;;  %v382_v29 = vunpack.c.l.b16 %v369_v20  ;;  %421 = vmatpush.bf16.msra.mxu0 %v413_v24 }
  0x1d   : > { %v383_v31 = vpack.c.b16 %v381_v28, %v380_v27  ;;  %v384_v32 = vpack.c.b16 %v382_v29, %v382_v29  ;;  %450 = vmatpush.bf16.msra.mxu1 %v708_v25  ;;  %487 = vmatpush.bf16.msra.mxu2 %v710_v26 }
  0x1f   : > { %v462_v33 = vrot.slane %v383_v31, 1  ;;  %v463_v34 = vrot.slane %v384_v32, 1  ;;  %v387_v35 = vshrl.u32 %v383_v31, 16  ;;  %v389_v36 = vshll.u32 %v383_v31, 16  ;;  %422 = vmatpush.bf16.msra.mxu0 %v709_v30 }
  0x20   : > { %v394_v37 = vshll.u32 %v384_v32, 16  ;;  %693 = vmatmul.msk.bf16.vlgmr.msra.gmra.mxu1 %vm407_vm3, %v383_v31 }
  0x21   : > { %v464_v39 = vsel %vm461_vm4, %v462_v33, %v463_v34  ;;  %v391_v40 = vrot.slane %v389_v36, 1 }
  0x22   : > { %701 = vmatmul.msk.bf16.vlgmr.msra.gmra.mxu2 %vm407_vm3, %v464_v39  ;;  %v396_v41 = vrot.slane %v394_v37, 1  ;;  %545 = vperm.xlu0 %752, %v537_v38  }
  0x23   : > { %v392_v42 = vor.u32 %v391_v40, %v387_v35 }
  0x25   : > { %v397_v43 = vsel %vm385_vm5, %v392_v42, %v396_v41 }
  0x26   : > { %688 = vmatmul.msk.bf16.vlgmr.msra.gmra.mxu0 %vm407_vm3, %v397_v43 }
  0x8c   : > { %v541_v55 = vpop.permute.xlu0 %540 }
  0x94   : > { %v546_v2 = vpop.permute.xlu0 %545 }
  0x9d   : > { %v452_v44 = vpop.f32.mrf.mxu1  ;;  %v523_v50 = vpop.f32.mrf.mxu3 }
  0xa3   : > { %v424_v45 = vpop.f32.mrf.mxu0 }
  0xa4   : > { %v453_v46 = vadd.f32 %v452_v44, %v424_v45 }
  0xa5   : > { %v489_v48 = vpop.f32.mrf.mxu2  ;;  %v454_v53 = vpop.f32.mrf.mxu1 }
  0xa6   : > { %v494_v49 = vadd.f32 %v489_v48, %v453_v46  ;;  %v525_v63 = vpop.f32.mrf.mxu3 }
  0xa8   : > { %v500_v51 = vadd.f32 %v753_v47, %v494_v49 }
  0xaa   : > { %v528_v54 = vadd.f32 %v523_v50, %v500_v51 }
  0xab   : > { %v426_v56 = vpop.f32.mrf.mxu0 }
  0xac   : > { %v534_v57 = vadd.f32 %v754_v52, %v528_v54  ;;  %v455_v58 = vadd.f32 %v454_v53, %v426_v56 }
  0xad   : > { %v491_v59 = vpop.f32.mrf.mxu2 }
  0xae   : > { %v548_v60 = vmul.f32 %v541_v55, %v534_v57  ;;  %v495_v61 = vadd.f32 %v491_v59, %v455_v58 }
  0xb0   : > { %551 = vst.msk [vmem:[%s362_s23] sm:$0xff] %vm550_vm6, %v548_v60  ;;  %v501_v62 = vadd.f32 %v753_v47, %v495_v61 }
  0xb2   : > { %v529_v0 = vadd.f32 %v525_v63, %v501_v62 }
  0xb4   : > { %v535_v1 = vadd.f32 %v754_v52, %v529_v0 }
  0xb6   : > { %v549_v3 = vmul.f32 %v546_v2, %v535_v1 }
  0xb8   : > { %552 = vst.msk [vmem:[%s362_s23 + $0x8] sm:$0xff] %vm550_vm6, %v549_v3 }
  0xb9 PF: > { %s19_s24 = sadd.s32 1, %s859_s24  }
  0xba   : > { %p16_p7 = scmp.ge.s32.totalorder %s19_s24, 4  }
  0xbc   :  { %18 = sbr.rel (!%p16_p7) target bundleno = 2 (0x2), region = 99 }
  0xc1   :  { %574 = vsyncpa [#allocation3], 1 }
  0xc2   :  { %576 = vsyncpa [#allocation3 + $0x1], 1 }
  0xc3   :  { %577 = vsyncpa [#allocation5], 1 }

// kernel: synthesizer_forward.14
= control target key start
LH: loop header
LB: loop body
LE: loop exit
PB: predicated region body
PF: predicated region fallthrough
CT: control target
= control target key end

     0   :  { %s2443_s30 = smov 0   ;;  %s2445_s20 = smov 0   ;;  %s2846_s0 = inlined_call_operand.vmem [shape: f32[2,32,32], index: 0, kind: input, shape index: {}]   ;;  %s2847_s1 = inlined_call_operand.vmem [shape: f32[2,16,32], index: 1, kind: input, shape index: {}]   ;;  %s2848_s2 = inlined_call_operand.vmem [shape: f32[2,1,16], index: 2, kind: input, shape index: {}]   ;;  %s2849_s3 = inlined_call_operand.vmem [shape: f32[2,1,32], index: 3, kind: input, shape index: {}]   ;;  %s2850_s4 = inlined_call_operand.vmem [shape: f32[2,1,32], index: 4, kind: input, shape index: {}]   ;;  %s2851_s5 = inlined_call_operand.vmem [shape: bf16[2,32,32], index: 5, kind: input, shape index: {}]   ;;  %s2852_s6 = inlined_call_operand.vmem [shape: f32[2,1,32], index: 6, kind: input, shape index: {}]   ;;  %s2853_s7 = inlined_call_operand.vmem [shape: bf16[2,32,64], index: 7, kind: input, shape index: {}]   ;;  %s2854_s8 = inlined_call_operand.vmem [shape: f32[2,1,64], index: 8, kind: input, shape index: {}]   ;;  %s2855_s9 = inlined_call_operand.vmem [shape: bf16[2,32,32], index: 9, kind: input, shape index: {}]   ;;  %s2856_s10 = inlined_call_operand.vmem [shape: f32[2,1,32], index: 10, kind: input, shape index: {}]   ;;  %s2857_s11 = inlined_call_operand.vmem [shape: f32[2,1,32], index: 11, kind: input, shape index: {}]   ;;  %s2858_s12 = inlined_call_operand.vmem [shape: f32[2,1,32], index: 12, kind: input, shape index: {}]   ;;  %s2859_s13 = inlined_call_operand.vmem [shape: bf16[2,32,128], index: 13, kind: input, shape index: {}]   ;;  %s2860_s14 = inlined_call_operand.vmem [shape: f32[2,1,128], index: 14, kind: input, shape index: {}]   ;;  %s2861_s15 = inlined_call_operand.vmem [shape: bf16[2,128,32], index: 15, kind: input, shape index: {}]   ;;  %s2862_s16 = inlined_call_operand.vmem [shape: f32[2,1,32], index: 16, kind: input, shape index: {}]   ;;  %s2863_s17 = inlined_call_operand.vmem [shape: f32[1,1,32], index: 17, kind: input, shape index: {}]   ;;  %s2864_s18 = inlined_call_operand.vmem [shape: f32[1,1,32], index: 18, kind: input, shape index: {}]   ;;  %s2865_s19 = inlined_call_operand.vmem [shape: f32[2,32,32], index: 19, kind: output, shape index: {}]  }
   0x1   :  { %2872 = sst [smem:[#allocation11_spill]] %s2846_s0  ;;  %s2441_s0 = smov 0  }
   0x2   :  { %2873 = sst [smem:[#allocation12_spill]] %s2847_s1  ;;  %s2447_s21 = smov 0  }
   0x3   :  { %2874 = sst [smem:[#allocation13_spill]] %s2848_s2  ;;  %s2449_s1 = smov 0  }
   0x4   :  { %2875 = sst [smem:[#allocation14_spill]] %s2849_s3 }
   0x5   :  { %2876 = sst [smem:[#allocation15_spill]] %s2851_s5 }
   0x6   :  { %2877 = sst [smem:[#allocation16_spill]] %s2853_s7 }
   0x7   :  { %2878 = sst [smem:[#allocation17_spill]] %s2855_s9 }
   0x8   :  { %2879 = sst [smem:[#allocation18_spill]] %s2856_s10 }
   0x9   :  { %2880 = sst [smem:[#allocation19_spill]] %s2857_s11 }
   0xa   :  { %2881 = sst [smem:[#allocation20_spill]] %s2858_s12 }
   0xb   :  { %2882 = sst [smem:[#allocation21_spill]] %s2859_s13 }
   0xc   :  { %2883 = sst [smem:[#allocation22_spill]] %s2860_s14 }
   0xd   :  { %2884 = sst [smem:[#allocation23_spill]] %s2861_s15 }
   0xe   :  { %2885 = sst [smem:[#allocation24_spill]] %s2862_s16 }
   0xf   :  { %2886 = sst [smem:[#allocation25_spill]] %s2863_s17 }
  0x10   :  { %2887 = sst [smem:[#allocation26_spill]] %s2864_s18 }
  0x11   :  { %2888 = sst [smem:[#allocation27_spill]] %s2865_s19 }
  0x12 LB: > { %2889 = sst [smem:[#allocation3_spill]] %s2317_s0  ;;  %s38_s22 = sadd.s32 1, %s2325_s20  ;;  %s2333_s1 = sphi %s2449_s1, %s29_s1   ;;  %s2329_s21 = sphi %s2447_s21, %s2936_s21   ;;  %s2325_s20 = sphi %s2445_s20, %s2935_s20   ;;  %s2321_s30 = sphi %s2443_s30, %s2934_s30   ;;  %s2317_s0 = sphi %s2441_s0, %s2933_s0  }
  0x13   : > { %2890 = sst [smem:[#allocation4_spill]] %s2325_s20  ;;  %s41_s2 = sadd.s32 1, %s2329_s21 }
  0x14   : > { %2891 = sst [smem:[#allocation5_spill]] %s2329_s21  ;;  %p39_p0 = scmp.ge.s32.totalorder %s38_s22, 2 }
  0x15   : > { %2892 = sst [smem:[#allocation6_spill]] %s2333_s1  ;;  %p2030_p1 = scmp.ge.s32.totalorder %s2333_s1, 1 }
  0x16   : > { %p689_p2 = scmp.lt.s32.totalorder %s2333_s1, 5  ;;  %s2938_s22 = smov (%p39_p0, %s38_s22), 0 }
  0x17   : > { %2893 = sst [smem:[#allocation7_spill]] %s2938_s22  ;;  %s2940_s2 = smov (!%p39_p0, %s41_s2), %s2329_s21 }
  0x18   : > { %p690_p3 = pnand %p2030_p1, %p689_p2  ;;  %p43_p4 = scmp.ge.s32.totalorder %s2940_s2, 2 }
  0x1a   : > { %s2942_s2 = smov (%p43_p4, %s2940_s2), 0  ;;  %693 = sbr.rel (%p690_p3) target bundleno = 2272 (0x8e0), region = 96 }
  0x1b   : > { %2894 = sst [smem:[#allocation8_spill]] %s2942_s2 }
  0x1f   : > { %p805_p5 = scmp.lt.s32.totalorder %s2321_s30, 1  ;;  %p818_p6 = scmp.lt.s32.totalorder %s2317_s0, 1 }
  0x20   : > { %s2896_s27 = sld [smem:[#allocation11_spill]] }
  0x21   : > { %s2944_s30 = smov (!%p805_p5, %s2321_s30), 1  ;;  %s2897_s22 = sld [smem:[#allocation12_spill]] }
  0x22   : > { %2895 = sst [smem:[#allocation9_spill]] %s2944_s30  ;;  %s2130_s24 = sshll.u32 %s2944_s30, 5 }
  0x23   : > { %s2477_s23 = scalar_select %p818_p6, %s2317_s0, 1 }
  0x24   : > { %s2131_s25 = sshll.u32 %s2944_s30, 4  ;;  %s2900_s5 = sld [smem:[#allocation15_spill]] }
  0x25   : > { %s2132_s26 = sshll.u32 %s2477_s23, 4  ;;  %s2901_s7 = sld [smem:[#allocation16_spill]] }
  0x26   : > { %s809_s28 = scalar_lea.vmem %s2896_s27, %s2130_s24  ;;  %s2902_s9 = sld [smem:[#allocation17_spill]] }
  0x27   : > { %s2487_s21 = scalar_lea.vmem %s2897_s22, %s2131_s25  ;;  %s2906_s16 = sld [smem:[#allocation20_spill]] }
  0x28   : > { %s2907_s19 = sld [smem:[#allocation21_spill]]  ;;  %s2136_s30 = sshll.u32 %s2477_s23, 6 }
  0x29   : > { %s2909_s3 = sld [smem:[#allocation24_spill]] }
  0x2a   : > { %s2505_s2 = scalar_lea.vmem %s2900_s5, %s2132_s26  ;;  %s2910_s20 = sld [smem:[#allocation23_spill]] }
  0x2b   : > { %s2514_s29 = scalar_lea.vmem %s2901_s7, %s2132_s26  ;;  %s2911_s18 = sld [smem:[#allocation27_spill]] }
  0x2c   : > { %s2523_s17 = scalar_lea.vmem %s2902_s9, %s2132_s26  ;;  %s2908_s9 = sld [smem:[#allocation22_spill]] }
  0x2d   : > { %2903 = sst [smem:[#allocation10_spill]] %s2523_s17  ;;  %s853_s5 = scalar_lea.vmem %s2906_s16, %s2477_s23 }
  0x2e   : > { %s2540_s13 = scalar_lea.vmem %s2907_s19, %s2132_s26  ;;  %s2912_s26 = sld [smem:[#allocation3_spill]] }
  0x2f   : > { %s869_s10 = scalar_lea.vmem %s2909_s3, %s2477_s23 }
  0x30   : > { %s2554_s11 = scalar_lea.vmem %s2910_s20, %s2136_s30 }
  0x31   : > { %s2559_s7 = scalar_lea.vmem %s2911_s18, %s2130_s24 }
  0x32   : > { %s861_s17 = scalar_lea.vmem %s2908_s9, %s2477_s23 }
  0x34   : > { %p2047_p7 = scmp.ne.s32.totalorder %s2912_s26, 0 }
  0x36   : > { %879 = sbr.rel (%p2047_p7) target bundleno = 64 (0x40), region = 100 }
  0x3b   : > { %v880_v0 = vld [vmem:[%s809_s28] sm:$0xff]  ;;  %vm884_vm0 = vcmask 261120   ;;  %v881_v1 = vld [vmem:[%s809_s28 + $0x8] sm:$0xff]  ;;  %v882_v2 = vld [vmem:[%s809_s28 + $0x10] sm:$0xff] }
  0x3c   : > { %885 = vst.msk [vmem:[#allocation2] sm:$0xff] %vm884_vm0, %v880_v0  ;;  %v883_v3 = vld [vmem:[%s809_s28 + $0x18] sm:$0xff] }
  0x3d   : > { %886 = vst.msk [vmem:[#allocation2 + $0x8] sm:$0xff] %vm884_vm0, %v881_v1 }
  0x3e   : > { %887 = vst.msk [vmem:[#allocation2 + $0x10] sm:$0xff] %vm884_vm0, %v882_v2 }
  0x3f   : > { %888 = vst.msk [vmem:[#allocation2 + $0x18] sm:$0xff] %vm884_vm0, %v883_v3 }
  0x40 PF: > { %vm898_vm1 = vcmask 261120   ;;  %v2335_v12 = vmov 32.0   ;;  %v2141_v39 = vld [vmem:[%s2514_s29 + $0x8] sm:$0xff]  ;;  %v2140_v40 = vld [vmem:[%s2514_s29] sm:$0xff]  ;;  %s2916_s15 = scalar_lea.vmem %s2854_s8, %s2477_s23  ;;  %vm1098_vm15 = vcmask 130048   ;;  %s2336_s19 = smov 112  }
  0x41   : > { %2227 = vrcp.f32 %v2335_v12  ;;  %1085 = vmatpush.bf16.msra.mxu1 %v2141_v39  ;;  %v893_v41 = vld [vmem:[%s2487_s21] sm:$0xff]  ;;  %v894_v42 = vld [vmem:[%s2487_s21 + $0x8] sm:$0xff]  ;;  %s2913_s21 = sld [smem:[#allocation14_spill]]  ;;  %s2917_s12 = scalar_lea.vmem %s2852_s6, %s2477_s23 }
  0x42   : > { %v1060_v43 = vpack.c.bf16 %v894_v42, %v893_v41  ;;  %v2139_v44 = vld [vmem:[%s2505_s2 + $0x8] sm:$0xff]  ;;  %v2138_v48 = vld [vmem:[%s2505_s2] sm:$0xff]  ;;  %s2915_s2 = scalar_lea.vmem %s2850_s4, %s2477_s23  ;;  %s2918_s27 = sld [smem:[#allocation9_spill]] }
  0x43   : > { %v2564_v5 = vld [vmem:[#allocation2] sm:$0xff]  ;;  %1042 = vmatpush.bf16.msra.mxu0 %v2139_v44  ;;  %s2919_s16 = sld [smem:[#allocation13_spill]]  ;;  %s2338_s18 = smov 96  }
  0x44   : > { %v899_v7 = vsel %vm898_vm1, %v2564_v5, 0.0  ;;  %v2572_v9 = vld [vmem:[#allocation2 + $0x8] sm:$0xff]  ;;  %s2339_s26 = smov 80   ;;  %s2921_s9 = sld [smem:[#allocation10_spill]] }
  0x45   : > { %v2562_v4 = vld [vmem:[#allocation2 + $0x10] sm:$0xff]  ;;  %900 = vadd.xlane.f32.xlu0 %v899_v7  ;;  %v902_v11 = vsel %vm898_vm1, %v2572_v9, 0.0  ;;  %1086 = vmatpush.bf16.msra.mxu1 %v2140_v40  ;;  %s2340_s30 = smov 16   ;;  %s2922_s28 = sld [smem:[#allocation18_spill]] }
  0x46   : > { %v905_v6 = vsel %vm898_vm1, %v2562_v4, 0.0  ;;  %v2570_v8 = vld [vmem:[#allocation2 + $0x18] sm:$0xff]  ;;  %s2924_s20 = sld [smem:[#allocation19_spill]] }
  0x47   : > { %906 = vadd.xlane.f32.xlu1 %v905_v6  ;;  %v908_v10 = vsel %vm898_vm1, %v2570_v8, 0.0  ;;  %v2228_v13 = vpop.eup %2227  ;;  %1043 = vmatpush.bf16.msra.mxu0 %v2138_v48  ;;  %s2914_s24 = scalar_lea.vmem %s2913_s21, %s2477_s23 }
  0x48   : > { %v912_v14 = vmul.f32 32.0, %v2228_v13  ;;  %vm916_vm2 = vweird.f32 %v2228_v13  ;;  %2066 = vmatmul.msk.bf16.vlgmr.msra.gmra.mxu1 %vm898_vm1, %v1060_v43 }
  0x49   : > { %s2920_s1 = scalar_lea.vmem %s2919_s16, %s2918_s27 }
  0x4a   : > { %v913_v15 = vsub.f32 1.0, %v912_v14 }
  0x4b   : > { %s2923_s3 = scalar_lea.vmem %s2922_s28, %s2477_s23 }
  0x4c   : > { %v914_v16 = vmul.f32 %v2228_v13, %v913_v15  ;;  %s2925_s29 = scalar_lea.vmem %s2924_s20, %s2477_s23 }
  0x4d   : > { %903 = vadd.xlane.f32.xlu0 %v902_v11 }
  0x4e   : > { %v915_v17 = vadd.f32 %v2228_v13, %v914_v16 }
  0x4f   : > { %909 = vadd.xlane.f32.xlu1 %v908_v10 }
  0x50   : > { %v2578_v18 = vsel %vm916_vm2, %v2228_v13, %v915_v17 }
  0xb8   : > { %v901_v20 = vpop.xlane.xlu0 %900 }
  0xb9   : > { %v918_v22 = vmul.f32 %v2578_v18, %v901_v20 }
  0xba   : > { %v907_v19 = vpop.xlane.xlu1 %906 }
  0xbb   : > { %v920_v21 = vmul.f32 %v2578_v18, %v907_v19  ;;  %v2586_v24 = vsub.f32 %v2564_v5, %v918_v22  ;;  %v2218_v19 = vld [vmem:[%s2914_s24] ss:$0 sm:$0xff] }
  0xbd   : > { %v2583_v23 = vsub.f32 %v2562_v4, %v920_v21  ;;  %v926_v26 = vmul.f32 %v2586_v24, %v2586_v24 }
  0xbf   : > { %v928_v25 = vmul.f32 %v2583_v23, %v2583_v23  ;;  %v930_v28 = vsel %vm898_vm1, %v926_v26, 0.0 }
  0xc0   : > { %931 = vadd.xlane.f32.xlu2 %v930_v28  ;;  %v904_v30 = vpop.xlane.xlu0 %903  ;;  %v2219_v28 = vld [vmem:[%s2915_s2] ss:$0 sm:$0xff] }
  0xc1   : > { %v936_v27 = vsel %vm898_vm1, %v928_v25, 0.0  ;;  %v919_v32 = vmul.f32 %v2578_v18, %v904_v30 }
  0xc2   : > { %v910_v29 = vpop.xlane.xlu1 %909  ;;  %937 = vadd.xlane.f32.xlu0 %v936_v27 }
  0xc3   : > { %v921_v31 = vmul.f32 %v2578_v18, %v910_v29  ;;  %v2600_v34 = vsub.f32 %v2572_v9, %v919_v32 }
  0xc5   : > { %v2597_v33 = vsub.f32 %v2570_v8, %v921_v31  ;;  %v927_v36 = vmul.f32 %v2600_v34, %v2600_v34 }
  0xc7   : > { %v929_v35 = vmul.f32 %v2597_v33, %v2597_v33  ;;  %v933_v38 = vsel %vm898_vm1, %v927_v36, 0.0 }
  0xc8   : > { %934 = vadd.xlane.f32.xlu2 %v933_v38 }
  0xc9   : > { %v939_v37 = vsel %vm898_vm1, %v929_v35, 0.0 }
  0xca   : > { %940 = vadd.xlane.f32.xlu1 %v939_v37 }
 0x133   : > { %v932_v45 = vpop.xlane.xlu2 %931 }
 0x134   : > { %v942_v46 = vmul.f32 %v932_v45, %v2578_v18  ;;  %v1088_v45 = vpop.f32.mrf.mxu1 }
 0x135   : > { %v938_v47 = vpop.xlane.xlu0 %937 }
 0x136   : > { %v946_v49 = vadd.f32 1e-05, %v942_v46  ;;  %v944_v50 = vmul.f32 %v938_v47, %v2578_v18  ;;  %v2220_v46 = vld [vmem:[%s2916_s15] ss:$0 sm:$0xff] }
 0x137   : > { %v1089_v47 = vadd.f32 %v2220_v46, %v1088_v45 }
 0x138   : > { %2229 = vrsqrt.f32 %v946_v49  ;;  %v948_v51 = vadd.f32 1e-05, %v944_v50  ;;  %vm956_vm4 = vweird.f32 %v946_v49 }
 0x13a   : > { %2231 = vrsqrt.f32 %v948_v51  ;;  %vm976_vm11 = vweird.f32 %v948_v51 }
 0x13b   : > { %v935_v53 = vpop.xlane.xlu2 %934 }
 0x13c   : > { %v943_v55 = vmul.f32 %v935_v53, %v2578_v18  ;;  %v1090_v48 = vpop.f32.mrf.mxu1 }
 0x13d   : > { %v941_v52 = vpop.xlane.xlu1 %940 }
 0x13e   : > { %v945_v54 = vmul.f32 %v941_v52, %v2578_v18  ;;  %v2230_v56 = vpop.eup %2229  ;;  %v947_v58 = vadd.f32 1e-05, %v943_v55 }
 0x13f   : > { %v951_v59 = vmul.f32 %v2230_v56, %v946_v49  ;;  %vm957_vm3 = vweird.f32 %v2230_v56  ;;  %v1091_v49 = vadd.f32 %v2220_v46, %v1090_v48 }
 0x140   : > { %v949_v57 = vadd.f32 1e-05, %v945_v54  ;;  %v2232_v62 = vpop.eup %2231  ;;  %vm958_vm5 = vmor %vm956_vm4, %vm957_vm3  ;;  %vm966_vm7 = vweird.f32 %v947_v58 }
 0x141   : > { %v952_v60 = vmul.f32 %v2230_v56, %v951_v59  ;;  %v971_v6 = vmul.f32 %v2232_v62, %v948_v51  ;;  %vm977_vm12 = vweird.f32 %v2232_v62  ;;  %v2221_v51 = vld [vmem:[%s2917_s12] ss:$0 sm:$0xff] }
 0x142   : > { %2233 = vrsqrt.f32 %v949_v57  ;;  %vm986_vm9 = vweird.f32 %v949_v57  ;;  %vm978_vm14 = vmor %vm976_vm11, %vm977_vm12 }
 0x143   : > { %2235 = vrsqrt.f32 %v947_v58  ;;  %v953_v61 = vmul.f32 0.5, %v952_v60  ;;  %v972_v13 = vmul.f32 %v2232_v62, %v971_v6 }
 0x145   : > { %v954_v63 = vsub.f32 1.5, %v953_v61  ;;  %v973_v20 = vmul.f32 0.5, %v972_v13 }
 0x147   : > { %v955_v3 = vmul.f32 %v2230_v56, %v954_v63 }
 0x148   : > { %v2234_v0 = vpop.eup %2233 }
 0x149   : > { %v2236_v1 = vpop.eup %2235  ;;  %v981_v2 = vmul.f32 %v2234_v0, %v949_v57  ;;  %v959_v12 = vsel %vm958_vm5, %v2230_v56, %v955_v3  ;;  %vm987_vm10 = vweird.f32 %v2234_v0 }
 0x14a   : > { %v961_v7 = vmul.f32 %v2236_v1, %v947_v58  ;;  %vm967_vm6 = vweird.f32 %v2236_v1  ;;  %v990_v17 = vmul.f32 %v959_v12, %v2586_v24  ;;  %v974_v24 = vsub.f32 1.5, %v973_v20  ;;  %vm988_vm13 = vmor %vm986_vm9, %vm987_vm10 }
 0x14b   : > { %v982_v10 = vmul.f32 %v2234_v0, %v981_v2  ;;  %vm968_vm8 = vmor %vm966_vm7, %vm967_vm6 }
 0x14c   : > { %v962_v11 = vmul.f32 %v2236_v1, %v961_v7  ;;  %v997_v27 = vmul.f32 %v2218_v19, %v990_v17  ;;  %v975_v35 = vmul.f32 %v2232_v62, %v974_v24 }
 0x14d   : > { %v983_v15 = vmul.f32 0.5, %v982_v10 }
 0x14e   : > { %v963_v14 = vmul.f32 0.5, %v962_v11  ;;  %v1004_v31 = vadd.f32 %v2219_v28, %v997_v27  ;;  %v979_v37 = vsel %vm978_vm14, %v2232_v62, %v975_v35 }
 0x14f   : > { %v984_v22 = vsub.f32 1.5, %v983_v15  ;;  %v992_v39 = vmul.f32 %v979_v37, %v2583_v23 }
 0x150   : > { %v964_v16 = vsub.f32 1.5, %v963_v14 }
 0x151   : > { %v985_v30 = vmul.f32 %v2234_v0, %v984_v22  ;;  %v999_v41 = vmul.f32 %v2218_v19, %v992_v39 }
 0x152   : > { %v965_v21 = vmul.f32 %v2236_v1, %v964_v16 }
 0x153   : > { %v989_v36 = vsel %vm988_vm13, %v2234_v0, %v985_v30  ;;  %v1006_v43 = vadd.f32 %v2219_v28, %v999_v41  ;;  %v895_v0 = vld [vmem:[%s2920_s1] sm:$0x1] }
 0x154   : > { %v969_v25 = vsel %vm968_vm8, %v2236_v1, %v965_v21  ;;  %v993_v38 = vmul.f32 %v989_v36, %v2597_v33  ;;  %v2640_v33 = vpack.c.bf16 %v1091_v49, %v1089_v47  ;;  %vm1093_vm0 = vcmp.gt.f32.partialorder %v895_v0, 0.5 }
 0x155   : > { %v991_v26 = vmul.f32 %v969_v25, %v2600_v34  ;;  %v2337_v1 = vmov -1e+09  }
 0x156   : > { %v1000_v40 = vmul.f32 %v2218_v19, %v993_v38  ;;  %v1106_v23 = vsel %vm1098_vm15, %v2640_v33, 0  ;;  %1219 = vrot.lane.b32.xlu2 %v2640_v33, %s2336_s19  ;;  %v1094_v2 = vsel %vm1093_vm0, 0.0, %v2337_v1 }
 0x157   : > { %v998_v29 = vmul.f32 %v2218_v19, %v991_v26  ;;  %1115 = vmatpush.bf16.xpose.msra.mxu2 %v1106_v23  ;;  %v1132_v6 = vperm.slane %v1094_v2, 0 }
 0x158   : > { %v1007_v42 = vadd.f32 %v2219_v28, %v1000_v40 }
 0x159   : > { %v1005_v32 = vadd.f32 %v2219_v28, %v998_v29 }
 0x15a   : > { %v1014_v44 = vpack.c.bf16 %v1007_v42, %v1006_v43 }
 0x15b   : > { %v1013_v34 = vpack.c.bf16 %v1005_v32, %v1004_v31 }
 0x15d   : > { %2056 = vmatmul.msk.bf16.vlgmr.msra.gmra.mxu0 %vm898_vm1, %v1013_v34 }
 0x16d   : > { %2057 = vmatmul.msk.bf16.gmra.mxu0 %vm898_vm1, %v1014_v44 }
 0x1b0   : > { %v1220_v61 = vpop.permute.xlu2 %1219 }
 0x1b1   : > { %v1228_v62 = vsel %vm1098_vm15, %v1220_v61, 0 }
 0x1b2   : > { %1237 = vmatpush.bf16.xpose.msrb.mxu1 %v1228_v62 }
 0x1da   : > { %v1045_v50 = vpop.f32.mrf.mxu0 }
 0x1db   : > { %v1046_v53 = vadd.f32 %v2221_v51, %v1045_v50 }
 0x1e2   : > { %v1047_v52 = vpop.f32.mrf.mxu0 }
 0x1e3   : > { %v1048_v54 = vadd.f32 %v2221_v51, %v1047_v52 }
 0x1e5   : > { %v1095_v55 = vpack.c.bf16 %v1048_v54, %v1046_v53 }
 0x1e7   : > { %1215 = vrot.lane.b32.xlu0 %v1095_v55, %s2336_s19  ;;  %2067 = vmatmul.msk.bf16.vlgmr.msra.gmra.mxu2 %vm1098_vm15, %v1095_v55 }
 0x1ea   : > { %v1050_v56 = vpop.f32.mrf.mxu0 }
 0x1eb   : > { %v1051_v58 = vadd.f32 %v2221_v51, %v1050_v56 }
 0x1f2   : > { %v1052_v57 = vpop.f32.mrf.mxu0 }
 0x1f3   : > { %v1053_v59 = vadd.f32 %v2221_v51, %v1052_v57 }
 0x1f5   : > { %v1096_v60 = vpack.c.bf16 %v1053_v59, %v1051_v58 }
 0x1f7   : > { %1217 = vrot.lane.b32.xlu1 %v1096_v60, %s2336_s19  ;;  %2068 = vmatmul.msk.bf16.gmra.mxu2 %vm1098_vm15, %v1096_v60 }
 0x259   : > { %v1216_v63 = vpop.permute.xlu0 %1215 }
 0x25a   : > { %2071 = vmatmul.msk.bf16.vlgmr.msrb.gmra.mxu1 %vm1098_vm15, %v1216_v63 }
 0x269   : > { %v1218_v3 = vpop.permute.xlu1 %1217 }
 0x26a   : > { %v1117_v7 = vpop.f32.mrf.mxu2  ;;  %2072 = vmatmul.msk.bf16.gmra.mxu1 %vm1098_vm15, %v1218_v3 }
 0x26b   : > { %v1127_v10 = vmul.f32 0.25, %v1117_v7 }
 0x26d   : > { %v1134_v11 = vadd.f32 %v1132_v6, %v1127_v10 }
 0x26f   : > { %v1138_v12 = vsel %vm1098_vm15, %v1134_v11, -inf }
 0x270   : > { %1139 = vmax.xlane.f32.xlu2 %v1138_v12 }
 0x272   : > { %v1119_v13 = vpop.f32.mrf.mxu2 }
 0x273   : > { %v1128_v14 = vmul.f32 0.25, %v1119_v13 }
 0x275   : > { %v1135_v15 = vadd.f32 %v1132_v6, %v1128_v14 }
 0x277   : > { %v1141_v16 = vsel %vm1098_vm15, %v1135_v15, -inf }
 0x278   : > { %1142 = vmax.xlane.f32.xlu0 %v1141_v16 }
 0x27a   : > { %v1122_v17 = vpop.f32.mrf.mxu2 }
 0x27b   : > { %v1129_v19 = vmul.f32 0.25, %v1122_v17 }
 0x27d   : > { %v1136_v20 = vadd.f32 %v1132_v6, %v1129_v19 }
 0x27f   : > { %v1144_v21 = vsel %vm1098_vm15, %v1136_v20, -inf }
 0x280   : > { %1145 = vmax.xlane.f32.xlu1 %v1144_v21 }
 0x282   : > { %v1124_v22 = vpop.f32.mrf.mxu2 }
 0x283   : > { %v1130_v25 = vmul.f32 0.25, %v1124_v22 }
 0x285   : > { %v1137_v26 = vadd.f32 %v1132_v6, %v1130_v25 }
 0x287   : > { %v1147_v27 = vsel %vm1098_vm15, %v1137_v26, -inf }
 0x288   : > { %1148 = vmax.xlane.f32.xlu2 %v1147_v27 }
 0x2d7   : > { %v1239_v28 = vpop.f32.mrf.mxu1 }
 0x2d8   : > { %v1249_v24 = vmul.f32 0.25, %v1239_v28 }
 0x2da   : > { %v1253_v29 = vadd.f32 %v1249_v24, %v1132_v6 }
 0x2dc   : > { %v1257_v30 = vsel %vm1098_vm15, %v1253_v29, -inf }
 0x2dd   : > { %1258 = vmax.xlane.f32.xlu0 %v1257_v30 }
 0x2df   : > { %v1241_v31 = vpop.f32.mrf.mxu1 }
 0x2e0   : > { %v1250_v32 = vmul.f32 0.25, %v1241_v31 }
 0x2e2   : > { %v1254_v35 = vadd.f32 %v1250_v32, %v1132_v6 }
 0x2e3   : > { %v1140_v34 = vpop.xlane.xlu2 %1139 }
 0x2e4   : > { %v1150_v36 = vsub.f32 %v1134_v11, %v1140_v34  ;;  %v1260_v37 = vsel %vm1098_vm15, %v1254_v35, -inf }
 0x2e5   : > { %1261 = vmax.xlane.f32.xlu2 %v1260_v37 }
 0x2e6   : > { %v1154_v38 = vmul.f32 1.442695, %v1150_v36 }
 0x2e7   : > { %v1244_v39 = vpop.f32.mrf.mxu1 }
 0x2e8   : > { %2237 = vpow2.f32 %v1154_v38  ;;  %v1251_v40 = vmul.f32 0.25, %v1244_v39 }
 0x2ea   : > { %v1255_v41 = vadd.f32 %v1251_v40, %v1132_v6 }
 0x2eb   : > { %v1143_v42 = vpop.xlane.xlu0 %1142 }
 0x2ec   : > { %v1151_v43 = vsub.f32 %v1135_v15, %v1143_v42  ;;  %v1263_v44 = vsel %vm1098_vm15, %v1255_v41, -inf }
 0x2ed   : > { %1264 = vmax.xlane.f32.xlu1 %v1263_v44 }
 0x2ee   : > { %v2667_v45 = vpop.eup %2237  ;;  %v1156_v46 = vmul.f32 1.442695, %v1151_v43 }
 0x2ef   : > { %v1246_v47 = vpop.f32.mrf.mxu1  ;;  %v1162_v48 = vsel %vm1098_vm15, %v2667_v45, 0.0 }
 0x2f0   : > { %2239 = vpow2.f32 %v1156_v46  ;;  %v1252_v49 = vmul.f32 0.25, %v1246_v47  ;;  %1163 = vadd.xlane.f32.xlu2 %v1162_v48 }
 0x2f2   : > { %v1256_v23 = vadd.f32 %v1252_v49, %v1132_v6 }
 0x2f3   : > { %v1146_v50 = vpop.xlane.xlu1 %1145 }
 0x2f4   : > { %v1152_v51 = vsub.f32 %v1136_v20, %v1146_v50  ;;  %v1266_v52 = vsel %vm1098_vm15, %v1256_v23, -inf }
 0x2f5   : > { %1267 = vmax.xlane.f32.xlu0 %v1266_v52 }
 0x2f6   : > { %v2240_v53 = vpop.eup %2239  ;;  %v1158_v54 = vmul.f32 1.442695, %v1152_v51 }
 0x2f7   : > { %v1165_v55 = vsel %vm1098_vm15, %v2240_v53, 0.0 }
 0x2f8   : > { %2241 = vpow2.f32 %v1158_v54  ;;  %1166 = vadd.xlane.f32.xlu1 %v1165_v55 }
 0x2fb   : > { %v1149_v56 = vpop.xlane.xlu2 %1148 }
 0x2fc   : > { %v1153_v57 = vsub.f32 %v1137_v26, %v1149_v56 }
 0x2fe   : > { %v2242_v58 = vpop.eup %2241  ;;  %v1160_v59 = vmul.f32 1.442695, %v1153_v57 }
 0x2ff   : > { %v1168_v60 = vsel %vm1098_vm15, %v2242_v58, 0.0 }
 0x300   : > { %2243 = vpow2.f32 %v1160_v59  ;;  %1169 = vadd.xlane.f32.xlu2 %v1168_v60 }
 0x306   : > { %v2244_v61 = vpop.eup %2243 }
 0x307   : > { %v1171_v62 = vsel %vm1098_vm15, %v2244_v61, 0.0 }
 0x308   : > { %1172 = vadd.xlane.f32.xlu1 %v1171_v62 }
 0x309   : > { %1185 = vrot.lane.b32.xlu0 %v2640_v33, %s2338_s18 }
 0x350   : > { %v1259_v63 = vpop.xlane.xlu0 %1258 }
 0x351   : > { %v1269_v0 = vsub.f32 %v1253_v29, %v1259_v63 }
 0x353   : > { %v1273_v1 = vmul.f32 1.442695, %v1269_v0  ;;  %v2143_v0 = vld [vmem:[%s2921_s9 + $0x8] sm:$0xff] }
 0x354   : > { %1385 = vmatpush.bf16.msrb.mxu0 %v2143_v0 }
 0x355   : > { %2245 = vpow2.f32 %v1273_v1  ;;  %v2142_v1 = vld [vmem:[%s2921_s9] sm:$0xff] }
 0x358   : > { %v1262_v2 = vpop.xlane.xlu2 %1261  ;;  %1386 = vmatpush.bf16.msrb.mxu0 %v2142_v1 }
 0x359   : > { %v1270_v3 = vsub.f32 %v1254_v35, %v1262_v2 }
 0x35b   : > { %v2246_v6 = vpop.eup %2245  ;;  %v1275_v7 = vmul.f32 1.442695, %v1270_v3 }
 0x35c   : > { %v1281_v10 = vsel %vm1098_vm15, %v2246_v6, 0.0 }
 0x35d   : > { %2247 = vpow2.f32 %v1275_v7  ;;  %1282 = vadd.xlane.f32.xlu2 %v1281_v10 }
 0x360   : > { %v1265_v11 = vpop.xlane.xlu1 %1264 }
 0x361   : > { %v1271_v12 = vsub.f32 %v1255_v41, %v1265_v11 }
 0x363   : > { %v2248_v13 = vpop.eup %2247  ;;  %v1277_v14 = vmul.f32 1.442695, %v1271_v12  ;;  %v1164_v25 = vpop.xlane.xlu2 %1163 }
 0x364   : > { %v1284_v15 = vsel %vm1098_vm15, %v2248_v13, 0.0 }
 0x365   : > { %2249 = vpow2.f32 %v1277_v14  ;;  %1285 = vadd.xlane.f32.xlu1 %v1284_v15 }
 0x368   : > { %v1268_v16 = vpop.xlane.xlu0 %1267 }
 0x369   : > { %v1272_v17 = vsub.f32 %v1256_v23, %v1268_v16 }
 0x36b   : > { %v2250_v19 = vpop.eup %2249  ;;  %v1279_v20 = vmul.f32 1.442695, %v1272_v17  ;;  %v1167_v22 = vpop.xlane.xlu1 %1166 }
 0x36c   : > { %v1287_v21 = vsel %vm1098_vm15, %v2250_v19, 0.0 }
 0x36d   : > { %2251 = vpow2.f32 %v1279_v20  ;;  %1288 = vadd.xlane.f32.xlu0 %v1287_v21 }
 0x36e   : > { %2253 = vrcp.f32 %v1167_v22 }
 0x36f   : > { %2255 = vrcp.f32 %v1164_v25 }
 0x373   : > { %v2252_v26 = vpop.eup %2251  ;;  %v1170_v34 = vpop.xlane.xlu2 %1169 }
 0x374   : > { %v1290_v27 = vsel %vm1098_vm15, %v2252_v26, 0.0  ;;  %v2254_v28 = vpop.eup %2253 }
 0x375   : > { %1303 = vrot.lane.b32.xlu2 %v2640_v33, %s2339_s26  ;;  %1291 = vadd.xlane.f32.xlu1 %v1290_v27  ;;  %v2256_v24 = vpop.eup %2255  ;;  %v1179_v29 = vmul.f32 %v2254_v28, %v2240_v53 }
 0x376   : > { %v1178_v31 = vmul.f32 %v2256_v24, %v2667_v45 }
 0x378   : > { %v1182_v35 = vpack.c.bf16 %v1179_v29, %v1178_v31 }
 0x37b   : > { %v1186_v30 = vpop.permute.xlu0 %1185  ;;  %v1173_v32 = vpop.xlane.xlu1 %1172 }
 0x37c   : > { %1201 = vmatpush.bf16.msra.mxu3 %v1186_v30  ;;  %2257 = vrcp.f32 %v1173_v32 }
 0x37d   : > { %2259 = vrcp.f32 %v1170_v34 }
 0x37f   : > { %2069 = vmatmul.msk.bf16.vlgmr.msra.gmra.mxu3 %vm1098_vm15, %v1182_v35 }
 0x382   : > { %v2258_v36 = vpop.eup %2257 }
 0x383   : > { %v2260_v37 = vpop.eup %2259  ;;  %v1181_v38 = vmul.f32 %v2258_v36, %v2244_v61 }
 0x384   : > { %v1180_v39 = vmul.f32 %v2260_v37, %v2242_v58 }
 0x386   : > { %v1183_v33 = vpack.c.bf16 %v1181_v38, %v1180_v39 }
 0x38f   : > { %2070 = vmatmul.msk.bf16.gmra.mxu3 %vm1098_vm15, %v1183_v33 }
 0x3d0   : > { %v1283_v40 = vpop.xlane.xlu2 %1282 }
 0x3d1   : > { %2261 = vrcp.f32 %v1283_v40 }
 0x3d7   : > { %v2262_v43 = vpop.eup %2261 }
 0x3d8   : > { %v1286_v41 = vpop.xlane.xlu1 %1285  ;;  %v1304_v42 = vpop.permute.xlu2 %1303  ;;  %v1297_v45 = vmul.f32 %v2262_v43, %v2246_v6 }
 0x3d9   : > { %2263 = vrcp.f32 %v1286_v41  ;;  %1319 = vmatpush.bf16.msrb.mxu3 %v1304_v42 }
 0x3df   : > { %v2264_v44 = vpop.eup %2263 }
 0x3e0   : > { %v1298_v46 = vmul.f32 %v2264_v44, %v2248_v13  ;;  %v1289_v48 = vpop.xlane.xlu0 %1288 }
 0x3e1   : > { %2265 = vrcp.f32 %v1289_v48 }
 0x3e2   : > { %v1301_v47 = vpack.c.bf16 %v1298_v46, %v1297_v45 }
 0x3e4   : > { %2073 = vmatmul.msk.bf16.vlgmr.msrb.gmra.mxu3 %vm1098_vm15, %v1301_v47 }
 0x3e7   : > { %v2266_v23 = vpop.eup %2265 }
 0x3e8   : > { %v1292_v49 = vpop.xlane.xlu1 %1291  ;;  %v1299_v51 = vmul.f32 %v2266_v23, %v2250_v19  ;;  %v2222_v19 = vld [vmem:[%s2923_s3] ss:$0 sm:$0xff] }
 0x3e9   : > { %2267 = vrcp.f32 %v1292_v49 }
 0x3ef   : > { %v2268_v50 = vpop.eup %2267 }
 0x3f0   : > { %v1300_v52 = vmul.f32 %v2268_v50, %v2252_v26 }
 0x3f2   : > { %v1302_v53 = vpack.c.bf16 %v1300_v52, %v1299_v51  ;;  %v2145_v52 = vld [vmem:[%s2540_s13 + $0x8] sm:$0xff] }
 0x3f3   : > { %1540 = vmatpush.bf16.msrb.mxu2 %v2145_v52 }
 0x3f4   : > { %2074 = vmatmul.msk.bf16.gmra.mxu3 %vm1098_vm15, %v1302_v53 }
 0x402   : > { %v1203_v54 = vpop.f32.mrf.mxu3 }
 0x40a   : > { %v1205_v55 = vpop.f32.mrf.mxu3 }
 0x412   : > { %v1208_v56 = vpop.f32.mrf.mxu3 }
 0x41a   : > { %v1210_v57 = vpop.f32.mrf.mxu3 }
 0x467   : > { %v1321_v58 = vpop.f32.mrf.mxu3 }
 0x46f   : > { %v1323_v59 = vpop.f32.mrf.mxu3 }
 0x470   : > { %v2208_v60 = vpack.i.bf16 %v1323_v59, %v1321_v58 }
 0x472   : > { %2209 = vrot.lane.b32.xlu1 %v2208_v60, %s2340_s30 }
 0x477   : > { %v1326_v61 = vpop.f32.mrf.mxu3 }
 0x47f   : > { %v1328_v62 = vpop.f32.mrf.mxu3 }
 0x480   : > { %v2213_v63 = vpack.i.bf16 %v1328_v62, %v1326_v61 }
 0x482   : > { %2214 = vrot.lane.b32.xlu2 %v2213_v63, %s2340_s30 }
 0x4dc   : > { %v2215_v12 = vpop.permute.xlu2 %2214 }
 0x4dd   : > { %v2217_v13 = vunpack.i.h.bf16 %v2215_v12  ;;  %v2216_v14 = vunpack.i.l.bf16 %v2215_v12 }
 0x4df   : > { %v1349_v15 = vsel %vm1098_vm15, %v1208_v56, %v2216_v14  ;;  %v1350_v16 = vsel %vm1098_vm15, %v1210_v57, %v2217_v13 }
 0x4e0   : > { %v1357_v17 = vpack.c.bf16 %v1350_v16, %v1349_v15 }
 0x4e4   : > { %v2210_v2 = vpop.permute.xlu1 %2209 }
 0x4e5   : > { %v2212_v3 = vunpack.i.h.bf16 %v2210_v2  ;;  %v2211_v6 = vunpack.i.l.bf16 %v2210_v2 }
 0x4e7   : > { %v1348_v7 = vsel %vm1098_vm15, %v1205_v55, %v2212_v3  ;;  %v1347_v10 = vsel %vm1098_vm15, %v1203_v54, %v2211_v6  ;;  %v2144_v55 = vld [vmem:[%s2540_s13] sm:$0xff] }
 0x4e8   : > { %v1356_v11 = vpack.c.bf16 %v1348_v7, %v1347_v10  ;;  %1541 = vmatpush.bf16.msrb.mxu2 %v2144_v55  ;;  %v2149_v55 = vld [vmem:[%s2554_s11 + $0x18] sm:$0xff] }
 0x4ea   : > { %2083 = vmatmul.msk.bf16.vlgmr.msrb.gmra.mxu0 %vm898_vm1, %v1356_v11 }
 0x4fa   : > { %2084 = vmatmul.msk.bf16.gmra.mxu0 %vm898_vm1, %v1357_v17 }
 0x567   : > { %v1388_v20 = vpop.f32.mrf.mxu0 }
 0x568   : > { %v1389_v21 = vadd.f32 %v2222_v19, %v1388_v20 }
 0x56a   : > { %v2700_v22 = vadd.f32 %v1389_v21, %v2564_v5  ;;  %v2223_v21 = vld [vmem:[%s2925_s29] ss:$0 sm:$0xff] }
 0x56c   : > { %v1404_v25 = vsel %vm898_vm1, %v2700_v22, 0.0 }
 0x56d   : > { %1405 = vadd.xlane.f32.xlu2 %v1404_v25 }
 0x56f   : > { %v1390_v26 = vpop.f32.mrf.mxu0 }
 0x570   : > { %v1391_v27 = vadd.f32 %v2222_v19, %v1390_v26 }
 0x572   : > { %v2705_v28 = vadd.f32 %v1391_v27, %v2572_v9 }
 0x574   : > { %v1407_v24 = vsel %vm898_vm1, %v2705_v28, 0.0 }
 0x575   : > { %1408 = vadd.xlane.f32.xlu1 %v1407_v24 }
 0x577   : > { %v1393_v29 = vpop.f32.mrf.mxu0 }
 0x578   : > { %v1394_v30 = vadd.f32 %v2222_v19, %v1393_v29 }
 0x57a   : > { %v2710_v31 = vadd.f32 %v1394_v30, %v2562_v4 }
 0x57c   : > { %v1410_v5 = vsel %vm898_vm1, %v2710_v31, 0.0 }
 0x57d   : > { %1411 = vadd.xlane.f32.xlu0 %v1410_v5  ;;  %v2224_v5 = vld [vmem:[%s853_s5] ss:$0 sm:$0xff] }
 0x57f   : > { %v1395_v32 = vpop.f32.mrf.mxu0 }
 0x580   : > { %v1396_v35 = vadd.f32 %v2222_v19, %v1395_v32 }
 0x582   : > { %v2715_v34 = vadd.f32 %v1396_v35, %v2570_v8 }
 0x584   : > { %v1413_v9 = vsel %vm898_vm1, %v2715_v34, 0.0 }
 0x585   : > { %1414 = vadd.xlane.f32.xlu0 %v1413_v9 }
 0x5e0   : > { %v1406_v36 = vpop.xlane.xlu2 %1405 }
 0x5e1   : > { %v1416_v37 = vmul.f32 %v1406_v36, %v2578_v18 }
 0x5e3   : > { %v1420_v38 = vsub.f32 %v2700_v22, %v1416_v37 }
 0x5e5   : > { %v1424_v4 = vmul.f32 %v1420_v38, %v1420_v38 }
 0x5e7   : > { %v1428_v39 = vsel %vm898_vm1, %v1424_v4, 0.0 }
 0x5e8   : > { %v1409_v33 = vpop.xlane.xlu1 %1408  ;;  %1429 = vadd.xlane.f32.xlu0 %v1428_v39 }
 0x5e9   : > { %v1417_v40 = vmul.f32 %v1409_v33, %v2578_v18 }
 0x5eb   : > { %v1421_v41 = vsub.f32 %v2705_v28, %v1417_v40 }
 0x5ed   : > { %v1425_v8 = vmul.f32 %v1421_v41, %v1421_v41 }
 0x5ef   : > { %v1431_v42 = vsel %vm898_vm1, %v1425_v8, 0.0 }
 0x5f0   : > { %1432 = vadd.xlane.f32.xlu0 %v1431_v42  ;;  %v1412_v43 = vpop.xlane.xlu0 %1411 }
 0x5f1   : > { %v1418_v44 = vmul.f32 %v1412_v43, %v2578_v18 }
 0x5f3   : > { %v2727_v45 = vsub.f32 %v2710_v31, %v1418_v44 }
 0x5f5   : > { %v1426_v46 = vmul.f32 %v2727_v45, %v2727_v45 }
 0x5f7   : > { %v1434_v47 = vsel %vm898_vm1, %v1426_v46, 0.0 }
 0x5f8   : > { %1435 = vadd.xlane.f32.xlu2 %v1434_v47  ;;  %v1415_v48 = vpop.xlane.xlu0 %1414 }
 0x5f9   : > { %v1419_v49 = vmul.f32 %v1415_v48, %v2578_v18 }
 0x5fb   : > { %v2734_v23 = vsub.f32 %v2715_v34, %v1419_v49 }
 0x5fd   : > { %v1427_v50 = vmul.f32 %v2734_v23, %v2734_v23 }
 0x5ff   : > { %v1437_v51 = vsel %vm898_vm1, %v1427_v50, 0.0 }
 0x600   : > { %1438 = vadd.xlane.f32.xlu0 %v1437_v51 }
 0x65b   : > { %v1430_v53 = vpop.xlane.xlu0 %1429 }
 0x65c   : > { %v1440_v54 = vmul.f32 %v1430_v53, %v2578_v18  ;;  %v2153_v53 = vld [vmem:[%s2554_s11 + $0x38] sm:$0xff] }
 0x65d   : > { %1659 = vmatpush.bf16.msra.mxu1 %v2153_v53  ;;  %2154 = vmatpush.bf16.msra.mxu3 %v2153_v53 }
 0x65e   : > { %v1444_v56 = vadd.f32 1e-05, %v1440_v54  ;;  %v2151_v54 = vld [vmem:[%s2554_s11 + $0x28] sm:$0xff] }
 0x660   : > { %2269 = vrsqrt.f32 %v1444_v56  ;;  %vm1454_vm3 = vweird.f32 %v1444_v56 }
 0x663   : > { %v1433_v57 = vpop.xlane.xlu0 %1432 }
 0x664   : > { %v1441_v58 = vmul.f32 %v1433_v57, %v2578_v18  ;;  %v2147_v57 = vld [vmem:[%s2554_s11 + $0x8] sm:$0xff] }
 0x666   : > { %v2270_v59 = vpop.eup %2269  ;;  %v1445_v60 = vadd.f32 1e-05, %v1441_v58  ;;  %v2225_v58 = vld [vmem:[%s861_s17] ss:$0 sm:$0xff] }
 0x667   : > { %v1449_v61 = vmul.f32 %v2270_v59, %v1444_v56  ;;  %vm1455_vm2 = vweird.f32 %v2270_v59  ;;  %v2148_v56 = vld [vmem:[%s2554_s11 + $0x10] sm:$0xff] }
 0x668   : > { %2271 = vrsqrt.f32 %v1445_v60  ;;  %vm1456_vm4 = vmor %vm1454_vm3, %vm1455_vm2  ;;  %vm1464_vm6 = vweird.f32 %v1445_v60 }
 0x669   : > { %v1450_v62 = vmul.f32 %v2270_v59, %v1449_v61 }
 0x66b   : > { %v1451_v63 = vmul.f32 0.5, %v1450_v62  ;;  %v1436_v0 = vpop.xlane.xlu2 %1435 }
 0x66c   : > { %v1442_v1 = vmul.f32 %v1436_v0, %v2578_v18 }
 0x66d   : > { %v1452_v2 = vsub.f32 1.5, %v1451_v63 }
 0x66e   : > { %v2272_v3 = vpop.eup %2271  ;;  %v1446_v6 = vadd.f32 1e-05, %v1442_v1 }
 0x66f   : > { %v1453_v7 = vmul.f32 %v2270_v59, %v1452_v2  ;;  %v1459_v10 = vmul.f32 %v2272_v3, %v1445_v60  ;;  %vm1465_vm5 = vweird.f32 %v2272_v3 }
 0x670   : > { %2273 = vrsqrt.f32 %v1446_v6  ;;  %vm1466_vm7 = vmor %vm1464_vm6, %vm1465_vm5  ;;  %vm1474_vm9 = vweird.f32 %v1446_v6 }
 0x671   : > { %v1460_v11 = vmul.f32 %v2272_v3, %v1459_v10  ;;  %v1457_v12 = vsel %vm1456_vm4, %v2270_v59, %v1453_v7  ;;  %v2146_v59 = vld [vmem:[%s2554_s11] sm:$0xff] }
 0x672   : > { %v1488_v19 = vmul.f32 %v1457_v12, %v1420_v38 }
 0x673   : > { %v1461_v13 = vmul.f32 0.5, %v1460_v11  ;;  %v1439_v14 = vpop.xlane.xlu0 %1438 }
 0x674   : > { %v1443_v15 = vmul.f32 %v1439_v14, %v2578_v18  ;;  %v1495_v30 = vmul.f32 %v2223_v21, %v1488_v19 }
 0x675   : > { %v1462_v16 = vsub.f32 1.5, %v1461_v13 }
 0x676   : > { %v2274_v17 = vpop.eup %2273  ;;  %v1447_v20 = vadd.f32 1e-05, %v1443_v15  ;;  %v1502_v37 = vadd.f32 %v2224_v5, %v1495_v30 }
 0x677   : > { %v1463_v25 = vmul.f32 %v2272_v3, %v1462_v16  ;;  %v1469_v26 = vmul.f32 %v2274_v17, %v1446_v6  ;;  %vm1475_vm8 = vweird.f32 %v2274_v17 }
 0x678   : > { %2275 = vrsqrt.f32 %v1447_v20  ;;  %vm1476_vm10 = vmor %vm1474_vm9, %vm1475_vm8  ;;  %vm1484_vm12 = vweird.f32 %v1447_v20 }
 0x679   : > { %v1467_v27 = vsel %vm1466_vm7, %v2272_v3, %v1463_v25  ;;  %v1470_v24 = vmul.f32 %v2274_v17, %v1469_v26 }
 0x67a   : > { %v1489_v29 = vmul.f32 %v1467_v27, %v1421_v41 }
 0x67b   : > { %v1471_v32 = vmul.f32 0.5, %v1470_v24 }
 0x67c   : > { %v1496_v35 = vmul.f32 %v2223_v21, %v1489_v29 }
 0x67d   : > { %v1472_v9 = vsub.f32 1.5, %v1471_v32 }
 0x67e   : > { %v2276_v36 = vpop.eup %2275  ;;  %v1503_v38 = vadd.f32 %v2224_v5, %v1496_v35 }
 0x67f   : > { %v1473_v4 = vmul.f32 %v2274_v17, %v1472_v9  ;;  %v1479_v39 = vmul.f32 %v2276_v36, %v1447_v20  ;;  %vm1485_vm11 = vweird.f32 %v2276_v36 }
 0x680   : > { %v1511_v33 = vpack.c.bf16 %v1503_v38, %v1502_v37  ;;  %vm1486_vm13 = vmor %vm1484_vm12, %vm1485_vm11 }
 0x681   : > { %v1480_v40 = vmul.f32 %v2276_v36, %v1479_v39  ;;  %v1477_v41 = vsel %vm1476_vm10, %v2274_v17, %v1473_v4 }
 0x682   : > { %2093 = vmatmul.msk.bf16.vlgmr.msrb.gmra.mxu2 %vm898_vm1, %v1511_v33  ;;  %v1490_v43 = vmul.f32 %v1477_v41, %v2727_v45  ;;  %v2152_v45 = vld [vmem:[%s2554_s11 + $0x30] sm:$0xff] }
 0x683   : > { %v1481_v8 = vmul.f32 0.5, %v1480_v40  ;;  %1660 = vmatpush.bf16.msra.mxu1 %v2152_v45  ;;  %2155 = vmatpush.bf16.msra.mxu3 %v2152_v45 }
 0x684   : > { %v1497_v48 = vmul.f32 %v2223_v21, %v1490_v43 }
 0x685   : > { %v1482_v42 = vsub.f32 1.5, %v1481_v8 }
 0x686   : > { %v1504_v50 = vadd.f32 %v2224_v5, %v1497_v48 }
 0x687   : > { %v1483_v44 = vmul.f32 %v2276_v36, %v1482_v42  ;;  %1661 = vmatpush.bf16.msra.mxu1 %v2151_v54  ;;  %2156 = vmatpush.bf16.msra.mxu3 %v2151_v54 }
 0x689   : > { %v1487_v46 = vsel %vm1486_vm13, %v2276_v36, %v1483_v44 }
 0x68a   : > { %v1491_v47 = vmul.f32 %v1487_v46, %v2734_v23  ;;  %v2150_v23 = vld [vmem:[%s2554_s11 + $0x20] sm:$0xff] }
 0x68b   : > { %1662 = vmatpush.bf16.msra.mxu1 %v2150_v23  ;;  %2157 = vmatpush.bf16.msra.mxu3 %v2150_v23 }
 0x68c   : > { %v1498_v49 = vmul.f32 %v2223_v21, %v1491_v47 }
 0x68e   : > { %v1505_v51 = vadd.f32 %v2224_v5, %v1498_v49  ;;  %v2226_v49 = vld [vmem:[%s869_s10] ss:$0 sm:$0xff]  ;;  %s2929_s10 = sld [smem:[#allocation3_spill]] }
 0x68f   : > { %1663 = vmatpush.bf16.msra.mxu1 %v2149_v55  ;;  %2158 = vmatpush.bf16.msra.mxu3 %v2149_v55 }
 0x690   : > { %v1512_v52 = vpack.c.bf16 %v1505_v51, %v1504_v50 }
 0x692   : > { %2094 = vmatmul.msk.bf16.gmra.mxu2 %vm898_vm1, %v1512_v52 }
 0x693   : > { %1664 = vmatpush.bf16.msra.mxu1 %v2148_v56  ;;  %2159 = vmatpush.bf16.msra.mxu3 %v2148_v56 }
 0x694   : > { %p2127_p8 = scmp.ne.s32.totalorder %s2929_s10, 1 }
 0x695   : > { %s2930_s25 = sld [smem:[#allocation25_spill]] (!%p2127_p8) }
 0x696   : > { %s2931_s18 = sld [smem:[#allocation26_spill]] (!%p2127_p8) }
 0x697   : > { %1665 = vmatpush.bf16.msra.mxu1 %v2147_v57  ;;  %2160 = vmatpush.bf16.msra.mxu3 %v2147_v57 }
 0x69b   : > { %1666 = vmatpush.bf16.msra.mxu1 %v2146_v59  ;;  %2161 = vmatpush.bf16.msra.mxu3 %v2146_v59 }
 0x705   : > { %v1543_v60 = vpop.f32.mrf.mxu2 }
 0x706   : > { %v1544_v61 = vadd.f32 %v2225_v58, %v1543_v60 }
 0x708   : > { %v1553_v62 = vmul.f32 %v1544_v61, %v1544_v61 }
 0x70a   : > { %v1557_v63 = vmul.f32 %v1553_v62, %v1544_v61 }
 0x70c   : > { %v1561_v0 = vmul.f32 0.044715, %v1557_v63 }
 0x70d   : > { %v1545_v1 = vpop.f32.mrf.mxu2 }
 0x70e   : > { %v1565_v2 = vadd.f32 %v1561_v0, %v1544_v61  ;;  %v1546_v3 = vadd.f32 %v2225_v58, %v1545_v1 }
 0x710   : > { %v1569_v6 = vmul.f32 0.7978846, %v1565_v2  ;;  %v1554_v7 = vmul.f32 %v1546_v3, %v1546_v3 }
 0x712   : > { %v1558_v10 = vmul.f32 %v1554_v7, %v1546_v3  ;;  %2277 = vtanh.f32 %v1569_v6 }
 0x714   : > { %v1562_v11 = vmul.f32 0.044715, %v1558_v10 }
 0x715   : > { %v1548_v12 = vpop.f32.mrf.mxu2 }
 0x716   : > { %v1566_v13 = vadd.f32 %v1562_v11, %v1546_v3  ;;  %v1549_v14 = vadd.f32 %v2225_v58, %v1548_v12 }
 0x718   : > { %v1570_v15 = vmul.f32 0.7978846, %v1566_v13  ;;  %v1555_v16 = vmul.f32 %v1549_v14, %v1549_v14  ;;  %v2278_v17 = vpop.eup %2277 }
 0x719   : > { %v1577_v21 = vadd.f32 1.0, %v2278_v17 }
 0x71a   : > { %2279 = vtanh.f32 %v1570_v15  ;;  %v1559_v19 = vmul.f32 %v1555_v16, %v1549_v14 }
 0x71b   : > { %v1581_v5 = vmul.f32 0.5, %v1577_v21 }
 0x71c   : > { %v1563_v20 = vmul.f32 0.044715, %v1559_v19 }
 0x71d   : > { %v1550_v25 = vpop.f32.mrf.mxu2  ;;  %v1585_v37 = vmul.f32 %v1581_v5, %v1544_v61 }
 0x71e   : > { %v1567_v26 = vadd.f32 %v1563_v20, %v1549_v14  ;;  %v1551_v27 = vadd.f32 %v2225_v58, %v1550_v25 }
 0x720   : > { %v2280_v24 = vpop.eup %2279  ;;  %v1571_v29 = vmul.f32 0.7978846, %v1567_v26  ;;  %v1556_v30 = vmul.f32 %v1551_v27, %v1551_v27 }
 0x721   : > { %v1578_v32 = vadd.f32 1.0, %v2280_v24 }
 0x722   : > { %v1560_v35 = vmul.f32 %v1556_v30, %v1551_v27  ;;  %2281 = vtanh.f32 %v1571_v29 }
 0x723   : > { %v1582_v9 = vmul.f32 0.5, %v1578_v32 }
 0x724   : > { %v1564_v36 = vmul.f32 0.044715, %v1560_v35 }
 0x725   : > { %v1586_v38 = vmul.f32 %v1582_v9, %v1546_v3 }
 0x726   : > { %v1568_v4 = vadd.f32 %v1564_v36, %v1551_v27 }
 0x727   : > { %v1606_v39 = vpack.c.bf16 %v1586_v38, %v1585_v37 }
 0x728   : > { %v1572_v33 = vmul.f32 0.7978846, %v1568_v4  ;;  %v2282_v40 = vpop.eup %2281 }
 0x729   : > { %1667 = vmatmul.bf16.vlgmr.msra.gmra.mxu1 %v1606_v39  ;;  %v1579_v41 = vadd.f32 1.0, %v2282_v40 }
 0x72a   : > { %2283 = vtanh.f32 %v1572_v33 }
 0x72b   : > { %v1583_v42 = vmul.f32 0.5, %v1579_v41 }
 0x72d   : > { %v1587_v46 = vmul.f32 %v1583_v42, %v1549_v14 }
 0x730   : > { %v2284_v8 = vpop.eup %2283 }
 0x731   : > { %v1580_v43 = vadd.f32 1.0, %v2284_v8 }
 0x733   : > { %v1584_v44 = vmul.f32 0.5, %v1580_v43 }
 0x735   : > { %v1588_v47 = vmul.f32 %v1584_v44, %v1551_v27 }
 0x737   : > { %v1607_v48 = vpack.c.bf16 %v1588_v47, %v1587_v46 }
 0x739   : > { %1672 = vmatmul.bf16.vlgmr.msra.gmra.mxu3 %v1607_v48 }
 0x7a6   : > { %v1668_v50 = vpop.f32.mrf.mxu1 }
 0x7a7   : > { %v1669_v51 = vadd.f32 %v2226_v49, %v1668_v50 }
 0x7a9   : > { %v1678_v52 = vadd.f32 %v1669_v51, %v2700_v22 }
 0x7ab   : > { %1682 = vst.msk [vmem:[#allocation2] sm:$0xff] %vm898_vm1, %v1678_v52 }
 0x7ae   : > { %v1670_v53 = vpop.f32.mrf.mxu1 }
 0x7af   : > { %v1671_v45 = vadd.f32 %v2226_v49, %v1670_v53 }
 0x7b1   : > { %v1679_v54 = vadd.f32 %v1671_v45, %v2705_v28 }
 0x7b3   : > { %1683 = vst.msk [vmem:[#allocation2 + $0x8] sm:$0xff] %vm898_vm1, %v1679_v54 }
 0x7bc   : > { %v1673_v23 = vpop.f32.mrf.mxu3 }
 0x7bd   : > { %v1674_v55 = vadd.f32 %v2226_v49, %v1673_v23 }
 0x7bf   : > { %v1680_v56 = vadd.f32 %v1674_v55, %v2710_v31 }
 0x7c1   : > { %1684 = vst.msk [vmem:[#allocation2 + $0x10] sm:$0xff] %vm898_vm1, %v1680_v56 }
 0x7c4   : > { %v1675_v57 = vpop.f32.mrf.mxu3 }
 0x7c5   : > { %v1676_v58 = vadd.f32 %v2226_v49, %v1675_v57  ;;  %1689 = sbr.rel (%p2127_p8) target bundleno = 2272 (0x8e0), region = 104 }
 0x7c7   : > { %v1681_v59 = vadd.f32 %v1676_v58, %v2715_v34 }
 0x7c9   : > { %1685 = vst.msk [vmem:[#allocation2 + $0x18] sm:$0xff] %vm898_vm1, %v1681_v59 }
 0x7ca   : > { %v1698_v22 = vsel %vm898_vm1, %v1680_v56, 0.0  ;;  %v1692_v28 = vsel %vm898_vm1, %v1678_v52, 0.0  ;;  %v1701_v60 = vsel %vm898_vm1, %v1681_v59, 0.0  ;;  %v1695_v31 = vsel %vm898_vm1, %v1679_v54, 0.0  ;;  %v2285_v48 = vld [vmem:[%s2930_s25] ss:$0 sm:$0xff] }
 0x7cb   : > { %1699 = vadd.xlane.f32.xlu1 %v1698_v22  ;;  %1693 = vadd.xlane.f32.xlu0 %v1692_v28  ;;  %v2286_v45 = vld [vmem:[%s2931_s18] ss:$0 sm:$0xff] }
 0x7d3   : > { %1702 = vadd.xlane.f32.xlu1 %v1701_v60  ;;  %1696 = vadd.xlane.f32.xlu0 %v1695_v31 }
 0x83e   : > { %v1700_v61 = vpop.xlane.xlu1 %1699  ;;  %v1694_v62 = vpop.xlane.xlu0 %1693 }
 0x83f   : > { %v1706_v34 = vmul.f32 %v1700_v61, %v2578_v18  ;;  %v1704_v63 = vmul.f32 %v1694_v62, %v2578_v18 }
 0x841   : > { %v2792_v0 = vsub.f32 %v1680_v56, %v1706_v34  ;;  %v1708_v1 = vsub.f32 %v1678_v52, %v1704_v63 }
 0x843   : > { %v1714_v2 = vmul.f32 %v2792_v0, %v2792_v0  ;;  %v1712_v3 = vmul.f32 %v1708_v1, %v1708_v1 }
 0x845   : > { %v1722_v6 = vsel %vm898_vm1, %v1714_v2, 0.0  ;;  %v1716_v7 = vsel %vm898_vm1, %v1712_v3, 0.0 }
 0x846   : > { %v1703_v10 = vpop.xlane.xlu1 %1702  ;;  %1723 = vadd.xlane.f32.xlu0 %v1722_v6  ;;  %1717 = vadd.xlane.f32.xlu2 %v1716_v7  ;;  %v1697_v11 = vpop.xlane.xlu0 %1696 }
 0x847   : > { %v1707_v12 = vmul.f32 %v1703_v10, %v2578_v18  ;;  %v1705_v13 = vmul.f32 %v1697_v11, %v2578_v18 }
 0x849   : > { %v2800_v14 = vsub.f32 %v1681_v59, %v1707_v12  ;;  %v2802_v15 = vsub.f32 %v1679_v54, %v1705_v13 }
 0x84b   : > { %v1715_v16 = vmul.f32 %v2800_v14, %v2800_v14  ;;  %v1713_v17 = vmul.f32 %v2802_v15, %v2802_v15 }
 0x84d   : > { %v1725_v19 = vsel %vm898_vm1, %v1715_v16, 0.0  ;;  %v1719_v20 = vsel %vm898_vm1, %v1713_v17, 0.0 }
 0x84e   : > { %1726 = vadd.xlane.f32.xlu1 %v1725_v19  ;;  %1720 = vadd.xlane.f32.xlu2 %v1719_v20 }
 0x8b9   : > { %v1718_v21 = vpop.xlane.xlu2 %1717  ;;  %v1724_v25 = vpop.xlane.xlu0 %1723 }
 0x8ba   : > { %v1728_v26 = vmul.f32 %v1718_v21, %v2578_v18  ;;  %v1730_v27 = vmul.f32 %v1724_v25, %v2578_v18 }
 0x8bc   : > { %v1732_v24 = vadd.f32 1e-05, %v1728_v26  ;;  %v1734_v29 = vadd.f32 1e-05, %v1730_v27 }
 0x8be   : > { %2287 = vrsqrt.f32 %v1732_v24  ;;  %vm1742_vm0 = vweird.f32 %v1732_v24  ;;  %vm1762_vm3 = vweird.f32 %v1734_v29 }
 0x8bf   : > { %2289 = vrsqrt.f32 %v1734_v29 }
 0x8c1   : > { %v1727_v30 = vpop.xlane.xlu1 %1726  ;;  %v1721_v5 = vpop.xlane.xlu2 %1720 }
 0x8c2   : > { %v1731_v32 = vmul.f32 %v1727_v30, %v2578_v18  ;;  %v1729_v35 = vmul.f32 %v1721_v5, %v2578_v18 }
 0x8c4   : > { %v2288_v9 = vpop.eup %2287  ;;  %v1735_v36 = vadd.f32 1e-05, %v1731_v32  ;;  %v1733_v37 = vadd.f32 1e-05, %v1729_v35 }
 0x8c5   : > { %v2290_v38 = vpop.eup %2289  ;;  %v1737_v4 = vmul.f32 %v2288_v9, %v1732_v24  ;;  %vm1743_vm14 = vweird.f32 %v2288_v9 }
 0x8c6   : > { %v1757_v39 = vmul.f32 %v2290_v38, %v1734_v29  ;;  %2291 = vrsqrt.f32 %v1735_v36  ;;  %vm1763_vm15 = vweird.f32 %v2290_v38  ;;  %vm1744_vm2 = vmor %vm1742_vm0, %vm1743_vm14  ;;  %vm1772_vm7 = vweird.f32 %v1735_v36 }
 0x8c7   : > { %v1738_v33 = vmul.f32 %v2288_v9, %v1737_v4  ;;  %2293 = vrsqrt.f32 %v1733_v37  ;;  %vm1764_vm4 = vmor %vm1762_vm3, %vm1763_vm15  ;;  %vm1752_vm9 = vweird.f32 %v1733_v37 }
 0x8c8   : > { %v1758_v40 = vmul.f32 %v2290_v38, %v1757_v39 }
 0x8c9   : > { %v1739_v41 = vmul.f32 0.5, %v1738_v33 }
 0x8ca   : > { %v1759_v8 = vmul.f32 0.5, %v1758_v40 }
 0x8cb   : > { %v1740_v42 = vsub.f32 1.5, %v1739_v41 }
 0x8cc   : > { %v2292_v43 = vpop.eup %2291  ;;  %v1760_v44 = vsub.f32 1.5, %v1759_v8 }
 0x8cd   : > { %v2294_v46 = vpop.eup %2293  ;;  %v1741_v47 = vmul.f32 %v2288_v9, %v1740_v42  ;;  %v1767_v18 = vmul.f32 %v2292_v43, %v1735_v36  ;;  %vm1773_vm5 = vweird.f32 %v2292_v43 }
 0x8ce   : > { %v1761_v49 = vmul.f32 %v2290_v38, %v1760_v44  ;;  %v1747_v50 = vmul.f32 %v2294_v46, %v1733_v37  ;;  %vm1753_vm6 = vweird.f32 %v2294_v46  ;;  %vm1774_vm8 = vmor %vm1772_vm7, %vm1773_vm5 }
 0x8cf   : > { %v1745_v51 = vsel %vm1744_vm2, %v2288_v9, %v1741_v47  ;;  %v1768_v52 = vmul.f32 %v2292_v43, %v1767_v18  ;;  %vm1754_vm10 = vmor %vm1752_vm9, %vm1753_vm6 }
 0x8d0   : > { %v1776_v53 = vmul.f32 %v1745_v51, %v1708_v1  ;;  %v1765_v54 = vsel %vm1764_vm4, %v2290_v38, %v1761_v49  ;;  %v1748_v23 = vmul.f32 %v2294_v46, %v1747_v50 }
 0x8d1   : > { %v1778_v55 = vmul.f32 %v1765_v54, %v2792_v0  ;;  %v1769_v56 = vmul.f32 0.5, %v1768_v52 }
 0x8d2   : > { %v1783_v57 = vmul.f32 %v2285_v48, %v1776_v53  ;;  %v1749_v58 = vmul.f32 0.5, %v1748_v23 }
 0x8d3   : > { %v1785_v59 = vmul.f32 %v2285_v48, %v1778_v55  ;;  %v1770_v22 = vsub.f32 1.5, %v1769_v56 }
 0x8d4   : > { %v1790_v28 = vadd.f32 %v2286_v45, %v1783_v57  ;;  %v1750_v60 = vsub.f32 1.5, %v1749_v58 }
 0x8d5   : > { %v1792_v31 = vadd.f32 %v2286_v45, %v1785_v59  ;;  %v1771_v61 = vmul.f32 %v2292_v43, %v1770_v22 }
 0x8d6   : > { %1794 = vst.msk [vmem:[%s2559_s7] sm:$0xff] %vm898_vm1, %v1790_v28  ;;  %v1751_v62 = vmul.f32 %v2294_v46, %v1750_v60 }
 0x8d7   : > { %1796 = vst.msk [vmem:[%s2559_s7 + $0x10] sm:$0xff] %vm898_vm1, %v1792_v31  ;;  %v1775_v34 = vsel %vm1774_vm8, %v2292_v43, %v1771_v61 }
 0x8d8   : > { %v1779_v63 = vmul.f32 %v1775_v34, %v2800_v14  ;;  %v1755_v0 = vsel %vm1754_vm10, %v2294_v46, %v1751_v62 }
 0x8d9   : > { %v1777_v1 = vmul.f32 %v1755_v0, %v2802_v15 }
 0x8da   : > { %v1786_v2 = vmul.f32 %v2285_v48, %v1779_v63 }
 0x8db   : > { %v1784_v3 = vmul.f32 %v2285_v48, %v1777_v1 }
 0x8dc   : > { %v1793_v6 = vadd.f32 %v2286_v45, %v1786_v2 }
 0x8dd   : > { %v1791_v7 = vadd.f32 %v2286_v45, %v1784_v3 }
 0x8de   : > { %1797 = vst.msk [vmem:[%s2559_s7 + $0x18] sm:$0xff] %vm898_vm1, %v1793_v6 }
 0x8df   : > { %1795 = vst.msk [vmem:[%s2559_s7 + $0x8] sm:$0xff] %vm898_vm1, %v1791_v7 }
 0x8e0 PF: > { %s2932_s26 = sld [smem:[#allocation6_spill]] }
 0x8e1   : > { %s2933_s0 = sld [smem:[#allocation4_spill]] }
 0x8e2   : > { %s2934_s30 = sld [smem:[#allocation5_spill]] }
 0x8e3   : > { %s2935_s20 = sld [smem:[#allocation7_spill]] }
 0x8e4   : > { %s2936_s21 = sld [smem:[#allocation8_spill]] }
 0x8e6   : > { %s29_s1 = sadd.s32 1, %s2932_s26  }
 0x8e7   : > { %p26_p9 = scmp.ge.s32.totalorder %s29_s1, 6  }
 0x8e9   :  { %28 = sbr.rel (!%p26_p9) target bundleno = 18 (0x12), region = 182 }

// kernel: synthesizer_forward.16
= control target key start
LH: loop header
LB: loop body
LE: loop exit
PB: predicated region body
PF: predicated region fallthrough
CT: control target
= control target key end

     0   :  { %8 = vsyncpa [#allocation4], 0  ;;  %s165_s15 = smov [#allocation3]   ;;  %s234_s0 = inlined_call_operand.vmem [shape: f32[32,32], index: 0, kind: input, shape index: {}]   ;;  %s235_s1 = inlined_call_operand.vmem [shape: bf16[32,32], index: 1, kind: input, shape index: {}]   ;;  %s236_s2 = inlined_call_operand.hbm [shape: f32[1,32], index: 2, kind: input, shape index: {}]   ;;  %s237_s3 = inlined_call_operand.vmem [shape: f32[32,32], index: 3, kind: output, shape index: {}]  }
   0x1   :  { %s18_s14 = sshll.u32 %s236_s2, 4  ;;  %s20_s16 = sshll.u32 %s165_s15, 4  ;;  %s19_s14 = int_to_ptr.hbm [resolvable:$true] %s18_s14  ;;  %s21_s16 = int_to_ptr.vmem [resolvable:$true] %s20_s16 }
   0x2   :  { %23 = dma.hbm_to_vmem [thread:$0]  %s19_s14, 16, %s21_s16, [#allocation4]  }
   0x3   :  { %163 = dma.done.wait [#allocation4], 16  }
   0x4   :  { %164 = vsyncadd [#allocation4], 4294967280  ;;  %vm33_vm0 = vcmask 261120   ;;  %v166_v0 = vmov 0.0   ;;  %v133_v1 = vld [vmem:[%s235_s1 + $0x8] sm:$0xff]  ;;  %v132_v2 = vld [vmem:[%s235_s1] sm:$0xff] }
   0x5   :  { %34 = vst.msk [vmem:[#allocation2] sm:$0xff] %vm33_vm0, %v166_v0  ;;  %v42_v3 = vld [vmem:[%s234_s0] sm:$0xff]  ;;  %v43_v4 = vld [vmem:[%s234_s0 + $0x8] sm:$0xff]  ;;  %77 = vmatpush.bf16.msra.mxu0 %v133_v1  ;;  %134 = vmatpush.bf16.msra.mxu1 %v133_v1  ;;  %v44_v5 = vld [vmem:[%s234_s0 + $0x10] sm:$0xff] }
   0x6   :  { %35 = vst.msk [vmem:[#allocation2 + $0x8] sm:$0xff] %vm33_vm0, %v166_v0  ;;  %v45_v6 = vld [vmem:[%s234_s0 + $0x18] sm:$0xff]  ;;  %v46_v7 = vpack.c.bf16 %v43_v4, %v42_v3  ;;  %v138_v17 = vld [vmem:[#allocation3] ss:$0 sm:$0xff] }
   0x7   :  { %36 = vst.msk [vmem:[#allocation2 + $0x10] sm:$0xff] %vm33_vm0, %v166_v0  ;;  %v47_v8 = vpack.c.bf16 %v45_v6, %v44_v5 }
   0x8   :  { %37 = vst.msk [vmem:[#allocation2 + $0x18] sm:$0xff] %vm33_vm0, %v166_v0 }
   0x9   :  { %78 = vmatpush.bf16.msra.mxu0 %v132_v2  ;;  %135 = vmatpush.bf16.msra.mxu1 %v132_v2 }
   0xc   :  { %130 = vmatmul.msk.bf16.vlgmr.msra.gmra.mxu0 %vm33_vm0, %v46_v7  ;;  %131 = vmatmul.msk.bf16.vlgmr.msra.gmra.mxu1 %vm33_vm0, %v47_v8  ;;  %v38_v9 = vld [vmem:[#allocation2] sm:$0xff] }
   0xd   :  { %v39_v15 = vld [vmem:[#allocation2 + $0x8] sm:$0xff] }
   0xe   :  { %v40_v10 = vld [vmem:[#allocation2 + $0x10] sm:$0xff] }
   0xf   :  { %v41_v16 = vld [vmem:[#allocation2 + $0x18] sm:$0xff] }
  0x89   :  { %v80_v11 = vpop.f32.mrf.mxu0  ;;  %v85_v12 = vpop.f32.mrf.mxu1 }
  0x8a   :  { %v90_v13 = vadd.f32 %v80_v11, %v38_v9  ;;  %v92_v14 = vadd.f32 %v85_v12, %v40_v10 }
  0x8c   :  { %94 = vst.msk [vmem:[#allocation2] sm:$0xff] %vm33_vm0, %v90_v13 }
  0x8d   :  { %96 = vst.msk [vmem:[#allocation2 + $0x10] sm:$0xff] %vm33_vm0, %v92_v14 }
  0x91   :  { %v82_v18 = vpop.f32.mrf.mxu0  ;;  %v87_v19 = vpop.f32.mrf.mxu1 }
  0x92   :  { %v91_v20 = vadd.f32 %v82_v18, %v39_v15  ;;  %v93_v21 = vadd.f32 %v87_v19, %v41_v16 }
  0x93   :  { %v101_v22 = vld [vmem:[#allocation2] sm:$0xff] }
  0x94   :  { %v109_v23 = vadd.f32 %v138_v17, %v101_v22  ;;  %v103_v24 = vld [vmem:[#allocation2 + $0x10] sm:$0xff]  ;;  %95 = vst.msk [vmem:[#allocation2 + $0x8] sm:$0xff] %vm33_vm0, %v91_v20 }
  0x95   :  { %v111_v25 = vadd.f32 %v138_v17, %v103_v24  ;;  %97 = vst.msk [vmem:[#allocation2 + $0x18] sm:$0xff] %vm33_vm0, %v93_v21 }
  0x96   :  { %113 = vst.msk [vmem:[%s237_s3] sm:$0xff] %vm33_vm0, %v109_v23 }
  0x97   :  { %115 = vst.msk [vmem:[%s237_s3 + $0x10] sm:$0xff] %vm33_vm0, %v111_v25 }
  0x9b   :  { %v102_v26 = vld [vmem:[#allocation2 + $0x8] sm:$0xff] }
  0x9c   :  { %v110_v27 = vadd.f32 %v138_v17, %v102_v26  ;;  %v104_v28 = vld [vmem:[#allocation2 + $0x18] sm:$0xff] }
  0x9d   :  { %v112_v29 = vadd.f32 %v138_v17, %v104_v28 }
  0x9e   :  { %114 = vst.msk [vmem:[%s237_s3 + $0x8] sm:$0xff] %vm33_vm0, %v110_v27 }
  0x9f   :  { %116 = vst.msk [vmem:[%s237_s3 + $0x18] sm:$0xff] %vm33_vm0, %v112_v29 }
  0xa0   :  { %121 = vsyncpa [#allocation4], 1 }

// kernel: synthesizer_forward.17
= control target key start
LH: loop header
LB: loop body
LE: loop exit
PB: predicated region body
PF: predicated region fallthrough
CT: control target
= control target key end

     0   :  { %8 = vsyncpa [#allocation4], 0  ;;  %s180_s15 = smov [#allocation3]   ;;  %s250_s0 = inlined_call_operand.vmem [shape: f32[32,48], index: 0, kind: input, shape index: {}]   ;;  %s251_s1 = inlined_call_operand.vmem [shape: bf16[48,32], index: 1, kind: input, shape index: {}]   ;;  %s252_s2 = inlined_call_operand.hbm [shape: f32[1,32], index: 2, kind: input, shape index: {}]   ;;  %s253_s3 = inlined_call_operand.vmem [shape: f32[32,32], index: 3, kind: output, shape index: {}]  }
   0x1   :  { %s18_s14 = sshll.u32 %s252_s2, 4  ;;  %s20_s16 = sshll.u32 %s180_s15, 4  ;;  %s19_s14 = int_to_ptr.hbm [resolvable:$true] %s18_s14  ;;  %s21_s16 = int_to_ptr.vmem [resolvable:$true] %s20_s16 }
   0x2   :  { %23 = dma.hbm_to_vmem [thread:$0]  %s19_s14, 16, %s21_s16, [#allocation4]  }
   0x3   :  { %178 = dma.done.wait [#allocation4], 16  }
   0x4   :  { %179 = vsyncadd [#allocation4], 4294967280  ;;  %vm33_vm0 = vcmask 261120   ;;  %v181_v0 = vmov 0.0   ;;  %v147_v1 = vld [vmem:[%s251_s1 + $0x10] sm:$0xff]  ;;  %v146_v2 = vld [vmem:[%s251_s1 + $0x8] sm:$0xff] }
   0x5   :  { %34 = vst.msk [vmem:[#allocation2] sm:$0xff] %vm33_vm0, %v181_v0  ;;  %84 = vmatpush.bf16.msra.mxu0 %v147_v1  ;;  %148 = vmatpush.bf16.msra.mxu1 %v147_v1  ;;  %v145_v3 = vld [vmem:[%s251_s1] sm:$0xff]  ;;  %v43_v5 = vld [vmem:[%s250_s0 + $0x8] sm:$0xff]  ;;  %v44_v6 = vld [vmem:[%s250_s0 + $0x10] sm:$0xff]  ;;  %vm72_vm1 = vcmask 392192  }
   0x6   :  { %35 = vst.msk [vmem:[#allocation2 + $0x8] sm:$0xff] %vm33_vm0, %v181_v0  ;;  %v42_v4 = vld [vmem:[%s250_s0] sm:$0xff]  ;;  %v45_v7 = vld [vmem:[%s250_s0 + $0x18] sm:$0xff] }
   0x7   :  { %36 = vst.msk [vmem:[#allocation2 + $0x10] sm:$0xff] %vm33_vm0, %v181_v0  ;;  %v46_v8 = vpack.c.bf16 %v43_v5, %v42_v4  ;;  %v47_v9 = vpack.c.bf16 %v45_v7, %v44_v6  ;;  %v153_v18 = vld [vmem:[#allocation3] ss:$0 sm:$0xff] }
   0x8   :  { %37 = vst.msk [vmem:[#allocation2 + $0x18] sm:$0xff] %vm33_vm0, %v181_v0 }
   0x9   :  { %85 = vmatpush.bf16.msra.mxu0 %v146_v2  ;;  %149 = vmatpush.bf16.msra.mxu1 %v146_v2 }
   0xc   :  { %v38_v10 = vld [vmem:[#allocation2] sm:$0xff] }
   0xd   :  { %86 = vmatpush.bf16.msra.mxu0 %v145_v3  ;;  %150 = vmatpush.bf16.msra.mxu1 %v145_v3  ;;  %v39_v16 = vld [vmem:[#allocation2 + $0x8] sm:$0xff] }
   0xe   :  { %v40_v11 = vld [vmem:[#allocation2 + $0x10] sm:$0xff] }
   0xf   :  { %v41_v17 = vld [vmem:[#allocation2 + $0x18] sm:$0xff] }
  0x10   :  { %143 = vmatmul.msk.bf16.vlgmr.msra.gmra.mxu0 %vm72_vm1, %v46_v8  ;;  %144 = vmatmul.msk.bf16.vlgmr.msra.gmra.mxu1 %vm72_vm1, %v47_v9 }
  0x8d   :  { %v88_v12 = vpop.f32.mrf.mxu0  ;;  %v93_v13 = vpop.f32.mrf.mxu1 }
  0x8e   :  { %v98_v14 = vadd.f32 %v88_v12, %v38_v10  ;;  %v100_v15 = vadd.f32 %v93_v13, %v40_v11 }
  0x90   :  { %103 = vst.msk [vmem:[#allocation2] sm:$0xff] %vm33_vm0, %v98_v14 }
  0x91   :  { %105 = vst.msk [vmem:[#allocation2 + $0x10] sm:$0xff] %vm33_vm0, %v100_v15 }
  0x95   :  { %v90_v19 = vpop.f32.mrf.mxu0  ;;  %v95_v20 = vpop.f32.mrf.mxu1 }
  0x96   :  { %v99_v21 = vadd.f32 %v90_v19, %v39_v16  ;;  %v101_v22 = vadd.f32 %v95_v20, %v41_v17 }
  0x97   :  { %v110_v23 = vld [vmem:[#allocation2] sm:$0xff] }
  0x98   :  { %v118_v24 = vadd.f32 %v153_v18, %v110_v23  ;;  %v112_v25 = vld [vmem:[#allocation2 + $0x10] sm:$0xff]  ;;  %104 = vst.msk [vmem:[#allocation2 + $0x8] sm:$0xff] %vm33_vm0, %v99_v21 }
  0x99   :  { %v120_v26 = vadd.f32 %v153_v18, %v112_v25  ;;  %106 = vst.msk [vmem:[#allocation2 + $0x18] sm:$0xff] %vm33_vm0, %v101_v22 }
  0x9a   :  { %122 = vst.msk [vmem:[%s253_s3] sm:$0xff] %vm33_vm0, %v118_v24 }
  0x9b   :  { %124 = vst.msk [vmem:[%s253_s3 + $0x10] sm:$0xff] %vm33_vm0, %v120_v26 }
  0x9f   :  { %v111_v27 = vld [vmem:[#allocation2 + $0x8] sm:$0xff] }
  0xa0   :  { %v119_v28 = vadd.f32 %v153_v18, %v111_v27  ;;  %v113_v29 = vld [vmem:[#allocation2 + $0x18] sm:$0xff] }
  0xa1   :  { %v121_v30 = vadd.f32 %v153_v18, %v113_v29 }
  0xa2   :  { %123 = vst.msk [vmem:[%s253_s3 + $0x8] sm:$0xff] %vm33_vm0, %v119_v28 }
  0xa3   :  { %125 = vst.msk [vmem:[%s253_s3 + $0x18] sm:$0xff] %vm33_vm0, %v121_v30 }
  0xa4   :  { %130 = vsyncpa [#allocation4], 1 }

// kernel: synthesizer_forward.15
= control target key start
LH: loop header
LB: loop body
LE: loop exit
PB: predicated region body
PF: predicated region fallthrough
CT: control target
= control target key end

     0   :  { %s4179_s0 = inlined_call_operand.vmem [shape: f32[2,16,32], index: 0, kind: input, shape index: {}]   ;;  %s4180_s1 = inlined_call_operand.vmem [shape: f32[2,32,32], index: 1, kind: input, shape index: {}]   ;;  %s4181_s2 = inlined_call_operand.vmem [shape: f32[2,16,1], index: 2, kind: input, shape index: {}]   ;;  %s4182_s3 = inlined_call_operand.vmem [shape: f32[2,1,16], index: 3, kind: input, shape index: {}]   ;;  %s4183_s4 = inlined_call_operand.vmem [shape: f32[2,1,32], index: 4, kind: input, shape index: {}]   ;;  %s4184_s5 = inlined_call_operand.vmem [shape: f32[2,1,32], index: 5, kind: input, shape index: {}]   ;;  %s4185_s6 = inlined_call_operand.hbm [shape: f32[2,1,32], index: 6, kind: input, shape index: {}]   ;;  %s4186_s7 = inlined_call_operand.vmem [shape: bf16[2,32,96], index: 7, kind: input, shape index: {}]   ;;  %s4187_s8 = inlined_call_operand.hbm [shape: f32[2,1,96], index: 8, kind: input, shape index: {}]   ;;  %s4188_s9 = inlined_call_operand.vmem [shape: bf16[2,32,32], index: 9, kind: input, shape index: {}]   ;;  %s4189_s10 = inlined_call_operand.hbm [shape: f32[2,1,32], index: 10, kind: input, shape index: {}]   ;;  %s4190_s11 = inlined_call_operand.hbm [shape: f32[2,1,32], index: 11, kind: input, shape index: {}]   ;;  %s4191_s12 = inlined_call_operand.hbm [shape: f32[2,1,32], index: 12, kind: input, shape index: {}]   ;;  %s4192_s13 = inlined_call_operand.vmem [shape: bf16[2,32,32], index: 13, kind: input, shape index: {}]   ;;  %s4193_s14 = inlined_call_operand.hbm [shape: f32[2,1,32], index: 14, kind: input, shape index: {}]   ;;  %s4194_s15 = inlined_call_operand.vmem [shape: bf16[2,32,64], index: 15, kind: input, shape index: {}]   ;;  %s4195_s16 = inlined_call_operand.hbm [shape: f32[2,1,64], index: 16, kind: input, shape index: {}]   ;;  %s4196_s17 = inlined_call_operand.vmem [shape: bf16[2,32,32], index: 17, kind: input, shape index: {}]   ;;  %s4197_s18 = inlined_call_operand.hbm [shape: f32[2,1,32], index: 18, kind: input, shape index: {}]   ;;  %s4198_s19 = inlined_call_operand.hbm [shape: f32[2,1,32], index: 19, kind: input, shape index: {}]   ;;  %s4199_s20 = inlined_call_operand.hbm [shape: f32[2,1,32], index: 20, kind: input, shape index: {}]   ;;  %s4200_s21 = inlined_call_operand.vmem [shape: bf16[2,32,64], index: 21, kind: input, shape index: {}]   ;;  %s4201_s22 = inlined_call_operand.hbm [shape: f32[2,1,64], index: 22, kind: input, shape index: {}]   ;;  %s4202_s23 = inlined_call_operand.vmem [shape: bf16[2,64,32], index: 23, kind: input, shape index: {}]   ;;  %s4203_s24 = inlined_call_operand.hbm [shape: f32[2,1,32], index: 24, kind: input, shape index: {}]   ;;  %s4204_s25 = inlined_call_operand.vmem [shape: f32[2,16,32], index: 25, kind: output, shape index: {}]  }
   0x1   :  { %4217 = sst [smem:[#allocation37_spill]] %s4179_s0 }
   0x2   :  { %4218 = sst [smem:[#allocation38_spill]] %s4180_s1 }
   0x3   :  { %4219 = sst [smem:[#allocation39_spill]] %s4181_s2 }
   0x4   :  { %4220 = sst [smem:[#allocation40_spill]] %s4182_s3 }
   0x5   :  { %4221 = sst [smem:[#allocation41_spill]] %s4183_s4 }
   0x6   :  { %4222 = sst [smem:[#allocation42_spill]] %s4184_s5 }
   0x7   :  { %4223 = sst [smem:[#allocation43_spill]] %s4185_s6 }
   0x8   :  { %4224 = sst [smem:[#allocation44_spill]] %s4186_s7 }
   0x9   :  { %4225 = sst [smem:[#allocation45_spill]] %s4187_s8 }
   0xa   :  { %4226 = sst [smem:[#allocation46_spill]] %s4188_s9 }
   0xb   :  { %4227 = sst [smem:[#allocation47_spill]] %s4189_s10 }
   0xc   :  { %4228 = sst [smem:[#allocation48_spill]] %s4190_s11 }
   0xd   :  { %4229 = sst [smem:[#allocation49_spill]] %s4191_s12 }
   0xe   :  { %4230 = sst [smem:[#allocation50_spill]] %s4192_s13 }
   0xf   :  { %4231 = sst [smem:[#allocation51_spill]] %s4193_s14 }
  0x10   :  { %4232 = sst [smem:[#allocation52_spill]] %s4194_s15 }
  0x11   :  { %4233 = sst [smem:[#allocation53_spill]] %s4195_s16 }
  0x12   :  { %4234 = sst [smem:[#allocation54_spill]] %s4196_s17 }
  0x13   :  { %4235 = sst [smem:[#allocation55_spill]] %s4197_s18 }
  0x14   :  { %4236 = sst [smem:[#allocation56_spill]] %s4198_s19 }
  0x15   :  { %4237 = sst [smem:[#allocation57_spill]] %s4199_s20 }
  0x16   :  { %4238 = sst [smem:[#allocation58_spill]] %s4200_s21 }
  0x17   :  { %4239 = sst [smem:[#allocation59_spill]] %s4201_s22 }
  0x18   :  { %4240 = sst [smem:[#allocation60_spill]] %s4202_s23 }
  0x19   :  { %4241 = sst [smem:[#allocation61_spill]] %s4203_s24 }
  0x1a   :  { %4242 = sst [smem:[#allocation62_spill]] %s4204_s25 }
  0x1b   :  { %30 = vsyncpa [#allocation4], 0 }
  0x1c   :  { %32 = vsyncpa [#allocation4 + $0x1], 0 }
  0x1d   :  { %33 = vsyncpa [#allocation6], 0 }
  0x1e   :  { %35 = vsyncpa [#allocation6 + $0x1], 0 }
  0x1f   :  { %36 = vsyncpa [#allocation9], 0 }
  0x20   :  { %38 = vsyncpa [#allocation9 + $0x1], 0 }
  0x21   :  { %39 = vsyncpa [#allocation12], 0 }
  0x22   :  { %41 = vsyncpa [#allocation12 + $0x1], 0 }
  0x23   :  { %42 = vsyncpa [#allocation15], 0 }
  0x24   :  { %44 = vsyncpa [#allocation15 + $0x1], 0 }
  0x25   :  { %45 = vsyncpa [#allocation18], 0 }
  0x26   :  { %47 = vsyncpa [#allocation18 + $0x1], 0 }
  0x27   :  { %48 = vsyncpa [#allocation21], 0 }
  0x28   :  { %50 = vsyncpa [#allocation21 + $0x1], 0  ;;  %s3627_s29 = smov 0   ;;  %s3629_s2 = smov 0  }
  0x29   :  { %s3631_s6 = smov 0   ;;  %s3633_s30 = smov 0  }
  0x2a   :  { %s3635_s7 = smov 0   ;;  %s3637_s3 = smov 0  }
  0x2b   :  { %s3639_s26 = smov 0   ;;  %s3641_s1 = smov 0  }
  0x2c LB: > { %4243 = sst [smem:[#allocation29_spill]] %s3462_s2  ;;  %s4206_s8 = sadd.s32 4294967295, %s3486_s1   ;;  %s3486_s1 = sphi %s3641_s1, %s56_s1   ;;  %s3482_s26 = sphi %s3639_s26, %s4311_s26   ;;  %s3478_s3 = sphi %s3637_s3, %s4310_s3   ;;  %s3474_s7 = sphi %s3635_s7, %s4309_s7   ;;  %s3470_s30 = sphi %s3633_s30, %s4308_s30   ;;  %s3466_s6 = sphi %s3631_s6, %s4307_s6   ;;  %s3462_s2 = sphi %s3629_s2, %s4306_s2   ;;  %s3458_s29 = sphi %s3627_s29, %s4305_s29  }
  0x2d   : > { %4244 = sst [smem:[#allocation30_spill]] %s3466_s6  ;;  %s65_s27 = sadd.s32 1, %s3478_s3 }
  0x2e   : > { %4245 = sst [smem:[#allocation31_spill]] %s3478_s3  ;;  %p66_p0 = scmp.ge.s32.totalorder %s65_s27, 2 }
  0x2f   : > { %4246 = sst [smem:[#allocation32_spill]] %s3482_s26  ;;  %s68_s4 = sadd.s32 1, %s3482_s26 }
  0x30   : > { %4247 = sst [smem:[#allocation33_spill]] %s3486_s1  ;;  %s231_s28 = sadd.s32 1, %s3466_s6 }
  0x31   : > { %p238_p1 = scmp.ne.s32.totalorder %s3466_s6, %s3462_s2  ;;  %s4313_s27 = smov (%p66_p0, %s65_s27), 0 }
  0x32   : > { %4248 = sst [smem:[#allocation34_spill]] %s4313_s27  ;;  %s4315_s4 = smov (!%p66_p0, %s68_s4), %s3482_s26 }
  0x33   : > { %s228_s9 = ssub.s32 %s3478_s3, %s4313_s27  ;;  %p239_p2 = scmp.eq.s32.totalorder %s3486_s1, 0 }
  0x34   : > { %p70_p3 = scmp.ge.s32.totalorder %s4315_s4, 2  ;;  %p229_p4 = scmp.eq.s32.totalorder %s228_s9, 0 }
  0x35   : > { %p240_p5 = por %p239_p2, %p238_p1  ;;  %p244_p6 = scmp.ne.s32.totalorder %s3462_s2, %s3458_s29 }
  0x36   : > { %s4317_s4 = smov (%p70_p3, %s4315_s4), 0  ;;  %p245_p7 = scmp.eq.s32.totalorder %s4206_s8, 0 }
  0x37   : > { %4249 = sst [smem:[#allocation35_spill]] %s4317_s4  ;;  %p2887_p8 = scmp.lt.s32.totalorder %s3486_s1, 4 }
  0x38   : > { %s3681_s5 = scalar_select %p229_p4, %s3466_s6, %s231_s28  }
  0x39   : > { %s3687_s0 = sand.u32 1, %s3466_s6   ;;  %p3689_p9 = por %p245_p7, %p244_p6 }
  0x3a   : > { %4250 = sst [smem:[#allocation36_spill]] %s3681_s5  ;;  %s3694_s9 = sand.u32 1, %s3486_s1  }
  0x3b   : > { %p3696_p10 = pnand %p2887_p8, %p240_p5  ;;  %s4253_s4 = sld [smem:[#allocation45_spill]] }
  0x3c   : > { %s832_s6 = scalar_lea.vmem [#allocation5], %s3687_s0  ;;  %p2692_p11 = scmp.ge.s32.totalorder %s3486_s1, 1 }
  0x3d   : > { %s839_s25 = sshll.u32 %s832_s6, 4  ;;  %s4209_s23 = scalar_lea.sflag [#allocation6], %s3694_s9  ;;  %s840_s25 = int_to_ptr.vmem [resolvable:$true] %s839_s25 }
  0x3e   : > { %p1062_p12 = scmp.lt.s32.totalorder %s3486_s1, 5  ;;  %s4254_s11 = sld [smem:[#allocation48_spill]] }
  0x3f   : > { %s874_s28 = scalar_lea.vmem [#allocation8], %s3687_s0  ;;  %s4256_s14 = sld [smem:[#allocation51_spill]] }
  0x40   : > { %p3716_p13 = pnand %p2692_p11, %p1062_p12  ;;  %s881_s17 = sshll.u32 %s874_s28, 4  ;;  %s882_s17 = int_to_ptr.vmem [resolvable:$true] %s881_s17 }
  0x41   : > { %s835_s26 = scalar_lea.hbm %s4253_s4, %s3478_s3  ;;  %s4211_s28 = scalar_lea.sflag [#allocation12], %s3694_s9 }
  0x42   : > { %s837_s5 = sshll.u32 %s835_s26, 4  ;;  %s4257_s18 = sld [smem:[#allocation55_spill]]  ;;  %s838_s5 = int_to_ptr.hbm [resolvable:$true] %s837_s5 }
  0x43   : > { %2856 = dma.hbm_to_vmem [thread:$0]  (!%p3696_p10), %s838_s5, 16, %s840_s25, %s4209_s23  }
  0x44   : > { %s877_s26 = scalar_lea.hbm %s4254_s11, %s3478_s3  ;;  %s4210_s25 = scalar_lea.sflag [#allocation9], %s3694_s9 }
  0x45   : > { %s879_s6 = sshll.u32 %s877_s26, 4  ;;  %s919_s8 = scalar_lea.hbm %s4256_s14, %s3478_s3  ;;  %s880_s6 = int_to_ptr.hbm [resolvable:$true] %s879_s6 }
  0x46   : > { %2862 = dma.hbm_to_vmem [thread:$0]  (!%p3696_p10), %s880_s6, 16, %s882_s17, %s4210_s25  }
  0x47   : > { %s921_s23 = sshll.u32 %s919_s8, 4  ;;  %s916_s11 = scalar_lea.vmem [#allocation11], %s3687_s0  ;;  %s922_s23 = int_to_ptr.hbm [resolvable:$true] %s921_s23 }
  0x48   : > { %s923_s26 = sshll.u32 %s916_s11, 4  ;;  %s969_s6 = scalar_lea.hbm %s4257_s18, %s3478_s3  ;;  %s924_s26 = int_to_ptr.vmem [resolvable:$true] %s923_s26 }
  0x49   : > { %2868 = dma.hbm_to_vmem [thread:$0]  (!%p3696_p10), %s922_s23, 16, %s924_s26, %s4211_s28  }
  0x4a   : > { %s966_s21 = scalar_lea.vmem [#allocation14], %s3687_s0  ;;  %s971_s8 = sshll.u32 %s969_s6, 4  ;;  %s972_s8 = int_to_ptr.hbm [resolvable:$true] %s971_s8 }
  0x4b   : > { %s973_s5 = sshll.u32 %s966_s21, 4  ;;  %s4212_s11 = scalar_lea.sflag [#allocation15], %s3694_s9  ;;  %s974_s5 = int_to_ptr.vmem [resolvable:$true] %s973_s5 }
  0x4c   : > { %2874 = dma.hbm_to_vmem [thread:$0]  (!%p3696_p10), %s972_s8, 16, %s974_s5, %s4212_s11  }
  0x4d   : > { %s4258_s20 = sld [smem:[#allocation57_spill]]  ;;  %s1000_s17 = scalar_lea.vmem [#allocation17], %s3687_s0 }
  0x4e   : > { %s1007_s28 = sshll.u32 %s1000_s17, 4  ;;  %s4213_s6 = scalar_lea.sflag [#allocation18], %s3694_s9  ;;  %s1008_s28 = int_to_ptr.vmem [resolvable:$true] %s1007_s28 }
  0x4f   : > { %s4259_s8 = sld [smem:[#allocation43_spill]]  ;;  %s807_s23 = scalar_lea.vmem [#allocation3], %s3687_s0 }
  0x50   : > { %s814_s11 = sshll.u32 %s807_s23, 4  ;;  %s805_s17 = scalar_lea.sflag [#allocation4], %s3687_s0  ;;  %s815_s11 = int_to_ptr.vmem [resolvable:$true] %s814_s11 }
  0x51   : > { %s4260_s10 = sld [smem:[#allocation47_spill]]  ;;  %s4265_s23 = scalar_lea.sflag [#allocation12], %s3694_s9 }
  0x52   : > { %s4262_s12 = sld [smem:[#allocation49_spill]] }
  0x53   : > { %s1003_s15 = scalar_lea.hbm %s4258_s20, %s3478_s3  ;;  %s4264_s16 = sld [smem:[#allocation53_spill]] }
  0x54   : > { %s1005_s26 = sshll.u32 %s1003_s15, 4  ;;  %s4266_s19 = sld [smem:[#allocation56_spill]]  ;;  %s1006_s26 = int_to_ptr.hbm [resolvable:$true] %s1005_s26 }
  0x55   : > { %2880 = dma.hbm_to_vmem [thread:$0]  (!%p3696_p10), %s1006_s26, 16, %s1008_s28, %s4213_s6  }
  0x56   : > { %s810_s25 = scalar_lea.hbm %s4259_s8, %s3478_s3  ;;  %s857_s26 = scalar_lea.vmem [#allocation7], %s3687_s0 }
  0x57   : > { %s812_s15 = sshll.u32 %s810_s25, 4  ;;  %s860_s28 = scalar_lea.hbm %s4260_s10, %s3478_s3  ;;  %s813_s15 = int_to_ptr.hbm [resolvable:$true] %s812_s15 }
  0x58   : > { %2853 = dma.hbm_to_vmem [thread:$0]  (!%p3696_p10), %s813_s15, 16, %s815_s11, %s805_s17  }
  0x59   : > { %s864_s21 = sshll.u32 %s857_s26, 4  ;;  %s862_s5 = sshll.u32 %s860_s28, 4  ;;  %s865_s21 = int_to_ptr.vmem [resolvable:$true] %s864_s21  ;;  %s863_s5 = int_to_ptr.hbm [resolvable:$true] %s862_s5 }
  0x5a   : > { %s4261_s8 = scalar_lea.sflag [#allocation6], %s3694_s9  ;;  %s894_s11 = scalar_lea.hbm %s4262_s12, %s3478_s3 }
  0x5b   : > { %2859 = dma.hbm_to_vmem [thread:$0]  (!%p3696_p10), %s863_s5, 16, %s865_s21, %s4261_s8  }
  0x5c   : > { %s891_s15 = scalar_lea.vmem [#allocation10], %s3687_s0  ;;  %s896_s18 = sshll.u32 %s894_s11, 4  ;;  %s897_s18 = int_to_ptr.hbm [resolvable:$true] %s896_s18 }
  0x5d   : > { %s898_s14 = sshll.u32 %s891_s15, 4  ;;  %s4263_s17 = scalar_lea.sflag [#allocation9], %s3694_s9  ;;  %s899_s14 = int_to_ptr.vmem [resolvable:$true] %s898_s14 }
  0x5e   : > { %2865 = dma.hbm_to_vmem [thread:$0]  (!%p3696_p10), %s897_s18, 16, %s899_s14, %s4263_s17  }
  0x5f   : > { %s944_s21 = scalar_lea.hbm %s4264_s16, %s3478_s3  ;;  %s941_s5 = scalar_lea.vmem [#allocation13], %s3687_s0 }
  0x60   : > { %s948_s8 = sshll.u32 %s941_s5, 4  ;;  %s946_s25 = sshll.u32 %s944_s21, 4  ;;  %s949_s8 = int_to_ptr.vmem [resolvable:$true] %s948_s8  ;;  %s947_s25 = int_to_ptr.hbm [resolvable:$true] %s946_s25 }
  0x61   : > { %2871 = dma.hbm_to_vmem [thread:$0]  (!%p3696_p10), %s947_s25, 16, %s949_s8, %s4265_s23  }
  0x62   : > { %s986_s14 = scalar_lea.hbm %s4266_s19, %s3478_s3  ;;  %s983_s18 = scalar_lea.vmem [#allocation16], %s3687_s0 }
  0x63   : > { %s990_s17 = sshll.u32 %s983_s18, 4  ;;  %s988_s28 = sshll.u32 %s986_s14, 4  ;;  %s991_s17 = int_to_ptr.vmem [resolvable:$true] %s990_s17  ;;  %s989_s28 = int_to_ptr.hbm [resolvable:$true] %s988_s28 }
  0x64   : > { %s4267_s26 = scalar_lea.sflag [#allocation15], %s3694_s9  ;;  %s4268_s22 = sld [smem:[#allocation59_spill]] }
  0x65   : > { %2877 = dma.hbm_to_vmem [thread:$0]  (!%p3696_p10), %s989_s28, 16, %s991_s17, %s4267_s26  }
  0x66   : > { %s1025_s8 = scalar_lea.vmem [#allocation19], %s3687_s0  ;;  %s4269_s11 = scalar_lea.sflag [#allocation18], %s3694_s9 }
  0x67   : > { %s1032_s25 = sshll.u32 %s1025_s8, 4  ;;  %s4270_s24 = sld [smem:[#allocation61_spill]]  ;;  %s1033_s25 = int_to_ptr.vmem [resolvable:$true] %s1032_s25 }
  0x68   : > { %s1050_s12 = scalar_lea.vmem [#allocation20], %s3687_s0  ;;  %s1048_s17 = scalar_lea.sflag [#allocation21], %s3687_s0 }
  0x69   : > { %s1057_s16 = sshll.u32 %s1050_s12, 4  ;;  %s1058_s16 = int_to_ptr.vmem [resolvable:$true] %s1057_s16 }
  0x6a   : > { %s1028_s6 = scalar_lea.hbm %s4268_s22, %s3478_s3 }
  0x6b   : > { %s1030_s23 = sshll.u32 %s1028_s6, 4  ;;  %1066 = sbr.rel (%p3716_p13) target bundleno = 3355 (0xd1b), region = 120  ;;  %s1031_s23 = int_to_ptr.hbm [resolvable:$true] %s1030_s23 }
  0x6c   : > { %2883 = dma.hbm_to_vmem [thread:$0]  (!%p3696_p10), %s1031_s23, 16, %s1033_s25, %s4269_s11  }
  0x6d   : > { %s1053_s18 = scalar_lea.hbm %s4270_s24, %s3478_s3  ;;  %s3820_s6 = sand.u32 (!%p3716_p13), 1, %s3462_s2  }
  0x6e   : > { %s1055_s10 = sshll.u32 %s1053_s18, 4  ;;  %s1069_s9 = scalar_lea.sflag (!%p3716_p13), [#allocation4], %s3820_s6  ;;  %s1056_s10 = int_to_ptr.hbm [resolvable:$true] %s1055_s10 }
  0x6f   : > { %2886 = dma.hbm_to_vmem [thread:$0]  (!%p3696_p10), %s1056_s10, 16, %s1058_s16, %s1048_s17  }
  0x70   : > { %3429 = dma.done.wait (%p3689_p9), %s1069_s9, 16  }
  0x71   : > { %3431 = vsyncadd (%p3689_p9), %s1069_s9, 4294967280  ;;  %s4271_s12 = sadd.s32 4294967295, %s3486_s1  }
  0x72   : > { %s1077_s10 = sand.u32 1, %s4271_s12  }
  0x73   : > { %s1078_s16 = scalar_lea.sflag [#allocation6], %s1077_s10 }
  0x74   : > { %3433 = dma.done.wait (%p3689_p9), %s1078_s16, 32  }
  0x75   : > { %3435 = vsyncadd (%p3689_p9), %s1078_s16, 4294967264  ;;  %s1096_s4 = scalar_lea.sflag [#allocation9], %s1077_s10 }
  0x76   : > { %3437 = dma.done.wait (%p3689_p9), %s1096_s4, 32  }
  0x77   : > { %3439 = vsyncadd (%p3689_p9), %s1096_s4, 4294967264  ;;  %s1114_s5 = scalar_lea.sflag [#allocation12], %s1077_s10 }
  0x78   : > { %3441 = dma.done.wait (%p3689_p9), %s1114_s5, 32  }
  0x79   : > { %3443 = vsyncadd (%p3689_p9), %s1114_s5, 4294967264  ;;  %s1132_s23 = scalar_lea.sflag [#allocation15], %s1077_s10 }
  0x7a   : > { %3445 = dma.done.wait (%p3689_p9), %s1132_s23, 32  }
  0x7b   : > { %3447 = vsyncadd (%p3689_p9), %s1132_s23, 4294967264  ;;  %s1150_s14 = scalar_lea.sflag [#allocation18], %s1077_s10 }
  0x7c   : > { %3449 = dma.done.wait (%p3689_p9), %s1150_s14, 32  }
  0x7d   : > { %3451 = vsyncadd (%p3689_p9), %s1150_s14, 4294967264  ;;  %s1168_s9 = scalar_lea.sflag [#allocation21], %s3820_s6 }
  0x7e   : > { %3453 = dma.done.wait (%p3689_p9), %s1168_s9, 16  }
  0x7f   : > { %3455 = vsyncadd (%p3689_p9), %s1168_s9, 4294967280  ;;  %p1340_p0 = scmp.lt.s32.totalorder %s3474_s7, 1  ;;  %p1361_p1 = scmp.lt.s32.totalorder %s3470_s30, 1 }
  0x80   : > { %s4272_s23 = sld [smem:[#allocation37_spill]]  ;;  %p2715_p2 = scmp.ne.s32.totalorder %s3470_s30, 0 }
  0x81   : > { %s4319_s7 = smov (!%p1340_p0, %s3474_s7), 1  ;;  %s4273_s17 = sld [smem:[#allocation38_spill]] }
  0x82   : > { %s3872_s10 = scalar_select %p1361_p1, %s3470_s30, 1 }
  0x83   : > { %s2799_s16 = sshll.u32 %s4319_s7, 4  ;;  %s2800_s27 = sshll.u32 %s4319_s7, 5 }
  0x84   : > { %s4274_s8 = sld [smem:[#allocation39_spill]]  ;;  %s2802_s12 = sshll.u32 %s3872_s10, 4 }
  0x85   : > { %s4278_s3 = sld [smem:[#allocation44_spill]] }
  0x86   : > { %s1344_s14 = scalar_lea.vmem %s4272_s23, %s2799_s16  ;;  %s4279_s2 = sld [smem:[#allocation46_spill]] }
  0x87   : > { %s3882_s18 = scalar_lea.vmem %s4273_s17, %s2800_s27  ;;  %s2808_s17 = sshll.u32 %s3872_s10, 5 }
  0x88   : > { %s4280_s13 = sld [smem:[#allocation50_spill]] }
  0x89   : > { %s4281_s4 = sld [smem:[#allocation52_spill]] }
  0x8a   : > { %s3887_s21 = scalar_lea.vmem %s4274_s8, %s2799_s16  ;;  %s4282_s27 = sld [smem:[#allocation54_spill]] }
  0x8b   : > { %s3906_s11 = scalar_lea.vmem %s4278_s3, %s2802_s12  ;;  %s4283_s8 = sld [smem:[#allocation58_spill]] }
  0x8c   : > { %s3911_s26 = scalar_lea.vmem %s4279_s2, %s2802_s12  ;;  %s4284_s29 = sld [smem:[#allocation60_spill]] }
  0x8d   : > { %s4285_s20 = sld [smem:[#allocation62_spill]] }
  0x8e   : > { %s3916_s19 = scalar_lea.vmem %s4280_s13, %s2802_s12 }
  0x8f   : > { %s3921_s5 = scalar_lea.vmem %s4281_s4, %s2802_s12  ;;  %1408 = sbr.rel (%p2715_p2) target bundleno = 151 (0x97), region = 172 }
  0x90   : > { %s3926_s3 = scalar_lea.vmem %s4282_s27, %s2802_s12 }
  0x91   : > { %s3931_s2 = scalar_lea.vmem %s4283_s8, %s2802_s12 }
  0x92   : > { %s3936_s25 = scalar_lea.vmem %s4284_s29, %s2808_s17 }
  0x93   : > { %s3941_s28 = scalar_lea.vmem %s4285_s20, %s2799_s16 }
  0x94   : > { %v1409_v0 = vld [vmem:[%s1344_s14] sm:$0xff]  ;;  %vm1411_vm0 = vcmask 261120   ;;  %v1410_v1 = vld [vmem:[%s1344_s14 + $0x8] sm:$0xff] }
  0x95   : > { %1412 = vst.msk [vmem:[#allocation2] sm:$0xff] %vm1411_vm0, %v1409_v0 }
  0x96   : > { %1413 = vst.msk [vmem:[#allocation2 + $0x8] sm:$0xff] %vm1411_vm0, %v1410_v1 }
  0x97 PF: > { %vm1426_vm1 = vcmask 261120   ;;  %v3488_v6 = vmov 32.0   ;;  %v2811_v23 = vld [vmem:[%s3906_s11 + $0x8] sm:$0xff]  ;;  %v2810_v25 = vld [vmem:[%s3906_s11] sm:$0xff]  ;;  %s4286_s24 = sld [smem:[#allocation42_spill]]  ;;  %s4288_s0 = scalar_lea.vmem [#allocation3], %s3820_s6 }
  0x98   : > { %2986 = vrcp.f32 %v3488_v6  ;;  %1518 = vmatpush.bf16.msra.mxu0 %v2811_v23  ;;  %v2974_v49 = vld [vmem:[%s4288_s0] ss:$0 sm:$0xff]  ;;  %s4289_s16 = scalar_lea.vmem [#allocation5], %s3820_s6  ;;  %s3490_s14 = smov 96   ;;  %vm1532_vm9 = vcmask 130048  }
  0x99   : > { %v2975_v55 = vld [vmem:[%s4289_s16] ss:$0 sm:$0xff]  ;;  %s3491_s12 = smov 80   ;;  %s4290_s4 = sld [smem:[#allocation40_spill]] }
  0x9a   : > { %s3493_s27 = smov 64   ;;  %s3494_s9 = smov 48  }
  0x9b   : > { %s3495_s8 = smov 16   ;;  %s4297_s20 = sld [smem:[#allocation41_spill]] }
  0x9c   : > { %v3944_v2 = vld [vmem:[#allocation2] sm:$0xff]  ;;  %1519 = vmatpush.bf16.msra.mxu0 %v2810_v25  ;;  %s4302_s22 = scalar_lea.vmem [#allocation19], %s3820_s6  ;;  %p2796_p3 = scmp.ne.s32.totalorder %s3470_s30, 1 }
  0x9d   : > { %v1427_v3 = vsel %vm1426_vm1, %v3944_v2, 0.0  ;;  %v3948_v4 = vld [vmem:[#allocation2 + $0x8] sm:$0xff]  ;;  %s4287_s1 = scalar_lea.vmem %s4286_s24, %s3872_s10  ;;  %s3489_s10 = smov 112  }
  0x9e   : > { %1428 = vadd.xlane.f32.xlu0 %v1427_v3  ;;  %v1430_v5 = vsel %vm1426_vm1, %v3948_v4, 0.0  ;;  %v2987_v7 = vpop.eup %2986  ;;  %v2973_v44 = vld [vmem:[%s4287_s1] ss:$0 sm:$0xff]  ;;  %v3492_v3 = vmov -1e+09  }
  0x9f   : > { %v1434_v8 = vmul.f32 32.0, %v2987_v7  ;;  %vm1438_vm2 = vweird.f32 %v2987_v7  ;;  %s4291_s23 = scalar_lea.vmem %s4290_s4, %s4319_s7 }
  0xa0   : > { %v1422_v1 = vld [vmem:[%s4291_s23] sm:$0x1] }
  0xa1   : > { %v1435_v9 = vsub.f32 1.0, %v1434_v8  ;;  %vm1526_vm10 = vcmp.gt.f32.partialorder %v1422_v1, 0.5  ;;  %s4298_s13 = scalar_lea.vmem %s4297_s20, %s4319_s7  ;;  %s4299_s7 = scalar_lea.vmem [#allocation14], %s3820_s6 }
  0xa3   : > { %v1436_v10 = vmul.f32 %v2987_v7, %v1435_v9 }
  0xa5   : > { %v1437_v11 = vadd.f32 %v2987_v7, %v1436_v10 }
  0xa6   : > { %1431 = vadd.xlane.f32.xlu0 %v1430_v5  ;;  %v1527_v5 = vsel %vm1526_vm10, 0.0, %v3492_v3 }
  0xa7   : > { %v3952_v12 = vsel %vm1438_vm2, %v2987_v7, %v1437_v11  ;;  %v1556_v6 = vperm.slane %v1527_v5, 0  ;;  %v2812_v5 = vld [vmem:[%s3911_s26] sm:$0xff] }
 0x111   : > { %v1429_v13 = vpop.xlane.xlu0 %1428 }
 0x112   : > { %v1440_v14 = vmul.f32 %v3952_v12, %v1429_v13 }
 0x114   : > { %v1442_v15 = vsub.f32 %v3944_v2, %v1440_v14 }
 0x116   : > { %v1444_v16 = vmul.f32 %v1442_v15, %v1442_v15 }
 0x118   : > { %v1446_v17 = vsel %vm1426_vm1, %v1444_v16, 0.0 }
 0x119   : > { %1447 = vadd.xlane.f32.xlu1 %v1446_v17  ;;  %v1432_v18 = vpop.xlane.xlu0 %1431 }
 0x11a   : > { %v1441_v19 = vmul.f32 %v3952_v12, %v1432_v18 }
 0x11c   : > { %v1443_v20 = vsub.f32 %v3948_v4, %v1441_v19 }
 0x11e   : > { %v1445_v21 = vmul.f32 %v1443_v20, %v1443_v20 }
 0x120   : > { %v1449_v22 = vsel %vm1426_vm1, %v1445_v21, 0.0 }
 0x121   : > { %1450 = vadd.xlane.f32.xlu1 %v1449_v22 }
 0x18c   : > { %v1448_v24 = vpop.xlane.xlu1 %1447 }
 0x18d   : > { %v1452_v26 = vmul.f32 %v1448_v24, %v3952_v12 }
 0x18f   : > { %v1454_v27 = vadd.f32 1e-05, %v1452_v26 }
 0x191   : > { %2988 = vrsqrt.f32 %v1454_v27  ;;  %vm1462_vm4 = vweird.f32 %v1454_v27 }
 0x194   : > { %v1451_v28 = vpop.xlane.xlu1 %1450 }
 0x195   : > { %v1453_v29 = vmul.f32 %v1451_v28, %v3952_v12 }
 0x197   : > { %v2989_v30 = vpop.eup %2988  ;;  %v1455_v31 = vadd.f32 1e-05, %v1453_v29 }
 0x198   : > { %v1457_v32 = vmul.f32 %v2989_v30, %v1454_v27  ;;  %vm1463_vm3 = vweird.f32 %v2989_v30 }
 0x199   : > { %2990 = vrsqrt.f32 %v1455_v31  ;;  %vm1464_vm5 = vmor %vm1462_vm4, %vm1463_vm3  ;;  %vm1472_vm7 = vweird.f32 %v1455_v31 }
 0x19a   : > { %v1458_v33 = vmul.f32 %v2989_v30, %v1457_v32 }
 0x19c   : > { %v1459_v34 = vmul.f32 0.5, %v1458_v33 }
 0x19e   : > { %v1460_v35 = vsub.f32 1.5, %v1459_v34 }
 0x19f   : > { %v2991_v36 = vpop.eup %2990 }
 0x1a0   : > { %v1461_v37 = vmul.f32 %v2989_v30, %v1460_v35  ;;  %v1467_v38 = vmul.f32 %v2991_v36, %v1455_v31  ;;  %vm1473_vm6 = vweird.f32 %v2991_v36 }
 0x1a1   : > { %vm1474_vm8 = vmor %vm1472_vm7, %vm1473_vm6 }
 0x1a2   : > { %v1468_v39 = vmul.f32 %v2991_v36, %v1467_v38  ;;  %v1465_v40 = vsel %vm1464_vm5, %v2989_v30, %v1461_v37 }
 0x1a3   : > { %v1476_v43 = vmul.f32 %v1465_v40, %v1442_v15 }
 0x1a4   : > { %v1469_v41 = vmul.f32 0.5, %v1468_v39 }
 0x1a5   : > { %v1481_v48 = vmul.f32 %v2973_v44, %v1476_v43 }
 0x1a6   : > { %v1470_v42 = vsub.f32 1.5, %v1469_v41 }
 0x1a7   : > { %v1486_v51 = vadd.f32 %v2974_v49, %v1481_v48 }
 0x1a8   : > { %v1471_v45 = vmul.f32 %v2991_v36, %v1470_v42 }
 0x1aa   : > { %v1475_v46 = vsel %vm1474_vm8, %v2991_v36, %v1471_v45 }
 0x1ab   : > { %v1477_v47 = vmul.f32 %v1475_v46, %v1443_v20 }
 0x1ad   : > { %v1482_v50 = vmul.f32 %v2973_v44, %v1477_v47 }
 0x1af   : > { %v1487_v52 = vadd.f32 %v2974_v49, %v1482_v50 }
 0x1b1   : > { %v1493_v53 = vpack.c.bf16 %v1487_v52, %v1486_v51 }
 0x1b3   : > { %2724 = vmatmul.msk.bf16.vlgmr.msra.gmra.mxu0 %vm1426_vm1, %v1493_v53 }
 0x230   : > { %v1521_v54 = vpop.f32.mrf.mxu0 }
 0x231   : > { %v1522_v57 = vadd.f32 %v2975_v55, %v1521_v54 }
 0x238   : > { %v1523_v56 = vpop.f32.mrf.mxu0 }
 0x239   : > { %v1524_v58 = vadd.f32 %v2975_v55, %v1523_v56 }
 0x23b   : > { %v3974_v59 = vpack.c.bf16 %v1524_v58, %v1522_v57 }
 0x23d   : > { %1603 = vrot.lane.b32.xlu0 %v3974_v59, %s3489_s10  ;;  %1530 = vrot.lane.b32.xlu2 %v3974_v59, %s3490_s14 }
 0x245   : > { %1605 = vrot.lane.b32.xlu2 %v3974_v59, %s3491_s12 }
 0x297   : > { %v1531_v60 = vpop.permute.xlu2 %1530 }
 0x298   : > { %v1537_v61 = vsel %vm1532_vm9, %v1531_v60, 0  ;;  %v2813_v60 = vld [vmem:[%s3911_s26 + $0x8] sm:$0xff]  ;;  %s4292_s26 = scalar_lea.vmem [#allocation7], %s3820_s6 }
 0x299   : > { %1546 = vmatpush.bf16.xpose.msra.mxu1 %v1537_v61  ;;  %1714 = vmatpush.bf16.msrb.mxu0 %v2813_v60 }
 0x29d   : > { %1715 = vmatpush.bf16.msrb.mxu0 %v2812_v5 }
 0x29f   : > { %v1606_v62 = vpop.permute.xlu2 %1605 }
 0x2a0   : > { %2725 = vmatmul.msk.bf16.vlgmr.msra.gmra.mxu1 %vm1532_vm9, %v3974_v59  ;;  %v1611_v63 = vsel %vm1532_vm9, %v1606_v62, 0 }
 0x2a1   : > { %1620 = vmatpush.bf16.xpose.msra.mxu3 %v1611_v63 }
 0x2af   : > { %v1604_v0 = vpop.permute.xlu0 %1603 }
 0x2b0   : > { %2727 = vmatmul.msk.bf16.vlgmr.msra.gmra.mxu3 %vm1532_vm9, %v1604_v0 }
 0x31d   : > { %v1548_v7 = vpop.f32.mrf.mxu1 }
 0x31e   : > { %v1553_v8 = vmul.f32 0.25, %v1548_v7  ;;  %v1421_v7 = vld [vmem:[%s3887_s21 + $0x8] sm:$0xff] }
 0x320   : > { %v1558_v9 = vadd.f32 %v1556_v6, %v1553_v8  ;;  %v3496_v8 = vmov 0  }
 0x321   : > { %2966 = vset.pattern.permute.xlu0 %v3496_v8  ;;  %2967 = vset.pattern.permute.xlu1 %v3496_v8 }
 0x322   : > { %v1560_v10 = vsel %vm1532_vm9, %v1558_v9, -inf }
 0x323   : > { %1561 = vmax.xlane.f32.xlu1 %v1560_v10 }
 0x325   : > { %v1550_v11 = vpop.f32.mrf.mxu1 }
 0x326   : > { %v1554_v13 = vmul.f32 0.25, %v1550_v11 }
 0x328   : > { %v1559_v14 = vadd.f32 %v1556_v6, %v1554_v13 }
 0x32a   : > { %v1563_v15 = vsel %vm1532_vm9, %v1559_v14, -inf }
 0x32b   : > { %1564 = vmax.xlane.f32.xlu2 %v1563_v15 }
 0x333   : > { %v1622_v16 = vpop.f32.mrf.mxu3 }
 0x334   : > { %v1627_v17 = vmul.f32 0.25, %v1622_v16  ;;  %v2976_v16 = vld [vmem:[%s4292_s26] ss:$0 sm:$0xff] }
 0x336   : > { %v1629_v18 = vadd.f32 %v1627_v17, %v1556_v6 }
 0x338   : > { %v1631_v19 = vsel %vm1532_vm9, %v1629_v18, -inf }
 0x339   : > { %1632 = vmax.xlane.f32.xlu1 %v1631_v19 }
 0x33b   : > { %v1624_v20 = vpop.f32.mrf.mxu3 }
 0x33c   : > { %v1628_v21 = vmul.f32 0.25, %v1624_v20 }
 0x33e   : > { %v1630_v22 = vadd.f32 %v1628_v21, %v1556_v6  ;;  %v1420_v6 = vld [vmem:[%s3887_s21] sm:$0xff]  ;;  %s4293_s21 = scalar_lea.vmem [#allocation13], %s3820_s6 }
 0x340   : > { %v1634_v23 = vsel %vm1532_vm9, %v1630_v22, -inf }
 0x341   : > { %1635 = vmax.xlane.f32.xlu1 %v1634_v23 }
 0x35a   : > { %1583 = vrot.lane.b32.xlu1 %v3974_v59, %s3493_s27 }
 0x396   : > { %v1562_v24 = vpop.xlane.xlu1 %1561 }
 0x397   : > { %v1566_v25 = vsub.f32 %v1558_v9, %v1562_v24 }
 0x399   : > { %v1568_v26 = vmul.f32 1.442695, %v1566_v25 }
 0x39b   : > { %2992 = vpow2.f32 %v1568_v26 }
 0x39e   : > { %v1565_v27 = vpop.xlane.xlu2 %1564 }
 0x39f   : > { %v1567_v28 = vsub.f32 %v1559_v14, %v1565_v27 }
 0x3a1   : > { %v2993_v29 = vpop.eup %2992  ;;  %v1570_v30 = vmul.f32 1.442695, %v1567_v28 }
 0x3a2   : > { %v1572_v31 = vsel %vm1532_vm9, %v2993_v29, 0.0 }
 0x3a3   : > { %2994 = vpow2.f32 %v1570_v30  ;;  %1573 = vadd.xlane.f32.xlu0 %v1572_v31  ;;  %v1416_v30 = vld [vmem:[%s3882_s18] sm:$0xff]  ;;  %v1417_v31 = vld [vmem:[%s3882_s18 + $0x8] sm:$0xff] }
 0x3a9   : > { %v2995_v32 = vpop.eup %2994 }
 0x3aa   : > { %v1575_v33 = vsel %vm1532_vm9, %v2995_v32, 0.0 }
 0x3ab   : > { %1576 = vadd.xlane.f32.xlu1 %v1575_v33 }
 0x3ac   : > { %v1633_v34 = vpop.xlane.xlu1 %1632 }
 0x3ad   : > { %v1637_v35 = vsub.f32 %v1629_v18, %v1633_v34 }
 0x3af   : > { %v1639_v36 = vmul.f32 1.442695, %v1637_v35 }
 0x3b1   : > { %2996 = vpow2.f32 %v1639_v36 }
 0x3b4   : > { %v1636_v37 = vpop.xlane.xlu1 %1635 }
 0x3b5   : > { %v1638_v38 = vsub.f32 %v1630_v22, %v1636_v37 }
 0x3b7   : > { %v2997_v39 = vpop.eup %2996  ;;  %v1641_v40 = vmul.f32 1.442695, %v1638_v38  ;;  %1724 = vperm.xlu0 %2966, %v1420_v6  }
 0x3b8   : > { %v1643_v41 = vsel %vm1532_vm9, %v2997_v39, 0.0 }
 0x3b9   : > { %2998 = vpow2.f32 %v1641_v40  ;;  %1644 = vadd.xlane.f32.xlu2 %v1643_v41 }
 0x3bf   : > { %v2999_v42 = vpop.eup %2998 }
 0x3c0   : > { %v1646_v43 = vsel %vm1532_vm9, %v2999_v42, 0.0 }
 0x3c1   : > { %1647 = vadd.xlane.f32.xlu2 %v1646_v43  ;;  %v1419_v43 = vld [vmem:[%s3882_s18 + $0x18] sm:$0xff] }
 0x3c4   : > { %1654 = vrot.lane.b32.xlu1 %v3974_v59, %s3494_s9 }
 0x3cc   : > { %v1584_v44 = vpop.permute.xlu1 %1583  ;;  %1729 = vperm.xlu1 %2967, %v1421_v7  }
 0x3cd   : > { %1596 = vmatpush.bf16.msra.mxu2 %v1584_v44 }
 0x416   : > { %v1574_v45 = vpop.xlane.xlu0 %1573 }
 0x417   : > { %3000 = vrcp.f32 %v1574_v45  ;;  %v2815_v45 = vld [vmem:[%s3916_s19 + $0x8] sm:$0xff] }
 0x418   : > { %1822 = vmatpush.bf16.msrb.mxu1 %v2815_v45 }
 0x41d   : > { %v3001_v47 = vpop.eup %3000 }
 0x41e   : > { %v1577_v46 = vpop.xlane.xlu1 %1576  ;;  %v1580_v49 = vmul.f32 %v3001_v47, %v2993_v29  ;;  %v2817_v29 = vld [vmem:[%s3921_s5 + $0x8] sm:$0xff]  ;;  %v2814_v47 = vld [vmem:[%s3916_s19] sm:$0xff]  ;;  %s4295_s19 = scalar_lea.vmem [#allocation10], %s3820_s6 }
 0x41f   : > { %3002 = vrcp.f32 %v1577_v46  ;;  %1864 = vmatpush.bf16.msrb.mxu3 %v2817_v29  ;;  %1823 = vmatpush.bf16.msrb.mxu1 %v2814_v47 }
 0x425   : > { %v3003_v48 = vpop.eup %3002 }
 0x426   : > { %v1581_v50 = vmul.f32 %v3003_v48, %v2995_v32  ;;  %v1835_v32 = vpack.c.bf16 %v1417_v31, %v1416_v30 }
 0x428   : > { %v1582_v51 = vpack.c.bf16 %v1581_v50, %v1580_v49 }
 0x429   : > { %v4015_v18 = vpop.permute.xlu0 %1724 }
 0x42a   : > { %2726 = vmatmul.msk.bf16.vlgmr.msra.gmra.mxu2 %vm1532_vm9, %v1582_v51 }
 0x42c   : > { %v1645_v52 = vpop.xlane.xlu2 %1644 }
 0x42d   : > { %3004 = vrcp.f32 %v1645_v52 }
 0x433   : > { %v3005_v55 = vpop.eup %3004 }
 0x434   : > { %v1648_v53 = vpop.xlane.xlu2 %1647  ;;  %v1651_v57 = vmul.f32 %v3005_v55, %v2997_v39 }
 0x435   : > { %3006 = vrcp.f32 %v1648_v53 }
 0x436   : > { %v1655_v54 = vpop.permute.xlu1 %1654 }
 0x437   : > { %1667 = vmatpush.bf16.msrb.mxu2 %v1655_v54 }
 0x43b   : > { %v3007_v56 = vpop.eup %3006 }
 0x43c   : > { %v1652_v58 = vmul.f32 %v3007_v56, %v2999_v42  ;;  %v1418_v42 = vld [vmem:[%s3882_s18 + $0x10] sm:$0xff]  ;;  %v2979_v56 = vld [vmem:[%s4293_s21] ss:$0 sm:$0xff]  ;;  %s4294_s18 = scalar_lea.vmem [#allocation8], %s3820_s6 }
 0x43d   : > { %v1836_v44 = vpack.c.bf16 %v1419_v43, %v1418_v42  ;;  %v1423_v42 = vld [vmem:[%s4298_s13] sm:$0x1] }
 0x43e   : > { %v1653_v59 = vpack.c.bf16 %v1652_v58, %v1651_v57  ;;  %v4023_v24 = vpop.permute.xlu1 %1729  ;;  %vm1877_vm2 = vcmp.gt.f32.partialorder %v1423_v42, 0.5 }
 0x43f   : > { %v1878_v43 = vsel %vm1877_vm2, 0.0, %v3492_v3 }
 0x440   : > { %2728 = vmatmul.msk.bf16.vlgmr.msrb.gmra.mxu2 %vm1532_vm9, %v1653_v59 }
 0x4ad   : > { %v1598_v61 = vpop.f32.mrf.mxu2 }
 0x4b5   : > { %v1600_v62 = vpop.f32.mrf.mxu2 }
 0x4c3   : > { %v1669_v63 = vpop.f32.mrf.mxu2 }
 0x4cb   : > { %v1671_v0 = vpop.f32.mrf.mxu2 }
 0x4cc   : > { %v2961_v1 = vpack.i.bf16 %v1671_v0, %v1669_v63 }
 0x4ce   : > { %2962 = vrot.lane.b32.xlu2 %v2961_v1, %s3495_s8 }
 0x528   : > { %v2963_v9 = vpop.permute.xlu2 %2962 }
 0x529   : > { %v2965_v10 = vunpack.i.h.bf16 %v2963_v9  ;;  %v2964_v11 = vunpack.i.l.bf16 %v2963_v9 }
 0x52b   : > { %v1683_v13 = vsel %vm1532_vm9, %v1600_v62, %v2965_v10  ;;  %v1682_v14 = vsel %vm1532_vm9, %v1598_v61, %v2964_v11  ;;  %v2977_v11 = vld [vmem:[%s4294_s18] ss:$0 sm:$0xff] }
 0x52c   : > { %v1689_v15 = vpack.c.bf16 %v1683_v13, %v1682_v14 }
 0x52e   : > { %2737 = vmatmul.msk.bf16.vlgmr.msrb.gmra.mxu0 %vm1426_vm1, %v1689_v15 }
 0x5ab   : > { %v1717_v17 = vpop.f32.mrf.mxu0 }
 0x5ac   : > { %v1718_v19 = vadd.f32 %v2976_v16, %v1717_v17  ;;  %v2978_v17 = vld [vmem:[%s4295_s19] ss:$0 sm:$0xff] }
 0x5ae   : > { %v1732_v20 = vmul.f32 %v4015_v18, %v1718_v19 }
 0x5b0   : > { %v4019_v21 = vadd.f32 %v1732_v20, %v3944_v2  ;;  %v2816_v2 = vld [vmem:[%s3921_s5] sm:$0xff]  ;;  %s4296_s5 = scalar_lea.vmem [#allocation11], %s3820_s6 }
 0x5b1   : > { %1865 = vmatpush.bf16.msrb.mxu3 %v2816_v2 }
 0x5b2   : > { %v1738_v22 = vsel %vm1426_vm1, %v4019_v21, 0.0 }
 0x5b3   : > { %v1719_v23 = vpop.f32.mrf.mxu0  ;;  %1739 = vadd.xlane.f32.xlu1 %v1738_v22 }
 0x5b4   : > { %v1720_v25 = vadd.f32 %v2976_v16, %v1719_v23  ;;  %2755 = vmatmul.msk.bf16.vlgmr.msrb.gmra.mxu3 %vm1426_vm1, %v1835_v32 }
 0x5b6   : > { %v1733_v26 = vmul.f32 %v4023_v24, %v1720_v25 }
 0x5b8   : > { %v4027_v27 = vadd.f32 %v1733_v26, %v3948_v4 }
 0x5ba   : > { %v1741_v28 = vsel %vm1426_vm1, %v4027_v27, 0.0 }
 0x5bb   : > { %1742 = vadd.xlane.f32.xlu2 %v1741_v28 }
 0x5c4   : > { %2756 = vmatmul.msk.bf16.gmra.mxu3 %vm1426_vm1, %v1836_v44  ;;  %v1908_v44 = vperm.slane %v1878_v43, 0 }
 0x626   : > { %v1740_v33 = vpop.xlane.xlu1 %1739 }
 0x627   : > { %v1744_v4 = vmul.f32 %v1740_v33, %v3952_v12  ;;  %v2980_v33 = vld [vmem:[%s4296_s5] ss:$0 sm:$0xff] }
 0x629   : > { %v1746_v34 = vsub.f32 %v4019_v21, %v1744_v4 }
 0x62b   : > { %v1748_v35 = vmul.f32 %v1746_v34, %v1746_v34 }
 0x62d   : > { %v1750_v36 = vsel %vm1426_vm1, %v1748_v35, 0.0 }
 0x62e   : > { %v1743_v37 = vpop.xlane.xlu2 %1742  ;;  %1751 = vadd.xlane.f32.xlu0 %v1750_v36 }
 0x62f   : > { %v1745_v38 = vmul.f32 %v1743_v37, %v3952_v12 }
 0x631   : > { %v1747_v39 = vsub.f32 %v4027_v27, %v1745_v38 }
 0x633   : > { %v1749_v40 = vmul.f32 %v1747_v39, %v1747_v39 }
 0x635   : > { %v1753_v41 = vsel %vm1426_vm1, %v1749_v40, 0.0 }
 0x636   : > { %1754 = vadd.xlane.f32.xlu1 %v1753_v41 }
 0x637   : > { %v1867_v50 = vpop.f32.mrf.mxu3 }
 0x638   : > { %v1868_v58 = vadd.f32 %v2979_v56, %v1867_v50 }
 0x63f   : > { %v1869_v59 = vpop.f32.mrf.mxu3 }
 0x640   : > { %v1870_v61 = vadd.f32 %v2979_v56, %v1869_v59 }
 0x642   : > { %v4051_v63 = vpack.c.bf16 %v1870_v61, %v1868_v58 }
 0x644   : > { %v1886_v31 = vsel %vm1532_vm9, %v4051_v63, 0 }
 0x647   : > { %v1872_v25 = vpop.f32.mrf.mxu3 }
 0x648   : > { %v1873_v26 = vadd.f32 %v2979_v56, %v1872_v25 }
 0x64f   : > { %1963 = vrot.lane.b32.xlu1 %v4051_v63, %s3489_s10  ;;  %v1874_v28 = vpop.f32.mrf.mxu3 }
 0x650   : > { %v1875_v29 = vadd.f32 %v2979_v56, %v1874_v28 }
 0x652   : > { %v4060_v2 = vpack.c.bf16 %v1875_v29, %v1873_v26 }
 0x654   : > { %v1889_v30 = vsel %vm1532_vm9, %v4060_v2, 0  ;;  %1965 = vrot.lane.b32.xlu2 %v4060_v2, %s3489_s10 }
 0x655   : > { %1897 = vmatpush.bf16.xpose.msra.mxu2 %v1889_v30 }
 0x65d   : > { %1898 = vmatpush.bf16.xpose.msra.mxu2 %v1886_v31 }
 0x6a1   : > { %v1752_v46 = vpop.xlane.xlu0 %1751 }
 0x6a2   : > { %v1756_v48 = vmul.f32 %v1752_v46, %v3952_v12 }
 0x6a4   : > { %v1758_v49 = vadd.f32 1e-05, %v1756_v48 }
 0x6a6   : > { %3008 = vrsqrt.f32 %v1758_v49  ;;  %vm1766_vm12 = vweird.f32 %v1758_v49 }
 0x6a9   : > { %v1755_v51 = vpop.xlane.xlu1 %1754 }
 0x6aa   : > { %v1757_v52 = vmul.f32 %v1755_v51, %v3952_v12 }
 0x6ac   : > { %v3009_v53 = vpop.eup %3008  ;;  %v1759_v54 = vadd.f32 1e-05, %v1757_v52 }
 0x6ad   : > { %v1761_v55 = vmul.f32 %v3009_v53, %v1758_v49  ;;  %vm1767_vm11 = vweird.f32 %v3009_v53 }
 0x6ae   : > { %3010 = vrsqrt.f32 %v1759_v54  ;;  %vm1768_vm13 = vmor %vm1766_vm12, %vm1767_vm11  ;;  %vm1776_vm15 = vweird.f32 %v1759_v54  ;;  %v1966_v37 = vpop.permute.xlu2 %1965 }
 0x6af   : > { %v1762_v57 = vmul.f32 %v3009_v53, %v1761_v55  ;;  %v1974_v38 = vsel %vm1532_vm9, %v1966_v37, 0 }
 0x6b0   : > { %1982 = vmatpush.bf16.xpose.msra.mxu1 %v1974_v38 }
 0x6b1   : > { %v1763_v60 = vmul.f32 0.5, %v1762_v57 }
 0x6b3   : > { %v1764_v62 = vsub.f32 1.5, %v1763_v60 }
 0x6b4   : > { %v3011_v0 = vpop.eup %3010 }
 0x6b5   : > { %v1765_v1 = vmul.f32 %v3009_v53, %v1764_v62  ;;  %v1771_v5 = vmul.f32 %v3011_v0, %v1759_v54  ;;  %vm1777_vm14 = vweird.f32 %v3011_v0 }
 0x6b6   : > { %vm1778_vm0 = vmor %vm1776_vm15, %vm1777_vm14 }
 0x6b7   : > { %v1772_v6 = vmul.f32 %v3011_v0, %v1771_v5  ;;  %v1769_v7 = vsel %vm1768_vm13, %v3009_v53, %v1765_v1 }
 0x6b8   : > { %v1780_v10 = vmul.f32 %v1769_v7, %v1746_v34 }
 0x6b9   : > { %v1773_v8 = vmul.f32 0.5, %v1772_v6 }
 0x6ba   : > { %v1785_v16 = vmul.f32 %v2977_v11, %v1780_v10 }
 0x6bb   : > { %v1774_v9 = vsub.f32 1.5, %v1773_v8 }
 0x6bc   : > { %v1790_v20 = vadd.f32 %v2978_v17, %v1785_v16 }
 0x6bd   : > { %v1775_v13 = vmul.f32 %v3011_v0, %v1774_v9 }
 0x6bf   : > { %v1779_v14 = vsel %vm1778_vm0, %v3011_v0, %v1775_v13 }
 0x6c0   : > { %v1781_v15 = vmul.f32 %v1779_v14, %v1747_v39 }
 0x6c1   : > { %v1964_v39 = vpop.permute.xlu1 %1963 }
 0x6c2   : > { %v1786_v19 = vmul.f32 %v2977_v11, %v1781_v15  ;;  %v1971_v40 = vsel %vm1532_vm9, %v1964_v39, 0 }
 0x6c3   : > { %1983 = vmatpush.bf16.xpose.msra.mxu1 %v1971_v40  ;;  %v2819_v40 = vld [vmem:[%s3926_s3 + $0x8] sm:$0xff] }
 0x6c4   : > { %v1791_v22 = vadd.f32 %v2978_v17, %v1786_v19 }
 0x6c6   : > { %v1797_v23 = vpack.c.bf16 %v1791_v22, %v1790_v20 }
 0x6c8   : > { %2746 = vmatmul.msk.bf16.vlgmr.msrb.gmra.mxu1 %vm1426_vm1, %v1797_v23 }
 0x745   : > { %v1825_v32 = vpop.f32.mrf.mxu1 }
 0x746   : > { %v1826_v34 = vadd.f32 %v2980_v33, %v1825_v32 }
 0x74d   : > { %v1827_v4 = vpop.f32.mrf.mxu1 }
 0x74e   : > { %v1828_v35 = vadd.f32 %v2980_v33, %v1827_v4 }
 0x750   : > { %v1879_v36 = vpack.c.bf16 %v1828_v35, %v1826_v34 }
 0x752   : > { %1961 = vrot.lane.b32.xlu0 %v1879_v36, %s3489_s10  ;;  %2757 = vmatmul.msk.bf16.vlgmr.msra.gmra.mxu2 %vm1532_vm9, %v1879_v36 }
 0x7c4   : > { %v1962_v41 = vpop.permute.xlu0 %1961 }
 0x7c5   : > { %2759 = vmatmul.msk.bf16.vlgmr.msra.gmra.mxu1 %vm1532_vm9, %v1962_v41 }
 0x7d5   : > { %v1900_v45 = vpop.f32.mrf.mxu2 }
 0x7d6   : > { %v1905_v46 = vmul.f32 0.25, %v1900_v45 }
 0x7d8   : > { %v1910_v47 = vadd.f32 %v1908_v44, %v1905_v46 }
 0x7da   : > { %v1912_v48 = vsel %vm1426_vm1, %v1910_v47, -inf }
 0x7db   : > { %1913 = vmax.xlane.f32.xlu0 %v1912_v48 }
 0x7dd   : > { %v1902_v51 = vpop.f32.mrf.mxu2 }
 0x7de   : > { %v1906_v53 = vmul.f32 0.25, %v1902_v51 }
 0x7e0   : > { %v1911_v57 = vadd.f32 %v1908_v44, %v1906_v53  ;;  %v2981_v53 = vld [vmem:[%s4299_s7] ss:$0 sm:$0xff] }
 0x7e2   : > { %v1915_v60 = vsel %vm1426_vm1, %v1911_v57, -inf }
 0x842   : > { %v1985_v49 = vpop.f32.mrf.mxu1 }
 0x843   : > { %v1990_v50 = vmul.f32 0.25, %v1985_v49 }
 0x845   : > { %v1992_v52 = vadd.f32 %v1990_v50, %v1908_v44 }
 0x847   : > { %v1994_v54 = vsel %vm1426_vm1, %v1992_v52, -inf }
 0x848   : > { %1995 = vmax.xlane.f32.xlu2 %v1994_v54 }
 0x84a   : > { %v1987_v55 = vpop.f32.mrf.mxu1 }
 0x84b   : > { %v1991_v56 = vmul.f32 0.25, %v1987_v55 }
 0x84d   : > { %v1993_v58 = vadd.f32 %v1991_v56, %v1908_v44  ;;  %v2818_v44 = vld [vmem:[%s3926_s3] sm:$0xff]  ;;  %s4300_s3 = scalar_lea.vmem [#allocation16], %s3820_s6 }
 0x84e   : > { %v1914_v3 = vpop.xlane.xlu0 %1913 }
 0x84f   : > { %v1918_v59 = vsub.f32 %v1910_v47, %v1914_v3  ;;  %v1997_v61 = vsel %vm1426_vm1, %v1993_v58, -inf }
 0x850   : > { %1916 = vmax.xlane.f32.xlu2 %v1915_v60  ;;  %1998 = vmax.xlane.f32.xlu1 %v1997_v61 }
 0x851   : > { %v1920_v62 = vmul.f32 1.442695, %v1918_v59 }
 0x853   : > { %3012 = vpow2.f32 %v1920_v62 }
 0x859   : > { %v3013_v0 = vpop.eup %3012 }
 0x85a   : > { %v1924_v1 = vsel %vm1426_vm1, %v3013_v0, 0.0 }
 0x85b   : > { %1925 = vadd.xlane.f32.xlu0 %v1924_v1 }
 0x8bb   : > { %v1996_v5 = vpop.xlane.xlu2 %1995 }
 0x8bc   : > { %v2000_v6 = vsub.f32 %v1992_v52, %v1996_v5 }
 0x8be   : > { %v2002_v7 = vmul.f32 1.442695, %v2000_v6 }
 0x8c0   : > { %3014 = vpow2.f32 %v2002_v7 }
 0x8c3   : > { %v1917_v8 = vpop.xlane.xlu2 %1916  ;;  %v1999_v9 = vpop.xlane.xlu1 %1998 }
 0x8c4   : > { %v1919_v10 = vsub.f32 %v1911_v57, %v1917_v8  ;;  %v2001_v11 = vsub.f32 %v1993_v58, %v1999_v9 }
 0x8c6   : > { %v3015_v13 = vpop.eup %3014  ;;  %v1922_v14 = vmul.f32 1.442695, %v1919_v10  ;;  %v2004_v15 = vmul.f32 1.442695, %v2001_v11  ;;  %v2821_v11 = vld [vmem:[%s3931_s2 + $0x8] sm:$0xff] }
 0x8c7   : > { %v2006_v16 = vsel %vm1426_vm1, %v3015_v13, 0.0  ;;  %2178 = vmatpush.bf16.msrb.mxu1 %v2821_v11 }
 0x8c8   : > { %3016 = vpow2.f32 %v1922_v14  ;;  %2007 = vadd.xlane.f32.xlu1 %v2006_v16  ;;  %v2820_v16 = vld [vmem:[%s3931_s2] sm:$0xff]  ;;  %s4301_s2 = scalar_lea.vmem [#allocation17], %s3820_s6 }
 0x8c9   : > { %3018 = vpow2.f32 %v2004_v15 }
 0x8cb   : > { %2179 = vmatpush.bf16.msrb.mxu1 %v2820_v16 }
 0x8ce   : > { %v3017_v17 = vpop.eup %3016  ;;  %v1926_v23 = vpop.xlane.xlu0 %1925 }
 0x8cf   : > { %v3019_v19 = vpop.eup %3018  ;;  %v1927_v20 = vsel %vm1426_vm1, %v3017_v17, 0.0 }
 0x8d0   : > { %1928 = vadd.xlane.f32.xlu0 %v1927_v20  ;;  %v2009_v22 = vsel %vm1426_vm1, %v3019_v19, 0.0 }
 0x8d1   : > { %2010 = vadd.xlane.f32.xlu2 %v2009_v22 }
 0x8e1   : > { %2019 = vrot.lane.b32.xlu1 %v4060_v2, %s3491_s12 }
 0x8e4   : > { %1939 = vrot.lane.b32.xlu0 %v4060_v2, %s3490_s14 }
 0x8e9   : > { %2017 = vrot.lane.b32.xlu2 %v4051_v63, %s3491_s12  ;;  %1937 = vrot.lane.b32.xlu1 %v4051_v63, %s3490_s14 }
 0x93b   : > { %v2008_v26 = vpop.xlane.xlu1 %2007 }
 0x943   : > { %v1929_v28 = vpop.xlane.xlu0 %1928 }
 0x944   : > { %v2011_v25 = vpop.xlane.xlu2 %2010 }
 0x945   : > { %3020 = vrcp.f32 %v2011_v25 }
 0x946   : > { %3022 = vrcp.f32 %v2008_v26 }
 0x947   : > { %3024 = vrcp.f32 %v1929_v28 }
 0x948   : > { %3026 = vrcp.f32 %v1926_v23 }
 0x94b   : > { %v3021_v29 = vpop.eup %3020 }
 0x94c   : > { %v3023_v31 = vpop.eup %3022  ;;  %v2015_v32 = vmul.f32 %v3021_v29, %v3019_v19  ;;  %v2018_v34 = vpop.permute.xlu2 %2017 }
 0x94d   : > { %v3025_v2 = vpop.eup %3024  ;;  %v2014_v4 = vmul.f32 %v3023_v31, %v3015_v13 }
 0x94e   : > { %v3027_v63 = vpop.eup %3026  ;;  %v1933_v35 = vmul.f32 %v3025_v2, %v3017_v17 }
 0x94f   : > { %v2016_v36 = vpack.c.bf16 %v2015_v32, %v2014_v4  ;;  %v1932_v37 = vmul.f32 %v3027_v63, %v3013_v0 }
 0x951   : > { %v1934_v39 = vpack.c.bf16 %v1933_v35, %v1932_v37 }
 0x953   : > { %v2020_v30 = vpop.permute.xlu1 %2019 }
 0x954   : > { %2032 = vmatpush.bf16.msrb.mxu2 %v2020_v30 }
 0x956   : > { %v1940_v33 = vpop.permute.xlu0 %1939 }
 0x957   : > { %1952 = vmatpush.bf16.msra.mxu0 %v1940_v33 }
 0x958   : > { %2033 = vmatpush.bf16.msrb.mxu2 %v2018_v34 }
 0x95b   : > { %2760 = vmatmul.msk.bf16.vlgmr.msrb.gmra.mxu2 %vm1426_vm1, %v2016_v36  ;;  %v1938_v38 = vpop.permute.xlu1 %1937  ;;  %v2983_v36 = vld [vmem:[%s4301_s2] ss:$0 sm:$0xff] }
 0x95c   : > { %1953 = vmatpush.bf16.msra.mxu0 %v1938_v38 }
 0x95f   : > { %2758 = vmatmul.msk.bf16.vlgmr.msra.gmra.mxu0 %vm1426_vm1, %v1934_v39 }
 0x960   : > { %2080 = vmatpush.bf16.msrb.mxu0 %v2819_v40 }
 0x964   : > { %2081 = vmatpush.bf16.msrb.mxu0 %v2818_v44  ;;  %v2824_v44 = vld [vmem:[%s3936_s25 + $0x10] sm:$0xff] }
 0x9dc   : > { %v1955_v45 = vpop.f32.mrf.mxu0 }
 0x9de   : > { %v2035_v41 = vpop.f32.mrf.mxu2 }
 0x9e4   : > { %v1957_v49 = vpop.f32.mrf.mxu0 }
 0x9e6   : > { %v2037_v42 = vpop.f32.mrf.mxu2 }
 0x9e7   : > { %v2968_v43 = vpack.i.bf16 %v2037_v42, %v2035_v41 }
 0x9e9   : > { %2969 = vrot.lane.b32.xlu2 %v2968_v43, %s3495_s8  ;;  %v2825_v43 = vld [vmem:[%s3936_s25 + $0x18] sm:$0xff] }
 0x9ea   : > { %2249 = vmatpush.bf16.msra.mxu3 %v2825_v43 }
 0x9ee   : > { %2250 = vmatpush.bf16.msra.mxu3 %v2824_v44 }
 0xa43   : > { %v2970_v46 = vpop.permute.xlu2 %2969 }
 0xa44   : > { %v2972_v47 = vunpack.i.h.bf16 %v2970_v46  ;;  %v2971_v48 = vunpack.i.l.bf16 %v2970_v46  ;;  %v2984_v46 = vld [vmem:[%s4302_s22] ss:$0 sm:$0xff] }
 0xa46   : > { %v2048_v50 = vsel %vm1532_vm9, %v1955_v45, %v2971_v48  ;;  %v2049_v51 = vsel %vm1532_vm9, %v1957_v49, %v2972_v47  ;;  %v2823_v45 = vld [vmem:[%s3936_s25 + $0x8] sm:$0xff]  ;;  %v2822_v48 = vld [vmem:[%s3936_s25] sm:$0xff]  ;;  %vm2241_vm9 = vcmask 523264   ;;  %s4303_s25 = scalar_lea.vmem [#allocation20], %s3820_s6 }
 0xa47   : > { %v2055_v52 = vpack.c.bf16 %v2049_v51, %v2048_v50  ;;  %2251 = vmatpush.bf16.msra.mxu3 %v2823_v45 }
 0xa49   : > { %2769 = vmatmul.msk.bf16.vlgmr.msrb.gmra.mxu0 %vm1426_vm1, %v2055_v52 }
 0xa4b   : > { %2252 = vmatpush.bf16.msra.mxu3 %v2822_v48 }
 0xac6   : > { %v2083_v54 = vpop.f32.mrf.mxu0 }
 0xac7   : > { %v2084_v55 = vadd.f32 %v2981_v53, %v2083_v54 }
 0xac9   : > { %v2088_v56 = vmul.f32 %v2084_v55, %v4015_v18 }
 0xacb   : > { %v4109_v57 = vadd.f32 %v2088_v56, %v4019_v21 }
 0xacd   : > { %v2094_v58 = vsel %vm1426_vm1, %v4109_v57, 0.0 }
 0xace   : > { %v2085_v3 = vpop.f32.mrf.mxu0  ;;  %2095 = vadd.xlane.f32.xlu1 %v2094_v58 }
 0xacf   : > { %v2086_v59 = vadd.f32 %v2981_v53, %v2085_v3 }
 0xad1   : > { %v2089_v60 = vmul.f32 %v2086_v59, %v4023_v24 }
 0xad3   : > { %v4115_v61 = vadd.f32 %v2089_v60, %v4027_v27 }
 0xad5   : > { %v2097_v62 = vsel %vm1426_vm1, %v4115_v61, 0.0 }
 0xad6   : > { %2098 = vadd.xlane.f32.xlu2 %v2097_v62 }
 0xb41   : > { %v2096_v0 = vpop.xlane.xlu1 %2095 }
 0xb42   : > { %v2100_v21 = vmul.f32 %v2096_v0, %v3952_v12 }
 0xb44   : > { %v2102_v1 = vsub.f32 %v4109_v57, %v2100_v21 }
 0xb46   : > { %v2104_v5 = vmul.f32 %v2102_v1, %v2102_v1 }
 0xb48   : > { %v2106_v6 = vsel %vm1426_vm1, %v2104_v5, 0.0 }
 0xb49   : > { %v2099_v7 = vpop.xlane.xlu2 %2098  ;;  %2107 = vadd.xlane.f32.xlu0 %v2106_v6 }
 0xb4a   : > { %v2101_v8 = vmul.f32 %v2099_v7, %v3952_v12 }
 0xb4c   : > { %v2103_v27 = vsub.f32 %v4115_v61, %v2101_v8 }
 0xb4e   : > { %v2105_v9 = vmul.f32 %v2103_v27, %v2103_v27 }
 0xb50   : > { %v2109_v10 = vsel %vm1426_vm1, %v2105_v9, 0.0 }
 0xb51   : > { %2110 = vadd.xlane.f32.xlu1 %v2109_v10  ;;  %v2985_v10 = vld [vmem:[%s4303_s25] ss:$0 sm:$0xff] }
 0xbbc   : > { %v2108_v13 = vpop.xlane.xlu0 %2107 }
 0xbbd   : > { %v2112_v14 = vmul.f32 %v2108_v13, %v3952_v12 }
 0xbbf   : > { %v2114_v15 = vadd.f32 1e-05, %v2112_v14 }
 0xbc1   : > { %3028 = vrsqrt.f32 %v2114_v15  ;;  %vm2122_vm4 = vweird.f32 %v2114_v15 }
 0xbc4   : > { %v2111_v17 = vpop.xlane.xlu1 %2110 }
 0xbc5   : > { %v2113_v19 = vmul.f32 %v2111_v17, %v3952_v12  ;;  %v2982_v12 = vld [vmem:[%s4300_s3] ss:$0 sm:$0xff] }
 0xbc7   : > { %v3029_v20 = vpop.eup %3028  ;;  %v2115_v22 = vadd.f32 1e-05, %v2113_v19 }
 0xbc8   : > { %v2117_v23 = vmul.f32 %v3029_v20, %v2114_v15  ;;  %vm2123_vm3 = vweird.f32 %v3029_v20 }
 0xbc9   : > { %3030 = vrsqrt.f32 %v2115_v22  ;;  %vm2124_vm5 = vmor %vm2122_vm4, %vm2123_vm3  ;;  %vm2132_vm7 = vweird.f32 %v2115_v22 }
 0xbca   : > { %v2118_v25 = vmul.f32 %v3029_v20, %v2117_v23 }
 0xbcc   : > { %v2119_v26 = vmul.f32 0.5, %v2118_v25 }
 0xbce   : > { %v2120_v28 = vsub.f32 1.5, %v2119_v26 }
 0xbcf   : > { %v3031_v29 = vpop.eup %3030 }
 0xbd0   : > { %v2121_v30 = vmul.f32 %v3029_v20, %v2120_v28  ;;  %v2127_v31 = vmul.f32 %v3031_v29, %v2115_v22  ;;  %vm2133_vm6 = vweird.f32 %v3031_v29 }
 0xbd1   : > { %vm2134_vm8 = vmor %vm2132_vm7, %vm2133_vm6 }
 0xbd2   : > { %v2128_v32 = vmul.f32 %v3031_v29, %v2127_v31  ;;  %v2125_v2 = vsel %vm2124_vm5, %v3029_v20, %v2121_v30 }
 0xbd3   : > { %v2136_v34 = vmul.f32 %v2125_v2, %v2102_v1 }
 0xbd4   : > { %v2129_v33 = vmul.f32 0.5, %v2128_v32 }
 0xbd5   : > { %v2141_v37 = vmul.f32 %v2982_v12, %v2136_v34 }
 0xbd6   : > { %v2130_v4 = vsub.f32 1.5, %v2129_v33 }
 0xbd7   : > { %v2146_v40 = vadd.f32 %v2983_v36, %v2141_v37 }
 0xbd8   : > { %v2131_v63 = vmul.f32 %v3031_v29, %v2130_v4 }
 0xbda   : > { %v2135_v35 = vsel %vm2134_vm8, %v3031_v29, %v2131_v63 }
 0xbdb   : > { %v2137_v38 = vmul.f32 %v2135_v35, %v2103_v27 }
 0xbdd   : > { %v2142_v39 = vmul.f32 %v2982_v12, %v2137_v38 }
 0xbdf   : > { %v2147_v41 = vadd.f32 %v2983_v36, %v2142_v39 }
 0xbe1   : > { %v2153_v42 = vpack.c.bf16 %v2147_v41, %v2146_v40 }
 0xbe3   : > { %2778 = vmatmul.msk.bf16.vlgmr.msrb.gmra.mxu1 %vm1426_vm1, %v2153_v42 }
 0xc60   : > { %v2181_v47 = vpop.f32.mrf.mxu1 }
 0xc61   : > { %v2182_v49 = vadd.f32 %v2984_v46, %v2181_v47 }
 0xc63   : > { %v2186_v50 = vmul.f32 %v2182_v49, %v2182_v49 }
 0xc65   : > { %v2188_v51 = vmul.f32 %v2186_v50, %v2182_v49 }
 0xc67   : > { %v2190_v52 = vmul.f32 0.044715, %v2188_v51 }
 0xc68   : > { %v2183_v53 = vpop.f32.mrf.mxu1 }
 0xc69   : > { %v2192_v54 = vadd.f32 %v2190_v52, %v2182_v49  ;;  %v2184_v55 = vadd.f32 %v2984_v46, %v2183_v53 }
 0xc6b   : > { %v2194_v56 = vmul.f32 0.7978846, %v2192_v54  ;;  %v2187_v58 = vmul.f32 %v2184_v55, %v2184_v55 }
 0xc6d   : > { %v2189_v3 = vmul.f32 %v2187_v58, %v2184_v55  ;;  %3032 = vtanh.f32 %v2194_v56 }
 0xc6f   : > { %v2191_v59 = vmul.f32 0.044715, %v2189_v3 }
 0xc71   : > { %v2193_v60 = vadd.f32 %v2191_v59, %v2184_v55 }
 0xc73   : > { %v2195_v62 = vmul.f32 0.7978846, %v2193_v60  ;;  %v3033_v0 = vpop.eup %3032 }
 0xc74   : > { %v2198_v21 = vadd.f32 1.0, %v3033_v0 }
 0xc75   : > { %3034 = vtanh.f32 %v2195_v62 }
 0xc76   : > { %v2200_v5 = vmul.f32 0.5, %v2198_v21 }
 0xc78   : > { %v2202_v8 = vmul.f32 %v2200_v5, %v2182_v49 }
 0xc7b   : > { %v3035_v1 = vpop.eup %3034 }
 0xc7c   : > { %v2199_v6 = vadd.f32 1.0, %v3035_v1 }
 0xc7e   : > { %v2201_v7 = vmul.f32 0.5, %v2199_v6 }
 0xc80   : > { %v2203_v27 = vmul.f32 %v2201_v7, %v2184_v55 }
 0xc82   : > { %v2213_v9 = vpack.c.bf16 %v2203_v27, %v2202_v8 }
 0xc84   : > { %2795 = vmatmul.msk.bf16.vlgmr.msra.gmra.mxu3 %vm2241_vm9, %v2213_v9 }
 0xd07   : > { %v2254_v11 = vpop.f32.mrf.mxu3 }
 0xd08   : > { %v2255_v13 = vadd.f32 %v2985_v10, %v2254_v11 }
 0xd0a   : > { %v2259_v14 = vmul.f32 %v2255_v13, %v4015_v18 }
 0xd0c   : > { %v2261_v15 = vadd.f32 %v2259_v14, %v4109_v57 }
 0xd0e   : > { %v2263_v16 = vmul.f32 %v2261_v15, %v4015_v18 }
 0xd0f   : > { %v2256_v17 = vpop.f32.mrf.mxu3 }
 0xd10   : > { %2265 = vst.msk [vmem:[#allocation2] sm:$0xff] %vm1426_vm1, %v2263_v16  ;;  %v2257_v19 = vadd.f32 %v2985_v10, %v2256_v17 }
 0xd12   : > { %v2260_v20 = vmul.f32 %v2257_v19, %v4023_v24 }
 0xd14   : > { %v2262_v22 = vadd.f32 %v2260_v20, %v4115_v61  ;;  %2270 = sbr.rel (%p2796_p3) target bundleno = 3355 (0xd1b), region = 176 }
 0xd16   : > { %v2264_v23 = vmul.f32 %v2262_v22, %v4023_v24 }
 0xd18   : > { %2266 = vst.msk [vmem:[#allocation2 + $0x8] sm:$0xff] %vm1426_vm1, %v2264_v23 }
 0xd19   : > { %2271 = vst.msk [vmem:[%s3941_s28] sm:$0xff] %vm1426_vm1, %v2263_v16 }
 0xd1a   : > { %2272 = vst.msk [vmem:[%s3941_s28 + $0x8] sm:$0xff] %vm1426_vm1, %v2264_v23 }
 0xd1b PF: > { %s4304_s6 = sld [smem:[#allocation33_spill]] }
 0xd1c   : > { %s4305_s29 = sld [smem:[#allocation29_spill]] }
 0xd1d   : > { %s4306_s2 = sld [smem:[#allocation30_spill]] }
 0xd1e   : > { %s4308_s30 = sld [smem:[#allocation31_spill]] }
 0xd1f   : > { %s4309_s7 = sld [smem:[#allocation32_spill]] }
 0xd20   : > { %s4310_s3 = sld [smem:[#allocation34_spill]] }
 0xd21   : > { %s56_s1 = sadd.s32 1, %s4304_s6   ;;  %s4307_s6 = sld [smem:[#allocation36_spill]] }
 0xd22   : > { %p53_p4 = scmp.ge.s32.totalorder %s56_s1, 6   ;;  %s4311_s26 = sld [smem:[#allocation35_spill]] }
 0xd24   :  { %55 = sbr.rel (!%p53_p4) target bundleno = 44 (0x2c), region = 340 }
 0xd29   :  { %2294 = vsyncpa [#allocation4], 1 }
 0xd2a   :  { %2296 = vsyncpa [#allocation4 + $0x1], 1 }
 0xd2b   :  { %2297 = vsyncpa [#allocation6], 1 }
 0xd2c   :  { %2299 = vsyncpa [#allocation6 + $0x1], 1 }
 0xd2d   :  { %2300 = vsyncpa [#allocation9], 1 }
 0xd2e   :  { %2302 = vsyncpa [#allocation9 + $0x1], 1 }
 0xd2f   :  { %2303 = vsyncpa [#allocation12], 1 }
 0xd30   :  { %2305 = vsyncpa [#allocation12 + $0x1], 1 }
 0xd31   :  { %2306 = vsyncpa [#allocation15], 1 }
 0xd32   :  { %2308 = vsyncpa [#allocation15 + $0x1], 1 }
 0xd33   :  { %2309 = vsyncpa [#allocation18], 1 }
 0xd34   :  { %2311 = vsyncpa [#allocation18 + $0x1], 1 }
 0xd35   :  { %2312 = vsyncpa [#allocation21], 1 }
 0xd36   :  { %2314 = vsyncpa [#allocation21 + $0x1], 1 }

// kernel: synthesizer_forward.18
= control target key start
LH: loop header
LB: loop body
LE: loop exit
PB: predicated region body
PF: predicated region fallthrough
CT: control target
= control target key end

     0   :  { %8 = vsyncpa [#allocation4], 0  ;;  %s129_s15 = smov [#allocation3]   ;;  %s169_s0 = inlined_call_operand.vmem [shape: f32[2,32], index: 0, kind: input, shape index: {}]   ;;  %s170_s1 = inlined_call_operand.vmem [shape: bf16[32,32], index: 1, kind: input, shape index: {}]   ;;  %s171_s2 = inlined_call_operand.hbm [shape: f32[1,32], index: 2, kind: input, shape index: {}]   ;;  %s172_s3 = inlined_call_operand.vmem [shape: f32[2,32], index: 3, kind: output, shape index: {}]  }
   0x1   :  { %s18_s14 = sshll.u32 %s171_s2, 4  ;;  %s20_s16 = sshll.u32 %s129_s15, 4  ;;  %s19_s14 = int_to_ptr.hbm [resolvable:$true] %s18_s14  ;;  %s21_s16 = int_to_ptr.vmem [resolvable:$true] %s20_s16 }
   0x2   :  { %23 = dma.hbm_to_vmem [thread:$0]  %s19_s14, 16, %s21_s16, [#allocation4]  }
   0x3   :  { %127 = dma.done.wait [#allocation4], 16  }
   0x4   :  { %128 = vsyncadd [#allocation4], 4294967280  ;;  %vm33_vm0 = vcmask 254976   ;;  %v130_v0 = vmov 0.0   ;;  %v99_v1 = vld [vmem:[%s170_s1 + $0x8] sm:$0xff]  ;;  %v98_v2 = vld [vmem:[%s170_s1] sm:$0xff] }
   0x5   :  { %34 = vst.msk [vmem:[#allocation2] sm:$0x3] %vm33_vm0, %v130_v0  ;;  %64 = vmatpush.bf16.msra.mxu0 %v99_v1  ;;  %v36_v3 = vld [vmem:[%s169_s0] sm:$0x3]  ;;  %vm54_vm1 = vcmask 261120  }
   0x6   :  { %v37_v4 = vpack.c.bf16 %v36_v3, %v36_v3  ;;  %v102_v8 = vld [vmem:[#allocation3] ss:$0 sm:$0xff] }
   0x9   :  { %65 = vmatpush.bf16.msra.mxu0 %v98_v2 }
   0xc   :  { %97 = vmatmul.msk.bf16.vlgmr.msra.gmra.mxu0 %vm54_vm1, %v37_v4  ;;  %v35_v5 = vld [vmem:[#allocation2] sm:$0x3] }
  0x89   :  { %v67_v6 = vpop.f32.mrf.mxu0 }
  0x8a   :  { %v71_v7 = vadd.f32 %v67_v6, %v35_v5 }
  0x8c   :  { %73 = vst.msk [vmem:[#allocation2] sm:$0x3] %vm33_vm0, %v71_v7 }
  0x91   :  { %v69_v9 = vpop.f32.mrf.mxu0 }
  0x93   :  { %v77_v10 = vld [vmem:[#allocation2] sm:$0x3] }
  0x94   :  { %v82_v11 = vadd.f32 %v102_v8, %v77_v10 }
  0x96   :  { %83 = vst.msk [vmem:[%s172_s3] sm:$0x3] %vm33_vm0, %v82_v11 }
  0x97   :  { %88 = vsyncpa [#allocation4], 1 }

// kernel: synthesizer_forward.21
= control target key start
LH: loop header
LB: loop body
LE: loop exit
PB: predicated region body
PF: predicated region fallthrough
CT: control target
= control target key end

     0   :  { %vm19_vm0 = vcmask 130048   ;;  %v124_v1 = vmov 0.0   ;;  %vm50_vm1 = vcmask 261120   ;;  %s190_s1 = inlined_call_operand.vmem [shape: bf16[32,16], index: 1, kind: input, shape index: {}]   ;;  %s191_s0 = inlined_call_operand.vmem [shape: f32[32,32], index: 0, kind: input, shape index: {}]   ;;  %s192_s2 = inlined_call_operand.vmem [shape: f32[1,16], index: 2, kind: input, shape index: {}]   ;;  %s193_s3 = inlined_call_operand.vmem [shape: f32[32,16], index: 3, kind: output, shape index: {}]  }
   0x1   :  { %v119_v0 = vld [vmem:[%s190_s1 + $0x8] sm:$0xff]  ;;  %20 = vst.msk [vmem:[#allocation2] sm:$0xff] %vm19_vm0, %v124_v1  ;;  %v118_v2 = vld [vmem:[%s190_s1] sm:$0xff]  ;;  %v30_v5 = vld [vmem:[%s191_s0 + $0x10] sm:$0xff] }
   0x2   :  { %v28_v3 = vld [vmem:[%s191_s0] sm:$0xff]  ;;  %v29_v4 = vld [vmem:[%s191_s0 + $0x8] sm:$0xff]  ;;  %21 = vst.msk [vmem:[#allocation2 + $0x8] sm:$0xff] %vm19_vm0, %v124_v1  ;;  %63 = vmatpush.bf16.msra.mxu0 %v119_v0  ;;  %120 = vmatpush.bf16.msra.mxu1 %v119_v0  ;;  %v31_v6 = vld [vmem:[%s191_s0 + $0x18] sm:$0xff] }
   0x3   :  { %22 = vst.msk [vmem:[#allocation2 + $0x10] sm:$0xff] %vm19_vm0, %v124_v1  ;;  %v32_v7 = vpack.c.bf16 %v29_v4, %v28_v3  ;;  %v33_v8 = vpack.c.bf16 %v31_v6, %v30_v5  ;;  %v123_v17 = vld [vmem:[%s192_s2] ss:$0 sm:$0xff] }
   0x4   :  { %23 = vst.msk [vmem:[#allocation2 + $0x18] sm:$0xff] %vm19_vm0, %v124_v1 }
   0x6   :  { %64 = vmatpush.bf16.msra.mxu0 %v118_v2  ;;  %121 = vmatpush.bf16.msra.mxu1 %v118_v2 }
   0x8   :  { %v24_v9 = vld [vmem:[#allocation2] sm:$0xff] }
   0x9   :  { %116 = vmatmul.msk.bf16.vlgmr.msra.gmra.mxu0 %vm50_vm1, %v32_v7  ;;  %117 = vmatmul.msk.bf16.vlgmr.msra.gmra.mxu1 %vm50_vm1, %v33_v8  ;;  %v25_v15 = vld [vmem:[#allocation2 + $0x8] sm:$0xff] }
   0xa   :  { %v26_v10 = vld [vmem:[#allocation2 + $0x10] sm:$0xff] }
   0xb   :  { %v27_v16 = vld [vmem:[#allocation2 + $0x18] sm:$0xff] }
  0x86   :  { %v66_v11 = vpop.f32.mrf.mxu0  ;;  %v71_v12 = vpop.f32.mrf.mxu1 }
  0x87   :  { %v76_v13 = vadd.f32 %v66_v11, %v24_v9  ;;  %v78_v14 = vadd.f32 %v71_v12, %v26_v10 }
  0x89   :  { %81 = vst.msk [vmem:[#allocation2] sm:$0xff] %vm19_vm0, %v76_v13 }
  0x8a   :  { %83 = vst.msk [vmem:[#allocation2 + $0x10] sm:$0xff] %vm19_vm0, %v78_v14 }
  0x8e   :  { %v68_v18 = vpop.f32.mrf.mxu0  ;;  %v73_v19 = vpop.f32.mrf.mxu1 }
  0x8f   :  { %v77_v20 = vadd.f32 %v68_v18, %v25_v15  ;;  %v79_v21 = vadd.f32 %v73_v19, %v27_v16 }
  0x90   :  { %v88_v22 = vld [vmem:[#allocation2] sm:$0xff] }
  0x91   :  { %v96_v23 = vadd.f32 %v123_v17, %v88_v22  ;;  %v90_v24 = vld [vmem:[#allocation2 + $0x10] sm:$0xff]  ;;  %82 = vst.msk [vmem:[#allocation2 + $0x8] sm:$0xff] %vm19_vm0, %v77_v20 }
  0x92   :  { %v98_v25 = vadd.f32 %v123_v17, %v90_v24  ;;  %84 = vst.msk [vmem:[#allocation2 + $0x18] sm:$0xff] %vm19_vm0, %v79_v21 }
  0x93   :  { %100 = vst.msk [vmem:[%s193_s3] sm:$0xff] %vm19_vm0, %v96_v23 }
  0x94   :  { %102 = vst.msk [vmem:[%s193_s3 + $0x10] sm:$0xff] %vm19_vm0, %v98_v25 }
  0x98   :  { %v89_v26 = vld [vmem:[#allocation2 + $0x8] sm:$0xff] }
  0x99   :  { %v97_v27 = vadd.f32 %v123_v17, %v89_v26  ;;  %v91_v28 = vld [vmem:[#allocation2 + $0x18] sm:$0xff] }
  0x9a   :  { %v99_v29 = vadd.f32 %v123_v17, %v91_v28 }
  0x9b   :  { %101 = vst.msk [vmem:[%s193_s3 + $0x8] sm:$0xff] %vm19_vm0, %v97_v27 }
  0x9c   :  { %103 = vst.msk [vmem:[%s193_s3 + $0x18] sm:$0xff] %vm19_vm0, %v99_v29 }

// kernel: synthesizer_forward.22
= control target key start
LH: loop header
LB: loop body
LE: loop exit
PB: predicated region body
PF: predicated region fallthrough
CT: control target
= control target key end

     0   :  { %s159_s0 = inlined_call_operand.vmem [shape: f32[32,16], index: 0, kind: input, shape index: {}]   ;;  %s160_s1 = inlined_call_operand.vmem [shape: f32[32,16], index: 1, kind: input, shape index: {}]   ;;  %s161_s2 = inlined_call_operand.vmem [shape: f32[32,16], index: 2, kind: input, shape index: {}]   ;;  %s162_s3 = inlined_call_operand.hbm [shape: f32[1], index: 3, kind: output, shape index: {}]  }
   0x1   :  { %v21_v0 = vld [vmem:[%s159_s0] sm:$0xff]  ;;  %v22_v1 = vld [vmem:[%s159_s0 + $0x8] sm:$0xff]  ;;  %v23_v2 = vld [vmem:[%s159_s0 + $0x10] sm:$0xff] }
   0x2   :  { %v24_v3 = vld [vmem:[%s159_s0 + $0x18] sm:$0xff]  ;;  %v25_v4 = vld [vmem:[%s160_s1] sm:$0xff]  ;;  %v26_v5 = vld [vmem:[%s160_s1 + $0x8] sm:$0xff] }
   0x3   :  { %v27_v6 = vld [vmem:[%s160_s1 + $0x10] sm:$0xff]  ;;  %v28_v7 = vld [vmem:[%s160_s1 + $0x18] sm:$0xff]  ;;  %v29_v8 = vsub.f32 %v21_v0, %v25_v4  ;;  %v30_v9 = vsub.f32 %v22_v1, %v26_v5  ;;  %v33_v10 = vld [vmem:[%s161_s2] sm:$0xff] }
   0x4   :  { %v31_v11 = vsub.f32 %v23_v2, %v27_v6  ;;  %v32_v12 = vsub.f32 %v24_v3, %v28_v7  ;;  %v34_v13 = vld [vmem:[%s161_s2 + $0x8] sm:$0xff]  ;;  %v35_v14 = vld [vmem:[%s161_s2 + $0x10] sm:$0xff]  ;;  %v36_v15 = vld [vmem:[%s161_s2 + $0x18] sm:$0xff] }
   0x5   :  { %v37_v16 = vmul.f32 %v33_v10, %v29_v8  ;;  %v38_v17 = vmul.f32 %v34_v13, %v30_v9 }
   0x6   :  { %8 = vsyncpa [#allocation3], 0  ;;  %v39_v18 = vmul.f32 %v35_v14, %v31_v11  ;;  %v40_v19 = vmul.f32 %v36_v15, %v32_v12  ;;  %vm46_vm0 = vcmask 130048   ;;  %s71_s8 = sshll.u32 %s162_s3, 4  ;;  %s99_s10 = smov [#allocation2]   ;;  %s72_s8 = int_to_ptr.hbm [resolvable:$true] %s71_s8 }
   0x7   :  { %v42_v20 = vmul.f32 %v37_v16, %v37_v16  ;;  %v43_v21 = vmul.f32 %v38_v17, %v38_v17 }
   0x8   :  { %v44_v22 = vmul.f32 %v39_v18, %v39_v18  ;;  %v45_v23 = vmul.f32 %v40_v19, %v40_v19 }
   0x9   :  { %v47_v24 = vsel %vm46_vm0, %v42_v20, 0.0  ;;  %v48_v25 = vsel %vm46_vm0, %v43_v21, 0.0 }
   0xa   :  { %v49_v26 = vadd.f32 %v48_v25, %v47_v24  ;;  %v50_v27 = vsel %vm46_vm0, %v44_v22, 0.0  ;;  %v52_v28 = vsel %vm46_vm0, %v45_v23, 0.0 }
   0xc   :  { %v51_v29 = vadd.f32 %v50_v27, %v49_v26 }
   0xe   :  { %v53_v30 = vadd.f32 %v52_v28, %v51_v29 }
  0x10   :  { %54 = vadd.xlane.f32.xlu0 %v53_v30 }
  0x83   :  { %v55_v31 = vpop.xlane.xlu0 %54 }
  0x84   :  { %v56_v32 = vrot.slane %v55_v31, 4 }
  0x86   :  { %v57_v33 = vadd.f32 %v56_v32, %v55_v31 }
  0x88   :  { %v58_v34 = vrot.slane %v57_v33, 2 }
  0x8a   :  { %v59_v35 = vadd.f32 %v58_v34, %v57_v33 }
  0x8c   :  { %v60_v36 = vrot.slane %v59_v35, 1 }
  0x8e   :  { %v61_v37 = vadd.f32 %v60_v36, %v59_v35 }
  0x90   :  { %81 = vpush %v61_v37 }
  0xc1   :  { %s82_s9 = spop %81 }
  0xc2   :  { %65 = sst [smem:[#allocation2]] %s82_s9 }
  0xc3   :  { %74 = dma.smem_to_hbm %s99_s10, 16, %s72_s8, [#allocation3]  }
  0xc4   :  { %97 = dma.done.wait [#allocation3], 16  }
  0xc5   :  { %98 = vsyncadd [#allocation3], 4294967280 }
  0xc6   :  { %79 = sfence }
  0xc7   :  { %80 = vsyncpa [#allocation3], 1 }

// kernel: synthesizer_forward.20
= control target key start
LH: loop header
LB: loop body
LE: loop exit
PB: predicated region body
PF: predicated region fallthrough
CT: control target
= control target key end

     0   :  { %s3667_s0 = inlined_call_operand.vmem [shape: f32[2,16,32], index: 0, kind: input, shape index: {}]   ;;  %s3668_s1 = inlined_call_operand.vmem [shape: f32[2,32,32], index: 1, kind: input, shape index: {}]   ;;  %s3669_s2 = inlined_call_operand.vmem [shape: f32[2,16,1], index: 2, kind: input, shape index: {}]   ;;  %s3670_s3 = inlined_call_operand.vmem [shape: f32[2,1,16], index: 3, kind: input, shape index: {}]   ;;  %s3671_s4 = inlined_call_operand.vmem [shape: f32[2,1,32], index: 4, kind: input, shape index: {}]   ;;  %s3672_s5 = inlined_call_operand.vmem [shape: f32[8,1,32], index: 5, kind: input, shape index: {}]   ;;  %s3673_s6 = inlined_call_operand.vmem [shape: f32[8,1,32], index: 6, kind: input, shape index: {}]   ;;  %s3674_s7 = inlined_call_operand.vmem [shape: bf16[8,32,96], index: 7, kind: input, shape index: {}]   ;;  %s3675_s8 = inlined_call_operand.vmem [shape: f32[8,1,96], index: 8, kind: input, shape index: {}]   ;;  %s3676_s9 = inlined_call_operand.vmem [shape: bf16[8,32,32], index: 9, kind: input, shape index: {}]   ;;  %s3677_s10 = inlined_call_operand.vmem [shape: f32[8,1,32], index: 10, kind: input, shape index: {}]   ;;  %s3678_s11 = inlined_call_operand.vmem [shape: f32[8,1,32], index: 11, kind: input, shape index: {}]   ;;  %s3679_s12 = inlined_call_operand.vmem [shape: f32[8,1,32], index: 12, kind: input, shape index: {}]   ;;  %s3680_s13 = inlined_call_operand.vmem [shape: bf16[8,32,32], index: 13, kind: input, shape index: {}]   ;;  %s3681_s14 = inlined_call_operand.vmem [shape: f32[8,1,32], index: 14, kind: input, shape index: {}]   ;;  %s3682_s15 = inlined_call_operand.vmem [shape: bf16[8,32,64], index: 15, kind: input, shape index: {}]   ;;  %s3683_s16 = inlined_call_operand.vmem [shape: f32[8,1,64], index: 16, kind: input, shape index: {}]   ;;  %s3684_s17 = inlined_call_operand.vmem [shape: bf16[8,32,32], index: 17, kind: input, shape index: {}]   ;;  %s3685_s18 = inlined_call_operand.hbm [shape: f32[8,1,32], index: 18, kind: input, shape index: {}]   ;;  %s3686_s19 = inlined_call_operand.hbm [shape: f32[8,1,32], index: 19, kind: input, shape index: {}]   ;;  %s3687_s20 = inlined_call_operand.hbm [shape: f32[8,1,32], index: 20, kind: input, shape index: {}]   ;;  %s3688_s21 = inlined_call_operand.vmem [shape: bf16[8,32,64], index: 21, kind: input, shape index: {}]   ;;  %s3689_s22 = inlined_call_operand.hbm [shape: f32[8,1,64], index: 22, kind: input, shape index: {}]   ;;  %s3690_s23 = inlined_call_operand.vmem [shape: bf16[8,64,32], index: 23, kind: input, shape index: {}]   ;;  %s3691_s24 = inlined_call_operand.hbm [shape: f32[8,1,32], index: 24, kind: input, shape index: {}]   ;;  %s3692_s25 = inlined_call_operand.vmem [shape: f32[2,16,32], index: 25, kind: output, shape index: {}]  }
   0x1   :  { %3702 = sst [smem:[#allocation24_spill]] %s3667_s0 }
   0x2   :  { %3703 = sst [smem:[#allocation25_spill]] %s3668_s1 }
   0x3   :  { %3704 = sst [smem:[#allocation26_spill]] %s3669_s2 }
   0x4   :  { %3705 = sst [smem:[#allocation27_spill]] %s3670_s3 }
   0x5   :  { %3706 = sst [smem:[#allocation28_spill]] %s3671_s4 }
   0x6   :  { %3707 = sst [smem:[#allocation29_spill]] %s3672_s5 }
   0x7   :  { %3708 = sst [smem:[#allocation30_spill]] %s3673_s6 }
   0x8   :  { %3709 = sst [smem:[#allocation31_spill]] %s3674_s7 }
   0x9   :  { %3710 = sst [smem:[#allocation32_spill]] %s3675_s8 }
   0xa   :  { %3711 = sst [smem:[#allocation33_spill]] %s3676_s9 }
   0xb   :  { %3712 = sst [smem:[#allocation34_spill]] %s3678_s11 }
   0xc   :  { %3713 = sst [smem:[#allocation35_spill]] %s3679_s12 }
   0xd   :  { %3714 = sst [smem:[#allocation36_spill]] %s3680_s13 }
   0xe   :  { %3715 = sst [smem:[#allocation37_spill]] %s3681_s14 }
   0xf   :  { %3716 = sst [smem:[#allocation38_spill]] %s3682_s15 }
  0x10   :  { %3717 = sst [smem:[#allocation39_spill]] %s3683_s16 }
  0x11   :  { %3718 = sst [smem:[#allocation40_spill]] %s3684_s17 }
  0x12   :  { %3719 = sst [smem:[#allocation41_spill]] %s3685_s18 }
  0x13   :  { %3720 = sst [smem:[#allocation42_spill]] %s3686_s19 }
  0x14   :  { %3721 = sst [smem:[#allocation43_spill]] %s3687_s20 }
  0x15   :  { %3722 = sst [smem:[#allocation44_spill]] %s3688_s21 }
  0x16   :  { %3723 = sst [smem:[#allocation45_spill]] %s3689_s22 }
  0x17   :  { %3724 = sst [smem:[#allocation46_spill]] %s3690_s23 }
  0x18   :  { %3725 = sst [smem:[#allocation47_spill]] %s3691_s24 }
  0x19   :  { %3726 = sst [smem:[#allocation48_spill]] %s3692_s25 }
  0x1a   :  { %30 = vsyncpa [#allocation4], 0 }
  0x1b   :  { %32 = vsyncpa [#allocation4 + $0x1], 0 }
  0x1c   :  { %33 = vsyncpa [#allocation6], 0 }
  0x1d   :  { %35 = vsyncpa [#allocation6 + $0x1], 0 }
  0x1e   :  { %36 = vsyncpa [#allocation9], 0 }
  0x1f   :  { %38 = vsyncpa [#allocation9 + $0x1], 0  ;;  %s3167_s29 = smov 0   ;;  %s3169_s2 = smov 0  }
  0x20   :  { %s3171_s6 = smov 0   ;;  %s3173_s30 = smov 0  }
  0x21   :  { %s3175_s7 = smov 0   ;;  %s3177_s3 = smov 0  }
  0x22   :  { %s3179_s26 = smov 0   ;;  %s3181_s1 = smov 0  }
  0x23 LB: > { %3727 = sst [smem:[#allocation14_spill]] %s3002_s2  ;;  %s3694_s8 = sadd.s32 4294967295, %s3026_s1   ;;  %s3026_s1 = sphi %s3181_s1, %s44_s1   ;;  %s3022_s26 = sphi %s3179_s26, %s3797_s26   ;;  %s3018_s3 = sphi %s3177_s3, %s3796_s3   ;;  %s3014_s7 = sphi %s3175_s7, %s3795_s7   ;;  %s3010_s30 = sphi %s3173_s30, %s3794_s30   ;;  %s3006_s6 = sphi %s3171_s6, %s3793_s6   ;;  %s3002_s2 = sphi %s3169_s2, %s3792_s2   ;;  %s2998_s29 = sphi %s3167_s29, %s3791_s29  }
  0x24   : > { %3728 = sst [smem:[#allocation15_spill]] %s3006_s6  ;;  %s53_s27 = sadd.s32 1, %s3018_s3 }
  0x25   : > { %3729 = sst [smem:[#allocation16_spill]] %s3018_s3  ;;  %p54_p0 = scmp.ge.s32.totalorder %s53_s27, 8 }
  0x26   : > { %3730 = sst [smem:[#allocation17_spill]] %s3022_s26  ;;  %s56_s4 = sadd.s32 1, %s3022_s26 }
  0x27   : > { %3731 = sst [smem:[#allocation18_spill]] %s3026_s1  ;;  %s531_s28 = sadd.s32 1, %s3006_s6 }
  0x28   : > { %p538_p1 = scmp.ne.s32.totalorder %s3006_s6, %s3002_s2  ;;  %s3799_s27 = smov (%p54_p0, %s53_s27), 0 }
  0x29   : > { %3732 = sst [smem:[#allocation19_spill]] %s3799_s27  ;;  %s3801_s4 = smov (!%p54_p0, %s56_s4), %s3022_s26 }
  0x2a   : > { %s528_s9 = ssub.s32 %s3018_s3, %s3799_s27  ;;  %p539_p2 = scmp.eq.s32.totalorder %s3026_s1, 0 }
  0x2b   : > { %p58_p3 = scmp.ge.s32.totalorder %s3801_s4, 2  ;;  %p529_p4 = scmp.eq.s32.totalorder %s528_s9, 0 }
  0x2c   : > { %p540_p5 = por %p539_p2, %p538_p1  ;;  %p544_p6 = scmp.ne.s32.totalorder %s3002_s2, %s2998_s29 }
  0x2d   : > { %s3803_s4 = smov (%p58_p3, %s3801_s4), 0  ;;  %p545_p7 = scmp.eq.s32.totalorder %s3694_s8, 0 }
  0x2e   : > { %3733 = sst [smem:[#allocation20_spill]] %s3803_s4  ;;  %p2653_p8 = scmp.lt.s32.totalorder %s3026_s1, 16 }
  0x2f   : > { %s3221_s5 = scalar_select %p529_p4, %s3006_s6, %s531_s28  }
  0x30   : > { %s3227_s0 = sand.u32 1, %s3006_s6   ;;  %p3229_p9 = por %p545_p7, %p544_p6 }
  0x31   : > { %3734 = sst [smem:[#allocation21_spill]] %s3221_s5  ;;  %s891_s9 = sand.u32 1, %s3026_s1  }
  0x32   : > { %p3234_p10 = pnand %p2653_p8, %p540_p5  ;;  %s3737_s19 = sld [smem:[#allocation42_spill]] }
  0x33   : > { %s894_s5 = scalar_lea.vmem [#allocation5], %s3227_s0  ;;  %p2493_p11 = scmp.ge.s32.totalorder %s3026_s1, 1 }
  0x34   : > { %s901_s6 = sshll.u32 %s894_s5, 4  ;;  %s892_s23 = scalar_lea.sflag [#allocation6], %s891_s9  ;;  %s902_s6 = int_to_ptr.vmem [resolvable:$true] %s901_s6 }
  0x35   : > { %p973_p12 = scmp.lt.s32.totalorder %s3026_s1, 17  ;;  %s3738_s22 = sld [smem:[#allocation45_spill]] }
  0x36   : > { %s936_s5 = scalar_lea.vmem [#allocation8], %s3227_s0  ;;  %s934_s17 = scalar_lea.sflag [#allocation9], %s891_s9 }
  0x37   : > { %p3251_p13 = pnand %p2493_p11, %p973_p12  ;;  %s3740_s18 = sld [smem:[#allocation41_spill]] }
  0x38   : > { %s897_s8 = scalar_lea.hbm %s3737_s19, %s3018_s3  ;;  %s943_s19 = sshll.u32 %s936_s5, 4  ;;  %s944_s19 = int_to_ptr.vmem [resolvable:$true] %s943_s19 }
  0x39   : > { %s899_s26 = sshll.u32 %s897_s8, 4  ;;  %s3741_s20 = sld [smem:[#allocation43_spill]]  ;;  %s900_s26 = int_to_ptr.hbm [resolvable:$true] %s899_s26 }
  0x3a   : > { %2643 = dma.hbm_to_vmem [thread:$0]  (!%p3234_p10), %s900_s26, 16, %s902_s6, %s892_s23  }
  0x3b   : > { %s939_s4 = scalar_lea.hbm %s3738_s22, %s3018_s3  ;;  %s877_s22 = scalar_lea.vmem [#allocation3], %s3227_s0 }
  0x3c   : > { %s941_s28 = sshll.u32 %s939_s4, 4  ;;  %s884_s16 = sshll.u32 %s877_s22, 4  ;;  %s942_s28 = int_to_ptr.hbm [resolvable:$true] %s941_s28  ;;  %s885_s16 = int_to_ptr.vmem [resolvable:$true] %s884_s16 }
  0x3d   : > { %2649 = dma.hbm_to_vmem [thread:$0]  (!%p3234_p10), %s942_s28, 16, %s944_s19, %s934_s17  }
  0x3e   : > { %s880_s25 = scalar_lea.hbm %s3740_s18, %s3018_s3  ;;  %s875_s4 = scalar_lea.sflag [#allocation4], %s3227_s0 }
  0x3f   : > { %s882_s26 = sshll.u32 %s880_s25, 4  ;;  %s914_s15 = scalar_lea.hbm %s3741_s20, %s3018_s3  ;;  %s883_s26 = int_to_ptr.hbm [resolvable:$true] %s882_s26 }
  0x40   : > { %2640 = dma.hbm_to_vmem [thread:$0]  (!%p3234_p10), %s883_s26, 16, %s885_s16, %s875_s4  }
  0x41   : > { %s916_s19 = sshll.u32 %s914_s15, 4  ;;  %s911_s28 = scalar_lea.vmem [#allocation7], %s3227_s0  ;;  %s917_s19 = int_to_ptr.hbm [resolvable:$true] %s916_s19 }
  0x42   : > { %s918_s14 = sshll.u32 %s911_s28, 4  ;;  %s3742_s24 = sld [smem:[#allocation47_spill]]  ;;  %s919_s14 = int_to_ptr.vmem [resolvable:$true] %s918_s14 }
  0x43   : > { %2646 = dma.hbm_to_vmem [thread:$0]  (!%p3234_p10), %s917_s19, 16, %s919_s14, %s892_s23  }
  0x44   : > { %s961_s18 = scalar_lea.vmem [#allocation10], %s3227_s0 }
  0x45   : > { %s968_s13 = sshll.u32 %s961_s18, 4  ;;  %s969_s13 = int_to_ptr.vmem [resolvable:$true] %s968_s13 }
  0x46   : > { %977 = sbr.rel (%p3251_p13) target bundleno = 3314 (0xcf2), region = 120 }
  0x48   : > { %s964_s22 = scalar_lea.hbm %s3742_s24, %s3018_s3 }
  0x49   : > { %s966_s25 = sshll.u32 %s964_s22, 4  ;;  %s967_s25 = int_to_ptr.hbm [resolvable:$true] %s966_s25 }
  0x4a   : > { %2652 = dma.hbm_to_vmem [thread:$0]  (!%p3234_p10), %s967_s25, 16, %s969_s13, %s934_s17  }
  0x4b   : > { %s3283_s15 = sand.u32 1, %s3002_s2  }
  0x4c   : > { %s980_s14 = scalar_lea.sflag [#allocation4], %s3283_s15 }
  0x4d   : > { %2985 = dma.done.wait (%p3229_p9), %s980_s14, 16  }
  0x4e   : > { %2987 = vsyncadd (%p3229_p9), %s980_s14, 4294967280  ;;  %s3743_s18 = sadd.s32 4294967295, %s3026_s1  }
  0x4f   : > { %s988_s13 = sand.u32 1, %s3743_s18  }
  0x50   : > { %s989_s17 = scalar_lea.sflag [#allocation6], %s988_s13 }
  0x51   : > { %2989 = dma.done.wait (%p3229_p9), %s989_s17, 32  }
  0x52   : > { %2991 = vsyncadd (%p3229_p9), %s989_s17, 4294967264  ;;  %s1007_s29 = scalar_lea.sflag [#allocation9], %s988_s13 }
  0x53   : > { %2993 = dma.done.wait (%p3229_p9), %s1007_s29, 32  }
  0x54   : > { %2995 = vsyncadd (%p3229_p9), %s1007_s29, 4294967264  ;;  %p1181_p0 = scmp.lt.s32.totalorder %s3014_s7, 1  ;;  %p1202_p1 = scmp.lt.s32.totalorder %s3010_s30, 7 }
  0x55   : > { %s3744_s19 = sld [smem:[#allocation24_spill]]  ;;  %p2516_p2 = scmp.ne.s32.totalorder %s3010_s30, 0 }
  0x56   : > { %s3805_s7 = smov (!%p1181_p0, %s3014_s7), 1  ;;  %s3745_s22 = sld [smem:[#allocation25_spill]] }
  0x57   : > { %s3310_s26 = scalar_select %p1202_p1, %s3010_s30, 7 }
  0x58   : > { %s2600_s27 = sshll.u32 %s3805_s7, 4  ;;  %s2601_s4 = sshll.u32 %s3805_s7, 5 }
  0x59   : > { %s3747_s13 = sld [smem:[#allocation26_spill]]  ;;  %s2603_s18 = sshll.u32 %s3310_s26, 4 }
  0x5a   : > { %s3752_s1 = sld [smem:[#allocation31_spill]]  ;;  %s2609_s9 = sshll.u32 %s3310_s26, 5 }
  0x5b   : > { %s1185_s28 = scalar_lea.vmem %s3744_s19, %s2600_s27  ;;  %s3754_s24 = sld [smem:[#allocation33_spill]] }
  0x5c   : > { %s3320_s25 = scalar_lea.vmem %s3745_s22, %s2601_s4  ;;  %s3757_s29 = sld [smem:[#allocation36_spill]] }
  0x5d   : > { %3746 = sst [smem:[#allocation22_spill]] %s3320_s25  ;;  %s1018_s22 = scalar_lea.vmem [#allocation10], %s3283_s15 }
  0x5e   : > { %s3760_s3 = sld [smem:[#allocation38_spill]] }
  0x5f   : > { %s3325_s17 = scalar_lea.vmem %s3747_s13, %s2600_s27  ;;  %s3761_s2 = sld [smem:[#allocation39_spill]] }
  0x60   : > { %s3347_s8 = scalar_lea.vmem %s3752_s1, %s2603_s18  ;;  %s3762_s14 = sld [smem:[#allocation40_spill]] }
  0x61   : > { %s3356_s19 = scalar_lea.vmem %s3754_s24, %s2603_s18  ;;  %s3764_s25 = sld [smem:[#allocation48_spill]] }
  0x62   : > { %s3373_s20 = scalar_lea.vmem %s3757_s29, %s2603_s18  ;;  %s3763_s29 = sld [smem:[#allocation44_spill]] }
  0x63   : > { %3758 = sst [smem:[#allocation23_spill]] %s3373_s20 }
  0x64   : > { %s3382_s6 = scalar_lea.vmem %s3760_s3, %s2603_s18  ;;  %s3765_s21 = sld [smem:[#allocation46_spill]] }
  0x65   : > { %s1245_s11 = scalar_lea.vmem %s3761_s2, %s3310_s26 }
  0x66   : > { %s3391_s12 = scalar_lea.vmem %s3762_s14, %s2603_s18  ;;  %1270 = sbr.rel (%p2516_p2) target bundleno = 110 (0x6e), region = 144 }
  0x67   : > { %s3402_s23 = scalar_lea.vmem %s3764_s25, %s2600_s27 }
  0x68   : > { %s3396_s20 = scalar_lea.vmem %s3763_s29, %s2603_s18 }
  0x6a   : > { %s3407_s2 = scalar_lea.vmem %s3765_s21, %s2609_s9 }
  0x6b   : > { %v1271_v0 = vld [vmem:[%s1185_s28] sm:$0xff]  ;;  %vm1273_vm0 = vcmask 261120   ;;  %v1272_v1 = vld [vmem:[%s1185_s28 + $0x8] sm:$0xff] }
  0x6c   : > { %1274 = vst.msk [vmem:[#allocation2] sm:$0xff] %vm1273_vm0, %v1271_v0 }
  0x6d   : > { %1275 = vst.msk [vmem:[#allocation2 + $0x8] sm:$0xff] %vm1273_vm0, %v1272_v1 }
  0x6e PF: > { %vm1288_vm1 = vcmask 261120   ;;  %v3028_v6 = vmov 32.0   ;;  %v2612_v23 = vld [vmem:[%s3347_s8 + $0x8] sm:$0xff]  ;;  %v2611_v25 = vld [vmem:[%s3347_s8] sm:$0xff]  ;;  %s3766_s14 = sld [smem:[#allocation29_spill]]  ;;  %s3029_s5 = smov 112  }
  0x6f   : > { %2752 = vrcp.f32 %v3028_v6  ;;  %1380 = vmatpush.bf16.msra.mxu0 %v2612_v23  ;;  %s3768_s13 = sld [smem:[#allocation30_spill]]  ;;  %s3030_s24 = smov 96   ;;  %vm1394_vm9 = vcmask 130048  }
  0x70   : > { %s3770_s29 = sld [smem:[#allocation32_spill]]  ;;  %s3031_s25 = smov 80  }
  0x71   : > { %s3772_s27 = sld [smem:[#allocation27_spill]]  ;;  %s3035_s8 = smov 16  }
  0x72   : > { %s3782_s16 = sld [smem:[#allocation37_spill]]  ;;  %p2597_p3 = scmp.ne.s32.totalorder %s3010_s30, 7 }
  0x73   : > { %v3411_v2 = vld [vmem:[#allocation2] sm:$0xff]  ;;  %1381 = vmatpush.bf16.msra.mxu0 %v2611_v25 }
  0x74   : > { %v1289_v3 = vsel %vm1288_vm1, %v3411_v2, 0.0  ;;  %v3415_v4 = vld [vmem:[#allocation2 + $0x8] sm:$0xff]  ;;  %s3767_s18 = scalar_lea.vmem %s3766_s14, %s3310_s26  ;;  %s3033_s14 = smov 64  }
  0x75   : > { %1290 = vadd.xlane.f32.xlu0 %v1289_v3  ;;  %v1292_v5 = vsel %vm1288_vm1, %v3415_v4, 0.0  ;;  %v2753_v7 = vpop.eup %2752  ;;  %v2739_v44 = vld [vmem:[%s3767_s18] ss:$0 sm:$0xff]  ;;  %s3769_s1 = scalar_lea.vmem %s3768_s13, %s3310_s26  ;;  %v3032_v3 = vmov -1e+09   ;;  %s3034_s18 = smov 48  }
  0x76   : > { %v1296_v8 = vmul.f32 32.0, %v2753_v7  ;;  %vm1300_vm2 = vweird.f32 %v2753_v7  ;;  %v2740_v49 = vld [vmem:[%s3769_s1] ss:$0 sm:$0xff]  ;;  %s3771_s9 = scalar_lea.vmem %s3770_s29, %s3310_s26  ;;  %s3774_s13 = scalar_lea.vmem %s3677_s10, %s3310_s26 }
  0x77   : > { %v2741_v55 = vld [vmem:[%s3771_s9] ss:$0 sm:$0xff]  ;;  %s3773_s28 = scalar_lea.vmem %s3772_s27, %s3805_s7  ;;  %s3776_s1 = sld [smem:[#allocation23_spill]] }
  0x78   : > { %v1297_v9 = vsub.f32 1.0, %v1296_v8  ;;  %v1284_v1 = vld [vmem:[%s3773_s28] sm:$0x1]  ;;  %s3778_s9 = sld [smem:[#allocation34_spill]] }
  0x79   : > { %vm1388_vm10 = vcmp.gt.f32.partialorder %v1284_v1, 0.5  ;;  %s3780_s28 = sld [smem:[#allocation35_spill]] }
  0x7a   : > { %v1298_v10 = vmul.f32 %v2753_v7, %v1297_v9 }
  0x7c   : > { %v1299_v11 = vadd.f32 %v2753_v7, %v1298_v10 }
  0x7d   : > { %1293 = vadd.xlane.f32.xlu0 %v1292_v5  ;;  %v1389_v5 = vsel %vm1388_vm10, 0.0, %v3032_v3 }
  0x7e   : > { %v3419_v12 = vsel %vm1300_vm2, %v2753_v7, %v1299_v11  ;;  %v1418_v6 = vperm.slane %v1389_v5, 0  ;;  %v2613_v5 = vld [vmem:[%s3356_s19] sm:$0xff]  ;;  %s3779_s3 = scalar_lea.vmem %s3778_s9, %s3310_s26 }
  0xe8   : > { %v1291_v13 = vpop.xlane.xlu0 %1290 }
  0xe9   : > { %v1302_v14 = vmul.f32 %v3419_v12, %v1291_v13 }
  0xeb   : > { %v1304_v15 = vsub.f32 %v3411_v2, %v1302_v14 }
  0xed   : > { %v1306_v16 = vmul.f32 %v1304_v15, %v1304_v15 }
  0xef   : > { %v1308_v17 = vsel %vm1288_vm1, %v1306_v16, 0.0 }
  0xf0   : > { %1309 = vadd.xlane.f32.xlu1 %v1308_v17  ;;  %v1294_v18 = vpop.xlane.xlu0 %1293 }
  0xf1   : > { %v1303_v19 = vmul.f32 %v3419_v12, %v1294_v18 }
  0xf3   : > { %v1305_v20 = vsub.f32 %v3415_v4, %v1303_v19 }
  0xf5   : > { %v1307_v21 = vmul.f32 %v1305_v20, %v1305_v20 }
  0xf7   : > { %v1311_v22 = vsel %vm1288_vm1, %v1307_v21, 0.0 }
  0xf8   : > { %1312 = vadd.xlane.f32.xlu1 %v1311_v22 }
 0x163   : > { %v1310_v24 = vpop.xlane.xlu1 %1309 }
 0x164   : > { %v1314_v26 = vmul.f32 %v1310_v24, %v3419_v12 }
 0x166   : > { %v1316_v27 = vadd.f32 1e-05, %v1314_v26 }
 0x168   : > { %2754 = vrsqrt.f32 %v1316_v27  ;;  %vm1324_vm4 = vweird.f32 %v1316_v27 }
 0x16b   : > { %v1313_v28 = vpop.xlane.xlu1 %1312 }
 0x16c   : > { %v1315_v29 = vmul.f32 %v1313_v28, %v3419_v12 }
 0x16e   : > { %v2755_v30 = vpop.eup %2754  ;;  %v1317_v31 = vadd.f32 1e-05, %v1315_v29 }
 0x16f   : > { %v1319_v32 = vmul.f32 %v2755_v30, %v1316_v27  ;;  %vm1325_vm3 = vweird.f32 %v2755_v30 }
 0x170   : > { %2756 = vrsqrt.f32 %v1317_v31  ;;  %vm1326_vm5 = vmor %vm1324_vm4, %vm1325_vm3  ;;  %vm1334_vm7 = vweird.f32 %v1317_v31 }
 0x171   : > { %v1320_v33 = vmul.f32 %v2755_v30, %v1319_v32 }
 0x173   : > { %v1321_v34 = vmul.f32 0.5, %v1320_v33 }
 0x175   : > { %v1322_v35 = vsub.f32 1.5, %v1321_v34 }
 0x176   : > { %v2757_v36 = vpop.eup %2756 }
 0x177   : > { %v1323_v37 = vmul.f32 %v2755_v30, %v1322_v35  ;;  %v1329_v38 = vmul.f32 %v2757_v36, %v1317_v31  ;;  %vm1335_vm6 = vweird.f32 %v2757_v36 }
 0x178   : > { %vm1336_vm8 = vmor %vm1334_vm7, %vm1335_vm6 }
 0x179   : > { %v1330_v39 = vmul.f32 %v2757_v36, %v1329_v38  ;;  %v1327_v40 = vsel %vm1326_vm5, %v2755_v30, %v1323_v37 }
 0x17a   : > { %v1338_v43 = vmul.f32 %v1327_v40, %v1304_v15 }
 0x17b   : > { %v1331_v41 = vmul.f32 0.5, %v1330_v39 }
 0x17c   : > { %v1343_v48 = vmul.f32 %v2739_v44, %v1338_v43 }
 0x17d   : > { %v1332_v42 = vsub.f32 1.5, %v1331_v41 }
 0x17e   : > { %v1348_v51 = vadd.f32 %v2740_v49, %v1343_v48 }
 0x17f   : > { %v1333_v45 = vmul.f32 %v2757_v36, %v1332_v42 }
 0x181   : > { %v1337_v46 = vsel %vm1336_vm8, %v2757_v36, %v1333_v45 }
 0x182   : > { %v1339_v47 = vmul.f32 %v1337_v46, %v1305_v20 }
 0x184   : > { %v1344_v50 = vmul.f32 %v2739_v44, %v1339_v47 }
 0x186   : > { %v1349_v52 = vadd.f32 %v2740_v49, %v1344_v50 }
 0x188   : > { %v1355_v53 = vpack.c.bf16 %v1349_v52, %v1348_v51 }
 0x18a   : > { %2525 = vmatmul.msk.bf16.vlgmr.msra.gmra.mxu0 %vm1288_vm1, %v1355_v53 }
 0x207   : > { %v1383_v54 = vpop.f32.mrf.mxu0 }
 0x208   : > { %v1384_v57 = vadd.f32 %v2741_v55, %v1383_v54 }
 0x20f   : > { %v1385_v56 = vpop.f32.mrf.mxu0 }
 0x210   : > { %v1386_v58 = vadd.f32 %v2741_v55, %v1385_v56 }
 0x212   : > { %v3447_v59 = vpack.c.bf16 %v1386_v58, %v1384_v57 }
 0x214   : > { %1465 = vrot.lane.b32.xlu0 %v3447_v59, %s3029_s5  ;;  %1392 = vrot.lane.b32.xlu2 %v3447_v59, %s3030_s24 }
 0x21c   : > { %1467 = vrot.lane.b32.xlu2 %v3447_v59, %s3031_s25 }
 0x26e   : > { %v1393_v60 = vpop.permute.xlu2 %1392 }
 0x26f   : > { %v1399_v61 = vsel %vm1394_vm9, %v1393_v60, 0  ;;  %v2614_v60 = vld [vmem:[%s3356_s19 + $0x8] sm:$0xff] }
 0x270   : > { %1408 = vmatpush.bf16.xpose.msra.mxu1 %v1399_v61  ;;  %1576 = vmatpush.bf16.msrb.mxu0 %v2614_v60 }
 0x274   : > { %1577 = vmatpush.bf16.msrb.mxu0 %v2613_v5 }
 0x276   : > { %v1468_v62 = vpop.permute.xlu2 %1467 }
 0x277   : > { %2526 = vmatmul.msk.bf16.vlgmr.msra.gmra.mxu1 %vm1394_vm9, %v3447_v59  ;;  %v1473_v63 = vsel %vm1394_vm9, %v1468_v62, 0 }
 0x278   : > { %1482 = vmatpush.bf16.xpose.msra.mxu3 %v1473_v63 }
 0x286   : > { %v1466_v0 = vpop.permute.xlu0 %1465 }
 0x287   : > { %2528 = vmatmul.msk.bf16.vlgmr.msra.gmra.mxu3 %vm1394_vm9, %v1466_v0 }
 0x2f4   : > { %v1410_v7 = vpop.f32.mrf.mxu1 }
 0x2f5   : > { %v1415_v8 = vmul.f32 0.25, %v1410_v7  ;;  %v1283_v7 = vld [vmem:[%s3325_s17 + $0x8] sm:$0xff] }
 0x2f7   : > { %v1420_v9 = vadd.f32 %v1418_v6, %v1415_v8  ;;  %v3036_v8 = vmov 0  }
 0x2f8   : > { %2732 = vset.pattern.permute.xlu0 %v3036_v8  ;;  %2733 = vset.pattern.permute.xlu1 %v3036_v8 }
 0x2f9   : > { %v1422_v10 = vsel %vm1394_vm9, %v1420_v9, -inf }
 0x2fa   : > { %1423 = vmax.xlane.f32.xlu1 %v1422_v10 }
 0x2fc   : > { %v1412_v11 = vpop.f32.mrf.mxu1 }
 0x2fd   : > { %v1416_v13 = vmul.f32 0.25, %v1412_v11 }
 0x2ff   : > { %v1421_v14 = vadd.f32 %v1418_v6, %v1416_v13 }
 0x301   : > { %v1425_v15 = vsel %vm1394_vm9, %v1421_v14, -inf }
 0x302   : > { %1426 = vmax.xlane.f32.xlu2 %v1425_v15 }
 0x30a   : > { %v1484_v16 = vpop.f32.mrf.mxu3 }
 0x30b   : > { %v1489_v17 = vmul.f32 0.25, %v1484_v16  ;;  %v2742_v16 = vld [vmem:[%s3774_s13] ss:$0 sm:$0xff]  ;;  %s3783_s13 = scalar_lea.vmem %s3782_s16, %s3310_s26 }
 0x30d   : > { %v1491_v18 = vadd.f32 %v1489_v17, %v1418_v6 }
 0x30f   : > { %v1493_v19 = vsel %vm1394_vm9, %v1491_v18, -inf }
 0x310   : > { %1494 = vmax.xlane.f32.xlu1 %v1493_v19 }
 0x312   : > { %v1486_v20 = vpop.f32.mrf.mxu3 }
 0x313   : > { %v1490_v21 = vmul.f32 0.25, %v1486_v20 }
 0x315   : > { %v1492_v22 = vadd.f32 %v1490_v21, %v1418_v6  ;;  %v1282_v6 = vld [vmem:[%s3325_s17] sm:$0xff]  ;;  %s3775_s17 = sld [smem:[#allocation22_spill]] }
 0x317   : > { %v1496_v23 = vsel %vm1394_vm9, %v1492_v22, -inf }
 0x318   : > { %1497 = vmax.xlane.f32.xlu1 %v1496_v23 }
 0x331   : > { %1445 = vrot.lane.b32.xlu1 %v3447_v59, %s3033_s14  ;;  %s3781_s14 = scalar_lea.vmem %s3780_s28, %s3310_s26 }
 0x36d   : > { %v1424_v24 = vpop.xlane.xlu1 %1423 }
 0x36e   : > { %v1428_v25 = vsub.f32 %v1420_v9, %v1424_v24 }
 0x370   : > { %v1430_v26 = vmul.f32 1.442695, %v1428_v25 }
 0x372   : > { %2758 = vpow2.f32 %v1430_v26 }
 0x375   : > { %v1427_v27 = vpop.xlane.xlu2 %1426 }
 0x376   : > { %v1429_v28 = vsub.f32 %v1421_v14, %v1427_v27 }
 0x378   : > { %v2759_v29 = vpop.eup %2758  ;;  %v1432_v30 = vmul.f32 1.442695, %v1429_v28 }
 0x379   : > { %v1434_v31 = vsel %vm1394_vm9, %v2759_v29, 0.0 }
 0x37a   : > { %2760 = vpow2.f32 %v1432_v30  ;;  %1435 = vadd.xlane.f32.xlu0 %v1434_v31  ;;  %v1278_v30 = vld [vmem:[%s3775_s17] sm:$0xff]  ;;  %v1279_v31 = vld [vmem:[%s3775_s17 + $0x8] sm:$0xff] }
 0x380   : > { %v2761_v32 = vpop.eup %2760 }
 0x381   : > { %v1437_v33 = vsel %vm1394_vm9, %v2761_v32, 0.0 }
 0x382   : > { %1438 = vadd.xlane.f32.xlu1 %v1437_v33 }
 0x383   : > { %v1495_v34 = vpop.xlane.xlu1 %1494 }
 0x384   : > { %v1499_v35 = vsub.f32 %v1491_v18, %v1495_v34 }
 0x386   : > { %v1501_v36 = vmul.f32 1.442695, %v1499_v35 }
 0x388   : > { %2762 = vpow2.f32 %v1501_v36 }
 0x38b   : > { %v1498_v37 = vpop.xlane.xlu1 %1497 }
 0x38c   : > { %v1500_v38 = vsub.f32 %v1492_v22, %v1498_v37 }
 0x38e   : > { %v2763_v39 = vpop.eup %2762  ;;  %v1503_v40 = vmul.f32 1.442695, %v1500_v38  ;;  %1586 = vperm.xlu0 %2732, %v1282_v6  }
 0x38f   : > { %v1505_v41 = vsel %vm1394_vm9, %v2763_v39, 0.0 }
 0x390   : > { %2764 = vpow2.f32 %v1503_v40  ;;  %1506 = vadd.xlane.f32.xlu2 %v1505_v41 }
 0x396   : > { %v2765_v42 = vpop.eup %2764 }
 0x397   : > { %v1508_v43 = vsel %vm1394_vm9, %v2765_v42, 0.0 }
 0x398   : > { %1509 = vadd.xlane.f32.xlu2 %v1508_v43  ;;  %v1281_v43 = vld [vmem:[%s3775_s17 + $0x18] sm:$0xff] }
 0x39b   : > { %1516 = vrot.lane.b32.xlu1 %v3447_v59, %s3034_s18 }
 0x3a3   : > { %v1446_v44 = vpop.permute.xlu1 %1445  ;;  %1591 = vperm.xlu1 %2733, %v1283_v7  }
 0x3a4   : > { %1458 = vmatpush.bf16.msra.mxu2 %v1446_v44 }
 0x3ed   : > { %v1436_v45 = vpop.xlane.xlu0 %1435 }
 0x3ee   : > { %2766 = vrcp.f32 %v1436_v45  ;;  %v2616_v45 = vld [vmem:[%s3776_s1 + $0x8] sm:$0xff] }
 0x3ef   : > { %1684 = vmatpush.bf16.msrb.mxu1 %v2616_v45 }
 0x3f4   : > { %v2767_v47 = vpop.eup %2766 }
 0x3f5   : > { %v1439_v46 = vpop.xlane.xlu1 %1438  ;;  %v1442_v49 = vmul.f32 %v2767_v47, %v2759_v29  ;;  %v2618_v29 = vld [vmem:[%s3382_s6 + $0x8] sm:$0xff]  ;;  %v2615_v47 = vld [vmem:[%s3776_s1] sm:$0xff]  ;;  %s3784_s1 = sld [smem:[#allocation28_spill]] }
 0x3f6   : > { %2768 = vrcp.f32 %v1439_v46  ;;  %1726 = vmatpush.bf16.msrb.mxu3 %v2618_v29  ;;  %1685 = vmatpush.bf16.msrb.mxu1 %v2615_v47 }
 0x3fc   : > { %v2769_v48 = vpop.eup %2768 }
 0x3fd   : > { %v1443_v50 = vmul.f32 %v2769_v48, %v2761_v32  ;;  %v1697_v32 = vpack.c.bf16 %v1279_v31, %v1278_v30 }
 0x3ff   : > { %v1444_v51 = vpack.c.bf16 %v1443_v50, %v1442_v49 }
 0x400   : > { %v3491_v18 = vpop.permute.xlu0 %1586 }
 0x401   : > { %2527 = vmatmul.msk.bf16.vlgmr.msra.gmra.mxu2 %vm1394_vm9, %v1444_v51 }
 0x403   : > { %v1507_v52 = vpop.xlane.xlu2 %1506 }
 0x404   : > { %2770 = vrcp.f32 %v1507_v52 }
 0x40a   : > { %v2771_v55 = vpop.eup %2770 }
 0x40b   : > { %v1510_v53 = vpop.xlane.xlu2 %1509  ;;  %v1513_v57 = vmul.f32 %v2771_v55, %v2763_v39 }
 0x40c   : > { %2772 = vrcp.f32 %v1510_v53 }
 0x40d   : > { %v1517_v54 = vpop.permute.xlu1 %1516 }
 0x40e   : > { %1529 = vmatpush.bf16.msrb.mxu2 %v1517_v54 }
 0x412   : > { %v2773_v56 = vpop.eup %2772 }
 0x413   : > { %v1514_v58 = vmul.f32 %v2773_v56, %v2765_v42  ;;  %v1280_v42 = vld [vmem:[%s3775_s17 + $0x10] sm:$0xff]  ;;  %v2745_v56 = vld [vmem:[%s1245_s11] ss:$0 sm:$0xff] }
 0x414   : > { %v1698_v44 = vpack.c.bf16 %v1281_v43, %v1280_v42 }
 0x415   : > { %v1515_v59 = vpack.c.bf16 %v1514_v58, %v1513_v57  ;;  %v3499_v24 = vpop.permute.xlu1 %1591 }
 0x417   : > { %2529 = vmatmul.msk.bf16.vlgmr.msrb.gmra.mxu2 %vm1394_vm9, %v1515_v59 }
 0x484   : > { %v1460_v61 = vpop.f32.mrf.mxu2 }
 0x48c   : > { %v1462_v62 = vpop.f32.mrf.mxu2 }
 0x49a   : > { %v1531_v63 = vpop.f32.mrf.mxu2 }
 0x4a2   : > { %v1533_v0 = vpop.f32.mrf.mxu2 }
 0x4a3   : > { %v2727_v1 = vpack.i.bf16 %v1533_v0, %v1531_v63 }
 0x4a5   : > { %2728 = vrot.lane.b32.xlu2 %v2727_v1, %s3035_s8 }
 0x4ff   : > { %v2729_v9 = vpop.permute.xlu2 %2728 }
 0x500   : > { %v2731_v10 = vunpack.i.h.bf16 %v2729_v9  ;;  %v2730_v11 = vunpack.i.l.bf16 %v2729_v9 }
 0x502   : > { %v1545_v13 = vsel %vm1394_vm9, %v1462_v62, %v2731_v10  ;;  %v1544_v14 = vsel %vm1394_vm9, %v1460_v61, %v2730_v11  ;;  %v2743_v11 = vld [vmem:[%s3779_s3] ss:$0 sm:$0xff] }
 0x503   : > { %v1551_v15 = vpack.c.bf16 %v1545_v13, %v1544_v14 }
 0x505   : > { %2538 = vmatmul.msk.bf16.vlgmr.msrb.gmra.mxu0 %vm1288_vm1, %v1551_v15 }
 0x582   : > { %v1579_v17 = vpop.f32.mrf.mxu0 }
 0x583   : > { %v1580_v19 = vadd.f32 %v2742_v16, %v1579_v17  ;;  %v2744_v17 = vld [vmem:[%s3781_s14] ss:$0 sm:$0xff] }
 0x585   : > { %v1594_v20 = vmul.f32 %v3491_v18, %v1580_v19 }
 0x587   : > { %v3495_v21 = vadd.f32 %v1594_v20, %v3411_v2  ;;  %v2617_v2 = vld [vmem:[%s3382_s6] sm:$0xff]  ;;  %s3785_s6 = scalar_lea.vmem %s3784_s1, %s3805_s7  ;;  %s3786_s7 = scalar_lea.vmem [#allocation3], %s3283_s15 }
 0x588   : > { %1727 = vmatpush.bf16.msrb.mxu3 %v2617_v2  ;;  %v1285_v42 = vld [vmem:[%s3785_s6] sm:$0x1] }
 0x589   : > { %v1600_v22 = vsel %vm1288_vm1, %v3495_v21, 0.0  ;;  %vm1739_vm2 = vcmp.gt.f32.partialorder %v1285_v42, 0.5 }
 0x58a   : > { %v1581_v23 = vpop.f32.mrf.mxu0  ;;  %1601 = vadd.xlane.f32.xlu1 %v1600_v22  ;;  %v1740_v43 = vsel %vm1739_vm2, 0.0, %v3032_v3 }
 0x58b   : > { %v1582_v25 = vadd.f32 %v2742_v16, %v1581_v23  ;;  %2556 = vmatmul.msk.bf16.vlgmr.msrb.gmra.mxu3 %vm1288_vm1, %v1697_v32 }
 0x58d   : > { %v1595_v26 = vmul.f32 %v3499_v24, %v1582_v25 }
 0x58f   : > { %v3503_v27 = vadd.f32 %v1595_v26, %v3415_v4 }
 0x591   : > { %v1603_v28 = vsel %vm1288_vm1, %v3503_v27, 0.0 }
 0x592   : > { %1604 = vadd.xlane.f32.xlu2 %v1603_v28 }
 0x59b   : > { %2557 = vmatmul.msk.bf16.gmra.mxu3 %vm1288_vm1, %v1698_v44  ;;  %v1770_v44 = vperm.slane %v1740_v43, 0 }
 0x5fd   : > { %v1602_v33 = vpop.xlane.xlu1 %1601 }
 0x5fe   : > { %v1606_v4 = vmul.f32 %v1602_v33, %v3419_v12  ;;  %v2746_v33 = vld [vmem:[%s3783_s13] ss:$0 sm:$0xff] }
 0x600   : > { %v1608_v34 = vsub.f32 %v3495_v21, %v1606_v4 }
 0x602   : > { %v1610_v35 = vmul.f32 %v1608_v34, %v1608_v34 }
 0x604   : > { %v1612_v36 = vsel %vm1288_vm1, %v1610_v35, 0.0 }
 0x605   : > { %v1605_v37 = vpop.xlane.xlu2 %1604  ;;  %1613 = vadd.xlane.f32.xlu0 %v1612_v36 }
 0x606   : > { %v1607_v38 = vmul.f32 %v1605_v37, %v3419_v12 }
 0x608   : > { %v1609_v39 = vsub.f32 %v3503_v27, %v1607_v38 }
 0x60a   : > { %v1611_v40 = vmul.f32 %v1609_v39, %v1609_v39 }
 0x60c   : > { %v1615_v41 = vsel %vm1288_vm1, %v1611_v40, 0.0 }
 0x60d   : > { %1616 = vadd.xlane.f32.xlu1 %v1615_v41 }
 0x60e   : > { %v1729_v50 = vpop.f32.mrf.mxu3 }
 0x60f   : > { %v1730_v58 = vadd.f32 %v2745_v56, %v1729_v50 }
 0x616   : > { %v1731_v59 = vpop.f32.mrf.mxu3 }
 0x617   : > { %v1732_v61 = vadd.f32 %v2745_v56, %v1731_v59 }
 0x619   : > { %v3530_v63 = vpack.c.bf16 %v1732_v61, %v1730_v58 }
 0x61b   : > { %v1748_v31 = vsel %vm1394_vm9, %v3530_v63, 0 }
 0x61e   : > { %v1734_v25 = vpop.f32.mrf.mxu3 }
 0x61f   : > { %v1735_v26 = vadd.f32 %v2745_v56, %v1734_v25 }
 0x626   : > { %1825 = vrot.lane.b32.xlu1 %v3530_v63, %s3029_s5  ;;  %v1736_v28 = vpop.f32.mrf.mxu3 }
 0x627   : > { %v1737_v29 = vadd.f32 %v2745_v56, %v1736_v28 }
 0x629   : > { %v3545_v2 = vpack.c.bf16 %v1737_v29, %v1735_v26 }
 0x62b   : > { %v1751_v30 = vsel %vm1394_vm9, %v3545_v2, 0  ;;  %1827 = vrot.lane.b32.xlu2 %v3545_v2, %s3029_s5 }
 0x62c   : > { %1759 = vmatpush.bf16.xpose.msra.mxu2 %v1751_v30 }
 0x634   : > { %1760 = vmatpush.bf16.xpose.msra.mxu2 %v1748_v31 }
 0x678   : > { %v1614_v46 = vpop.xlane.xlu0 %1613 }
 0x679   : > { %v1618_v48 = vmul.f32 %v1614_v46, %v3419_v12 }
 0x67b   : > { %v1620_v49 = vadd.f32 1e-05, %v1618_v48 }
 0x67d   : > { %2774 = vrsqrt.f32 %v1620_v49  ;;  %vm1628_vm12 = vweird.f32 %v1620_v49 }
 0x680   : > { %v1617_v51 = vpop.xlane.xlu1 %1616 }
 0x681   : > { %v1619_v52 = vmul.f32 %v1617_v51, %v3419_v12 }
 0x683   : > { %v2775_v53 = vpop.eup %2774  ;;  %v1621_v54 = vadd.f32 1e-05, %v1619_v52 }
 0x684   : > { %v1623_v55 = vmul.f32 %v2775_v53, %v1620_v49  ;;  %vm1629_vm11 = vweird.f32 %v2775_v53 }
 0x685   : > { %2776 = vrsqrt.f32 %v1621_v54  ;;  %vm1630_vm13 = vmor %vm1628_vm12, %vm1629_vm11  ;;  %vm1638_vm15 = vweird.f32 %v1621_v54  ;;  %v1828_v37 = vpop.permute.xlu2 %1827 }
 0x686   : > { %v1624_v57 = vmul.f32 %v2775_v53, %v1623_v55  ;;  %v1836_v38 = vsel %vm1394_vm9, %v1828_v37, 0 }
 0x687   : > { %1844 = vmatpush.bf16.xpose.msra.mxu1 %v1836_v38 }
 0x688   : > { %v1625_v60 = vmul.f32 0.5, %v1624_v57 }
 0x68a   : > { %v1626_v62 = vsub.f32 1.5, %v1625_v60 }
 0x68b   : > { %v2777_v0 = vpop.eup %2776 }
 0x68c   : > { %v1627_v1 = vmul.f32 %v2775_v53, %v1626_v62  ;;  %v1633_v5 = vmul.f32 %v2777_v0, %v1621_v54  ;;  %vm1639_vm14 = vweird.f32 %v2777_v0 }
 0x68d   : > { %vm1640_vm0 = vmor %vm1638_vm15, %vm1639_vm14 }
 0x68e   : > { %v1634_v6 = vmul.f32 %v2777_v0, %v1633_v5  ;;  %v1631_v7 = vsel %vm1630_vm13, %v2775_v53, %v1627_v1 }
 0x68f   : > { %v1642_v10 = vmul.f32 %v1631_v7, %v1608_v34 }
 0x690   : > { %v1635_v8 = vmul.f32 0.5, %v1634_v6 }
 0x691   : > { %v1647_v16 = vmul.f32 %v2743_v11, %v1642_v10 }
 0x692   : > { %v1636_v9 = vsub.f32 1.5, %v1635_v8 }
 0x693   : > { %v1652_v20 = vadd.f32 %v2744_v17, %v1647_v16 }
 0x694   : > { %v1637_v13 = vmul.f32 %v2777_v0, %v1636_v9 }
 0x696   : > { %v1641_v14 = vsel %vm1640_vm0, %v2777_v0, %v1637_v13 }
 0x697   : > { %v1643_v15 = vmul.f32 %v1641_v14, %v1609_v39 }
 0x698   : > { %v1826_v39 = vpop.permute.xlu1 %1825 }
 0x699   : > { %v1648_v19 = vmul.f32 %v2743_v11, %v1643_v15  ;;  %v1833_v40 = vsel %vm1394_vm9, %v1826_v39, 0 }
 0x69a   : > { %1845 = vmatpush.bf16.xpose.msra.mxu1 %v1833_v40  ;;  %v2620_v40 = vld [vmem:[%s3391_s12 + $0x8] sm:$0xff] }
 0x69b   : > { %v1653_v22 = vadd.f32 %v2744_v17, %v1648_v19 }
 0x69d   : > { %v1659_v23 = vpack.c.bf16 %v1653_v22, %v1652_v20 }
 0x69f   : > { %2547 = vmatmul.msk.bf16.vlgmr.msrb.gmra.mxu1 %vm1288_vm1, %v1659_v23 }
 0x71c   : > { %v1687_v32 = vpop.f32.mrf.mxu1 }
 0x71d   : > { %v1688_v34 = vadd.f32 %v2746_v33, %v1687_v32 }
 0x724   : > { %v1689_v4 = vpop.f32.mrf.mxu1 }
 0x725   : > { %v1690_v35 = vadd.f32 %v2746_v33, %v1689_v4 }
 0x727   : > { %v1741_v36 = vpack.c.bf16 %v1690_v35, %v1688_v34 }
 0x729   : > { %1823 = vrot.lane.b32.xlu0 %v1741_v36, %s3029_s5  ;;  %2558 = vmatmul.msk.bf16.vlgmr.msra.gmra.mxu2 %vm1394_vm9, %v1741_v36  ;;  %s3789_s5 = scalar_lea.vmem [#allocation8], %s3283_s15 }
 0x79b   : > { %v1824_v41 = vpop.permute.xlu0 %1823 }
 0x79c   : > { %2560 = vmatmul.msk.bf16.vlgmr.msra.gmra.mxu1 %vm1394_vm9, %v1824_v41 }
 0x7ac   : > { %v1762_v45 = vpop.f32.mrf.mxu2 }
 0x7ad   : > { %v1767_v46 = vmul.f32 0.25, %v1762_v45 }
 0x7af   : > { %v1772_v47 = vadd.f32 %v1770_v44, %v1767_v46 }
 0x7b1   : > { %v1774_v48 = vsel %vm1288_vm1, %v1772_v47, -inf }
 0x7b2   : > { %1775 = vmax.xlane.f32.xlu0 %v1774_v48 }
 0x7b4   : > { %v1764_v51 = vpop.f32.mrf.mxu2 }
 0x7b5   : > { %v1768_v53 = vmul.f32 0.25, %v1764_v51 }
 0x7b7   : > { %v1773_v57 = vadd.f32 %v1770_v44, %v1768_v53  ;;  %v2747_v53 = vld [vmem:[%s3786_s7] ss:$0 sm:$0xff] }
 0x7b9   : > { %v1777_v60 = vsel %vm1288_vm1, %v1773_v57, -inf }
 0x819   : > { %v1847_v49 = vpop.f32.mrf.mxu1 }
 0x81a   : > { %v1852_v50 = vmul.f32 0.25, %v1847_v49 }
 0x81c   : > { %v1854_v52 = vadd.f32 %v1852_v50, %v1770_v44 }
 0x81e   : > { %v1856_v54 = vsel %vm1288_vm1, %v1854_v52, -inf }
 0x81f   : > { %1857 = vmax.xlane.f32.xlu2 %v1856_v54 }
 0x821   : > { %v1849_v55 = vpop.f32.mrf.mxu1 }
 0x822   : > { %v1853_v56 = vmul.f32 0.25, %v1849_v55 }
 0x824   : > { %v1855_v58 = vadd.f32 %v1853_v56, %v1770_v44  ;;  %v2619_v44 = vld [vmem:[%s3391_s12] sm:$0xff]  ;;  %s3787_s12 = scalar_lea.vmem [#allocation5], %s3283_s15 }
 0x825   : > { %v1776_v3 = vpop.xlane.xlu0 %1775 }
 0x826   : > { %v1780_v59 = vsub.f32 %v1772_v47, %v1776_v3  ;;  %v1859_v61 = vsel %vm1288_vm1, %v1855_v58, -inf }
 0x827   : > { %1778 = vmax.xlane.f32.xlu2 %v1777_v60  ;;  %1860 = vmax.xlane.f32.xlu1 %v1859_v61 }
 0x828   : > { %v1782_v62 = vmul.f32 1.442695, %v1780_v59 }
 0x82a   : > { %2778 = vpow2.f32 %v1782_v62 }
 0x830   : > { %v2779_v0 = vpop.eup %2778 }
 0x831   : > { %v1786_v1 = vsel %vm1288_vm1, %v2779_v0, 0.0 }
 0x832   : > { %1787 = vadd.xlane.f32.xlu0 %v1786_v1 }
 0x892   : > { %v1858_v5 = vpop.xlane.xlu2 %1857 }
 0x893   : > { %v1862_v6 = vsub.f32 %v1854_v52, %v1858_v5 }
 0x895   : > { %v1864_v7 = vmul.f32 1.442695, %v1862_v6 }
 0x897   : > { %2780 = vpow2.f32 %v1864_v7 }
 0x89a   : > { %v1779_v8 = vpop.xlane.xlu2 %1778  ;;  %v1861_v9 = vpop.xlane.xlu1 %1860 }
 0x89b   : > { %v1781_v10 = vsub.f32 %v1773_v57, %v1779_v8  ;;  %v1863_v11 = vsub.f32 %v1855_v58, %v1861_v9 }
 0x89d   : > { %v2781_v13 = vpop.eup %2780  ;;  %v1784_v14 = vmul.f32 1.442695, %v1781_v10  ;;  %v1866_v15 = vmul.f32 1.442695, %v1863_v11  ;;  %v2622_v11 = vld [vmem:[%s3396_s20 + $0x8] sm:$0xff] }
 0x89e   : > { %v1868_v16 = vsel %vm1288_vm1, %v2781_v13, 0.0  ;;  %2040 = vmatpush.bf16.msrb.mxu1 %v2622_v11 }
 0x89f   : > { %2782 = vpow2.f32 %v1784_v14  ;;  %1869 = vadd.xlane.f32.xlu1 %v1868_v16  ;;  %v2621_v16 = vld [vmem:[%s3396_s20] sm:$0xff]  ;;  %s3788_s20 = scalar_lea.vmem [#allocation7], %s3283_s15 }
 0x8a0   : > { %2784 = vpow2.f32 %v1866_v15 }
 0x8a2   : > { %2041 = vmatpush.bf16.msrb.mxu1 %v2621_v16 }
 0x8a5   : > { %v2783_v17 = vpop.eup %2782  ;;  %v1788_v23 = vpop.xlane.xlu0 %1787 }
 0x8a6   : > { %v2785_v19 = vpop.eup %2784  ;;  %v1789_v20 = vsel %vm1288_vm1, %v2783_v17, 0.0 }
 0x8a7   : > { %1790 = vadd.xlane.f32.xlu0 %v1789_v20  ;;  %v1871_v22 = vsel %vm1288_vm1, %v2785_v19, 0.0 }
 0x8a8   : > { %1872 = vadd.xlane.f32.xlu2 %v1871_v22 }
 0x8b8   : > { %1881 = vrot.lane.b32.xlu1 %v3545_v2, %s3031_s25 }
 0x8bb   : > { %1801 = vrot.lane.b32.xlu0 %v3545_v2, %s3030_s24 }
 0x8c0   : > { %1879 = vrot.lane.b32.xlu2 %v3530_v63, %s3031_s25  ;;  %1799 = vrot.lane.b32.xlu1 %v3530_v63, %s3030_s24 }
 0x912   : > { %v1870_v26 = vpop.xlane.xlu1 %1869 }
 0x91a   : > { %v1791_v28 = vpop.xlane.xlu0 %1790 }
 0x91b   : > { %v1873_v25 = vpop.xlane.xlu2 %1872 }
 0x91c   : > { %2786 = vrcp.f32 %v1873_v25 }
 0x91d   : > { %2788 = vrcp.f32 %v1870_v26 }
 0x91e   : > { %2790 = vrcp.f32 %v1791_v28 }
 0x91f   : > { %2792 = vrcp.f32 %v1788_v23 }
 0x922   : > { %v2787_v29 = vpop.eup %2786 }
 0x923   : > { %v2789_v31 = vpop.eup %2788  ;;  %v1877_v32 = vmul.f32 %v2787_v29, %v2785_v19  ;;  %v1880_v34 = vpop.permute.xlu2 %1879 }
 0x924   : > { %v2791_v2 = vpop.eup %2790  ;;  %v1876_v4 = vmul.f32 %v2789_v31, %v2781_v13 }
 0x925   : > { %v2793_v63 = vpop.eup %2792  ;;  %v1795_v35 = vmul.f32 %v2791_v2, %v2783_v17 }
 0x926   : > { %v1878_v36 = vpack.c.bf16 %v1877_v32, %v1876_v4  ;;  %v1794_v37 = vmul.f32 %v2793_v63, %v2779_v0 }
 0x928   : > { %v1796_v39 = vpack.c.bf16 %v1795_v35, %v1794_v37 }
 0x92a   : > { %v1882_v30 = vpop.permute.xlu1 %1881 }
 0x92b   : > { %1894 = vmatpush.bf16.msrb.mxu2 %v1882_v30 }
 0x92d   : > { %v1802_v33 = vpop.permute.xlu0 %1801 }
 0x92e   : > { %1814 = vmatpush.bf16.msra.mxu0 %v1802_v33 }
 0x92f   : > { %1895 = vmatpush.bf16.msrb.mxu2 %v1880_v34 }
 0x932   : > { %2561 = vmatmul.msk.bf16.vlgmr.msrb.gmra.mxu2 %vm1288_vm1, %v1878_v36  ;;  %v1800_v38 = vpop.permute.xlu1 %1799  ;;  %v2749_v36 = vld [vmem:[%s3788_s20] ss:$0 sm:$0xff] }
 0x933   : > { %1815 = vmatpush.bf16.msra.mxu0 %v1800_v38 }
 0x936   : > { %2559 = vmatmul.msk.bf16.vlgmr.msra.gmra.mxu0 %vm1288_vm1, %v1796_v39 }
 0x937   : > { %1942 = vmatpush.bf16.msrb.mxu0 %v2620_v40 }
 0x93b   : > { %1943 = vmatpush.bf16.msrb.mxu0 %v2619_v44  ;;  %v2625_v44 = vld [vmem:[%s3407_s2 + $0x10] sm:$0xff] }
 0x9b3   : > { %v1817_v45 = vpop.f32.mrf.mxu0 }
 0x9b5   : > { %v1897_v41 = vpop.f32.mrf.mxu2 }
 0x9bb   : > { %v1819_v49 = vpop.f32.mrf.mxu0 }
 0x9bd   : > { %v1899_v42 = vpop.f32.mrf.mxu2 }
 0x9be   : > { %v2734_v43 = vpack.i.bf16 %v1899_v42, %v1897_v41 }
 0x9c0   : > { %2735 = vrot.lane.b32.xlu2 %v2734_v43, %s3035_s8  ;;  %v2626_v43 = vld [vmem:[%s3407_s2 + $0x18] sm:$0xff] }
 0x9c1   : > { %2111 = vmatpush.bf16.msra.mxu3 %v2626_v43 }
 0x9c5   : > { %2112 = vmatpush.bf16.msra.mxu3 %v2625_v44 }
 0xa1a   : > { %v2736_v46 = vpop.permute.xlu2 %2735 }
 0xa1b   : > { %v2738_v47 = vunpack.i.h.bf16 %v2736_v46  ;;  %v2737_v48 = vunpack.i.l.bf16 %v2736_v46  ;;  %v2750_v46 = vld [vmem:[%s3789_s5] ss:$0 sm:$0xff] }
 0xa1d   : > { %v1910_v50 = vsel %vm1394_vm9, %v1817_v45, %v2737_v48  ;;  %v1911_v51 = vsel %vm1394_vm9, %v1819_v49, %v2738_v47  ;;  %v2624_v45 = vld [vmem:[%s3407_s2 + $0x8] sm:$0xff]  ;;  %v2623_v48 = vld [vmem:[%s3407_s2] sm:$0xff]  ;;  %vm2103_vm9 = vcmask 523264  }
 0xa1e   : > { %v1917_v52 = vpack.c.bf16 %v1911_v51, %v1910_v50  ;;  %2113 = vmatpush.bf16.msra.mxu3 %v2624_v45 }
 0xa20   : > { %2570 = vmatmul.msk.bf16.vlgmr.msrb.gmra.mxu0 %vm1288_vm1, %v1917_v52 }
 0xa22   : > { %2114 = vmatpush.bf16.msra.mxu3 %v2623_v48 }
 0xa9d   : > { %v1945_v54 = vpop.f32.mrf.mxu0 }
 0xa9e   : > { %v1946_v55 = vadd.f32 %v2747_v53, %v1945_v54 }
 0xaa0   : > { %v1950_v56 = vmul.f32 %v1946_v55, %v3491_v18 }
 0xaa2   : > { %v3597_v57 = vadd.f32 %v1950_v56, %v3495_v21 }
 0xaa4   : > { %v1956_v58 = vsel %vm1288_vm1, %v3597_v57, 0.0 }
 0xaa5   : > { %v1947_v3 = vpop.f32.mrf.mxu0  ;;  %1957 = vadd.xlane.f32.xlu1 %v1956_v58 }
 0xaa6   : > { %v1948_v59 = vadd.f32 %v2747_v53, %v1947_v3 }
 0xaa8   : > { %v1951_v60 = vmul.f32 %v1948_v59, %v3499_v24 }
 0xaaa   : > { %v3603_v61 = vadd.f32 %v1951_v60, %v3503_v27 }
 0xaac   : > { %v1959_v62 = vsel %vm1288_vm1, %v3603_v61, 0.0 }
 0xaad   : > { %1960 = vadd.xlane.f32.xlu2 %v1959_v62 }
 0xb18   : > { %v1958_v0 = vpop.xlane.xlu1 %1957 }
 0xb19   : > { %v1962_v21 = vmul.f32 %v1958_v0, %v3419_v12 }
 0xb1b   : > { %v1964_v1 = vsub.f32 %v3597_v57, %v1962_v21 }
 0xb1d   : > { %v1966_v5 = vmul.f32 %v1964_v1, %v1964_v1 }
 0xb1f   : > { %v1968_v6 = vsel %vm1288_vm1, %v1966_v5, 0.0 }
 0xb20   : > { %v1961_v7 = vpop.xlane.xlu2 %1960  ;;  %1969 = vadd.xlane.f32.xlu0 %v1968_v6 }
 0xb21   : > { %v1963_v8 = vmul.f32 %v1961_v7, %v3419_v12 }
 0xb23   : > { %v1965_v27 = vsub.f32 %v3603_v61, %v1963_v8 }
 0xb25   : > { %v1967_v9 = vmul.f32 %v1965_v27, %v1965_v27 }
 0xb27   : > { %v1971_v10 = vsel %vm1288_vm1, %v1967_v9, 0.0 }
 0xb28   : > { %1972 = vadd.xlane.f32.xlu1 %v1971_v10  ;;  %v2751_v10 = vld [vmem:[%s1018_s22] ss:$0 sm:$0xff] }
 0xb93   : > { %v1970_v13 = vpop.xlane.xlu0 %1969 }
 0xb94   : > { %v1974_v14 = vmul.f32 %v1970_v13, %v3419_v12 }
 0xb96   : > { %v1976_v15 = vadd.f32 1e-05, %v1974_v14 }
 0xb98   : > { %2794 = vrsqrt.f32 %v1976_v15  ;;  %vm1984_vm4 = vweird.f32 %v1976_v15 }
 0xb9b   : > { %v1973_v17 = vpop.xlane.xlu1 %1972 }
 0xb9c   : > { %v1975_v19 = vmul.f32 %v1973_v17, %v3419_v12  ;;  %v2748_v12 = vld [vmem:[%s3787_s12] ss:$0 sm:$0xff] }
 0xb9e   : > { %v2795_v20 = vpop.eup %2794  ;;  %v1977_v22 = vadd.f32 1e-05, %v1975_v19 }
 0xb9f   : > { %v1979_v23 = vmul.f32 %v2795_v20, %v1976_v15  ;;  %vm1985_vm3 = vweird.f32 %v2795_v20 }
 0xba0   : > { %2796 = vrsqrt.f32 %v1977_v22  ;;  %vm1986_vm5 = vmor %vm1984_vm4, %vm1985_vm3  ;;  %vm1994_vm7 = vweird.f32 %v1977_v22 }
 0xba1   : > { %v1980_v25 = vmul.f32 %v2795_v20, %v1979_v23 }
 0xba3   : > { %v1981_v26 = vmul.f32 0.5, %v1980_v25 }
 0xba5   : > { %v1982_v28 = vsub.f32 1.5, %v1981_v26 }
 0xba6   : > { %v2797_v29 = vpop.eup %2796 }
 0xba7   : > { %v1983_v30 = vmul.f32 %v2795_v20, %v1982_v28  ;;  %v1989_v31 = vmul.f32 %v2797_v29, %v1977_v22  ;;  %vm1995_vm6 = vweird.f32 %v2797_v29 }
 0xba8   : > { %vm1996_vm8 = vmor %vm1994_vm7, %vm1995_vm6 }
 0xba9   : > { %v1990_v32 = vmul.f32 %v2797_v29, %v1989_v31  ;;  %v1987_v2 = vsel %vm1986_vm5, %v2795_v20, %v1983_v30 }
 0xbaa   : > { %v1998_v34 = vmul.f32 %v1987_v2, %v1964_v1 }
 0xbab   : > { %v1991_v33 = vmul.f32 0.5, %v1990_v32 }
 0xbac   : > { %v2003_v37 = vmul.f32 %v2748_v12, %v1998_v34 }
 0xbad   : > { %v1992_v4 = vsub.f32 1.5, %v1991_v33 }
 0xbae   : > { %v2008_v40 = vadd.f32 %v2749_v36, %v2003_v37 }
 0xbaf   : > { %v1993_v63 = vmul.f32 %v2797_v29, %v1992_v4 }
 0xbb1   : > { %v1997_v35 = vsel %vm1996_vm8, %v2797_v29, %v1993_v63 }
 0xbb2   : > { %v1999_v38 = vmul.f32 %v1997_v35, %v1965_v27 }
 0xbb4   : > { %v2004_v39 = vmul.f32 %v2748_v12, %v1999_v38 }
 0xbb6   : > { %v2009_v41 = vadd.f32 %v2749_v36, %v2004_v39 }
 0xbb8   : > { %v2015_v42 = vpack.c.bf16 %v2009_v41, %v2008_v40 }
 0xbba   : > { %2579 = vmatmul.msk.bf16.vlgmr.msrb.gmra.mxu1 %vm1288_vm1, %v2015_v42 }
 0xc37   : > { %v2043_v47 = vpop.f32.mrf.mxu1 }
 0xc38   : > { %v2044_v49 = vadd.f32 %v2750_v46, %v2043_v47 }
 0xc3a   : > { %v2048_v50 = vmul.f32 %v2044_v49, %v2044_v49 }
 0xc3c   : > { %v2050_v51 = vmul.f32 %v2048_v50, %v2044_v49 }
 0xc3e   : > { %v2052_v52 = vmul.f32 0.044715, %v2050_v51 }
 0xc3f   : > { %v2045_v53 = vpop.f32.mrf.mxu1 }
 0xc40   : > { %v2054_v54 = vadd.f32 %v2052_v52, %v2044_v49  ;;  %v2046_v55 = vadd.f32 %v2750_v46, %v2045_v53 }
 0xc42   : > { %v2056_v56 = vmul.f32 0.7978846, %v2054_v54  ;;  %v2049_v58 = vmul.f32 %v2046_v55, %v2046_v55 }
 0xc44   : > { %v2051_v3 = vmul.f32 %v2049_v58, %v2046_v55  ;;  %2798 = vtanh.f32 %v2056_v56 }
 0xc46   : > { %v2053_v59 = vmul.f32 0.044715, %v2051_v3 }
 0xc48   : > { %v2055_v60 = vadd.f32 %v2053_v59, %v2046_v55 }
 0xc4a   : > { %v2057_v62 = vmul.f32 0.7978846, %v2055_v60  ;;  %v2799_v0 = vpop.eup %2798 }
 0xc4b   : > { %v2060_v21 = vadd.f32 1.0, %v2799_v0 }
 0xc4c   : > { %2800 = vtanh.f32 %v2057_v62 }
 0xc4d   : > { %v2062_v5 = vmul.f32 0.5, %v2060_v21 }
 0xc4f   : > { %v2064_v8 = vmul.f32 %v2062_v5, %v2044_v49 }
 0xc52   : > { %v2801_v1 = vpop.eup %2800 }
 0xc53   : > { %v2061_v6 = vadd.f32 1.0, %v2801_v1 }
 0xc55   : > { %v2063_v7 = vmul.f32 0.5, %v2061_v6 }
 0xc57   : > { %v2065_v27 = vmul.f32 %v2063_v7, %v2046_v55 }
 0xc59   : > { %v2075_v9 = vpack.c.bf16 %v2065_v27, %v2064_v8 }
 0xc5b   : > { %2596 = vmatmul.msk.bf16.vlgmr.msra.gmra.mxu3 %vm2103_vm9, %v2075_v9 }
 0xcde   : > { %v2116_v11 = vpop.f32.mrf.mxu3 }
 0xcdf   : > { %v2117_v13 = vadd.f32 %v2751_v10, %v2116_v11 }
 0xce1   : > { %v2121_v14 = vmul.f32 %v2117_v13, %v3491_v18 }
 0xce3   : > { %v2123_v15 = vadd.f32 %v2121_v14, %v3597_v57 }
 0xce5   : > { %v2125_v16 = vmul.f32 %v2123_v15, %v3491_v18 }
 0xce6   : > { %v2118_v17 = vpop.f32.mrf.mxu3 }
 0xce7   : > { %2127 = vst.msk [vmem:[#allocation2] sm:$0xff] %vm1288_vm1, %v2125_v16  ;;  %v2119_v19 = vadd.f32 %v2751_v10, %v2118_v17 }
 0xce9   : > { %v2122_v20 = vmul.f32 %v2119_v19, %v3499_v24 }
 0xceb   : > { %v2124_v22 = vadd.f32 %v2122_v20, %v3603_v61  ;;  %2132 = sbr.rel (%p2597_p3) target bundleno = 3314 (0xcf2), region = 148 }
 0xced   : > { %v2126_v23 = vmul.f32 %v2124_v22, %v3499_v24 }
 0xcef   : > { %2128 = vst.msk [vmem:[#allocation2 + $0x8] sm:$0xff] %vm1288_vm1, %v2126_v23 }
 0xcf0   : > { %2133 = vst.msk [vmem:[%s3402_s23] sm:$0xff] %vm1288_vm1, %v2125_v16 }
 0xcf1   : > { %2134 = vst.msk [vmem:[%s3402_s23 + $0x8] sm:$0xff] %vm1288_vm1, %v2126_v23 }
 0xcf2 PF: > { %s3790_s15 = sld [smem:[#allocation18_spill]] }
 0xcf3   : > { %s3791_s29 = sld [smem:[#allocation14_spill]] }
 0xcf4   : > { %s3792_s2 = sld [smem:[#allocation15_spill]] }
 0xcf5   : > { %s3793_s6 = sld [smem:[#allocation21_spill]] }
 0xcf6   : > { %s3794_s30 = sld [smem:[#allocation16_spill]] }
 0xcf7   : > { %s3795_s7 = sld [smem:[#allocation17_spill]] }
 0xcf8   : > { %s44_s1 = sadd.s32 1, %s3790_s15   ;;  %s3796_s3 = sld [smem:[#allocation19_spill]] }
 0xcf9   : > { %p41_p4 = scmp.ge.s32.totalorder %s44_s1, 18   ;;  %s3797_s26 = sld [smem:[#allocation20_spill]] }
 0xcfb   :  { %43 = sbr.rel (!%p41_p4) target bundleno = 35 (0x23), region = 276 }
 0xd00   :  { %2156 = vsyncpa [#allocation4], 1 }
 0xd01   :  { %2158 = vsyncpa [#allocation4 + $0x1], 1 }
 0xd02   :  { %2159 = vsyncpa [#allocation6], 1 }
 0xd03   :  { %2161 = vsyncpa [#allocation6 + $0x1], 1 }
 0xd04   :  { %2162 = vsyncpa [#allocation9], 1 }
 0xd05   :  { %2164 = vsyncpa [#allocation9 + $0x1], 1 }

// kernel: synthesizer_forward.23
= control target key start
LH: loop header
LB: loop body
LE: loop exit
PB: predicated region body
PF: predicated region fallthrough
CT: control target
= control target key end

     0   :  { %vm21_vm0 = vcmask 7168   ;;  %v126_v2 = vmov 0.0   ;;  %vm52_vm1 = vcmask 261120   ;;  %s192_s1 = inlined_call_operand.vmem [shape: bf16[32,1], index: 1, kind: input, shape index: {}]   ;;  %s193_s0 = inlined_call_operand.vmem [shape: f32[32,32], index: 0, kind: input, shape index: {}]   ;;  %s194_s2 = inlined_call_operand.<no memory space> [shape: f32[1,1], index: 2, kind: input, shape index: {}]   ;;  %s195_s3 = inlined_call_operand.vmem [shape: f32[32,1], index: 3, kind: output, shape index: {}]  }
   0x1   :  { %v121_v0 = vld [vmem:[%s192_s1 + $0x8] sm:$0xff]  ;;  %v8_v1 = vstv %s194_s2  ;;  %22 = vst.msk [vmem:[#allocation2] sm:$0xff] %vm21_vm0, %v126_v2  ;;  %v120_v3 = vld [vmem:[%s192_s1] sm:$0xff]  ;;  %v32_v6 = vld [vmem:[%s193_s0 + $0x10] sm:$0xff] }
   0x2   :  { %v30_v4 = vld [vmem:[%s193_s0] sm:$0xff]  ;;  %9 = vst [vmem:[#allocation3] sm:$0x1] %v8_v1  ;;  %65 = vmatpush.bf16.msra.mxu0 %v121_v0  ;;  %122 = vmatpush.bf16.msra.mxu1 %v121_v0  ;;  %v31_v5 = vld [vmem:[%s193_s0 + $0x8] sm:$0xff]  ;;  %v33_v7 = vld [vmem:[%s193_s0 + $0x18] sm:$0xff] }
   0x3   :  { %23 = vst.msk [vmem:[#allocation2 + $0x8] sm:$0xff] %vm21_vm0, %v126_v2  ;;  %v34_v8 = vpack.c.bf16 %v31_v5, %v30_v4  ;;  %v35_v9 = vpack.c.bf16 %v33_v7, %v32_v6 }
   0x4   :  { %24 = vst.msk [vmem:[#allocation2 + $0x10] sm:$0xff] %vm21_vm0, %v126_v2 }
   0x5   :  { %25 = vst.msk [vmem:[#allocation2 + $0x18] sm:$0xff] %vm21_vm0, %v126_v2 }
   0x6   :  { %66 = vmatpush.bf16.msra.mxu0 %v120_v3  ;;  %123 = vmatpush.bf16.msra.mxu1 %v120_v3 }
   0x8   :  { %v26_v10 = vld [vmem:[#allocation2] sm:$0xff] }
   0x9   :  { %118 = vmatmul.msk.bf16.vlgmr.msra.gmra.mxu0 %vm52_vm1, %v34_v8  ;;  %119 = vmatmul.msk.bf16.vlgmr.msra.gmra.mxu1 %vm52_vm1, %v35_v9  ;;  %v125_v18 = vld [vmem:[#allocation3] ss:$0 sm:$0xff] }
   0xa   :  { %v27_v16 = vld [vmem:[#allocation2 + $0x8] sm:$0xff] }
   0xb   :  { %v28_v11 = vld [vmem:[#allocation2 + $0x10] sm:$0xff] }
   0xc   :  { %v29_v17 = vld [vmem:[#allocation2 + $0x18] sm:$0xff] }
  0x86   :  { %v68_v12 = vpop.f32.mrf.mxu0  ;;  %v73_v13 = vpop.f32.mrf.mxu1 }
  0x87   :  { %v78_v14 = vadd.f32 %v68_v12, %v26_v10  ;;  %v80_v15 = vadd.f32 %v73_v13, %v28_v11 }
  0x89   :  { %83 = vst.msk [vmem:[#allocation2] sm:$0xff] %vm21_vm0, %v78_v14 }
  0x8a   :  { %85 = vst.msk [vmem:[#allocation2 + $0x10] sm:$0xff] %vm21_vm0, %v80_v15 }
  0x8e   :  { %v70_v19 = vpop.f32.mrf.mxu0  ;;  %v75_v20 = vpop.f32.mrf.mxu1 }
  0x8f   :  { %v79_v21 = vadd.f32 %v70_v19, %v27_v16  ;;  %v81_v22 = vadd.f32 %v75_v20, %v29_v17 }
  0x90   :  { %v90_v23 = vld [vmem:[#allocation2] sm:$0xff] }
  0x91   :  { %v98_v24 = vadd.f32 %v125_v18, %v90_v23  ;;  %v92_v25 = vld [vmem:[#allocation2 + $0x10] sm:$0xff]  ;;  %84 = vst.msk [vmem:[#allocation2 + $0x8] sm:$0xff] %vm21_vm0, %v79_v21 }
  0x92   :  { %v100_v26 = vadd.f32 %v125_v18, %v92_v25  ;;  %86 = vst.msk [vmem:[#allocation2 + $0x18] sm:$0xff] %vm21_vm0, %v81_v22 }
  0x93   :  { %102 = vst.msk [vmem:[%s195_s3] sm:$0xff] %vm21_vm0, %v98_v24 }
  0x94   :  { %104 = vst.msk [vmem:[%s195_s3 + $0x10] sm:$0xff] %vm21_vm0, %v100_v26 }
  0x98   :  { %v91_v27 = vld [vmem:[#allocation2 + $0x8] sm:$0xff] }
  0x99   :  { %v99_v28 = vadd.f32 %v125_v18, %v91_v27  ;;  %v93_v29 = vld [vmem:[#allocation2 + $0x18] sm:$0xff] }
  0x9a   :  { %v101_v30 = vadd.f32 %v125_v18, %v93_v29 }
  0x9b   :  { %103 = vst.msk [vmem:[%s195_s3 + $0x8] sm:$0xff] %vm21_vm0, %v99_v28 }
  0x9c   :  { %105 = vst.msk [vmem:[%s195_s3 + $0x18] sm:$0xff] %vm21_vm0, %v101_v30 }

</bundles_post_ra>
